<compile_context>
chip_gen: v7x
topology: tpu7x:2x2x1
jax: 0.10.0
libtpu: 0.0.40
codegen_flags: <defaults>
</compile_context>

<pallas_src>
import functools

import jax
import jax.numpy as jnp
from jax.experimental import pallas as pl
from jax.experimental.pallas import tpu as pltpu


def _branch_sizes(max_conv_size):
    return [3] + [k for k in (5, 7, 9) if max_conv_size >= k]


# ----------------------------------------------------------------------------
# in-kernel helpers (pure functions on traced values)
# ----------------------------------------------------------------------------
def _in_lrelu(y, gamma, beta, instance_norm):
    """y: (R, C) f32. InstanceNorm (two-pass, biased var, eps=1e-5, affine) +
    LeakyReLU(0.2)."""
    if instance_norm:
        mean = jnp.mean(y, axis=0, keepdims=True)
        yc = y - mean
        var = jnp.mean(yc * yc, axis=0, keepdims=True)        # two-pass: no E[x^2]-E[x]^2
        y = yc * jax.lax.rsqrt(var + 1e-5)
        y = y * gamma + beta                                  # affine=True
    return jnp.maximum(y, 0.2 * y)                            # LeakyReLU(0.2)


def _row_conv_accumulate(xp_bf16, w_row_ref, K, H, W, base):
    """Per-kernel-row decomposed conv.

    xp_bf16 : (Hp, Wp, C) bf16 padded input (pad >= base + K//2 on each side)
    w_row_ref: ref (K, K*C, Cout) bf16 — per-dy weight matrices
    Accumulates K matmuls of (H*W, K*C) @ (K*C, Cout) in f32.
    """
    acc = None
    for dy in range(K):
        row = jnp.concatenate(
            [xp_bf16[base + dy:base + dy + H, base + dx:base + dx + W, :]
             for dx in range(K)],
            axis=-1)                                          # (H, W, K*C) bf16
        cols = row.reshape(H * W, row.shape[-1])              # (H*W, K*C) bf16
        part = jnp.dot(cols, w_row_ref[dy],
                       preferred_element_type=jnp.float32)    # (H*W, Cout) f32
        acc = part if acc is None else acc + part
    return acc


def _multiblock_kernel(x_ref, prma_ref, prmb_ref, wa_ref, *rest,
                       ks, H, W, Cin, Cout, pmax, instance_norm):
    nb = len(ks)
    wb_refs = rest[:nb]
    o_ref = rest[nb]
    pad_ref = rest[nb + 1]                  # VMEM scratch (Hp, Wp, Cout) bf16
    Kmax = 2 * pmax + 1

    # ---------------- fused layer a: one wide matmul per kernel row ---------
    x = x_ref[...]                          # (H+2*pmax, W+2*pmax, Cin) bf16 (no f32 upcast)
    acc = _row_conv_accumulate(x, wa_ref, Kmax, H, W, base=0)  # (H*W, nb*Cout) f32

    prma = prma_ref[...]                    # (3, nb*Cout) f32: bias/gamma/beta
    ya = acc + prma[0:1]
    ya = _in_lrelu(ya, prma[1:2], prma[2:3], instance_norm)    # (H*W, nb*Cout) f32

    prmb = prmb_ref[...]                    # (3*nb, Cout) f32

    # ---------------- per-branch layer b ------------------------------------
    for bi, K in enumerate(ks):
        p = K // 2
        base = pmax - p

        # reflection-pad the layer-a intermediate via ref stores into scratch
        yab = ya[:, bi * Cout:(bi + 1) * Cout].astype(jnp.bfloat16)
        yab = yab.reshape(H, W, Cout)
        pad_ref[pmax:pmax + H, pmax:pmax + W, :] = yab                    # body
        for i in range(1, p + 1):                                         # rows
            pad_ref[pmax - i:pmax - i + 1, pmax:pmax + W, :] = yab[i:i + 1]
            pad_ref[pmax + H - 1 + i:pmax + H + i, pmax:pmax + W, :] = \
                yab[H - 1 - i:H - i]
        for j in range(1, p + 1):                                         # cols (+corners)
            left_src = pad_ref[:, pmax + j:pmax + j + 1, :]
            pad_ref[:, pmax - j:pmax - j + 1, :] = left_src
            right_src = pad_ref[:, pmax + W - 1 - j:pmax + W - j, :]
            pad_ref[:, pmax + W - 1 + j:pmax + W + j, :] = right_src

        xpb = pad_ref[...]                  # (Hp, Wp, Cout) bf16
        accb = _row_conv_accumulate(xpb, wb_refs[bi], K, H, W, base=base)

        r = 3 * bi
        yb = accb + prmb[r:r + 1]
        yb = _in_lrelu(yb, prmb[r + 1:r + 2], prmb[r + 2:r + 3], instance_norm)

        # direct per-branch store into the channel slice (no final concat)
        o_ref[:, bi * Cout:(bi + 1) * Cout] = yb.astype(o_ref.dtype)


# ----------------------------------------------------------------------------
# wrapper
# ----------------------------------------------------------------------------
def _padded_vmem_bytes(shape, dtype):
    item = jnp.dtype(dtype).itemsize
    sub = {4: 8, 2: 16, 1: 32}.get(item, 8)
    dims = list(shape) if len(shape) >= 2 else [1] + list(shape)
    lead = 1
    for d in dims[:-2]:
        lead *= d
    rows = -(-dims[-2] // sub) * sub
    cols = -(-dims[-1] // 128) * 128
    return lead * rows * cols * item


def _vmem_limit_bytes(est_bytes):
    # generation-aware cap (v7x has only 64 MiB per-TC VMEM)
    try:
        cap = int(pltpu.get_tpu_info().vmem_capacity_bytes)
    except Exception:
        cap = 128 << 20
    cap = int(cap * 0.85)                   # headroom for Mosaic-internal scratch
    return int(min(cap, max(32 << 20, est_bytes)))


def conv_multi_block_forward(params, x_nchw, *, max_conv_size, instance_norm):
    N, Cin, H, W = x_nchw.shape
    ks = _branch_sizes(max_conv_size)
    nb = len(ks)
    Cout = params[f"conv_{ks[0]}a"]["w"].shape[-1]
    Kmax = max(ks)
    pmax = Kmax // 2
    assert W % 16 == 0, "W must be a multiple of 16 (bf16 (H,W,*)->(H*W,*) reshape)"
    assert pmax <= H - 1 and pmax <= W - 1, "ReflectionPad2d requires pad < spatial dim"

    x = jnp.transpose(x_nchw, (0, 2, 3, 1))                   # NCHW -> NHWC
    # single reflection-padded bf16 copy in HBM (no K^2 tap stacking)
    xpad = jnp.pad(x, ((0, 0), (pmax, pmax), (pmax, pmax), (0, 0)),
                   mode="reflect").astype(jnp.bfloat16)
    Hpm, Wpm = H + 2 * pmax, W + 2 * pmax

    # --- fused layer-a weights: zero-filled taps outside each branch window,
    #     packed per kernel row: (Kmax, Kmax*Cin, nb*Cout) bf16
    wa = jnp.zeros((Kmax, Kmax, Cin, nb * Cout), jnp.float32)
    for bi, K in enumerate(ks):
        off = pmax - K // 2
        wK = params[f"conv_{K}a"]["w"]                        # (K, K, Cin, Cout)
        wa = wa.at[off:off + K, off:off + K, :, bi * Cout:(bi + 1) * Cout].set(wK)
    wa = wa.reshape(Kmax, Kmax * Cin, nb * Cout).astype(jnp.bfloat16)

    # --- per-branch layer-b weights, per kernel row: (K, K*Cout, Cout) bf16
    wbs = [params[f"conv_{K}b"]["w"].reshape(K, K * Cout, Cout).astype(jnp.bfloat16)
           for K in ks]

    # --- packed bias / gamma / beta
    prma = jnp.stack([
        jnp.concatenate([params[f"conv_{K}a"]["b"] for K in ks]),
        jnp.concatenate([params[f"conv_{K}a"]["gamma"] for K in ks]),
        jnp.concatenate([params[f"conv_{K}a"]["beta"] for K in ks]),
    ]).astype(jnp.float32)                                    # (3, nb*Cout)
    prmb_rows = []
    for K in ks:
        lp = params[f"conv_{K}b"]
        prmb_rows += [lp["b"], lp["gamma"], lp["beta"]]
    prmb = jnp.stack(prmb_rows).astype(jnp.float32)           # (3*nb, Cout)

    C_total = nb * Cout
    kern = functools.partial(_multiblock_kernel, ks=tuple(ks), H=H, W=W,
                             Cin=Cin, Cout=Cout, pmax=pmax,
                             instance_norm=instance_norm)

    in_specs = [
        pl.BlockSpec((None, Hpm, Wpm, Cin), lambda n: (n, 0, 0, 0)),
        pl.BlockSpec(prma.shape, lambda n: (0, 0)),
        pl.BlockSpec(prmb.shape, lambda n: (0, 0)),
        pl.BlockSpec(wa.shape, lambda n: (0, 0, 0)),
    ] + [pl.BlockSpec(w.shape, lambda n: (0, 0, 0)) for w in wbs]

    # VMEM budget estimate from the actual block / working-set sizes
    est = 0
    est += 2 * _padded_vmem_bytes((Hpm, Wpm, Cin), jnp.bfloat16)          # x (dbl-buf)
    est += 2 * _padded_vmem_bytes((H * W, C_total), jnp.float32)          # out (dbl-buf)
    est += _padded_vmem_bytes(wa.shape, jnp.bfloat16)
    est += sum(_padded_vmem_bytes(w.shape, jnp.bfloat16) for w in wbs)
    est += _padded_vmem_bytes(prma.shape, jnp.float32)
    est += _padded_vmem_bytes(prmb.shape, jnp.float32)
    est += _padded_vmem_bytes((Hpm, Wpm, Cout), jnp.bfloat16)             # pad scratch
    est += 2 * _padded_vmem_bytes((H * W, C_total), jnp.float32)          # acc / ya
    est += 2 * _padded_vmem_bytes((H * W, Kmax * max(Cin, Cout)), jnp.bfloat16)  # row cols
    est += 2 * _padded_vmem_bytes((H * W, Cout), jnp.float32)             # accb / yb
    vmem_limit = _vmem_limit_bytes(2 * est)

    out = pl.pallas_call(
        kern,
        out_shape=jax.ShapeDtypeStruct((N, H * W, C_total), jnp.float32),
        grid=(N,),
        in_specs=in_specs,
        out_specs=pl.BlockSpec((None, H * W, C_total), lambda n: (n, 0, 0)),
        scratch_shapes=[pltpu.VMEM((Hpm, Wpm, Cout), jnp.bfloat16)],
        compiler_params=pltpu.CompilerParams(
            dimension_semantics=("parallel",),       # N>=2 feeds both TCs on v7x
            vmem_limit_bytes=vmem_limit),
    )(xpad, prma, prmb, wa, *wbs)

    out = out.reshape(N, H, W, C_total)
    return jnp.transpose(out, (0, 3, 1, 2))                   # NHWC -> NCHW


# ----------------------------------------------------------------------------
# parameter init
# ----------------------------------------------------------------------------
def _init_conv_params(key, K, cin, cout):
    kw, kb, kg, kbe = jax.random.split(key, 4)
    fan_in = cin * K * K
    bound = 1.0 / (fan_in ** 0.5)
    w = jax.random.uniform(kw, (K, K, cin, cout), jnp.float32, -bound, bound)
    b = jax.random.uniform(kb, (cout,), jnp.float32, -bound, bound)
    gamma = 1.0 + 0.1 * jax.random.normal(kg, (cout,), jnp.float32)
    beta = 0.1 * jax.random.normal(kbe, (cout,), jnp.float32)
    return dict(w=w, b=b, gamma=gamma, beta=beta)


def init_conv_multi_block(key, in_channels, out_channels, max_conv_size):
    params = {}
    for K in _branch_sizes(max_conv_size):
        key, ka, kb = jax.random.split(key, 3)
        params[f"conv_{K}a"] = _init_conv_params(ka, K, in_channels, out_channels)
        params[f"conv_{K}b"] = _init_conv_params(kb, K, out_channels, out_channels)
    return params


# ----------------------------------------------------------------------------
# pure-JAX reference (mirrors the kernel's bf16 MXU-operand quantization so the
# check isolates structural/math correctness; remaining diff vs pure-f32
# PyTorch is only the documented bf16 quantization of MXU operands)
# ----------------------------------------------------------------------------
def _conv_layer_ref(x, w, b, gamma, beta, K, instance_norm, matmul_dtype):
    pad = K // 2
    xp = jnp.pad(x, ((0, 0), (pad, pad), (pad, pad), (0, 0)), mode="reflect")
    xq = xp.astype(matmul_dtype).astype(jnp.float32)
    wq = w.astype(matmul_dtype).astype(jnp.float32)
    out = jax.lax.conv_general_dilated(
        xq, wq, (1, 1), "VALID",
        dimension_numbers=("NHWC", "HWIO", "NHWC")) + b.reshape(1, 1, 1, -1)
    if instance_norm:
        mean = out.mean(axis=(1, 2), keepdims=True)
        var = jnp.square(out - mean).mean(axis=(1, 2), keepdims=True)
        out = (out - mean) * jax.lax.rsqrt(var + 1e-5)
        out = out * gamma.reshape(1, 1, 1, -1) + beta.reshape(1, 1, 1, -1)
    return jnp.where(out > 0, out, 0.2 * out)


def conv_multi_block_ref(params, x_nchw, *, max_conv_size, instance_norm,
                         matmul_dtype=jnp.bfloat16):
    x = jnp.transpose(x_nchw, (0, 2, 3, 1))
    outs = []
    for K in _branch_sizes(max_conv_size):
        pa = params[f"conv_{K}a"]
        pb = params[f"conv_{K}b"]
        o = _conv_layer_ref(x, pa["w"], pa["b"], pa["gamma"], pa["beta"],
                            K, instance_norm, matmul_dtype)
        o = _conv_layer_ref(o, pb["w"], pb["b"], pb["gamma"], pb["beta"],
                            K, instance_norm, matmul_dtype)
        outs.append(o)
    out = jnp.concatenate(outs, axis=-1)
    return jnp.transpose(out, (0, 3, 1, 2))


# ----------------------------------------------------------------------------
if __name__ == "__main__":
    key = jax.random.PRNGKey(0)
    in_channels, out_channels = 4, 4
    max_conv_size = 5
    instance_norm = True
    N, H, W = 2, 16, 16

    kx, kp = jax.random.split(key)
    x = jax.random.normal(kx, (N, in_channels, H, W), jnp.float32)   # NCHW
    params = init_conv_multi_block(kp, in_channels, out_channels, max_conv_size)

    out = conv_multi_block_forward(params, x, max_conv_size=max_conv_size,
                                   instance_norm=instance_norm)
    out = jax.block_until_ready(out)

    expected_channels = out_channels * len(_branch_sizes(max_conv_size))
    assert out.shape == (N, expected_channels, H, W), out.shape

    ref = conv_multi_block_ref(params, x, max_conv_size=max_conv_size,
                               instance_norm=instance_norm,
                               matmul_dtype=jnp.bfloat16)
    ref = jax.block_until_ready(ref)
    max_err = float(jnp.max(jnp.abs(out - ref)))
    assert max_err < 5e-3, f"mismatch vs reference: max abs err {max_err}"

    print("KERNEL_OK")
</pallas_src>

<mosaic_0001>
module attributes {stable_mosaic.version = 11 : i64} {
  func.func @_multiblock_kernel(%arg0: i32, %arg1: memref<1x20x20x4xbf16, #tpu.memory_space<vmem>>, %arg2: memref<3x8xf32, #tpu.memory_space<vmem>>, %arg3: memref<6x4xf32, #tpu.memory_space<vmem>>, %arg4: memref<5x20x8xbf16, #tpu.memory_space<vmem>>, %arg5: memref<3x12x4xbf16, #tpu.memory_space<vmem>>, %arg6: memref<5x20x4xbf16, #tpu.memory_space<vmem>>, %arg7: memref<1x256x8xf32, #tpu.memory_space<vmem>>, %arg8: memref<20x20x4xbf16, #tpu.memory_space<vmem>>) attributes {dimension_semantics = [#tpu.dimension_semantics<parallel>], iteration_bounds = array<i64: 2>, scalar_prefetch = 0 : i64, scratch_operands = 1 : i64, tpu.core_type = #tpu.core_type<tc>, window_params = [{transform_indices = @transform_0, window_bounds = array<i64: 1, 20, 20, 4>}, {pipeline_mode = #tpu.pipeline_mode<synchronous>, transform_indices = @transform_1, window_bounds = array<i64: 3, 8>}, {pipeline_mode = #tpu.pipeline_mode<synchronous>, transform_indices = @transform_2, window_bounds = array<i64: 6, 4>}, {pipeline_mode = #tpu.pipeline_mode<synchronous>, transform_indices = @transform_3, window_bounds = array<i64: 5, 20, 8>}, {pipeline_mode = #tpu.pipeline_mode<synchronous>, transform_indices = @transform_4, window_bounds = array<i64: 3, 12, 4>}, {pipeline_mode = #tpu.pipeline_mode<synchronous>, transform_indices = @transform_5, window_bounds = array<i64: 5, 20, 4>}, {transform_indices = @transform_6, window_bounds = array<i64: 1, 256, 8>}]} {
    %c0 = arith.constant 0 : index
    %c0_0 = arith.constant 0 : index
    %c0_1 = arith.constant 0 : index
    %c0_2 = arith.constant 0 : index
    %0 = vector.load %arg1[%c0, %c0_0, %c0_1, %c0_2] : memref<1x20x20x4xbf16, #tpu.memory_space<vmem>>, vector<1x20x20x4xbf16>
    %1 = vector.shape_cast %0 : vector<1x20x20x4xbf16> to vector<20x20x4xbf16>
    %2 = vector.extract_strided_slice %1 {offsets = [0, 0, 0], sizes = [16, 16, 4], strides = [1, 1, 1]} : vector<20x20x4xbf16> to vector<16x16x4xbf16>
    %3 = vector.extract_strided_slice %1 {offsets = [0, 1, 0], sizes = [16, 16, 4], strides = [1, 1, 1]} : vector<20x20x4xbf16> to vector<16x16x4xbf16>
    %4 = vector.extract_strided_slice %1 {offsets = [0, 2, 0], sizes = [16, 16, 4], strides = [1, 1, 1]} : vector<20x20x4xbf16> to vector<16x16x4xbf16>
    %5 = vector.extract_strided_slice %1 {offsets = [0, 3, 0], sizes = [16, 16, 4], strides = [1, 1, 1]} : vector<20x20x4xbf16> to vector<16x16x4xbf16>
    %6 = vector.extract_strided_slice %1 {offsets = [0, 4, 0], sizes = [16, 16, 4], strides = [1, 1, 1]} : vector<20x20x4xbf16> to vector<16x16x4xbf16>
    %7 = tpu.concatenate %2, %3, %4, %5, %6 in 2 : vector<16x16x4xbf16>, vector<16x16x4xbf16>, vector<16x16x4xbf16>, vector<16x16x4xbf16>, vector<16x16x4xbf16> -> vector<16x16x20xbf16>
    %8 = vector.shape_cast %7 : vector<16x16x20xbf16> to vector<256x20xbf16>
    %c0_3 = arith.constant 0 : index
    %c0_4 = arith.constant 0 : index
    %c0_5 = arith.constant 0 : index
    %9 = vector.load %arg4[%c0_3, %c0_4, %c0_5] : memref<5x20x8xbf16, #tpu.memory_space<vmem>>, vector<1x20x8xbf16>
    %10 = vector.shape_cast %9 : vector<1x20x8xbf16> to vector<20x8xbf16>
    %cst = arith.constant dense<0.000000e+00> : vector<256x8xf32>
    %11 = tpu.matmul %8, %10, %cst {dimension_numbers = #tpu.dot_dimension_numbers<[1], [0], [0], [1], [0, 0, 1, 1], [], []>} : vector<256x20xbf16>, vector<20x8xbf16>, vector<256x8xf32> -> vector<256x8xf32>
    %12 = vector.extract_strided_slice %1 {offsets = [1, 0, 0], sizes = [16, 16, 4], strides = [1, 1, 1]} : vector<20x20x4xbf16> to vector<16x16x4xbf16>
    %13 = vector.extract_strided_slice %1 {offsets = [1, 1, 0], sizes = [16, 16, 4], strides = [1, 1, 1]} : vector<20x20x4xbf16> to vector<16x16x4xbf16>
    %14 = vector.extract_strided_slice %1 {offsets = [1, 2, 0], sizes = [16, 16, 4], strides = [1, 1, 1]} : vector<20x20x4xbf16> to vector<16x16x4xbf16>
    %15 = vector.extract_strided_slice %1 {offsets = [1, 3, 0], sizes = [16, 16, 4], strides = [1, 1, 1]} : vector<20x20x4xbf16> to vector<16x16x4xbf16>
    %16 = vector.extract_strided_slice %1 {offsets = [1, 4, 0], sizes = [16, 16, 4], strides = [1, 1, 1]} : vector<20x20x4xbf16> to vector<16x16x4xbf16>
    %17 = tpu.concatenate %12, %13, %14, %15, %16 in 2 : vector<16x16x4xbf16>, vector<16x16x4xbf16>, vector<16x16x4xbf16>, vector<16x16x4xbf16>, vector<16x16x4xbf16> -> vector<16x16x20xbf16>
    %18 = vector.shape_cast %17 : vector<16x16x20xbf16> to vector<256x20xbf16>
    %c1 = arith.constant 1 : index
    %c0_6 = arith.constant 0 : index
    %c0_7 = arith.constant 0 : index
    %19 = vector.load %arg4[%c1, %c0_6, %c0_7] : memref<5x20x8xbf16, #tpu.memory_space<vmem>>, vector<1x20x8xbf16>
    %20 = vector.shape_cast %19 : vector<1x20x8xbf16> to vector<20x8xbf16>
    %cst_8 = arith.constant dense<0.000000e+00> : vector<256x8xf32>
    %21 = tpu.matmul %18, %20, %cst_8 {dimension_numbers = #tpu.dot_dimension_numbers<[1], [0], [0], [1], [0, 0, 1, 1], [], []>} : vector<256x20xbf16>, vector<20x8xbf16>, vector<256x8xf32> -> vector<256x8xf32>
    %22 = arith.addf %11, %21 : vector<256x8xf32>
    %23 = vector.extract_strided_slice %1 {offsets = [2, 0, 0], sizes = [16, 16, 4], strides = [1, 1, 1]} : vector<20x20x4xbf16> to vector<16x16x4xbf16>
    %24 = vector.extract_strided_slice %1 {offsets = [2, 1, 0], sizes = [16, 16, 4], strides = [1, 1, 1]} : vector<20x20x4xbf16> to vector<16x16x4xbf16>
    %25 = vector.extract_strided_slice %1 {offsets = [2, 2, 0], sizes = [16, 16, 4], strides = [1, 1, 1]} : vector<20x20x4xbf16> to vector<16x16x4xbf16>
    %26 = vector.extract_strided_slice %1 {offsets = [2, 3, 0], sizes = [16, 16, 4], strides = [1, 1, 1]} : vector<20x20x4xbf16> to vector<16x16x4xbf16>
    %27 = vector.extract_strided_slice %1 {offsets = [2, 4, 0], sizes = [16, 16, 4], strides = [1, 1, 1]} : vector<20x20x4xbf16> to vector<16x16x4xbf16>
    %28 = tpu.concatenate %23, %24, %25, %26, %27 in 2 : vector<16x16x4xbf16>, vector<16x16x4xbf16>, vector<16x16x4xbf16>, vector<16x16x4xbf16>, vector<16x16x4xbf16> -> vector<16x16x20xbf16>
    %29 = vector.shape_cast %28 : vector<16x16x20xbf16> to vector<256x20xbf16>
    %c2 = arith.constant 2 : index
    %c0_9 = arith.constant 0 : index
    %c0_10 = arith.constant 0 : index
    %30 = vector.load %arg4[%c2, %c0_9, %c0_10] : memref<5x20x8xbf16, #tpu.memory_space<vmem>>, vector<1x20x8xbf16>
    %31 = vector.shape_cast %30 : vector<1x20x8xbf16> to vector<20x8xbf16>
    %cst_11 = arith.constant dense<0.000000e+00> : vector<256x8xf32>
    %32 = tpu.matmul %29, %31, %cst_11 {dimension_numbers = #tpu.dot_dimension_numbers<[1], [0], [0], [1], [0, 0, 1, 1], [], []>} : vector<256x20xbf16>, vector<20x8xbf16>, vector<256x8xf32> -> vector<256x8xf32>
    %33 = arith.addf %22, %32 : vector<256x8xf32>
    %34 = vector.extract_strided_slice %1 {offsets = [3, 0, 0], sizes = [16, 16, 4], strides = [1, 1, 1]} : vector<20x20x4xbf16> to vector<16x16x4xbf16>
    %35 = vector.extract_strided_slice %1 {offsets = [3, 1, 0], sizes = [16, 16, 4], strides = [1, 1, 1]} : vector<20x20x4xbf16> to vector<16x16x4xbf16>
    %36 = vector.extract_strided_slice %1 {offsets = [3, 2, 0], sizes = [16, 16, 4], strides = [1, 1, 1]} : vector<20x20x4xbf16> to vector<16x16x4xbf16>
    %37 = vector.extract_strided_slice %1 {offsets = [3, 3, 0], sizes = [16, 16, 4], strides = [1, 1, 1]} : vector<20x20x4xbf16> to vector<16x16x4xbf16>
    %38 = vector.extract_strided_slice %1 {offsets = [3, 4, 0], sizes = [16, 16, 4], strides = [1, 1, 1]} : vector<20x20x4xbf16> to vector<16x16x4xbf16>
    %39 = tpu.concatenate %34, %35, %36, %37, %38 in 2 : vector<16x16x4xbf16>, vector<16x16x4xbf16>, vector<16x16x4xbf16>, vector<16x16x4xbf16>, vector<16x16x4xbf16> -> vector<16x16x20xbf16>
    %40 = vector.shape_cast %39 : vector<16x16x20xbf16> to vector<256x20xbf16>
    %c3 = arith.constant 3 : index
    %c0_12 = arith.constant 0 : index
    %c0_13 = arith.constant 0 : index
    %41 = vector.load %arg4[%c3, %c0_12, %c0_13] : memref<5x20x8xbf16, #tpu.memory_space<vmem>>, vector<1x20x8xbf16>
    %42 = vector.shape_cast %41 : vector<1x20x8xbf16> to vector<20x8xbf16>
    %cst_14 = arith.constant dense<0.000000e+00> : vector<256x8xf32>
    %43 = tpu.matmul %40, %42, %cst_14 {dimension_numbers = #tpu.dot_dimension_numbers<[1], [0], [0], [1], [0, 0, 1, 1], [], []>} : vector<256x20xbf16>, vector<20x8xbf16>, vector<256x8xf32> -> vector<256x8xf32>
    %44 = arith.addf %33, %43 : vector<256x8xf32>
    %45 = vector.extract_strided_slice %1 {offsets = [4, 0, 0], sizes = [16, 16, 4], strides = [1, 1, 1]} : vector<20x20x4xbf16> to vector<16x16x4xbf16>
    %46 = vector.extract_strided_slice %1 {offsets = [4, 1, 0], sizes = [16, 16, 4], strides = [1, 1, 1]} : vector<20x20x4xbf16> to vector<16x16x4xbf16>
    %47 = vector.extract_strided_slice %1 {offsets = [4, 2, 0], sizes = [16, 16, 4], strides = [1, 1, 1]} : vector<20x20x4xbf16> to vector<16x16x4xbf16>
    %48 = vector.extract_strided_slice %1 {offsets = [4, 3, 0], sizes = [16, 16, 4], strides = [1, 1, 1]} : vector<20x20x4xbf16> to vector<16x16x4xbf16>
    %49 = vector.extract_strided_slice %1 {offsets = [4, 4, 0], sizes = [16, 16, 4], strides = [1, 1, 1]} : vector<20x20x4xbf16> to vector<16x16x4xbf16>
    %50 = tpu.concatenate %45, %46, %47, %48, %49 in 2 : vector<16x16x4xbf16>, vector<16x16x4xbf16>, vector<16x16x4xbf16>, vector<16x16x4xbf16>, vector<16x16x4xbf16> -> vector<16x16x20xbf16>
    %51 = vector.shape_cast %50 : vector<16x16x20xbf16> to vector<256x20xbf16>
    %c4 = arith.constant 4 : index
    %c0_15 = arith.constant 0 : index
    %c0_16 = arith.constant 0 : index
    %52 = vector.load %arg4[%c4, %c0_15, %c0_16] : memref<5x20x8xbf16, #tpu.memory_space<vmem>>, vector<1x20x8xbf16>
    %53 = vector.shape_cast %52 : vector<1x20x8xbf16> to vector<20x8xbf16>
    %cst_17 = arith.constant dense<0.000000e+00> : vector<256x8xf32>
    %54 = tpu.matmul %51, %53, %cst_17 {dimension_numbers = #tpu.dot_dimension_numbers<[1], [0], [0], [1], [0, 0, 1, 1], [], []>} : vector<256x20xbf16>, vector<20x8xbf16>, vector<256x8xf32> -> vector<256x8xf32>
    %55 = arith.addf %44, %54 : vector<256x8xf32>
    %c0_18 = arith.constant 0 : index
    %c0_19 = arith.constant 0 : index
    %56 = vector.load %arg2[%c0_18, %c0_19] : memref<3x8xf32, #tpu.memory_space<vmem>>, vector<3x8xf32>
    %57 = vector.extract_strided_slice %56 {offsets = [0, 0], sizes = [1, 8], strides = [1, 1]} : vector<3x8xf32> to vector<1x8xf32>
    %58 = vector.broadcast %57 : vector<1x8xf32> to vector<256x8xf32>
    %59 = arith.addf %55, %58 : vector<256x8xf32>
    %60 = vector.extract_strided_slice %56 {offsets = [1, 0], sizes = [1, 8], strides = [1, 1]} : vector<3x8xf32> to vector<1x8xf32>
    %61 = vector.extract_strided_slice %56 {offsets = [2, 0], sizes = [1, 8], strides = [1, 1]} : vector<3x8xf32> to vector<1x8xf32>
    %cst_20 = arith.constant dense<0.000000e+00> : vector<8xf32>
    %62 = vector.multi_reduction <add>, %59, %cst_20 [0] : vector<256x8xf32> to vector<8xf32>
    %63 = vector.shape_cast %62 : vector<8xf32> to vector<1x8xf32>
    %cst_21 = arith.constant 2.560000e+02 : f32
    %64 = vector.broadcast %cst_21 : f32 to vector<1x8xf32>
    %65 = arith.divf %63, %64 : vector<1x8xf32>
    %66 = vector.broadcast %65 : vector<1x8xf32> to vector<256x8xf32>
    %67 = arith.subf %59, %66 : vector<256x8xf32>
    %68 = arith.mulf %67, %67 : vector<256x8xf32>
    %cst_22 = arith.constant dense<0.000000e+00> : vector<8xf32>
    %69 = vector.multi_reduction <add>, %68, %cst_22 [0] : vector<256x8xf32> to vector<8xf32>
    %70 = vector.shape_cast %69 : vector<8xf32> to vector<1x8xf32>
    %cst_23 = arith.constant 2.560000e+02 : f32
    %71 = vector.broadcast %cst_23 : f32 to vector<1x8xf32>
    %72 = arith.divf %70, %71 : vector<1x8xf32>
    %cst_24 = arith.constant 9.99999974E-6 : f32
    %73 = vector.broadcast %cst_24 : f32 to vector<1x8xf32>
    %74 = arith.addf %72, %73 : vector<1x8xf32>
    %75 = math.rsqrt %74 : vector<1x8xf32>
    %76 = vector.broadcast %75 : vector<1x8xf32> to vector<256x8xf32>
    %77 = arith.mulf %67, %76 : vector<256x8xf32>
    %78 = vector.broadcast %60 : vector<1x8xf32> to vector<256x8xf32>
    %79 = arith.mulf %77, %78 : vector<256x8xf32>
    %80 = vector.broadcast %61 : vector<1x8xf32> to vector<256x8xf32>
    %81 = arith.addf %79, %80 : vector<256x8xf32>
    %cst_25 = arith.constant 2.000000e-01 : f32
    %82 = vector.broadcast %cst_25 : f32 to vector<256x8xf32>
    %83 = arith.mulf %82, %81 : vector<256x8xf32>
    %84 = arith.maximumf %81, %83 : vector<256x8xf32>
    %c0_26 = arith.constant 0 : index
    %c0_27 = arith.constant 0 : index
    %85 = vector.load %arg3[%c0_26, %c0_27] : memref<6x4xf32, #tpu.memory_space<vmem>>, vector<6x4xf32>
    %86 = vector.extract_strided_slice %84 {offsets = [0, 0], sizes = [256, 4], strides = [1, 1]} : vector<256x8xf32> to vector<256x4xf32>
    %87 = arith.truncf %86 : vector<256x4xf32> to vector<256x4xbf16>
    %88 = vector.shape_cast %87 : vector<256x4xbf16> to vector<16x16x4xbf16>
    %c2_28 = arith.constant 2 : index
    %c2_29 = arith.constant 2 : index
    %c0_30 = arith.constant 0 : index
    %89 = vector.load %arg8[%c2_28, %c2_29, %c0_30] : memref<20x20x4xbf16, #tpu.memory_space<vmem>>, vector<16x16x4xbf16>
    tpu.vector_store %arg8[%c2_28, %c2_29, %c0_30], %88 {strides = array<i32>} : memref<20x20x4xbf16, #tpu.memory_space<vmem>>, vector<16x16x4xbf16>,
    %90 = vector.extract_strided_slice %88 {offsets = [1, 0, 0], sizes = [1, 16, 4], strides = [1, 1, 1]} : vector<16x16x4xbf16> to vector<1x16x4xbf16>
    %c1_31 = arith.constant 1 : index
    %c2_32 = arith.constant 2 : index
    %c0_33 = arith.constant 0 : index
    %91 = vector.load %arg8[%c1_31, %c2_32, %c0_33] : memref<20x20x4xbf16, #tpu.memory_space<vmem>>, vector<1x16x4xbf16>
    tpu.vector_store %arg8[%c1_31, %c2_32, %c0_33], %90 {strides = array<i32>} : memref<20x20x4xbf16, #tpu.memory_space<vmem>>, vector<1x16x4xbf16>,
    %92 = vector.extract_strided_slice %88 {offsets = [14, 0, 0], sizes = [1, 16, 4], strides = [1, 1, 1]} : vector<16x16x4xbf16> to vector<1x16x4xbf16>
    %c18 = arith.constant 18 : index
    %c2_34 = arith.constant 2 : index
    %c0_35 = arith.constant 0 : index
    %93 = vector.load %arg8[%c18, %c2_34, %c0_35] : memref<20x20x4xbf16, #tpu.memory_space<vmem>>, vector<1x16x4xbf16>
    tpu.vector_store %arg8[%c18, %c2_34, %c0_35], %92 {strides = array<i32>} : memref<20x20x4xbf16, #tpu.memory_space<vmem>>, vector<1x16x4xbf16>,
    %c0_36 = arith.constant 0 : index
    %c3_37 = arith.constant 3 : index
    %c0_38 = arith.constant 0 : index
    %94 = vector.load %arg8[%c0_36, %c3_37, %c0_38] : memref<20x20x4xbf16, #tpu.memory_space<vmem>>, vector<20x1x4xbf16>
    %c0_39 = arith.constant 0 : index
    %c1_40 = arith.constant 1 : index
    %c0_41 = arith.constant 0 : index
    %95 = vector.load %arg8[%c0_39, %c1_40, %c0_41] : memref<20x20x4xbf16, #tpu.memory_space<vmem>>, vector<20x1x4xbf16>
    tpu.vector_store %arg8[%c0_39, %c1_40, %c0_41], %94 {strides = array<i32>} : memref<20x20x4xbf16, #tpu.memory_space<vmem>>, vector<20x1x4xbf16>,
    %c0_42 = arith.constant 0 : index
    %c16 = arith.constant 16 : index
    %c0_43 = arith.constant 0 : index
    %96 = vector.load %arg8[%c0_42, %c16, %c0_43] : memref<20x20x4xbf16, #tpu.memory_space<vmem>>, vector<20x1x4xbf16>
    %c0_44 = arith.constant 0 : index
    %c18_45 = arith.constant 18 : index
    %c0_46 = arith.constant 0 : index
    %97 = vector.load %arg8[%c0_44, %c18_45, %c0_46] : memref<20x20x4xbf16, #tpu.memory_space<vmem>>, vector<20x1x4xbf16>
    tpu.vector_store %arg8[%c0_44, %c18_45, %c0_46], %96 {strides = array<i32>} : memref<20x20x4xbf16, #tpu.memory_space<vmem>>, vector<20x1x4xbf16>,
    %c0_47 = arith.constant 0 : index
    %c0_48 = arith.constant 0 : index
    %c0_49 = arith.constant 0 : index
    %98 = vector.load %arg8[%c0_47, %c0_48, %c0_49] : memref<20x20x4xbf16, #tpu.memory_space<vmem>>, vector<20x20x4xbf16>
    %99 = vector.extract_strided_slice %98 {offsets = [1, 1, 0], sizes = [16, 16, 4], strides = [1, 1, 1]} : vector<20x20x4xbf16> to vector<16x16x4xbf16>
    %100 = vector.extract_strided_slice %98 {offsets = [1, 2, 0], sizes = [16, 16, 4], strides = [1, 1, 1]} : vector<20x20x4xbf16> to vector<16x16x4xbf16>
    %101 = vector.extract_strided_slice %98 {offsets = [1, 3, 0], sizes = [16, 16, 4], strides = [1, 1, 1]} : vector<20x20x4xbf16> to vector<16x16x4xbf16>
    %102 = tpu.concatenate %99, %100, %101 in 2 : vector<16x16x4xbf16>, vector<16x16x4xbf16>, vector<16x16x4xbf16> -> vector<16x16x12xbf16>
    %103 = vector.shape_cast %102 : vector<16x16x12xbf16> to vector<256x12xbf16>
    %c0_50 = arith.constant 0 : index
    %c0_51 = arith.constant 0 : index
    %c0_52 = arith.constant 0 : index
    %104 = vector.load %arg5[%c0_50, %c0_51, %c0_52] : memref<3x12x4xbf16, #tpu.memory_space<vmem>>, vector<1x12x4xbf16>
    %105 = vector.shape_cast %104 : vector<1x12x4xbf16> to vector<12x4xbf16>
    %cst_53 = arith.constant dense<0.000000e+00> : vector<256x4xf32>
    %106 = tpu.matmul %103, %105, %cst_53 {dimension_numbers = #tpu.dot_dimension_numbers<[1], [0], [0], [1], [0, 0, 1, 1], [], []>} : vector<256x12xbf16>, vector<12x4xbf16>, vector<256x4xf32> -> vector<256x4xf32>
    %107 = vector.extract_strided_slice %98 {offsets = [2, 1, 0], sizes = [16, 16, 4], strides = [1, 1, 1]} : vector<20x20x4xbf16> to vector<16x16x4xbf16>
    %108 = vector.extract_strided_slice %98 {offsets = [2, 2, 0], sizes = [16, 16, 4], strides = [1, 1, 1]} : vector<20x20x4xbf16> to vector<16x16x4xbf16>
    %109 = vector.extract_strided_slice %98 {offsets = [2, 3, 0], sizes = [16, 16, 4], strides = [1, 1, 1]} : vector<20x20x4xbf16> to vector<16x16x4xbf16>
    %110 = tpu.concatenate %107, %108, %109 in 2 : vector<16x16x4xbf16>, vector<16x16x4xbf16>, vector<16x16x4xbf16> -> vector<16x16x12xbf16>
    %111 = vector.shape_cast %110 : vector<16x16x12xbf16> to vector<256x12xbf16>
    %c1_54 = arith.constant 1 : index
    %c0_55 = arith.constant 0 : index
    %c0_56 = arith.constant 0 : index
    %112 = vector.load %arg5[%c1_54, %c0_55, %c0_56] : memref<3x12x4xbf16, #tpu.memory_space<vmem>>, vector<1x12x4xbf16>
    %113 = vector.shape_cast %112 : vector<1x12x4xbf16> to vector<12x4xbf16>
    %cst_57 = arith.constant dense<0.000000e+00> : vector<256x4xf32>
    %114 = tpu.matmul %111, %113, %cst_57 {dimension_numbers = #tpu.dot_dimension_numbers<[1], [0], [0], [1], [0, 0, 1, 1], [], []>} : vector<256x12xbf16>, vector<12x4xbf16>, vector<256x4xf32> -> vector<256x4xf32>
    %115 = arith.addf %106, %114 : vector<256x4xf32>
    %116 = vector.extract_strided_slice %98 {offsets = [3, 1, 0], sizes = [16, 16, 4], strides = [1, 1, 1]} : vector<20x20x4xbf16> to vector<16x16x4xbf16>
    %117 = vector.extract_strided_slice %98 {offsets = [3, 2, 0], sizes = [16, 16, 4], strides = [1, 1, 1]} : vector<20x20x4xbf16> to vector<16x16x4xbf16>
    %118 = vector.extract_strided_slice %98 {offsets = [3, 3, 0], sizes = [16, 16, 4], strides = [1, 1, 1]} : vector<20x20x4xbf16> to vector<16x16x4xbf16>
    %119 = tpu.concatenate %116, %117, %118 in 2 : vector<16x16x4xbf16>, vector<16x16x4xbf16>, vector<16x16x4xbf16> -> vector<16x16x12xbf16>
    %120 = vector.shape_cast %119 : vector<16x16x12xbf16> to vector<256x12xbf16>
    %c2_58 = arith.constant 2 : index
    %c0_59 = arith.constant 0 : index
    %c0_60 = arith.constant 0 : index
    %121 = vector.load %arg5[%c2_58, %c0_59, %c0_60] : memref<3x12x4xbf16, #tpu.memory_space<vmem>>, vector<1x12x4xbf16>
    %122 = vector.shape_cast %121 : vector<1x12x4xbf16> to vector<12x4xbf16>
    %cst_61 = arith.constant dense<0.000000e+00> : vector<256x4xf32>
    %123 = tpu.matmul %120, %122, %cst_61 {dimension_numbers = #tpu.dot_dimension_numbers<[1], [0], [0], [1], [0, 0, 1, 1], [], []>} : vector<256x12xbf16>, vector<12x4xbf16>, vector<256x4xf32> -> vector<256x4xf32>
    %124 = arith.addf %115, %123 : vector<256x4xf32>
    %125 = vector.extract_strided_slice %85 {offsets = [0, 0], sizes = [1, 4], strides = [1, 1]} : vector<6x4xf32> to vector<1x4xf32>
    %126 = vector.broadcast %125 : vector<1x4xf32> to vector<256x4xf32>
    %127 = arith.addf %124, %126 : vector<256x4xf32>
    %128 = vector.extract_strided_slice %85 {offsets = [1, 0], sizes = [1, 4], strides = [1, 1]} : vector<6x4xf32> to vector<1x4xf32>
    %129 = vector.extract_strided_slice %85 {offsets = [2, 0], sizes = [1, 4], strides = [1, 1]} : vector<6x4xf32> to vector<1x4xf32>
    %cst_62 = arith.constant dense<0.000000e+00> : vector<4xf32>
    %130 = vector.multi_reduction <add>, %127, %cst_62 [0] : vector<256x4xf32> to vector<4xf32>
    %131 = vector.shape_cast %130 : vector<4xf32> to vector<1x4xf32>
    %cst_63 = arith.constant 2.560000e+02 : f32
    %132 = vector.broadcast %cst_63 : f32 to vector<1x4xf32>
    %133 = arith.divf %131, %132 : vector<1x4xf32>
    %134 = vector.broadcast %133 : vector<1x4xf32> to vector<256x4xf32>
    %135 = arith.subf %127, %134 : vector<256x4xf32>
    %136 = arith.mulf %135, %135 : vector<256x4xf32>
    %cst_64 = arith.constant dense<0.000000e+00> : vector<4xf32>
    %137 = vector.multi_reduction <add>, %136, %cst_64 [0] : vector<256x4xf32> to vector<4xf32>
    %138 = vector.shape_cast %137 : vector<4xf32> to vector<1x4xf32>
    %cst_65 = arith.constant 2.560000e+02 : f32
    %139 = vector.broadcast %cst_65 : f32 to vector<1x4xf32>
    %140 = arith.divf %138, %139 : vector<1x4xf32>
    %cst_66 = arith.constant 9.99999974E-6 : f32
    %141 = vector.broadcast %cst_66 : f32 to vector<1x4xf32>
    %142 = arith.addf %140, %141 : vector<1x4xf32>
    %143 = math.rsqrt %142 : vector<1x4xf32>
    %144 = vector.broadcast %143 : vector<1x4xf32> to vector<256x4xf32>
    %145 = arith.mulf %135, %144 : vector<256x4xf32>
    %146 = vector.broadcast %128 : vector<1x4xf32> to vector<256x4xf32>
    %147 = arith.mulf %145, %146 : vector<256x4xf32>
    %148 = vector.broadcast %129 : vector<1x4xf32> to vector<256x4xf32>
    %149 = arith.addf %147, %148 : vector<256x4xf32>
    %cst_67 = arith.constant 2.000000e-01 : f32
    %150 = vector.broadcast %cst_67 : f32 to vector<256x4xf32>
    %151 = arith.mulf %150, %149 : vector<256x4xf32>
    %152 = arith.maximumf %149, %151 : vector<256x4xf32>
    %c0_68 = arith.constant 0 : index
    %c0_69 = arith.constant 0 : index
    %c0_70 = arith.constant 0 : index
    %153 = vector.load %arg7[%c0_68, %c0_69, %c0_70] : memref<1x256x8xf32, #tpu.memory_space<vmem>>, vector<1x256x4xf32>
    %154 = vector.shape_cast %153 : vector<1x256x4xf32> to vector<256x4xf32>
    %155 = vector.shape_cast %152 : vector<256x4xf32> to vector<1x256x4xf32>
    tpu.vector_store %arg7[%c0_68, %c0_69, %c0_70], %155 {strides = array<i32>} : memref<1x256x8xf32, #tpu.memory_space<vmem>>, vector<1x256x4xf32>,
    %156 = vector.extract_strided_slice %84 {offsets = [0, 4], sizes = [256, 4], strides = [1, 1]} : vector<256x8xf32> to vector<256x4xf32>
    %157 = arith.truncf %156 : vector<256x4xf32> to vector<256x4xbf16>
    %158 = vector.shape_cast %157 : vector<256x4xbf16> to vector<16x16x4xbf16>
    %c2_71 = arith.constant 2 : index
    %c2_72 = arith.constant 2 : index
    %c0_73 = arith.constant 0 : index
    %159 = vector.load %arg8[%c2_71, %c2_72, %c0_73] : memref<20x20x4xbf16, #tpu.memory_space<vmem>>, vector<16x16x4xbf16>
    tpu.vector_store %arg8[%c2_71, %c2_72, %c0_73], %158 {strides = array<i32>} : memref<20x20x4xbf16, #tpu.memory_space<vmem>>, vector<16x16x4xbf16>,
    %160 = vector.extract_strided_slice %158 {offsets = [1, 0, 0], sizes = [1, 16, 4], strides = [1, 1, 1]} : vector<16x16x4xbf16> to vector<1x16x4xbf16>
    %c1_74 = arith.constant 1 : index
    %c2_75 = arith.constant 2 : index
    %c0_76 = arith.constant 0 : index
    %161 = vector.load %arg8[%c1_74, %c2_75, %c0_76] : memref<20x20x4xbf16, #tpu.memory_space<vmem>>, vector<1x16x4xbf16>
    tpu.vector_store %arg8[%c1_74, %c2_75, %c0_76], %160 {strides = array<i32>} : memref<20x20x4xbf16, #tpu.memory_space<vmem>>, vector<1x16x4xbf16>,
    %162 = vector.extract_strided_slice %158 {offsets = [14, 0, 0], sizes = [1, 16, 4], strides = [1, 1, 1]} : vector<16x16x4xbf16> to vector<1x16x4xbf16>
    %c18_77 = arith.constant 18 : index
    %c2_78 = arith.constant 2 : index
    %c0_79 = arith.constant 0 : index
    %163 = vector.load %arg8[%c18_77, %c2_78, %c0_79] : memref<20x20x4xbf16, #tpu.memory_space<vmem>>, vector<1x16x4xbf16>
    tpu.vector_store %arg8[%c18_77, %c2_78, %c0_79], %162 {strides = array<i32>} : memref<20x20x4xbf16, #tpu.memory_space<vmem>>, vector<1x16x4xbf16>,
    %164 = vector.extract_strided_slice %158 {offsets = [2, 0, 0], sizes = [1, 16, 4], strides = [1, 1, 1]} : vector<16x16x4xbf16> to vector<1x16x4xbf16>
    %c0_80 = arith.constant 0 : index
    %c2_81 = arith.constant 2 : index
    %c0_82 = arith.constant 0 : index
    %165 = vector.load %arg8[%c0_80, %c2_81, %c0_82] : memref<20x20x4xbf16, #tpu.memory_space<vmem>>, vector<1x16x4xbf16>
    tpu.vector_store %arg8[%c0_80, %c2_81, %c0_82], %164 {strides = array<i32>} : memref<20x20x4xbf16, #tpu.memory_space<vmem>>, vector<1x16x4xbf16>,
    %166 = vector.extract_strided_slice %158 {offsets = [13, 0, 0], sizes = [1, 16, 4], strides = [1, 1, 1]} : vector<16x16x4xbf16> to vector<1x16x4xbf16>
    %c19 = arith.constant 19 : index
    %c2_83 = arith.constant 2 : index
    %c0_84 = arith.constant 0 : index
    %167 = vector.load %arg8[%c19, %c2_83, %c0_84] : memref<20x20x4xbf16, #tpu.memory_space<vmem>>, vector<1x16x4xbf16>
    tpu.vector_store %arg8[%c19, %c2_83, %c0_84], %166 {strides = array<i32>} : memref<20x20x4xbf16, #tpu.memory_space<vmem>>, vector<1x16x4xbf16>,
    %c0_85 = arith.constant 0 : index
    %c3_86 = arith.constant 3 : index
    %c0_87 = arith.constant 0 : index
    %168 = vector.load %arg8[%c0_85, %c3_86, %c0_87] : memref<20x20x4xbf16, #tpu.memory_space<vmem>>, vector<20x1x4xbf16>
    %c0_88 = arith.constant 0 : index
    %c1_89 = arith.constant 1 : index
    %c0_90 = arith.constant 0 : index
    %169 = vector.load %arg8[%c0_88, %c1_89, %c0_90] : memref<20x20x4xbf16, #tpu.memory_space<vmem>>, vector<20x1x4xbf16>
    tpu.vector_store %arg8[%c0_88, %c1_89, %c0_90], %168 {strides = array<i32>} : memref<20x20x4xbf16, #tpu.memory_space<vmem>>, vector<20x1x4xbf16>,
    %c0_91 = arith.constant 0 : index
    %c16_92 = arith.constant 16 : index
    %c0_93 = arith.constant 0 : index
    %170 = vector.load %arg8[%c0_91, %c16_92, %c0_93] : memref<20x20x4xbf16, #tpu.memory_space<vmem>>, vector<20x1x4xbf16>
    %c0_94 = arith.constant 0 : index
    %c18_95 = arith.constant 18 : index
    %c0_96 = arith.constant 0 : index
    %171 = vector.load %arg8[%c0_94, %c18_95, %c0_96] : memref<20x20x4xbf16, #tpu.memory_space<vmem>>, vector<20x1x4xbf16>
    tpu.vector_store %arg8[%c0_94, %c18_95, %c0_96], %170 {strides = array<i32>} : memref<20x20x4xbf16, #tpu.memory_space<vmem>>, vector<20x1x4xbf16>,
    %c0_97 = arith.constant 0 : index
    %c4_98 = arith.constant 4 : index
    %c0_99 = arith.constant 0 : index
    %172 = vector.load %arg8[%c0_97, %c4_98, %c0_99] : memref<20x20x4xbf16, #tpu.memory_space<vmem>>, vector<20x1x4xbf16>
    %c0_100 = arith.constant 0 : index
    %c0_101 = arith.constant 0 : index
    %c0_102 = arith.constant 0 : index
    %173 = vector.load %arg8[%c0_100, %c0_101, %c0_102] : memref<20x20x4xbf16, #tpu.memory_space<vmem>>, vector<20x1x4xbf16>
    tpu.vector_store %arg8[%c0_100, %c0_101, %c0_102], %172 {strides = array<i32>} : memref<20x20x4xbf16, #tpu.memory_space<vmem>>, vector<20x1x4xbf16>,
    %c0_103 = arith.constant 0 : index
    %c15 = arith.constant 15 : index
    %c0_104 = arith.constant 0 : index
    %174 = vector.load %arg8[%c0_103, %c15, %c0_104] : memref<20x20x4xbf16, #tpu.memory_space<vmem>>, vector<20x1x4xbf16>
    %c0_105 = arith.constant 0 : index
    %c19_106 = arith.constant 19 : index
    %c0_107 = arith.constant 0 : index
    %175 = vector.load %arg8[%c0_105, %c19_106, %c0_107] : memref<20x20x4xbf16, #tpu.memory_space<vmem>>, vector<20x1x4xbf16>
    tpu.vector_store %arg8[%c0_105, %c19_106, %c0_107], %174 {strides = array<i32>} : memref<20x20x4xbf16, #tpu.memory_space<vmem>>, vector<20x1x4xbf16>,
    %c0_108 = arith.constant 0 : index
    %c0_109 = arith.constant 0 : index
    %c0_110 = arith.constant 0 : index
    %176 = vector.load %arg8[%c0_108, %c0_109, %c0_110] : memref<20x20x4xbf16, #tpu.memory_space<vmem>>, vector<20x20x4xbf16>
    %177 = vector.extract_strided_slice %176 {offsets = [0, 0, 0], sizes = [16, 16, 4], strides = [1, 1, 1]} : vector<20x20x4xbf16> to vector<16x16x4xbf16>
    %178 = vector.extract_strided_slice %176 {offsets = [0, 1, 0], sizes = [16, 16, 4], strides = [1, 1, 1]} : vector<20x20x4xbf16> to vector<16x16x4xbf16>
    %179 = vector.extract_strided_slice %176 {offsets = [0, 2, 0], sizes = [16, 16, 4], strides = [1, 1, 1]} : vector<20x20x4xbf16> to vector<16x16x4xbf16>
    %180 = vector.extract_strided_slice %176 {offsets = [0, 3, 0], sizes = [16, 16, 4], strides = [1, 1, 1]} : vector<20x20x4xbf16> to vector<16x16x4xbf16>
    %181 = vector.extract_strided_slice %176 {offsets = [0, 4, 0], sizes = [16, 16, 4], strides = [1, 1, 1]} : vector<20x20x4xbf16> to vector<16x16x4xbf16>
    %182 = tpu.concatenate %177, %178, %179, %180, %181 in 2 : vector<16x16x4xbf16>, vector<16x16x4xbf16>, vector<16x16x4xbf16>, vector<16x16x4xbf16>, vector<16x16x4xbf16> -> vector<16x16x20xbf16>
    %183 = vector.shape_cast %182 : vector<16x16x20xbf16> to vector<256x20xbf16>
    %c0_111 = arith.constant 0 : index
    %c0_112 = arith.constant 0 : index
    %c0_113 = arith.constant 0 : index
    %184 = vector.load %arg6[%c0_111, %c0_112, %c0_113] : memref<5x20x4xbf16, #tpu.memory_space<vmem>>, vector<1x20x4xbf16>
    %185 = vector.shape_cast %184 : vector<1x20x4xbf16> to vector<20x4xbf16>
    %cst_114 = arith.constant dense<0.000000e+00> : vector<256x4xf32>
    %186 = tpu.matmul %183, %185, %cst_114 {dimension_numbers = #tpu.dot_dimension_numbers<[1], [0], [0], [1], [0, 0, 1, 1], [], []>} : vector<256x20xbf16>, vector<20x4xbf16>, vector<256x4xf32> -> vector<256x4xf32>
    %187 = vector.extract_strided_slice %176 {offsets = [1, 0, 0], sizes = [16, 16, 4], strides = [1, 1, 1]} : vector<20x20x4xbf16> to vector<16x16x4xbf16>
    %188 = vector.extract_strided_slice %176 {offsets = [1, 1, 0], sizes = [16, 16, 4], strides = [1, 1, 1]} : vector<20x20x4xbf16> to vector<16x16x4xbf16>
    %189 = vector.extract_strided_slice %176 {offsets = [1, 2, 0], sizes = [16, 16, 4], strides = [1, 1, 1]} : vector<20x20x4xbf16> to vector<16x16x4xbf16>
    %190 = vector.extract_strided_slice %176 {offsets = [1, 3, 0], sizes = [16, 16, 4], strides = [1, 1, 1]} : vector<20x20x4xbf16> to vector<16x16x4xbf16>
    %191 = vector.extract_strided_slice %176 {offsets = [1, 4, 0], sizes = [16, 16, 4], strides = [1, 1, 1]} : vector<20x20x4xbf16> to vector<16x16x4xbf16>
    %192 = tpu.concatenate %187, %188, %189, %190, %191 in 2 : vector<16x16x4xbf16>, vector<16x16x4xbf16>, vector<16x16x4xbf16>, vector<16x16x4xbf16>, vector<16x16x4xbf16> -> vector<16x16x20xbf16>
    %193 = vector.shape_cast %192 : vector<16x16x20xbf16> to vector<256x20xbf16>
    %c1_115 = arith.constant 1 : index
    %c0_116 = arith.constant 0 : index
    %c0_117 = arith.constant 0 : index
    %194 = vector.load %arg6[%c1_115, %c0_116, %c0_117] : memref<5x20x4xbf16, #tpu.memory_space<vmem>>, vector<1x20x4xbf16>
    %195 = vector.shape_cast %194 : vector<1x20x4xbf16> to vector<20x4xbf16>
    %cst_118 = arith.constant dense<0.000000e+00> : vector<256x4xf32>
    %196 = tpu.matmul %193, %195, %cst_118 {dimension_numbers = #tpu.dot_dimension_numbers<[1], [0], [0], [1], [0, 0, 1, 1], [], []>} : vector<256x20xbf16>, vector<20x4xbf16>, vector<256x4xf32> -> vector<256x4xf32>
    %197 = arith.addf %186, %196 : vector<256x4xf32>
    %198 = vector.extract_strided_slice %176 {offsets = [2, 0, 0], sizes = [16, 16, 4], strides = [1, 1, 1]} : vector<20x20x4xbf16> to vector<16x16x4xbf16>
    %199 = vector.extract_strided_slice %176 {offsets = [2, 1, 0], sizes = [16, 16, 4], strides = [1, 1, 1]} : vector<20x20x4xbf16> to vector<16x16x4xbf16>
    %200 = vector.extract_strided_slice %176 {offsets = [2, 2, 0], sizes = [16, 16, 4], strides = [1, 1, 1]} : vector<20x20x4xbf16> to vector<16x16x4xbf16>
    %201 = vector.extract_strided_slice %176 {offsets = [2, 3, 0], sizes = [16, 16, 4], strides = [1, 1, 1]} : vector<20x20x4xbf16> to vector<16x16x4xbf16>
    %202 = vector.extract_strided_slice %176 {offsets = [2, 4, 0], sizes = [16, 16, 4], strides = [1, 1, 1]} : vector<20x20x4xbf16> to vector<16x16x4xbf16>
    %203 = tpu.concatenate %198, %199, %200, %201, %202 in 2 : vector<16x16x4xbf16>, vector<16x16x4xbf16>, vector<16x16x4xbf16>, vector<16x16x4xbf16>, vector<16x16x4xbf16> -> vector<16x16x20xbf16>
    %204 = vector.shape_cast %203 : vector<16x16x20xbf16> to vector<256x20xbf16>
    %c2_119 = arith.constant 2 : index
    %c0_120 = arith.constant 0 : index
    %c0_121 = arith.constant 0 : index
    %205 = vector.load %arg6[%c2_119, %c0_120, %c0_121] : memref<5x20x4xbf16, #tpu.memory_space<vmem>>, vector<1x20x4xbf16>
    %206 = vector.shape_cast %205 : vector<1x20x4xbf16> to vector<20x4xbf16>
    %cst_122 = arith.constant dense<0.000000e+00> : vector<256x4xf32>
    %207 = tpu.matmul %204, %206, %cst_122 {dimension_numbers = #tpu.dot_dimension_numbers<[1], [0], [0], [1], [0, 0, 1, 1], [], []>} : vector<256x20xbf16>, vector<20x4xbf16>, vector<256x4xf32> -> vector<256x4xf32>
    %208 = arith.addf %197, %207 : vector<256x4xf32>
    %209 = vector.extract_strided_slice %176 {offsets = [3, 0, 0], sizes = [16, 16, 4], strides = [1, 1, 1]} : vector<20x20x4xbf16> to vector<16x16x4xbf16>
    %210 = vector.extract_strided_slice %176 {offsets = [3, 1, 0], sizes = [16, 16, 4], strides = [1, 1, 1]} : vector<20x20x4xbf16> to vector<16x16x4xbf16>
    %211 = vector.extract_strided_slice %176 {offsets = [3, 2, 0], sizes = [16, 16, 4], strides = [1, 1, 1]} : vector<20x20x4xbf16> to vector<16x16x4xbf16>
    %212 = vector.extract_strided_slice %176 {offsets = [3, 3, 0], sizes = [16, 16, 4], strides = [1, 1, 1]} : vector<20x20x4xbf16> to vector<16x16x4xbf16>
    %213 = vector.extract_strided_slice %176 {offsets = [3, 4, 0], sizes = [16, 16, 4], strides = [1, 1, 1]} : vector<20x20x4xbf16> to vector<16x16x4xbf16>
    %214 = tpu.concatenate %209, %210, %211, %212, %213 in 2 : vector<16x16x4xbf16>, vector<16x16x4xbf16>, vector<16x16x4xbf16>, vector<16x16x4xbf16>, vector<16x16x4xbf16> -> vector<16x16x20xbf16>
    %215 = vector.shape_cast %214 : vector<16x16x20xbf16> to vector<256x20xbf16>
    %c3_123 = arith.constant 3 : index
    %c0_124 = arith.constant 0 : index
    %c0_125 = arith.constant 0 : index
    %216 = vector.load %arg6[%c3_123, %c0_124, %c0_125] : memref<5x20x4xbf16, #tpu.memory_space<vmem>>, vector<1x20x4xbf16>
    %217 = vector.shape_cast %216 : vector<1x20x4xbf16> to vector<20x4xbf16>
    %cst_126 = arith.constant dense<0.000000e+00> : vector<256x4xf32>
    %218 = tpu.matmul %215, %217, %cst_126 {dimension_numbers = #tpu.dot_dimension_numbers<[1], [0], [0], [1], [0, 0, 1, 1], [], []>} : vector<256x20xbf16>, vector<20x4xbf16>, vector<256x4xf32> -> vector<256x4xf32>
    %219 = arith.addf %208, %218 : vector<256x4xf32>
    %220 = vector.extract_strided_slice %176 {offsets = [4, 0, 0], sizes = [16, 16, 4], strides = [1, 1, 1]} : vector<20x20x4xbf16> to vector<16x16x4xbf16>
    %221 = vector.extract_strided_slice %176 {offsets = [4, 1, 0], sizes = [16, 16, 4], strides = [1, 1, 1]} : vector<20x20x4xbf16> to vector<16x16x4xbf16>
    %222 = vector.extract_strided_slice %176 {offsets = [4, 2, 0], sizes = [16, 16, 4], strides = [1, 1, 1]} : vector<20x20x4xbf16> to vector<16x16x4xbf16>
    %223 = vector.extract_strided_slice %176 {offsets = [4, 3, 0], sizes = [16, 16, 4], strides = [1, 1, 1]} : vector<20x20x4xbf16> to vector<16x16x4xbf16>
    %224 = vector.extract_strided_slice %176 {offsets = [4, 4, 0], sizes = [16, 16, 4], strides = [1, 1, 1]} : vector<20x20x4xbf16> to vector<16x16x4xbf16>
    %225 = tpu.concatenate %220, %221, %222, %223, %224 in 2 : vector<16x16x4xbf16>, vector<16x16x4xbf16>, vector<16x16x4xbf16>, vector<16x16x4xbf16>, vector<16x16x4xbf16> -> vector<16x16x20xbf16>
    %226 = vector.shape_cast %225 : vector<16x16x20xbf16> to vector<256x20xbf16>
    %c4_127 = arith.constant 4 : index
    %c0_128 = arith.constant 0 : index
    %c0_129 = arith.constant 0 : index
    %227 = vector.load %arg6[%c4_127, %c0_128, %c0_129] : memref<5x20x4xbf16, #tpu.memory_space<vmem>>, vector<1x20x4xbf16>
    %228 = vector.shape_cast %227 : vector<1x20x4xbf16> to vector<20x4xbf16>
    %cst_130 = arith.constant dense<0.000000e+00> : vector<256x4xf32>
    %229 = tpu.matmul %226, %228, %cst_130 {dimension_numbers = #tpu.dot_dimension_numbers<[1], [0], [0], [1], [0, 0, 1, 1], [], []>} : vector<256x20xbf16>, vector<20x4xbf16>, vector<256x4xf32> -> vector<256x4xf32>
    %230 = arith.addf %219, %229 : vector<256x4xf32>
    %231 = vector.extract_strided_slice %85 {offsets = [3, 0], sizes = [1, 4], strides = [1, 1]} : vector<6x4xf32> to vector<1x4xf32>
    %232 = vector.broadcast %231 : vector<1x4xf32> to vector<256x4xf32>
    %233 = arith.addf %230, %232 : vector<256x4xf32>
    %234 = vector.extract_strided_slice %85 {offsets = [4, 0], sizes = [1, 4], strides = [1, 1]} : vector<6x4xf32> to vector<1x4xf32>
    %235 = vector.extract_strided_slice %85 {offsets = [5, 0], sizes = [1, 4], strides = [1, 1]} : vector<6x4xf32> to vector<1x4xf32>
    %cst_131 = arith.constant dense<0.000000e+00> : vector<4xf32>
    %236 = vector.multi_reduction <add>, %233, %cst_131 [0] : vector<256x4xf32> to vector<4xf32>
    %237 = vector.shape_cast %236 : vector<4xf32> to vector<1x4xf32>
    %cst_132 = arith.constant 2.560000e+02 : f32
    %238 = vector.broadcast %cst_132 : f32 to vector<1x4xf32>
    %239 = arith.divf %237, %238 : vector<1x4xf32>
    %240 = vector.broadcast %239 : vector<1x4xf32> to vector<256x4xf32>
    %241 = arith.subf %233, %240 : vector<256x4xf32>
    %242 = arith.mulf %241, %241 : vector<256x4xf32>
    %cst_133 = arith.constant dense<0.000000e+00> : vector<4xf32>
    %243 = vector.multi_reduction <add>, %242, %cst_133 [0] : vector<256x4xf32> to vector<4xf32>
    %244 = vector.shape_cast %243 : vector<4xf32> to vector<1x4xf32>
    %cst_134 = arith.constant 2.560000e+02 : f32
    %245 = vector.broadcast %cst_134 : f32 to vector<1x4xf32>
    %246 = arith.divf %244, %245 : vector<1x4xf32>
    %cst_135 = arith.constant 9.99999974E-6 : f32
    %247 = vector.broadcast %cst_135 : f32 to vector<1x4xf32>
    %248 = arith.addf %246, %247 : vector<1x4xf32>
    %249 = math.rsqrt %248 : vector<1x4xf32>
    %250 = vector.broadcast %249 : vector<1x4xf32> to vector<256x4xf32>
    %251 = arith.mulf %241, %250 : vector<256x4xf32>
    %252 = vector.broadcast %234 : vector<1x4xf32> to vector<256x4xf32>
    %253 = arith.mulf %251, %252 : vector<256x4xf32>
    %254 = vector.broadcast %235 : vector<1x4xf32> to vector<256x4xf32>
    %255 = arith.addf %253, %254 : vector<256x4xf32>
    %cst_136 = arith.constant 2.000000e-01 : f32
    %256 = vector.broadcast %cst_136 : f32 to vector<256x4xf32>
    %257 = arith.mulf %256, %255 : vector<256x4xf32>
    %258 = arith.maximumf %255, %257 : vector<256x4xf32>
    %c0_137 = arith.constant 0 : index
    %c0_138 = arith.constant 0 : index
    %c4_139 = arith.constant 4 : index
    %259 = vector.load %arg7[%c0_137, %c0_138, %c4_139] : memref<1x256x8xf32, #tpu.memory_space<vmem>>, vector<1x256x4xf32>
    %260 = vector.shape_cast %259 : vector<1x256x4xf32> to vector<256x4xf32>
    %261 = vector.shape_cast %258 : vector<256x4xf32> to vector<1x256x4xf32>
    tpu.vector_store %arg7[%c0_137, %c0_138, %c4_139], %261 {strides = array<i32>} : memref<1x256x8xf32, #tpu.memory_space<vmem>>, vector<1x256x4xf32>,
    return
  }
  func.func @transform_0(%arg0: i32) -> (i32, i32, i32, i32) {
    %c0_i32 = arith.constant 0 : i32
    %c0_i32_0 = arith.constant 0 : i32
    %c0_i32_1 = arith.constant 0 : i32
    %c0_i32_2 = arith.constant 0 : i32
    return %arg0, %c0_i32, %c0_i32_0, %c0_i32_1 : i32, i32, i32, i32
  }
  func.func @transform_1(%arg0: i32) -> (i32, i32) {
    %c0_i32 = arith.constant 0 : i32
    %c0_i32_0 = arith.constant 0 : i32
    %c0_i32_1 = arith.constant 0 : i32
    return %c0_i32, %c0_i32_0 : i32, i32
  }
  func.func @transform_2(%arg0: i32) -> (i32, i32) {
    %c0_i32 = arith.constant 0 : i32
    %c0_i32_0 = arith.constant 0 : i32
    %c0_i32_1 = arith.constant 0 : i32
    return %c0_i32, %c0_i32_0 : i32, i32
  }
  func.func @transform_3(%arg0: i32) -> (i32, i32, i32) {
    %c0_i32 = arith.constant 0 : i32
    %c0_i32_0 = arith.constant 0 : i32
    %c0_i32_1 = arith.constant 0 : i32
    %c0_i32_2 = arith.constant 0 : i32
    return %c0_i32, %c0_i32_0, %c0_i32_1 : i32, i32, i32
  }
  func.func @transform_4(%arg0: i32) -> (i32, i32, i32) {
    %c0_i32 = arith.constant 0 : i32
    %c0_i32_0 = arith.constant 0 : i32
    %c0_i32_1 = arith.constant 0 : i32
    %c0_i32_2 = arith.constant 0 : i32
    return %c0_i32, %c0_i32_0, %c0_i32_1 : i32, i32, i32
  }
  func.func @transform_5(%arg0: i32) -> (i32, i32, i32) {
    %c0_i32 = arith.constant 0 : i32
    %c0_i32_0 = arith.constant 0 : i32
    %c0_i32_1 = arith.constant 0 : i32
    %c0_i32_2 = arith.constant 0 : i32
    return %c0_i32, %c0_i32_0, %c0_i32_1 : i32, i32, i32
  }
  func.func @transform_6(%arg0: i32) -> (i32, i32, i32) {
    %c0_i32 = arith.constant 0 : i32
    %c0_i32_0 = arith.constant 0 : i32
    %c0_i32_1 = arith.constant 0 : i32
    return %arg0, %c0_i32, %c0_i32_0 : i32, i32, i32
  }
}

</mosaic_0001>

<bundles_post_ra>
// kernel: tpu_custom_call.1
= control target key start
LH: loop header
LB: loop body
LE: loop exit
PB: predicated region body
PF: predicated region fallthrough
CT: control target
= control target key end

     0   :  { %s10721_s21 = smov 0   ;;  %s16406_s0 = inlined_call_operand.vmem [shape: bf16[2,20,20,4], index: 0, kind: input, shape index: {}]   ;;  %s16407_s1 = inlined_call_operand.vmem [shape: f32[3,8], index: 1, kind: input, shape index: {}]   ;;  %s16408_s2 = inlined_call_operand.vmem [shape: f32[6,4], index: 2, kind: input, shape index: {}]   ;;  %s16409_s3 = inlined_call_operand.vmem [shape: bf16[5,20,8], index: 3, kind: input, shape index: {}]   ;;  %s16410_s4 = inlined_call_operand.vmem [shape: bf16[3,12,4], index: 4, kind: input, shape index: {}]   ;;  %s16411_s5 = inlined_call_operand.vmem [shape: bf16[5,20,4], index: 5, kind: input, shape index: {}]   ;;  %s16412_s6 = inlined_call_operand.vmem [shape: f32[2,256,8], index: 6, kind: output, shape index: {}]  }
   0x1 LB: > { %s8940_s22 = sadd.s32 4294967295, %s10679_s21   ;;  %p8944_p0 = scmp.ge.s32.totalorder %s10679_s21, 1  ;;  %s10679_s21 = sphi %s10721_s21, %s16_s21  }
   0x2   : > { %p212_p1 = scmp.lt.s32.totalorder %s10679_s21, 3 }
   0x4   : > { %p213_p2 = pnand %p8944_p0, %p212_p1 }
   0x6   : > { %216 = sbr.rel (%p213_p2) target bundleno = 2259 (0x8d3), region = 44 }
   0xd   : > { %p242_p3 = scmp.lt.s32.totalorder %s8940_s22, 1  ;;  %vm16508_vm0 = vcmask 1045504   ;;  %vm666_vm1 = vcmask 1046528   ;;  %vm441_vm2 = vsmask.f32 7424  ;;  %v10545_v0 = vld [vmem:[%s16409_s3 + $0xc] sm:$0xff]  }
   0xe   : > { %9701 = vmatprep.subr.bf16.mxu0 %v10545_v0  ;;  %s10681_s29 = smov 16   ;;  %s10682_s30 = smov 8   ;;  %vm16507_vm3 = vsmask.f32 6400  ;;  %vm1237_vm4 = vcmask 1041408   ;;  %vm1005_vm5 = vcmask 31744  }
   0xf   : > { %s17022_s22 = smov (!%p242_p3, %s8940_s22), 1  ;;  %9702 = vmatpush3.bf16.msra.mxu0 %v10545_v0  ;;  %s10683_s7 = smov 4   ;;  %vm16509_vm6 = vcmask 64512   ;;  %vm1071_vm7 = vcmask 97280   ;;  %vm16417_vm8 = vcmask 130048   ;;  %vm16416_vm9 = vcmask 162816  }
  0x10   : > { %s10499_s23 = smul.u32 240, %s17022_s22  ;;  %s10684_s8 = smov 12   ;;  %vm16448_vm10 = vcmask 27649   ;;  %vm2872_vm11 = vcmask 1040384   ;;  %vm2873_vm12 = vcmask 1044484   ;;  %vm3008_vm13 = vcmask 24576  }
  0x11   : > { %s10685_s11 = smov 124   ;;  %vm3006_vm14 = vcmask 27648   ;;  %vm12020_vm15 = vmor %vm2872_vm11, %vm2873_vm12  ;;  %vm3306_vm11 = vcmask 25601   ;;  %vm3307_vm12 = vsmask.f32 1280  ;;  %s9437_s25 = sshll.u32 %s17022_s22, 8 }
  0x12   : > { %s10735_s26 = scalar_lea.vmem %s16406_s0, %s10499_s23  ;;  %s15881_s27 = scalar_lea.vmem %s16412_s6, %s9437_s25 }
  0x13   : > { %v10513_v1 = vld [vmem:[%s10735_s26 + $0xc] sm:$0xff]   ;;  %v10514_v2 = vld [vmem:[%s10735_s26 + $0x14] ss:$0 sps:$4 sm:$0x33]   ;;  %v10515_v3 = vld [vmem:[%s10735_s26 + $0x18] sm:$0xff]  }
  0x14   : > { %v928_v4 = vrot.slane %v10513_v1, 2  ;;  %v929_v5 = vrot.slane %v10514_v2, 2  ;;  %v670_v6 = vrot.slane %v10513_v1, 1  ;;  %v671_v7 = vrot.slane %v10514_v2, 1  ;;  %v10749_v20 = vld [vmem:[%s10735_s26 + $0x30] sm:$0xff]   ;;  %v10757_v30 = vld [vmem:[%s10735_s26 + $0x24] sm:$0xff]  }
  0x15   : > { %v10516_v8 = vld [vmem:[%s10735_s26 + $0x20] ss:$0 sps:$4 sm:$0x33]   ;;  %v673_v9 = vrot.slane %v10515_v3, 1  ;;  %v455_v10 = vshrl.u32 %v10513_v1, 16  ;;  %v457_v11 = vshll.u32 %v10513_v1, 16 }
  0x16   : > { %v930_v12 = vsel %vm16508_vm0, %v928_v4, %v929_v5  ;;  %v672_v13 = vsel %vm666_vm1, %v670_v6, %v671_v7  ;;  %v462_v14 = vshll.u32 %v10514_v2, 16  ;;  %v931_v15 = vrot.slane %v10515_v3, 2  ;;  %v10754_v29 = vld [vmem:[%s10735_s26 + $0x38] ss:$0 sps:$4 sm:$0x33]  }
  0x17   : > { %975 = vrot.lane.b32.xlu0 %v930_v12, %s10681_s29  ;;  %717 = vrot.lane.b32.xlu1 %v672_v13, %s10682_s30  ;;  %v674_v16 = vrot.slane %v10516_v8, 1  ;;  %v459_v17 = vrot.slane %v457_v11, 1  ;;  %v932_v18 = vrot.slane %v10516_v8, 2  ;;  %v467_v19 = vshrl.u32 %v10515_v3, 16 }
  0x18   : > { %v464_v21 = vrot.slane %v462_v14, 1  ;;  %v469_v22 = vshll.u32 %v10515_v3, 16  ;;  %v474_v23 = vshll.u32 %v10516_v8, 16  ;;  %v769_v24 = vshrl.u32 %v10516_v8, 16 }
  0x19   : > { %v675_v25 = vsel %vm666_vm1, %v673_v9, %v674_v16  ;;  %v460_v26 = vor.u32 %v459_v17, %v455_v10  ;;  %v933_v27 = vsel %vm16508_vm0, %v931_v15, %v932_v18  ;;  %v766_v28 = vrot.slane %v467_v19, 1  ;;  %v10762_v39 = vld [vmem:[%s10735_s26 + $0x2c] ss:$0 sps:$4 sm:$0x33]   ;;  %v10790_v15 = vld [vmem:[%s10735_s26 + $0x3c] sm:$0xff]  }
  0x1a   : > { %v471_v31 = vrot.slane %v469_v22, 1  ;;  %v476_v32 = vrot.slane %v474_v23, 1  ;;  %v767_v33 = vrot.slane %v469_v22, 2  ;;  %v771_v34 = vrot.slane %v769_v24, 1  ;;  %v10785_v9 = vld [vmem:[%s10735_s26 + $0x48] sm:$0xff]  }
  0x1b   : > { %719 = vrot.lane.b32.xlu1 %v675_v25, %s10682_s30  ;;  %v465_v35 = vsel %vm441_vm2, %v460_v26, %v464_v21  ;;  %v772_v36 = vrot.slane %v474_v23, 2  ;;  %v757_v37 = vrot.slane %v455_v10, 1  ;;  %v758_v38 = vrot.slane %v457_v11, 2  ;;  %v10796_v21 = vld [vmem:[%s10735_s26 + $0x50] ss:$0 sps:$4 sm:$0x33]  }
  0x1c   : > { %636 = vrot.lane.b32.xlu0 %v465_v35, %s10683_s7  ;;  %v472_v40 = vor.u32 %v471_v31, %v467_v19  ;;  %v768_v41 = vor.u32 %v767_v33, %v766_v28  ;;  %v760_v42 = vshrl.u32 %v10514_v2, 16  ;;  %v763_v43 = vrot.slane %v462_v14, 2  ;;  %v10801_v26 = vld [vmem:[%s10735_s26 + $0x44] ss:$0 sps:$4 sm:$0x33]  }
  0x1d   : > { %v773_v44 = vor.u32 %v772_v36, %v771_v34  ;;  %v491_v45 = vshrl.u32 %v10749_v20, 16  ;;  %v493_v46 = vshll.u32 %v10749_v20, 16  ;;  %v759_v48 = vor.u32 %v758_v38, %v757_v37 }
  0x1e   : > { %v477_v47 = vsel %vm441_vm2, %v472_v40, %v476_v32  ;;  %v762_v49 = vrot.slane %v760_v42, 1  ;;  %v498_v50 = vshll.u32 %v10754_v29, 16  ;;  %v479_v52 = vshrl.u32 %v10757_v30, 16 }
  0x1f   : > { %977 = vrot.lane.b32.xlu1 %v933_v27, %s10681_s29  ;;  %v495_v51 = vrot.slane %v493_v46, 1  ;;  %v481_v53 = vshll.u32 %v10757_v30, 16  ;;  %v486_v54 = vshll.u32 %v10762_v39, 16  ;;  %v774_v55 = vsel %vm16507_vm3, %v768_v41, %v773_v44 }
  0x20   : > { %638 = vrot.lane.b32.xlu0 %v477_v47, %s10683_s7  ;;  %v764_v56 = vor.u32 %v763_v43, %v762_v49  ;;  %v500_v57 = vrot.slane %v498_v50, 1  ;;  %v679_v61 = vrot.slane %v10749_v20, 1  ;;  %v680_v63 = vrot.slane %v10754_v29, 1 }
  0x21   : > { %v496_v58 = vor.u32 %v495_v51, %v491_v45  ;;  %v483_v59 = vrot.slane %v481_v53, 1  ;;  %v488_v60 = vrot.slane %v486_v54, 1  ;;  %v676_v0 = vrot.slane %v10757_v30, 1 }
  0x22   : > { %v765_v62 = vsel %vm16507_vm3, %v759_v48, %v764_v56  ;;  %v677_v1 = vrot.slane %v10762_v39, 1  ;;  %v784_v3 = vrot.slane %v491_v45, 1  ;;  %v787_v4 = vshrl.u32 %v10754_v29, 16 }
  0x23   : > { %896 = vrot.lane.b32.xlu1 %v774_v55, %s10684_s8  ;;  %v484_v2 = vor.u32 %v483_v59, %v479_v52  ;;  %v501_v5 = vsel %vm441_vm2, %v496_v58, %v500_v57  ;;  %v785_v6 = vrot.slane %v493_v46, 2  ;;  %v790_v7 = vrot.slane %v498_v50, 2 }
  0x24   : > { %894 = vrot.lane.b32.xlu0 %v765_v62, %s10684_s8  ;;  %v775_v8 = vrot.slane %v479_v52, 1  ;;  %v789_v11 = vrot.slane %v787_v4, 1  ;;  %v776_v12 = vrot.slane %v481_v53, 2  ;;  %v778_v13 = vshrl.u32 %v10762_v39, 16  ;;  %v10834_v62 = vld [vmem:[%s10735_s26 + $0x54] sm:$0xff]  }
  0x25   : > { %v489_v10 = vsel %vm441_vm2, %v484_v2, %v488_v60  ;;  %v781_v14 = vrot.slane %v486_v54, 2  ;;  %v681_v17 = vsel %vm666_vm1, %v679_v61, %v680_v63  ;;  %v786_v18 = vor.u32 %v785_v6, %v784_v3  ;;  %v10828_v54 = vld [vmem:[%s10735_s26 + $0x60] sm:$0xff]   ;;  %v10838_v63 = vld [vmem:[%s10735_s26 + $0x68] ss:$0 sps:$4 sm:$0x33]  }
  0x26   : > { %v780_v16 = vrot.slane %v778_v13, 1  ;;  %v791_v19 = vor.u32 %v790_v7, %v789_v11  ;;  %v517_v22 = vshll.u32 %v10785_v9, 16  ;;  %v678_v23 = vsel %vm666_vm1, %v676_v0, %v677_v1  ;;  %v10845_v7 = vld [vmem:[%s10735_s26 + $0x5c] ss:$0 sps:$4 sm:$0x33]  }
  0x27   : > { %642 = vrot.lane.b32.xlu1 %v501_v5, %s10683_s7  ;;  %v777_v24 = vor.u32 %v776_v12, %v775_v8  ;;  %v505_v27 = vshll.u32 %v10790_v15, 16  ;;  %v937_v28 = vrot.slane %v10749_v20, 2  ;;  %v938_v31 = vrot.slane %v10754_v29, 2 }
  0x28   : > { %640 = vrot.lane.b32.xlu0 %v489_v10, %s10683_s7  ;;  %v782_v25 = vor.u32 %v781_v14, %v780_v16  ;;  %v934_v32 = vrot.slane %v10757_v30, 2  ;;  %v935_v33 = vrot.slane %v10762_v39, 2  ;;  %v792_v34 = vsel %vm16507_vm3, %v786_v18, %v791_v19 }
  0x29   : > { %v515_v35 = vshrl.u32 %v10785_v9, 16  ;;  %v519_v36 = vrot.slane %v517_v22, 1  ;;  %v522_v37 = vshll.u32 %v10796_v21, 16  ;;  %v503_v40 = vshrl.u32 %v10790_v15, 16 }
  0x2a   : > { %v783_v38 = vsel %vm16507_vm3, %v777_v24, %v782_v25  ;;  %v507_v20 = vrot.slane %v505_v27, 1  ;;  %v510_v29 = vshll.u32 %v10801_v26, 16  ;;  %v939_v30 = vsel %vm16508_vm0, %v937_v28, %v938_v31 }
  0x2b   : > { %723 = vrot.lane.b32.xlu1 %v681_v17, %s10682_s30  ;;  %v520_v39 = vor.u32 %v519_v36, %v515_v35  ;;  %v524_v41 = vrot.slane %v522_v37, 1  ;;  %v805_v42 = vshrl.u32 %v10796_v21, 16  ;;  %v936_v43 = vsel %vm16508_vm0, %v934_v32, %v935_v33 }
  0x2c   : > { %721 = vrot.lane.b32.xlu0 %v678_v23, %s10682_s30  ;;  %v508_v44 = vor.u32 %v507_v20, %v503_v40  ;;  %v512_v45 = vrot.slane %v510_v29, 1  ;;  %v796_v46 = vshrl.u32 %v10801_v26, 16  ;;  %v685_v47 = vrot.slane %v10785_v9, 1 }
  0x2d   : > { %v686_v48 = vrot.slane %v10796_v21, 1  ;;  %v682_v49 = vrot.slane %v10790_v15, 1  ;;  %v683_v50 = vrot.slane %v10801_v26, 1  ;;  %v802_v51 = vrot.slane %v515_v35, 1 }
  0x2e   : > { %v803_v52 = vrot.slane %v517_v22, 2  ;;  %v808_v53 = vrot.slane %v522_v37, 2  ;;  %v525_v55 = vsel %vm441_vm2, %v520_v39, %v524_v41  ;;  %v807_v56 = vrot.slane %v805_v42, 1 }
  0x2f   : > { %900 = vrot.lane.b32.xlu1 %v792_v34, %s10684_s8  ;;  %v793_v57 = vrot.slane %v503_v40, 1  ;;  %v513_v58 = vsel %vm441_vm2, %v508_v44, %v512_v45  ;;  %v794_v59 = vrot.slane %v505_v27, 2  ;;  %v798_v60 = vrot.slane %v796_v46, 1  ;;  %v10878_v44 = vld [vmem:[%s10735_s26 + $0x6c] sm:$0xff]  }
  0x30   : > { %898 = vrot.lane.b32.xlu0 %v783_v38, %s10684_s8  ;;  %v799_v61 = vrot.slane %v510_v29, 2  ;;  %v541_v0 = vshll.u32 %v10828_v54, 16  ;;  %v687_v1 = vsel %vm666_vm1, %v685_v47, %v686_v48  ;;  %v804_v2 = vor.u32 %v803_v52, %v802_v51  ;;  %v10873_v38 = vld [vmem:[%s10735_s26 + $0x78] sm:$0xff]   ;;  %v10881_v45 = vld [vmem:[%s10735_s26 + $0x80] ss:$0 sps:$4 sm:$0x33]  }
  0x31   : > { %v809_v3 = vor.u32 %v808_v53, %v807_v56  ;;  %v684_v4 = vsel %vm666_vm1, %v682_v49, %v683_v50  ;;  %v795_v5 = vor.u32 %v794_v59, %v793_v57  ;;  %v529_v8 = vshll.u32 %v10834_v62, 16  ;;  %v10885_v46 = vld [vmem:[%s10735_s26 + $0x74] ss:$0 sps:$4 sm:$0x33]  }
  0x32   : > { %v800_v6 = vor.u32 %v799_v61, %v798_v60  ;;  %v943_v10 = vrot.slane %v10785_v9, 2  ;;  %v539_v11 = vshrl.u32 %v10828_v54, 16  ;;  %v543_v12 = vrot.slane %v541_v0, 1 }
  0x33   : > { %981 = vrot.lane.b32.xlu1 %v939_v30, %s10681_s29  ;;  %v546_v13 = vshll.u32 %v10838_v63, 16  ;;  %v810_v14 = vsel %vm16507_vm3, %v804_v2, %v809_v3  ;;  %v944_v16 = vrot.slane %v10796_v21, 2  ;;  %v940_v17 = vrot.slane %v10790_v15, 2 }
  0x34   : > { %979 = vrot.lane.b32.xlu0 %v936_v43, %s10681_s29  ;;  %v941_v18 = vrot.slane %v10801_v26, 2  ;;  %v801_v19 = vsel %vm16507_vm3, %v795_v5, %v800_v6  ;;  %v527_v22 = vshrl.u32 %v10834_v62, 16  ;;  %v531_v9 = vrot.slane %v529_v8, 1 }
  0x35   : > { %v534_v23 = vshll.u32 %v10845_v7, 16  ;;  %v544_v24 = vor.u32 %v543_v12, %v539_v11  ;;  %v548_v25 = vrot.slane %v546_v13, 1  ;;  %v945_v21 = vsel %vm16508_vm0, %v943_v10, %v944_v16 }
  0x36   : > { %v823_v15 = vshrl.u32 %v10838_v63, 16  ;;  %v942_v26 = vsel %vm16508_vm0, %v940_v17, %v941_v18  ;;  %v532_v27 = vor.u32 %v531_v9, %v527_v22  ;;  %v814_v31 = vshrl.u32 %v10845_v7, 16 }
  0x37   : > { %646 = vrot.lane.b32.xlu1 %v525_v55, %s10683_s7  ;;  %v536_v28 = vrot.slane %v534_v23, 1  ;;  %v691_v32 = vrot.slane %v10828_v54, 1  ;;  %v692_v33 = vrot.slane %v10838_v63, 1  ;;  %v549_v34 = vsel %vm441_vm2, %v544_v24, %v548_v25 }
  0x38   : > { %644 = vrot.lane.b32.xlu0 %v513_v58, %s10683_s7  ;;  %v688_v35 = vrot.slane %v10834_v62, 1  ;;  %v689_v36 = vrot.slane %v10845_v7, 1  ;;  %v820_v37 = vrot.slane %v539_v11, 1  ;;  %v821_v40 = vrot.slane %v541_v0, 2 }
  0x39   : > { %v825_v20 = vrot.slane %v823_v15, 1  ;;  %v826_v29 = vrot.slane %v546_v13, 2  ;;  %v811_v30 = vrot.slane %v527_v22, 1  ;;  %v537_v39 = vsel %vm441_vm2, %v532_v27, %v536_v28 }
  0x3a   : > { %v812_v41 = vrot.slane %v529_v8, 2  ;;  %v816_v42 = vrot.slane %v814_v31, 1  ;;  %v817_v43 = vrot.slane %v534_v23, 2  ;;  %v693_v47 = vsel %vm666_vm1, %v691_v32, %v692_v33  ;;  %v10922_v31 = vld [vmem:[%s10735_s26 + $0x84] sm:$0xff]  }
  0x3b   : > { %727 = vrot.lane.b32.xlu1 %v687_v1, %s10682_s30  ;;  %v822_v48 = vor.u32 %v821_v40, %v820_v37  ;;  %v827_v49 = vor.u32 %v826_v29, %v825_v20  ;;  %v565_v50 = vshll.u32 %v10873_v38, 16  ;;  %v690_v51 = vsel %vm666_vm1, %v688_v35, %v689_v36  ;;  %v10926_v32 = vld [vmem:[%s10735_s26 + $0x98] ss:$0 sps:$4 sm:$0x33]  }
  0x3c   : > { %725 = vrot.lane.b32.xlu0 %v684_v4, %s10682_s30  ;;  %v813_v52 = vor.u32 %v812_v41, %v811_v30  ;;  %v818_v53 = vor.u32 %v817_v43, %v816_v42  ;;  %v553_v55 = vshll.u32 %v10878_v44, 16  ;;  %v949_v56 = vrot.slane %v10828_v54, 2  ;;  %v10933_v29 = vld [vmem:[%s10735_s26 + $0x8c] ss:$0 sps:$4 sm:$0x33]  }
  0x3d   : > { %v950_v57 = vrot.slane %v10838_v63, 2  ;;  %v946_v58 = vrot.slane %v10834_v62, 2  ;;  %v947_v59 = vrot.slane %v10845_v7, 2  ;;  %v563_v60 = vshrl.u32 %v10873_v38, 16 }
  0x3e   : > { %v828_v61 = vsel %vm16507_vm3, %v822_v48, %v827_v49  ;;  %v567_v0 = vrot.slane %v565_v50, 1  ;;  %v570_v1 = vshll.u32 %v10881_v45, 16  ;;  %v551_v2 = vshrl.u32 %v10878_v44, 16 }
  0x3f   : > { %904 = vrot.lane.b32.xlu1 %v810_v14, %s10684_s8  ;;  %v819_v63 = vsel %vm16507_vm3, %v813_v52, %v818_v53  ;;  %v555_v3 = vrot.slane %v553_v55, 1  ;;  %v558_v4 = vshll.u32 %v10885_v46, 16  ;;  %v951_v5 = vsel %vm16508_vm0, %v949_v56, %v950_v57  ;;  %v10911_v14 = vld [vmem:[%s10735_s26 + $0x90] sm:$0xff]  }
  0x40   : > { %902 = vrot.lane.b32.xlu0 %v801_v19, %s10684_s8  ;;  %v568_v6 = vor.u32 %v567_v0, %v563_v60  ;;  %v572_v7 = vrot.slane %v570_v1, 1  ;;  %v841_v8 = vshrl.u32 %v10881_v45, 16  ;;  %v948_v10 = vsel %vm16508_vm0, %v946_v58, %v947_v59 }
  0x41   : > { %v556_v11 = vor.u32 %v555_v3, %v551_v2  ;;  %v560_v12 = vrot.slane %v558_v4, 1  ;;  %v832_v13 = vshrl.u32 %v10885_v46, 16  ;;  %v697_v16 = vrot.slane %v10873_v38, 1 }
  0x42   : > { %v698_v17 = vrot.slane %v10881_v45, 1  ;;  %v694_v18 = vrot.slane %v10878_v44, 1  ;;  %v695_v19 = vrot.slane %v10885_v46, 1  ;;  %v838_v22 = vrot.slane %v563_v60, 1 }
  0x43   : > { %985 = vrot.lane.b32.xlu1 %v945_v21, %s10681_s29  ;;  %v839_v9 = vrot.slane %v565_v50, 2  ;;  %v573_v23 = vsel %vm441_vm2, %v568_v6, %v572_v7  ;;  %v843_v24 = vrot.slane %v841_v8, 1  ;;  %v844_v25 = vrot.slane %v570_v1, 2 }
  0x44   : > { %983 = vrot.lane.b32.xlu0 %v942_v26, %s10681_s29  ;;  %v829_v21 = vrot.slane %v551_v2, 1  ;;  %v561_v15 = vsel %vm441_vm2, %v556_v11, %v560_v12  ;;  %v830_v26 = vrot.slane %v553_v55, 2  ;;  %v834_v27 = vrot.slane %v832_v13, 1  ;;  %v10965_v11 = vld [vmem:[%s10735_s26 + $0xa8] sm:$0xff]  }
  0x45   : > { %v835_v28 = vrot.slane %v558_v4, 2  ;;  %v589_v33 = vshll.u32 %v10911_v14, 16  ;;  %v840_v35 = vor.u32 %v839_v9, %v838_v22  ;;  %v845_v36 = vor.u32 %v844_v25, %v843_v24  ;;  %v10980_v24 = vld [vmem:[%s10735_s26 + $0xb0] ss:$0 sps:$4 sm:$0x33]  }
  0x46   : > { %v696_v37 = vsel %vm666_vm1, %v694_v18, %v695_v19  ;;  %v831_v40 = vor.u32 %v830_v26, %v829_v21  ;;  %v577_v30 = vshll.u32 %v10922_v31, 16  ;;  %v956_v41 = vrot.slane %v10881_v45, 2  ;;  %v10969_v18 = vld [vmem:[%s10735_s26 + $0x9c] sm:$0xff]  }
  0x47   : > { %650 = vrot.lane.b32.xlu1 %v549_v34, %s10683_s7  ;;  %v699_v34 = vsel %vm666_vm1, %v697_v16, %v698_v17  ;;  %v836_v20 = vor.u32 %v835_v28, %v834_v27  ;;  %v587_v42 = vshrl.u32 %v10911_v14, 16  ;;  %v591_v43 = vrot.slane %v589_v33, 1  ;;  %v10974_v19 = vld [vmem:[%s16409_s3] sm:$0xff]  }
  0x48   : > { %648 = vrot.lane.b32.xlu0 %v537_v39, %s10683_s7  ;;  %v955_v39 = vrot.slane %v10873_v38, 2  ;;  %v846_v48 = vsel %vm16507_vm3, %v840_v35, %v845_v36  ;;  %v952_v49 = vrot.slane %v10878_v44, 2  ;;  %v953_v50 = vrot.slane %v10885_v46, 2  ;;  %v10987_v28 = vld [vmem:[%s10735_s26 + $0xa4] ss:$0 sps:$4 sm:$0x33]  }
  0x49   : > { %v837_v52 = vsel %vm16507_vm3, %v831_v40, %v836_v20  ;;  %v579_v45 = vrot.slane %v577_v30, 1  ;;  %v582_v53 = vshll.u32 %v10933_v29, 16  ;;  %v592_v55 = vor.u32 %v591_v43, %v587_v42 }
  0x4a   : > { %v957_v57 = vsel %vm16508_vm0, %v955_v39, %v956_v41  ;;  %v859_v58 = vshrl.u32 %v10926_v32, 16  ;;  %v954_v59 = vsel %vm16508_vm0, %v952_v49, %v953_v50  ;;  %v703_v0 = vrot.slane %v10911_v14, 1 }
  0x4b   : > { %731 = vrot.lane.b32.xlu1 %v693_v47, %s10682_s30  ;;  %v594_v47 = vshll.u32 %v10926_v32, 16  ;;  %v584_v60 = vrot.slane %v582_v53, 1  ;;  %v704_v1 = vrot.slane %v10926_v32, 1  ;;  %v701_v3 = vrot.slane %v10933_v29, 1 }
  0x4c   : > { %729 = vrot.lane.b32.xlu0 %v690_v51, %s10682_s30  ;;  %v575_v51 = vshrl.u32 %v10922_v31, 16  ;;  %v856_v4 = vrot.slane %v587_v42, 1  ;;  %v857_v6 = vrot.slane %v589_v33, 2  ;;  %v861_v7 = vrot.slane %v859_v58, 1 }
  0x4d   : > { %v596_v56 = vrot.slane %v594_v47, 1  ;;  %v862_v8 = vrot.slane %v594_v47, 2  ;;  %v848_v13 = vrot.slane %v577_v30, 2  ;;  %v853_v17 = vrot.slane %v582_v53, 2 }
  0x4e   : > { %v580_v46 = vor.u32 %v579_v45, %v575_v51  ;;  %v705_v22 = vsel %vm666_vm1, %v703_v0, %v704_v1  ;;  %v858_v9 = vor.u32 %v857_v6, %v856_v4  ;;  %v613_v25 = vshll.u32 %v10965_v11, 16  ;;  %v11018_v4 = vld [vmem:[%s10735_s26 + $0xb4] sm:$0xff]  }
  0x4f   : > { %908 = vrot.lane.b32.xlu1 %v828_v61, %s10684_s8  ;;  %v850_v61 = vshrl.u32 %v10933_v29, 16  ;;  %v597_v2 = vsel %vm441_vm2, %v592_v55, %v596_v56  ;;  %v601_v33 = vshll.u32 %v10969_v18, 16  ;;  %v962_v35 = vrot.slane %v10926_v32, 2 }
  0x50   : > { %906 = vrot.lane.b32.xlu0 %v819_v63, %s10684_s8  ;;  %v700_v63 = vrot.slane %v10922_v31, 1  ;;  %v585_v12 = vsel %vm441_vm2, %v580_v46, %v584_v60  ;;  %v958_v36 = vrot.slane %v10922_v31, 2  ;;  %v611_v20 = vshrl.u32 %v10965_v11, 16 }
  0x51   : > { %v852_v16 = vrot.slane %v850_v61, 1  ;;  %v615_v30 = vrot.slane %v613_v25, 1  ;;  %v618_v39 = vshll.u32 %v10980_v24, 16  ;;  %v599_v42 = vshrl.u32 %v10969_v18, 16 }
  0x52   : > { %v603_v43 = vrot.slane %v601_v33, 1  ;;  %v606_v32 = vshll.u32 %v10987_v28, 16  ;;  %v877_v49 = vshrl.u32 %v10980_v24, 16  ;;  %v868_v45 = vshrl.u32 %v10987_v28, 16 }
  0x53   : > { %989 = vrot.lane.b32.xlu1 %v951_v5, %s10681_s29  ;;  %v10546_v5 = vld [vmem:[%s16409_s3 + $0x14] ss:$0 sps:$4 sm:$0x33]   ;;  %v854_v27 = vor.u32 %v853_v17, %v852_v16  ;;  %v616_v47 = vor.u32 %v615_v30, %v611_v20  ;;  %v709_v53 = vrot.slane %v10965_v11, 1  ;;  %v710_v55 = vrot.slane %v10980_v24, 1  ;;  %v11029_v17 = vld [vmem:[%s10735_s26 + $0xc0] sm:$0xff]  }
  0x54   : > { %987 = vrot.lane.b32.xlu0 %v948_v10, %s10681_s29  ;;  %v847_v10 = vrot.slane %v575_v51, 1  ;;  %10485 = vmatprep.subr.msk.bf16.mxu0 %vm1237_vm4, %v10546_v5  ;;  %v1239_v21 = vsel %vm1237_vm4, %v10546_v5, 0  ;;  %v604_v51 = vor.u32 %v603_v43, %v599_v42  ;;  %v706_v56 = vrot.slane %v10969_v18, 1 }
  0x55   : > { %9704 = vmatpush3.bf16.msra.mxu0 %v1239_v21  ;;  %v874_v58 = vrot.slane %v611_v20, 1  ;;  %v879_v60 = vrot.slane %v877_v49, 1  ;;  %v880_v61 = vrot.slane %v618_v39, 2  ;;  %v865_v0 = vrot.slane %v599_v42, 1 }
  0x56   : > { %v849_v26 = vor.u32 %v848_v13, %v847_v10  ;;  %9737 = vmatprep.subr.bf16.mxu0 %v10974_v19  ;;  %v711_v5 = vsel %vm666_vm1, %v709_v53, %v710_v55  ;;  %v625_v16 = vshll.u32 %v11018_v4, 16  ;;  %v11060_v55 = vld [vmem:[%s10735_s26] sm:$0xff]  }
  0x57   : > { %654 = vrot.lane.b32.xlu1 %v573_v23, %s10683_s7  ;;  %v863_v23 = vor.u32 %v862_v8, %v861_v7  ;;  %v881_v7 = vor.u32 %v880_v61, %v879_v60  ;;  %v11024_v8 = vld [vmem:[%s10735_s26 + $0xbc] ss:$0 sps:$4 sm:$0x33]  }
  0x58   : > { %652 = vrot.lane.b32.xlu0 %v561_v15, %s10683_s7  ;;  %v702_v15 = vsel %vm666_vm1, %v700_v63, %v701_v3  ;;  %v855_v41 = vsel %vm16507_vm3, %v849_v26, %v854_v27  ;;  %v870_v63 = vrot.slane %v868_v45, 1  ;;  %v871_v3 = vrot.slane %v606_v32, 2 }
  0x59   : > { %v864_v40 = vsel %vm16507_vm3, %v858_v9, %v863_v23  ;;  %v968_v9 = vrot.slane %v10980_v24, 2  ;;  %v964_v23 = vrot.slane %v10969_v18, 2  ;;  %v886_v26 = vshrl.u32 %v11024_v8, 16 }
  0x5a   : > { %v872_v13 = vor.u32 %v871_v3, %v870_v63  ;;  %v1151_v24 = vshll.u32 %v11029_v17, 16 }
  0x5b   : > { %735 = vrot.lane.b32.xlu1 %v699_v34, %s10682_s30  ;;  %v961_v34 = vrot.slane %v10911_v14, 2 }
  0x5c   : > { %733 = vrot.lane.b32.xlu0 %v696_v37, %s10682_s30  ;;  %v959_v37 = vrot.slane %v10933_v29, 2  ;;  %v1168_v61 = vrot.slane %v1151_v24, 2 }
  0x5d   : > { %v963_v29 = vsel %vm16508_vm0, %v961_v34, %v962_v35  ;;  %v627_v34 = vrot.slane %v625_v16, 1  ;;  %v11043_v35 = vld [vmem:[%s10735_s26 + $0xc8] ss:$0 sps:$4 sm:$0x33]  }
  0x5e   : > { %v960_v50 = vsel %vm16508_vm0, %v958_v36, %v959_v37  ;;  %v712_v36 = vrot.slane %v11018_v4, 1  ;;  %v1170_v53 = vshrl.u32 %v11043_v35, 16 }
  0x5f   : > { %912 = vrot.lane.b32.xlu1 %v846_v48, %s10684_s8  ;;  %v620_v48 = vrot.slane %v618_v39, 1  ;;  %v884_v39 = vrot.slane %v625_v16, 2  ;;  %v443_v16 = vshrl.u32 %v11060_v55, 16 }
  0x60   : > { %910 = vrot.lane.b32.xlu0 %v837_v52, %s10684_s8  ;;  %v608_v52 = vrot.slane %v606_v32, 1  ;;  %v1149_v32 = vshrl.u32 %v11029_v17, 16  ;;  %v1172_v3 = vrot.slane %v1170_v53, 1 }
  0x61   : > { %v621_v46 = vsel %vm441_vm2, %v616_v47, %v620_v48  ;;  %v1156_v47 = vshll.u32 %v11043_v35, 16 }
  0x62   : > { %v609_v1 = vsel %vm441_vm2, %v604_v51, %v608_v52  ;;  %v1167_v60 = vrot.slane %v1149_v32, 1 }
  0x63   : > { %993 = vrot.lane.b32.xlu1 %v957_v57, %s10681_s29  ;;  %v707_v57 = vrot.slane %v10987_v28, 1  ;;  %v1158_v45 = vrot.slane %v1156_v47, 1 }
  0x64   : > { %991 = vrot.lane.b32.xlu0 %v954_v59, %s10681_s29  ;;  %v875_v59 = vrot.slane %v613_v25, 2  ;;  %v965_v25 = vrot.slane %v10987_v28, 2 }
  0x65   : > { %v708_v10 = vsel %vm666_vm1, %v706_v56, %v707_v57  ;;  %v970_v56 = vrot.slane %v11018_v4, 2  ;;  %v971_v57 = vrot.slane %v11024_v8, 2 }
  0x66   : > { %v876_v6 = vor.u32 %v875_v59, %v874_v58  ;;  %v966_v37 = vsel %vm16508_vm0, %v964_v23, %v965_v25  ;;  %v1162_v58 = vrot.slane %v11029_v17, 1  ;;  %v1169_v25 = vor.u32 %v1168_v61, %v1167_v60 }
  0x67   : > { %658 = vrot.lane.b32.xlu1 %v597_v2, %s10683_s7  ;;  %v866_v2 = vrot.slane %v601_v33, 2  ;;  %v623_v33 = vshrl.u32 %v11018_v4, 16 }
  0x68   : > { %656 = vrot.lane.b32.xlu0 %v585_v12, %s10683_s7  ;;  %v882_v21 = vsel %vm16507_vm3, %v876_v6, %v881_v7  ;;  %v445_v6 = vshll.u32 %v11060_v55, 16 }
  0x69   : > { %v867_v12 = vor.u32 %v866_v2, %v865_v0  ;;  %v883_v20 = vrot.slane %v623_v33, 1  ;;  %v628_v43 = vor.u32 %v627_v34, %v623_v33  ;;  %v11070_v0 = vld [vmem:[%s10735_s26 + $0x8] ss:$0 sps:$4 sm:$0x33]  }
  0x6a   : > { %v751_v7 = vshrl.u32 %v11070_v0, 16  ;;  %v749_v33 = vrot.slane %v445_v6, 2 }
  0x6b   : > { %739 = vrot.lane.b32.xlu1 %v705_v22, %s10682_s30  ;;  %v967_v22 = vrot.slane %v10965_v11, 2  ;;  %v873_v27 = vsel %vm16507_vm3, %v867_v12, %v872_v13  ;;  %v885_v49 = vor.u32 %v884_v39, %v883_v20  ;;  %v1178_v12 = vrot.slane %v11029_v17, 2 }
  0x6c   : > { %737 = vrot.lane.b32.xlu0 %v702_v15, %s10682_s30  ;;  %v630_v15 = vshll.u32 %v11024_v8, 16  ;;  %v1179_v13 = vrot.slane %v11043_v35, 2  ;;  %v753_v34 = vrot.slane %v751_v7, 1 }
  0x6d   : > { %v969_v28 = vsel %vm16508_vm0, %v967_v22, %v968_v9  ;;  %v450_v22 = vshll.u32 %v11070_v0, 16 }
  0x6e   : > { %v632_v30 = vrot.slane %v630_v15, 1  ;;  %v889_v42 = vrot.slane %v630_v15, 2  ;;  %v447_v15 = vrot.slane %v445_v6, 1 }
  0x6f   : > { %916 = vrot.lane.b32.xlu1 %v864_v40, %s10684_s8  ;;  %v713_v40 = vrot.slane %v11024_v8, 1  ;;  %v972_v8 = vsel %vm16508_vm0, %v970_v56, %v971_v57 }
  0x70   : > { %914 = vrot.lane.b32.xlu0 %v855_v41, %s10684_s8  ;;  %v888_v41 = vrot.slane %v886_v26, 1  ;;  %v633_v51 = vsel %vm441_vm2, %v628_v43, %v632_v30  ;;  %v448_v39 = vor.u32 %v447_v15, %v443_v16 }
  0x71   : > { %v714_v48 = vsel %vm666_vm1, %v712_v36, %v713_v40  ;;  %v1180_v36 = vsel %vm16508_vm0, %v1178_v12, %v1179_v13  ;;  %v11095_v40 = vld [vmem:[%s10735_s26 + $0xd4] ss:$0 sps:$4 sm:$0x33]  }
  0x72   : > { %v1593_v56 = vshll.u32 %v11095_v40, 16 }
  0x73   : > { %997 = vrot.lane.b32.xlu1 %v963_v29, %s10681_s29  ;;  %v1153_v29 = vrot.slane %v1151_v24, 1  ;;  %v754_v24 = vrot.slane %v450_v22, 2 }
  0x74   : > { %995 = vrot.lane.b32.xlu0 %v960_v50, %s10681_s29  ;;  %v890_v50 = vor.u32 %v889_v42, %v888_v41  ;;  %v452_v41 = vrot.slane %v450_v22, 1  ;;  %v1595_v12 = vrot.slane %v1593_v56, 1 }
  0x75   : > { %v1154_v52 = vor.u32 %v1153_v29, %v1149_v32  ;;  %v755_v32 = vor.u32 %v754_v24, %v753_v34  ;;  %v925_v29 = vrot.slane %v11060_v55, 2  ;;  %v1616_v34 = vrot.slane %v11095_v40, 2 }
  0x76   : > { %v891_v59 = vsel %vm16507_vm3, %v885_v49, %v890_v50  ;;  %v10648_v50 = vld [vmem:[%s10735_s26 + $0x18] sm:$0xff]  }
  0x77   : > { %662 = vrot.lane.b32.xlu1 %v621_v46, %s10683_s7  ;;  %v1163_v46 = vrot.slane %v11043_v35, 1  ;;  %v1159_v63 = vsel %vm441_vm2, %v1154_v52, %v1158_v45 }
  0x78   : > { %660 = vrot.lane.b32.xlu0 %v609_v1, %s10683_s7 }
  0x79   : > { %v1164_v23 = vsel %vm666_vm1, %v1162_v58, %v1163_v46  ;;  %v1607_v46 = vshrl.u32 %v11095_v40, 16 }
  0x7b   : > { %743 = vrot.lane.b32.xlu1 %v711_v5, %s10682_s30  ;;  %v1173_v5 = vrot.slane %v1156_v47, 2  ;;  %v926_v47 = vrot.slane %v11070_v0, 2 }
  0x7c   : > { %741 = vrot.lane.b32.xlu0 %v708_v10, %s10682_s30  ;;  %v11080_v10 = vld [vmem:[%s10735_s26 + $0xcc] sm:$0xff]  }
  0x7d   : > { %v1588_v35 = vshll.u32 %v11080_v10, 16  ;;  %v1586_v52 = vshrl.u32 %v11080_v10, 16  ;;  %v1599_v13 = vrot.slane %v11080_v10, 1 }
  0x7f   : > { %920 = vrot.lane.b32.xlu1 %v882_v21, %s10684_s8  ;;  %v1174_v21 = vor.u32 %v1173_v5, %v1172_v3  ;;  %v1590_v45 = vrot.slane %v1588_v35, 1 }
  0x80   : > { %918 = vrot.lane.b32.xlu0 %v873_v27, %s10684_s8  ;;  %v748_v27 = vrot.slane %v443_v16, 1  ;;  %v1600_v16 = vrot.slane %v11095_v40, 1 }
  0x81   : > { %v1175_v30 = vsel %vm16507_vm3, %v1169_v25, %v1174_v21  ;;  %v1591_v7 = vor.u32 %v1590_v45, %v1586_v52  ;;  %v1609_v25 = vrot.slane %v1607_v46, 1  ;;  %v1610_v21 = vrot.slane %v1593_v56, 2  ;;  %v10651_v46 = vld [vmem:[%s10735_s26 + $0x48] sm:$0xff]  }
  0x82   : > { %v750_v43 = vor.u32 %v749_v33, %v748_v27  ;;  %v11144_v27 = vld [vmem:[%s16409_s3 + $0x18] sm:$0xff]   ;;  %v1615_v33 = vrot.slane %v11080_v10, 2 }
  0x83   : > { %1001 = vrot.lane.b32.xlu1 %v969_v28, %s10681_s29  ;;  %v667_v28 = vrot.slane %v11060_v55, 1 }
  0x84   : > { %999 = vrot.lane.b32.xlu0 %v966_v37, %s10681_s29  ;;  %v668_v37 = vrot.slane %v11070_v0, 1  ;;  %v756_v6 = vsel %vm16507_vm3, %v750_v43, %v755_v32 }
  0x86   : > { %v669_v53 = vsel %vm666_vm1, %v667_v28, %v668_v37  ;;  %v1617_v37 = vsel %vm16508_vm0, %v1615_v33, %v1616_v34 }
  0x87   : > { %745 = vrot.lane.b32.xlu1 %v714_v48, %s10682_s30  ;;  %v10647_v48 = vld [vmem:[%s10735_s26 + $0xc] sm:$0xff]  }
  0x88   : > { %664 = vrot.lane.b32.xlu0 %v633_v51, %s10683_s7 }
  0x89   : > { %v11072_v1 = vpop.permute.xlu0 %975  ;;  %v718_v2 = vpop.permute.xlu1 %717 }
  0x8b   : > { %922 = vrot.lane.b32.xlu1 %v891_v59, %s10684_s8  ;;  %v453_v59 = vsel %vm441_vm2, %v448_v39, %v452_v41  ;;  %v10649_v39 = vld [vmem:[%s10735_s26 + $0x30] sm:$0xff]  }
  0x8c   : > { %1160 = vrot.lane.b32.xlu0 %v1159_v63, %s10683_s7  ;;  %v927_v63 = vsel %vm16508_vm0, %v925_v29, %v926_v47 }
  0x8d   : > { %v720_v9 = vpop.permute.xlu1 %719 }
  0x8e   : > { %v637_v26 = vpop.permute.xlu0 %636 }
  0x8f   : > { %1003 = vrot.lane.b32.xlu1 %v972_v8, %s10681_s29  ;;  %v1009_v49 = vsel %vm1005_vm5, %v10647_v48, %v637_v26  ;;  %v1601_v26 = vsel %vm666_vm1, %v1599_v13, %v1600_v16 }
  0x90   : > { %1165 = vrot.lane.b32.xlu0 %v1164_v23, %s10682_s30  ;;  %v1042_v61 = vsel %vm16509_vm6, %v1009_v49, %v718_v2  ;;  %v10550_v2 = vld [vmem:[%s16409_s3 + $0x8] ss:$0 sps:$4 sm:$0x33]   ;;  %v1605_v23 = vrot.slane %v1588_v35, 2 }
  0x91   : > { %v978_v20 = vpop.permute.xlu1 %977  ;;  %v1414_v15 = vsel %vm1237_vm4, %v10550_v2, 0 }
  0x92   : > { %v639_v42 = vpop.permute.xlu0 %638 }
  0x93   : > { %v1011_v51 = vsel %vm1005_vm5, %v10648_v50, %v639_v42  ;;  %1181 = vrot.lane.b32.xlu1 %v1180_v36, %s10681_s29  ;;  %v1611_v36 = vor.u32 %v1610_v21, %v1609_v25  ;;  %v10650_v42 = vld [vmem:[%s10735_s26 + $0x24] sm:$0xff]  }
  0x94   : > { %1176 = vrot.lane.b32.xlu0 %v1175_v30, %s10684_s8  ;;  %v1044_v58 = vsel %vm16509_vm6, %v1011_v51, %v720_v9  ;;  %v1604_v9 = vrot.slane %v1586_v52, 1 }
  0x95   : > { %v897_v57 = vpop.permute.xlu1 %896 }
  0x96   : > { %v1077_v60 = vsel %vm1071_vm7, %v1044_v58, %v897_v57  ;;  %v895_v0 = vpop.permute.xlu0 %894  ;;  %v1606_v35 = vor.u32 %v1605_v23, %v1604_v9 }
  0x97   : > { %v1075_v3 = vsel %vm1071_vm7, %v1042_v61, %v895_v0  ;;  %715 = vrot.lane.b32.xlu1 %v669_v53, %s10682_s30  ;;  %v11118_v5 = vsel %vm16417_vm8, %v1077_v60, %v978_v20  ;;  %v10652_v61 = vld [vmem:[%s10735_s26 + $0x3c] sm:$0xff]  }
  0x98   : > { %634 = vrot.lane.b32.xlu0 %v453_v59, %s10683_s7  ;;  %v11124_v8 = vsel %vm16417_vm8, %v1075_v3, %v11072_v1  ;;  %v1612_v30 = vsel %vm16507_vm3, %v1606_v35, %v1611_v36 }
  0x99   : > { %9705 = vmatprep.mubr.msk.bf16.mxu0 %vm16416_vm9, %v11124_v8  ;;  %v643_v22 = vpop.permute.xlu1 %642 }
  0x9a   : > { %9706 = vmatmul.mubr.msk.bf16.vlgmr.msra.gmra.mrb[0].mxu0 %vm16416_vm9, %v11118_v5  ;;  %v641_v1 = vpop.permute.xlu0 %640  ;;  %v1015_v41 = vsel %vm1005_vm5, %v10649_v39, %v643_v22 }
  0x9b   : > { %973 = vrot.lane.b32.xlu1 %v927_v63, %s10681_s29  ;;  %9738 = vmatpush3.bf16.msra.mxu0 %v10974_v19  ;;  %v1596_v19 = vsel %vm441_vm2, %v1591_v7, %v1595_v12  ;;  %v1013_v43 = vsel %vm1005_vm5, %v10650_v42, %v641_v1 }
  0x9c   : > { %892 = vrot.lane.b32.xlu0 %v756_v6, %s10684_s8  ;;  %10486 = vmatprep.subr.msk.bf16.mxu0 %vm1237_vm4, %v10550_v2 }
  0x9d   : > { %v724_v24 = vpop.permute.xlu1 %723 }
  0x9e   : > { %v722_v28 = vpop.permute.xlu0 %721  ;;  %v1048_v32 = vsel %vm16509_vm6, %v1015_v41, %v724_v24 }
  0x9f   : > { %9740 = vmatpush3.bf16.msra.mxu0 %v1414_v15  ;;  %1602 = vrot.lane.b32.xlu1 %v1601_v26, %s10682_s30  ;;  %v1046_v29 = vsel %vm16509_vm6, %v1013_v43, %v722_v28 }
  0xa0   : > { %1597 = vrot.lane.b32.xlu0 %v1596_v19, %s10683_s7  ;;  %9773 = vmatprep.subr.bf16.mxu0 %v11144_v27 }
  0xa1   : > { %v901_v20 = vpop.permute.xlu1 %900 }
  0xa2   : > { %v899_v40 = vpop.permute.xlu0 %898  ;;  %v1081_v47 = vsel %vm1071_vm7, %v1048_v32, %v901_v20 }
  0xa3   : > { %1618 = vrot.lane.b32.xlu1 %v1617_v37, %s10681_s29  ;;  %v1079_v49 = vsel %vm1071_vm7, %v1046_v29, %v899_v40  ;;  %v11204_v37 = vld [vmem:[%s10735_s26 + $0xd8] sm:$0xff]  }
  0xa4   : > { %1613 = vrot.lane.b32.xlu0 %v1612_v30, %s10684_s8  ;;  %v1850_v20 = vshll.u32 %v11204_v37, 16  ;;  %v1848_v39 = vshrl.u32 %v11204_v37, 16  ;;  %v1861_v43 = vrot.slane %v11204_v37, 1 }
  0xa5   : > { %v982_v48 = vpop.permute.xlu1 %981 }
  0xa6   : > { %v11165_v50 = vsel %vm16417_vm8, %v1081_v47, %v982_v48  ;;  %v980_v51 = vpop.permute.xlu0 %979  ;;  %v1852_v41 = vrot.slane %v1850_v20, 1 }
  0xa7   : > { %v11168_v52 = vsel %vm16417_vm8, %v1079_v49, %v980_v51 }
  0xa8   : > { %9709 = vmatprep.mubr.msk.bf16.mxu0 %vm16416_vm9, %v11168_v52  ;;  %v1853_v29 = vor.u32 %v1852_v41, %v1848_v39 }
  0xa9   : > { %9710 = vmatmul.mubr.msk.bf16.gmra.mrb[4].mxu0 %vm16416_vm9, %v11165_v50  ;;  %v647_v45 = vpop.permute.xlu1 %646 }
  0xaa   : > { %v645_v53 = vpop.permute.xlu0 %644  ;;  %v1019_v60 = vsel %vm1005_vm5, %v10651_v46, %v647_v45 }
  0xab   : > { %v1017_v0 = vsel %vm1005_vm5, %v10652_v61, %v645_v53 }
  0xad   : > { %v728_v56 = vpop.permute.xlu1 %727 }
  0xae   : > { %v726_v57 = vpop.permute.xlu0 %725  ;;  %v1052_v63 = vsel %vm16509_vm6, %v1019_v60, %v728_v56  ;;  %v1866_v56 = vrot.slane %v1848_v39, 1 }
  0xaf   : > { %v1050_v3 = vsel %vm16509_vm6, %v1017_v0, %v726_v57  ;;  %v1867_v57 = vrot.slane %v1850_v20, 2  ;;  %v1877_v0 = vrot.slane %v11204_v37, 2 }
  0xb1   : > { %v905_v58 = vpop.permute.xlu1 %904  ;;  %v1868_v46 = vor.u32 %v1867_v57, %v1866_v56 }
  0xb2   : > { %v903_v59 = vpop.permute.xlu0 %902  ;;  %v1085_v6 = vsel %vm1071_vm7, %v1052_v63, %v905_v58 }
  0xb3   : > { %v1083_v2 = vsel %vm1071_vm7, %v1050_v3, %v903_v59 }
  0xb5   : > { %v986_v7 = vpop.permute.xlu1 %985 }
  0xb6   : > { %v11183_v12 = vsel %vm16417_vm8, %v1085_v6, %v986_v7  ;;  %v984_v13 = vpop.permute.xlu0 %983 }
  0xb7   : > { %v11186_v16 = vsel %vm16417_vm8, %v1083_v2, %v984_v13 }
  0xb8   : > { %9713 = vmatprep.mubr.msk.bf16.mxu0 %vm16416_vm9, %v11186_v16 }
  0xb9   : > { %9714 = vmatmul.mubr.msk.bf16.gmra.mrb[8].mxu0 %vm16416_vm9, %v11183_v12  ;;  %v651_v22 = vpop.permute.xlu1 %650 }
  0xba   : > { %v649_v9 = vpop.permute.xlu0 %648  ;;  %v1023_v15 = vsel %vm1005_vm5, %v10828_v54, %v651_v22 }
  0xbb   : > { %v1021_v26 = vsel %vm1005_vm5, %v10834_v62, %v649_v9  ;;  %v10556_v62 = vld [vmem:[%s10735_s26 + $0xe0] ss:$0 sps:$4 sm:$0x33]  }
  0xbc   : > { %v1855_v42 = vshll.u32 %v10556_v62, 16  ;;  %v1862_v32 = vrot.slane %v10556_v62, 1  ;;  %v1869_v48 = vshrl.u32 %v10556_v62, 16  ;;  %v1878_v63 = vrot.slane %v10556_v62, 2 }
  0xbd   : > { %v732_v23 = vpop.permute.xlu1 %731 }
  0xbe   : > { %v730_v25 = vpop.permute.xlu0 %729  ;;  %v1056_v33 = vsel %vm16509_vm6, %v1023_v15, %v732_v23  ;;  %v1857_v47 = vrot.slane %v1855_v42, 1  ;;  %v1863_v51 = vsel %vm666_vm1, %v1861_v43, %v1862_v32  ;;  %v1871_v58 = vrot.slane %v1869_v48, 1 }
  0xbf   : > { %v1054_v34 = vsel %vm16509_vm6, %v1021_v26, %v730_v25  ;;  %1864 = vrot.lane.b32.xlu1 %v1863_v51, %s10682_s30  ;;  %v1872_v59 = vrot.slane %v1855_v42, 2  ;;  %v1879_v2 = vsel %vm16508_vm0, %v1877_v0, %v1878_v63 }
  0xc0   : > { %v1858_v53 = vsel %vm441_vm2, %v1853_v29, %v1857_v47 }
  0xc1   : > { %v909_v21 = vpop.permute.xlu1 %908  ;;  %1859 = vrot.lane.b32.xlu0 %v1858_v53, %s10683_s7  ;;  %v1873_v61 = vor.u32 %v1872_v59, %v1871_v58 }
  0xc2   : > { %v907_v1 = vpop.permute.xlu0 %906  ;;  %v1089_v24 = vsel %vm1071_vm7, %v1056_v33, %v909_v21 }
  0xc3   : > { %v1087_v35 = vsel %vm1071_vm7, %v1054_v34, %v907_v1  ;;  %v1874_v7 = vsel %vm16507_vm3, %v1868_v46, %v1873_v61  ;;  %1880 = vrot.lane.b32.xlu1 %v1879_v2, %s10681_s29 }
  0xc5   : > { %v990_v19 = vpop.permute.xlu1 %989  ;;  %1875 = vrot.lane.b32.xlu0 %v1874_v7, %s10684_s8 }
  0xc6   : > { %v11201_v36 = vsel %vm16417_vm8, %v1089_v24, %v990_v19  ;;  %v988_v28 = vpop.permute.xlu0 %987 }
  0xc7   : > { %v11207_v54 = vsel %vm16417_vm8, %v1087_v35, %v988_v28 }
  0xc8   : > { %9717 = vmatprep.mubr.msk.bf16.mxu0 %vm16416_vm9, %v11207_v54 }
  0xc9   : > { %9718 = vmatmul.mubr.msk.bf16.gmra.mrb[12].mxu0 %vm16416_vm9, %v11201_v36  ;;  %v655_v30 = vpop.permute.xlu1 %654 }
  0xca   : > { %v653_v40 = vpop.permute.xlu0 %652  ;;  %v1027_v6 = vsel %vm1005_vm5, %v10873_v38, %v655_v30 }
  0xcb   : > { %v1025_v13 = vsel %vm1005_vm5, %v10878_v44, %v653_v40 }
  0xcd   : > { %v736_v49 = vpop.permute.xlu1 %735 }
  0xce   : > { %v734_v45 = vpop.permute.xlu0 %733  ;;  %v1060_v22 = vsel %vm16509_vm6, %v1027_v6, %v736_v49 }
  0xcf   : > { %v1058_v9 = vsel %vm16509_vm6, %v1025_v13, %v734_v45 }
  0xd1   : > { %v913_v60 = vpop.permute.xlu1 %912 }
  0xd2   : > { %v911_v3 = vpop.permute.xlu0 %910  ;;  %v1093_v23 = vsel %vm1071_vm7, %v1060_v22, %v913_v60 }
  0xd3   : > { %v1091_v38 = vsel %vm1071_vm7, %v1058_v9, %v911_v3 }
  0xd5   : > { %v994_v25 = vpop.permute.xlu1 %993 }
  0xd6   : > { %v11235_v21 = vsel %vm16417_vm8, %v1093_v23, %v994_v25  ;;  %v992_v1 = vpop.permute.xlu0 %991  ;;  %v11293_v25 = vld [vmem:[%s10735_s26 + $0xe4] sm:$0xff]  }
  0xd7   : > { %v11238_v15 = vsel %vm16417_vm8, %v1091_v38, %v992_v1 }
  0xd8   : > { %9721 = vmatprep.mubr.msk.bf16.mxu0 %vm16416_vm9, %v11238_v15 }
  0xd9   : > { %9722 = vmatmul.mubr.msk.bf16.gmra.mrb[16].mxu0 %vm16416_vm9, %v11235_v21  ;;  %v659_v44 = vpop.permute.xlu1 %658 }
  0xda   : > { %v657_v26 = vpop.permute.xlu0 %656  ;;  %v1031_v35 = vsel %vm1005_vm5, %v10911_v14, %v659_v44  ;;  %v10560_v44 = vld [vmem:[%s10735_s26 + $0xec] ss:$0 sps:$4 sm:$0x33]  }
  0xdb   : > { %v1029_v28 = vsel %vm1005_vm5, %v10922_v31, %v657_v26  ;;  %v2112_v26 = vshll.u32 %v11293_v25, 16 }
  0xdd   : > { %v740_v33 = vpop.permute.xlu1 %739 }
  0xde   : > { %v738_v34 = vpop.permute.xlu0 %737  ;;  %v1064_v62 = vsel %vm16509_vm6, %v1031_v35, %v740_v33 }
  0xdf   : > { %v1062_v20 = vsel %vm16509_vm6, %v1029_v28, %v738_v34  ;;  %v2123_v28 = vrot.slane %v11293_v25, 1 }
  0xe1   : > { %v917_v24 = vpop.permute.xlu1 %916 }
  0xe2   : > { %v915_v19 = vpop.permute.xlu0 %914  ;;  %v1097_v30 = vsel %vm1071_vm7, %v1064_v62, %v917_v24  ;;  %v2114_v24 = vrot.slane %v2112_v26, 1  ;;  %v2124_v62 = vrot.slane %v10560_v44, 1 }
  0xe3   : > { %v1095_v39 = vsel %vm1071_vm7, %v1062_v20, %v915_v19  ;;  %v2117_v19 = vshll.u32 %v10560_v44, 16 }
  0xe5   : > { %v998_v40 = vpop.permute.xlu1 %997 }
  0xe6   : > { %v11253_v41 = vsel %vm16417_vm8, %v1097_v30, %v998_v40  ;;  %v996_v42 = vpop.permute.xlu0 %995  ;;  %v2119_v30 = vrot.slane %v2117_v19, 1  ;;  %v2131_v40 = vshrl.u32 %v10560_v44, 16 }
  0xe7   : > { %v11256_v43 = vsel %vm16417_vm8, %v1095_v39, %v996_v42 }
  0xe8   : > { %9725 = vmatprep.mubr.msk.bf16.mxu0 %vm16416_vm9, %v11256_v43 }
  0xe9   : > { %9726 = vmatmul.mubr.msk.bf16.gmra.mrb[20].mxu0 %vm16416_vm9, %v11253_v41  ;;  %v663_v14 = vpop.permute.xlu1 %662 }
  0xea   : > { %v661_v31 = vpop.permute.xlu0 %660  ;;  %v1035_v49 = vsel %vm1005_vm5, %v10965_v11, %v663_v14  ;;  %v2125_v14 = vsel %vm666_vm1, %v2123_v28, %v2124_v62 }
  0xeb   : > { %v1033_v51 = vsel %vm1005_vm5, %v10969_v18, %v661_v31  ;;  %2126 = vrot.lane.b32.xlu1 %v2125_v14, %s10682_s30 }
  0xed   : > { %v744_v32 = vpop.permute.xlu1 %743 }
  0xee   : > { %v742_v29 = vpop.permute.xlu0 %741  ;;  %v1068_v45 = vsel %vm16509_vm6, %v1035_v49, %v744_v32  ;;  %v2134_v49 = vrot.slane %v2117_v19, 2 }
  0xef   : > { %v1066_v53 = vsel %vm16509_vm6, %v1033_v51, %v742_v29 }
  0xf1   : > { %v921_v47 = vpop.permute.xlu1 %920 }
  0xf2   : > { %v919_v48 = vpop.permute.xlu0 %918  ;;  %v1101_v56 = vsel %vm1071_vm7, %v1068_v45, %v921_v47  ;;  %v2129_v47 = vrot.slane %v2112_v26, 2  ;;  %v10554_v45 = vld [vmem:[%s16409_s3 + $0x20] ss:$0 sps:$4 sm:$0x33]  }
  0xf3   : > { %v1099_v58 = vsel %vm1071_vm7, %v1066_v53, %v919_v48  ;;  %v2133_v48 = vrot.slane %v2131_v40, 1 }
  0xf5   : > { %v1002_v57 = vpop.permute.xlu1 %1001 }
  0xf6   : > { %v11271_v59 = vsel %vm16417_vm8, %v1101_v56, %v1002_v57  ;;  %v1000_v46 = vpop.permute.xlu0 %999  ;;  %v2135_v56 = vor.u32 %v2134_v49, %v2133_v48  ;;  %v2139_v57 = vrot.slane %v11293_v25, 2 }
  0xf7   : > { %v11274_v60 = vsel %vm16417_vm8, %v1099_v58, %v1000_v46  ;;  %v2140_v58 = vrot.slane %v10560_v44, 2 }
  0xf8   : > { %9729 = vmatprep.mubr.msk.bf16.mxu0 %vm16416_vm9, %v11274_v60 }
  0xf9   : > { %9730 = vmatmul.mubr.msk.bf16.gmra.mrb[24].mxu0 %vm16416_vm9, %v11271_v59  ;;  %v746_v11 = vpop.permute.xlu1 %745 }
  0xfa   : > { %v665_v18 = vpop.permute.xlu0 %664 }
  0xfb   : > { %v1037_v61 = vsel %vm1005_vm5, %v11018_v4, %v665_v18  ;;  %v1644_v18 = vsel %vm1237_vm4, %v10554_v45, 0 }
  0xfc   : > { %v1070_v3 = vsel %vm16509_vm6, %v1037_v61, %v746_v11  ;;  %v2141_v11 = vsel %vm16508_vm0, %v2139_v57, %v2140_v58  ;;  %v10557_v61 = vld [vmem:[%s16409_s3 + $0x24] sm:$0xff]  }
  0xfd   : > { %v923_v0 = vpop.permute.xlu1 %922  ;;  %2142 = vrot.lane.b32.xlu1 %v2141_v11, %s10681_s29 }
  0xfe   : > { %v1161_v63 = vpop.permute.xlu0 %1160  ;;  %v1103_v6 = vsel %vm1071_vm7, %v1070_v3, %v923_v0  ;;  %v10561_v0 = vld [vmem:[%s16409_s3 + $0x30] sm:$0xff]  }
  0xff   : > { %v1184_v22 = vsel %vm1005_vm5, %v11029_v17, %v1161_v63  ;;  %v2110_v17 = vshrl.u32 %v11293_v25, 16 }
 0x101   : > { %v1004_v7 = vpop.permute.xlu1 %1003  ;;  %v2115_v20 = vor.u32 %v2114_v24, %v2110_v17  ;;  %v2128_v29 = vrot.slane %v2110_v17, 1 }
 0x102   : > { %v11285_v2 = vsel %vm16417_vm8, %v1103_v6, %v1004_v7  ;;  %v1166_v13 = vpop.permute.xlu0 %1165 }
 0x103   : > { %9733 = vmatprep.mubr.msk.bf16.mxu0 %vm16416_vm9, %v11285_v2  ;;  %v1186_v4 = vsel %vm16509_vm6, %v1184_v22, %v1166_v13  ;;  %v2120_v32 = vsel %vm441_vm2, %v2115_v20, %v2119_v30  ;;  %v2130_v53 = vor.u32 %v2129_v47, %v2128_v29 }
 0x104   : > { %2121 = vrot.lane.b32.xlu0 %v2120_v32, %s10683_s7 }
 0x105   : > { %v1182_v9 = vpop.permute.xlu1 %1181  ;;  %v2136_v46 = vsel %vm16507_vm3, %v2130_v53, %v2135_v56 }
 0x106   : > { %v1177_v23 = vpop.permute.xlu0 %1176 }
 0x107   : > { %v1188_v38 = vsel %vm1071_vm7, %v1186_v4, %v1177_v23 }
 0x108   : > { %v11297_v1 = vsel %vm16417_vm8, %v1188_v38, %v1182_v9  ;;  %2137 = vrot.lane.b32.xlu0 %v2136_v46, %s10684_s8 }
 0x109   : > { %9734 = vmatmul.mubr.msk.bf16.gmra.mrb[28].mxu0 %vm16416_vm9, %v11297_v1  ;;  %v716_v33 = vpop.permute.xlu1 %715 }
 0x10a   : > { %v635_v34 = vpop.permute.xlu0 %634 }
 0x10b   : > { %v1007_v35 = vsel %vm1005_vm5, %v11060_v55, %v635_v34 }
 0x10c   : > { %v1040_v39 = vsel %vm16509_vm6, %v1007_v35, %v716_v33 }
 0x10d   : > { %v974_v42 = vpop.permute.xlu1 %973 }
 0x10e   : > { %v893_v31 = vpop.permute.xlu0 %892 }
 0x10f   : > { %v1073_v55 = vsel %vm1071_vm7, %v1040_v39, %v893_v31 }
 0x110   : > { %v1106_v51 = vsel %vm16417_vm8, %v1073_v55, %v974_v42 }
 0x111   : > { %9741 = vmatprep.mubr.msk.bf16.mxu0 %vm16416_vm9, %v1106_v51  ;;  %v1603_v3 = vpop.permute.xlu1 %1602 }
 0x112   : > { %9742 = vmatmul.mubr.msk.bf16.vlgmr.msra.gmra.mrb[0].mxu0 %vm16416_vm9, %v11124_v8  ;;  %v10558_v8 = vld [vmem:[%s16409_s3 + $0x2c] ss:$0 sps:$4 sm:$0x33]  }
 0x113   : > { %9774 = vmatpush3.bf16.msra.mxu0 %v11144_v27  ;;  %9745 = vmatprep.mubr.msk.bf16.mxu0 %vm16416_vm9, %v11118_v5  ;;  %v1906_v27 = vsel %vm1237_vm4, %v10558_v8, 0 }
 0x114   : > { %10487 = vmatprep.subr.msk.bf16.mxu0 %vm1237_vm4, %v10554_v45 }
 0x115   : > { %v1619_v22 = vpop.permute.xlu1 %1618 }
 0x117   : > { %9776 = vmatpush3.bf16.msra.mxu0 %v1644_v18 }
 0x118   : > { %9809 = vmatprep.subr.bf16.mxu0 %v10557_v61 }
 0x11a   : > { %9746 = vmatmul.mubr.msk.bf16.gmra.mrb[4].mxu0 %vm16416_vm9, %v11168_v52 }
 0x11b   : > { %9749 = vmatprep.mubr.msk.bf16.mxu0 %vm16416_vm9, %v11165_v50 }
 0x122   : > { %9750 = vmatmul.mubr.msk.bf16.gmra.mrb[8].mxu0 %vm16416_vm9, %v11186_v16 }
 0x123   : > { %9753 = vmatprep.mubr.msk.bf16.mxu0 %vm16416_vm9, %v11183_v12 }
 0x12a   : > { %9754 = vmatmul.mubr.msk.bf16.gmra.mrb[12].mxu0 %vm16416_vm9, %v11207_v54 }
 0x12b   : > { %9757 = vmatprep.mubr.msk.bf16.mxu0 %vm16416_vm9, %v11201_v36 }
 0x131   : > { %v1865_v38 = vpop.permute.xlu1 %1864 }
 0x132   : > { %9758 = vmatmul.mubr.msk.bf16.gmra.mrb[16].mxu0 %vm16416_vm9, %v11238_v15 }
 0x133   : > { %9761 = vmatprep.mubr.msk.bf16.mxu0 %vm16416_vm9, %v11235_v21 }
 0x135   : > { %v1881_v34 = vpop.permute.xlu1 %1880 }
 0x13a   : > { %9762 = vmatmul.mubr.msk.bf16.gmra.mrb[20].mxu0 %vm16416_vm9, %v11256_v43 }
 0x13b   : > { %9765 = vmatprep.mubr.msk.bf16.mxu0 %vm16416_vm9, %v11253_v41 }
 0x142   : > { %9766 = vmatmul.mubr.msk.bf16.gmra.mrb[24].mxu0 %vm16416_vm9, %v11274_v60 }
 0x143   : > { %9769 = vmatprep.mubr.msk.bf16.mxu0 %vm16416_vm9, %v11271_v59 }
 0x14a   : > { %9770 = vmatmul.mubr.msk.bf16.gmra.mrb[28].mxu0 %vm16416_vm9, %v11285_v2 }
 0x14b   : > { %9777 = vmatprep.mubr.msk.bf16.mxu0 %vm16416_vm9, %v11118_v5  ;;  %v1598_v5 = vpop.permute.xlu0 %1597 }
 0x14c   : > { %v1621_v63 = vsel %vm1005_vm5, %v11080_v10, %v1598_v5  ;;  %v10562_v10 = vld [vmem:[%s16409_s3 + $0x38] ss:$0 sps:$4 sm:$0x33]  }
 0x14d   : > { %v1623_v6 = vsel %vm16509_vm6, %v1621_v63, %v1603_v3  ;;  %v2168_v4 = vsel %vm1237_vm4, %v10562_v10, 0 }
 0x14f   : > { %v1614_v7 = vpop.permute.xlu0 %1613 }
 0x150   : > { %v1625_v13 = vsel %vm1071_vm7, %v1623_v6, %v1614_v7 }
 0x151   : > { %v1627_v9 = vsel %vm16417_vm8, %v1625_v13, %v1619_v22 }
 0x152   : > { %9778 = vmatmul.mubr.msk.bf16.vlgmr.msra.gmra.mrb[0].mxu0 %vm16416_vm9, %v11168_v52 }
 0x153   : > { %9810 = vmatpush3.bf16.msra.mxu0 %v10557_v61  ;;  %9781 = vmatprep.mubr.msk.bf16.mxu0 %vm16416_vm9, %v11165_v50 }
 0x154   : > { %10488 = vmatprep.subr.msk.bf16.mxu0 %vm1237_vm4, %v10558_v8 }
 0x157   : > { %9812 = vmatpush3.bf16.msra.mxu0 %v1906_v27 }
 0x158   : > { %9845 = vmatprep.subr.bf16.mxu0 %v10561_v0 }
 0x15a   : > { %9782 = vmatmul.mubr.msk.bf16.gmra.mrb[4].mxu0 %vm16416_vm9, %v11186_v16 }
 0x15b   : > { %9785 = vmatprep.mubr.msk.bf16.mxu0 %vm16416_vm9, %v11183_v12 }
 0x162   : > { %9786 = vmatmul.mubr.msk.bf16.gmra.mrb[8].mxu0 %vm16416_vm9, %v11207_v54 }
 0x163   : > { %9789 = vmatprep.mubr.msk.bf16.mxu0 %vm16416_vm9, %v11201_v36 }
 0x16a   : > { %9790 = vmatmul.mubr.msk.bf16.gmra.mrb[12].mxu0 %vm16416_vm9, %v11238_v15 }
 0x16b   : > { %9793 = vmatprep.mubr.msk.bf16.mxu0 %vm16416_vm9, %v11235_v21 }
 0x172   : > { %9794 = vmatmul.mubr.msk.bf16.gmra.mrb[16].mxu0 %vm16416_vm9, %v11256_v43 }
 0x173   : > { %9797 = vmatprep.mubr.msk.bf16.mxu0 %vm16416_vm9, %v11253_v41 }
 0x17a   : > { %9798 = vmatmul.mubr.msk.bf16.gmra.mrb[20].mxu0 %vm16416_vm9, %v11274_v60 }
 0x17b   : > { %9801 = vmatprep.mubr.msk.bf16.mxu0 %vm16416_vm9, %v11271_v59 }
 0x182   : > { %9802 = vmatmul.mubr.msk.bf16.gmra.mrb[24].mxu0 %vm16416_vm9, %v11285_v2 }
 0x183   : > { %9805 = vmatprep.mubr.msk.bf16.mxu0 %vm16416_vm9, %v11297_v1 }
 0x18a   : > { %9806 = vmatmul.mubr.msk.bf16.gmra.mrb[28].mxu0 %vm16416_vm9, %v1627_v9 }
 0x18b   : > { %9813 = vmatprep.mubr.msk.bf16.mxu0 %vm16416_vm9, %v11168_v52  ;;  %v1860_v52 = vpop.permute.xlu0 %1859 }
 0x18c   : > { %v1883_v23 = vsel %vm1005_vm5, %v11204_v37, %v1860_v52 }
 0x18d   : > { %v1885_v44 = vsel %vm16509_vm6, %v1883_v23, %v1865_v38 }
 0x18f   : > { %v1876_v26 = vpop.permute.xlu0 %1875 }
 0x190   : > { %v1887_v33 = vsel %vm1071_vm7, %v1885_v44, %v1876_v26 }
 0x191   : > { %v1889_v17 = vsel %vm16417_vm8, %v1887_v33, %v1881_v34 }
 0x192   : > { %9814 = vmatmul.mubr.msk.bf16.vlgmr.msra.gmra.mrb[0].mxu0 %vm16416_vm9, %v11165_v50 }
 0x193   : > { %9846 = vmatpush3.bf16.msra.mxu0 %v10561_v0  ;;  %9817 = vmatprep.mubr.msk.bf16.mxu0 %vm16416_vm9, %v11186_v16 }
 0x194   : > { %10489 = vmatprep.subr.msk.bf16.mxu0 %vm1237_vm4, %v10562_v10 }
 0x197   : > { %9848 = vmatpush3.bf16.msra.mxu0 %v2168_v4 }
 0x19a   : > { %9818 = vmatmul.mubr.msk.bf16.gmra.mrb[4].mxu0 %vm16416_vm9, %v11183_v12 }
 0x19b   : > { %9821 = vmatprep.mubr.msk.bf16.mxu0 %vm16416_vm9, %v11207_v54 }
 0x1a2   : > { %9822 = vmatmul.mubr.msk.bf16.gmra.mrb[8].mxu0 %vm16416_vm9, %v11201_v36 }
 0x1a3   : > { %9825 = vmatprep.mubr.msk.bf16.mxu0 %vm16416_vm9, %v11238_v15 }
 0x1aa   : > { %9826 = vmatmul.mubr.msk.bf16.gmra.mrb[12].mxu0 %vm16416_vm9, %v11235_v21 }
 0x1ab   : > { %9829 = vmatprep.mubr.msk.bf16.mxu0 %vm16416_vm9, %v11256_v43 }
 0x1b2   : > { %9830 = vmatmul.mubr.msk.bf16.gmra.mrb[16].mxu0 %vm16416_vm9, %v11253_v41 }
 0x1b3   : > { %9833 = vmatprep.mubr.msk.bf16.mxu0 %vm16416_vm9, %v11274_v60 }
 0x1ba   : > { %9834 = vmatmul.mubr.msk.bf16.gmra.mrb[20].mxu0 %vm16416_vm9, %v11271_v59 }
 0x1bb   : > { %9837 = vmatprep.mubr.msk.bf16.mxu0 %vm16416_vm9, %v11285_v2 }
 0x1c2   : > { %9838 = vmatmul.mubr.msk.bf16.gmra.mrb[24].mxu0 %vm16416_vm9, %v11297_v1 }
 0x1c3   : > { %9841 = vmatprep.mubr.msk.bf16.mxu0 %vm16416_vm9, %v1627_v9 }
 0x1ca   : > { %9842 = vmatmul.mubr.msk.bf16.gmra.mrb[28].mxu0 %vm16416_vm9, %v1889_v17 }
 0x1cb   : > { %9849 = vmatprep.mubr.msk.bf16.mxu0 %vm16416_vm9, %v11165_v50  ;;  %v2122_v50 = vpop.permute.xlu0 %2121 }
 0x1cf   : > { %v2138_v37 = vpop.permute.xlu0 %2137 }
 0x1d2   : > { %9850 = vmatmul.mubr.msk.bf16.vlgmr.msra.gmra.mrb[0].mxu0 %vm16416_vm9, %v11186_v16  ;;  %v2127_v16 = vpop.permute.xlu1 %2126 }
 0x1d3   : > { %9853 = vmatprep.mubr.msk.bf16.mxu0 %vm16416_vm9, %v11183_v12  ;;  %v2145_v12 = vsel %vm1005_vm5, %v11293_v25, %v2122_v50 }
 0x1da   : > { %9854 = vmatmul.mubr.msk.bf16.gmra.mrb[4].mxu0 %vm16416_vm9, %v11207_v54 }
 0x1db   : > { %9857 = vmatprep.mubr.msk.bf16.mxu0 %vm16416_vm9, %v11201_v36  ;;  %v2147_v36 = vsel %vm16509_vm6, %v2145_v12, %v2127_v16 }
 0x1dc   : > { %v2149_v54 = vsel %vm1071_vm7, %v2147_v36, %v2138_v37 }
 0x1e2   : > { %9858 = vmatmul.mubr.msk.bf16.gmra.mrb[8].mxu0 %vm16416_vm9, %v11238_v15 }
 0x1e3   : > { %9861 = vmatprep.mubr.msk.bf16.mxu0 %vm16416_vm9, %v11235_v21  ;;  %v2143_v21 = vpop.permute.xlu1 %2142 }
 0x1e4   : > { %v2151_v15 = vsel %vm16417_vm8, %v2149_v54, %v2143_v21  ;;  %vm12213_vm8 = vmand %vm3306_vm11, %vm3307_vm12 }
 0x1ea   : > { %9862 = vmatmul.mubr.msk.bf16.gmra.mrb[12].mxu0 %vm16416_vm9, %v11256_v43 }
 0x1eb   : > { %9865 = vmatprep.mubr.msk.bf16.mxu0 %vm16416_vm9, %v11253_v41  ;;  %v2364_v41 = vlaneseq }
 0x1ed   : > { %v11477_v43 = vshrl.u32 %v2364_v41, 7 }
 0x1ef   : > { %16552 = vst [vmem:[#allocation3_spill] sm:$0xff] %v11477_v43 }
 0x1f2   : > { %9866 = vmatmul.mubr.msk.bf16.gmra.mrb[16].mxu0 %vm16416_vm9, %v11274_v60  ;;  %v11483_v60 = vld [vmem:[%s16407_s1] sm:$0x7] }
 0x1f3   : > { %9869 = vmatprep.mubr.msk.bf16.mxu0 %vm16416_vm9, %v11271_v59  ;;  %v16415_v59 = vsub.s32 0, %v11477_v43 }
 0x1fa   : > { %9870 = vmatmul.mubr.msk.bf16.gmra.mrb[20].mxu0 %vm16416_vm9, %v11285_v2  ;;  %v11488_v2 = vrot.slane %v11483_v60, %v16415_v59 }
 0x1fb   : > { %9873 = vmatprep.mubr.msk.bf16.mxu0 %vm16416_vm9, %v11297_v1 }
 0x202   : > { %9874 = vmatmul.mubr.msk.bf16.gmra.mrb[24].mxu0 %vm16416_vm9, %v1627_v9 }
 0x203   : > { %9877 = vmatprep.mubr.msk.bf16.mxu0 %vm16416_vm9, %v1889_v17 }
 0x20a   : > { %9878 = vmatmul.mubr.msk.bf16.gmra.mrb[28].mxu0 %vm16416_vm9, %v2151_v15  ;;  %vm3164_vm9 = vsmask.f32 7938 }
 0x20b   : > { %vm12232_vm12 = vmand %vm3008_vm13, %vm3164_vm9  ;;  %vm5990_vm9 = vsmask.f32 256 }
 0x2a5   : > { %v9851_v25 = vpop.f32.mrb[0].mxu0 }
 0x2a6   : > { %v2204_v1 = vpop.f32.mrb[1].mxu0  ;;  %v11494_v28 = vadd.f32 %v9851_v25, %v11488_v2 }
 0x2a7   : > { %v11491_v24 = vadd.f32 %v11488_v2, %v2204_v1  ;;  %v9852_v19 = vpop.f32.mrb[2].mxu0 }
 0x2a8   : > { %v2207_v35 = vpop.f32.mrb[3].mxu0  ;;  %v11502_v30 = vadd.f32 %v9852_v19, %v11488_v2  ;;  %v2403_v42 = vsel %vm16509_vm6, %v11494_v28, 0.0 }
 0x2a9   : > { %v11497_v62 = vadd.f32 %v11488_v2, %v2207_v35  ;;  %v2400_v20 = vsel %vm16509_vm6, %v11491_v24, 0.0 }
 0x2aa   : > { %v2405_v29 = vsel %vm16509_vm6, %v11502_v30, 0.0 }
 0x2ab   : > { %v2401_v40 = vsel %vm16509_vm6, %v11497_v62, 0.0 }
 0x2ac   : > { %v2402_v39 = vadd.f32 %v2401_v40, %v2400_v20 }
 0x2ad   : > { %v9855_v14 = vpop.f32.mrb[4].mxu0 }
 0x2ae   : > { %v2404_v31 = vadd.f32 %v2403_v42, %v2402_v39  ;;  %v2220_v32 = vpop.f32.mrb[5].mxu0  ;;  %v11514_v51 = vadd.f32 %v9855_v14, %v11488_v2 }
 0x2af   : > { %v11511_v47 = vadd.f32 %v11488_v2, %v2220_v32  ;;  %v9856_v48 = vpop.f32.mrb[6].mxu0 }
 0x2b0   : > { %v2406_v55 = vadd.f32 %v2405_v29, %v2404_v31  ;;  %v2223_v49 = vpop.f32.mrb[7].mxu0  ;;  %v11522_v57 = vadd.f32 %v9856_v48, %v11488_v2  ;;  %v2411_v11 = vsel %vm16509_vm6, %v11514_v51, 0.0 }
 0x2b1   : > { %v2407_v45 = vsel %vm16509_vm6, %v11511_v47, 0.0  ;;  %v11519_v53 = vadd.f32 %v11488_v2, %v2223_v49 }
 0x2b2   : > { %v2408_v56 = vadd.f32 %v2407_v45, %v2406_v55  ;;  %v2413_v27 = vsel %vm16509_vm6, %v11522_v57, 0.0 }
 0x2b3   : > { %v2409_v58 = vsel %vm16509_vm6, %v11519_v53, 0.0 }
 0x2b4   : > { %v2410_v46 = vadd.f32 %v2409_v58, %v2408_v56 }
 0x2b5   : > { %v9859_v18 = vpop.f32.mrb[8].mxu0 }
 0x2b6   : > { %v2412_v61 = vadd.f32 %v2411_v11, %v2410_v46  ;;  %v2236_v8 = vpop.f32.mrb[9].mxu0  ;;  %v11534_v6 = vadd.f32 %v9859_v18, %v11488_v2 }
 0x2b7   : > { %v11531_v0 = vadd.f32 %v11488_v2, %v2236_v8  ;;  %v9860_v5 = vpop.f32.mrb[10].mxu0 }
 0x2b8   : > { %v2414_v63 = vadd.f32 %v2413_v27, %v2412_v61  ;;  %v2239_v3 = vpop.f32.mrb[11].mxu0  ;;  %v11542_v9 = vadd.f32 %v9860_v5, %v11488_v2  ;;  %v2419_v52 = vsel %vm16509_vm6, %v11534_v6, 0.0 }
 0x2b9   : > { %v2415_v7 = vsel %vm16509_vm6, %v11531_v0, 0.0  ;;  %v11539_v13 = vadd.f32 %v11488_v2, %v2239_v3 }
 0x2ba   : > { %v2416_v22 = vadd.f32 %v2415_v7, %v2414_v63  ;;  %v2421_v26 = vsel %vm16509_vm6, %v11542_v9, 0.0 }
 0x2bb   : > { %v2417_v10 = vsel %vm16509_vm6, %v11539_v13, 0.0 }
 0x2bc   : > { %v2418_v4 = vadd.f32 %v2417_v10, %v2416_v22 }
 0x2bd   : > { %v9863_v23 = vpop.f32.mrb[12].mxu0 }
 0x2be   : > { %v2420_v38 = vadd.f32 %v2419_v52, %v2418_v4  ;;  %v2252_v44 = vpop.f32.mrb[13].mxu0  ;;  %v11554_v12 = vadd.f32 %v9863_v23, %v11488_v2 }
 0x2bf   : > { %v11551_v33 = vadd.f32 %v11488_v2, %v2252_v44  ;;  %v9864_v34 = vpop.f32.mrb[14].mxu0 }
 0x2c0   : > { %v2422_v17 = vadd.f32 %v2421_v26, %v2420_v38  ;;  %v2255_v50 = vpop.f32.mrb[15].mxu0  ;;  %v11562_v54 = vadd.f32 %v9864_v34, %v11488_v2  ;;  %v2427_v41 = vsel %vm16509_vm6, %v11554_v12, 0.0 }
 0x2c1   : > { %v2423_v16 = vsel %vm16509_vm6, %v11551_v33, 0.0  ;;  %v11559_v36 = vadd.f32 %v11488_v2, %v2255_v50 }
 0x2c2   : > { %v2424_v37 = vadd.f32 %v2423_v16, %v2422_v17  ;;  %v2429_v35 = vsel %vm16509_vm6, %v11562_v54, 0.0 }
 0x2c3   : > { %v2425_v21 = vsel %vm16509_vm6, %v11559_v36, 0.0 }
 0x2c4   : > { %v2426_v15 = vadd.f32 %v2425_v21, %v2424_v37 }
 0x2c5   : > { %v9867_v25 = vpop.f32.mrb[16].mxu0 }
 0x2c6   : > { %v2428_v1 = vadd.f32 %v2427_v41, %v2426_v15  ;;  %v2268_v19 = vpop.f32.mrb[17].mxu0  ;;  %v11574_v14 = vadd.f32 %v9867_v25, %v11488_v2 }
 0x2c7   : > { %v11571_v20 = vadd.f32 %v11488_v2, %v2268_v19  ;;  %v9868_v40 = vpop.f32.mrb[18].mxu0 }
 0x2c8   : > { %v2430_v39 = vadd.f32 %v2429_v35, %v2428_v1  ;;  %v2271_v42 = vpop.f32.mrb[19].mxu0  ;;  %v11582_v48 = vadd.f32 %v9868_v40, %v11488_v2  ;;  %v2435_v45 = vsel %vm16509_vm6, %v11574_v14, 0.0 }
 0x2c9   : > { %v2431_v31 = vsel %vm16509_vm6, %v11571_v20, 0.0  ;;  %v11579_v32 = vadd.f32 %v11488_v2, %v2271_v42 }
 0x2ca   : > { %v2432_v29 = vadd.f32 %v2431_v31, %v2430_v39  ;;  %v2437_v11 = vsel %vm16509_vm6, %v11582_v48, 0.0 }
 0x2cb   : > { %v2433_v55 = vsel %vm16509_vm6, %v11579_v32, 0.0 }
 0x2cc   : > { %v2434_v49 = vadd.f32 %v2433_v55, %v2432_v29 }
 0x2cd   : > { %v9871_v56 = vpop.f32.mrb[20].mxu0 }
 0x2ce   : > { %v2436_v58 = vadd.f32 %v2435_v45, %v2434_v49  ;;  %v2284_v46 = vpop.f32.mrb[21].mxu0  ;;  %v2390_v5 = vadd.f32 %v9871_v56, %v11488_v2 }
 0x2cf   : > { %v11591_v18 = vadd.f32 %v11488_v2, %v2284_v46  ;;  %v9872_v61 = vpop.f32.mrb[22].mxu0 }
 0x2d0   : > { %v2438_v8 = vadd.f32 %v2437_v11, %v2436_v58  ;;  %v2287_v27 = vpop.f32.mrb[23].mxu0  ;;  %v2391_v22 = vadd.f32 %v9872_v61, %v11488_v2  ;;  %v2443_v52 = vsel %vm16509_vm6, %v2390_v5, 0.0 }
 0x2d1   : > { %v2439_v63 = vsel %vm16509_vm6, %v11591_v18, 0.0  ;;  %v2389_v3 = vadd.f32 %v11488_v2, %v2287_v27 }
 0x2d2   : > { %v2440_v7 = vadd.f32 %v2439_v63, %v2438_v8  ;;  %v2445_v26 = vsel %vm16509_vm6, %v2391_v22, 0.0 }
 0x2d3   : > { %v2441_v10 = vsel %vm16509_vm6, %v2389_v3, 0.0 }
 0x2d4   : > { %v2442_v4 = vadd.f32 %v2441_v10, %v2440_v7 }
 0x2d5   : > { %v9875_v23 = vpop.f32.mrb[24].mxu0 }
 0x2d6   : > { %v2444_v38 = vadd.f32 %v2443_v52, %v2442_v4  ;;  %v2300_v44 = vpop.f32.mrb[25].mxu0  ;;  %v2394_v37 = vadd.f32 %v9875_v23, %v11488_v2 }
 0x2d7   : > { %v2392_v34 = vadd.f32 %v11488_v2, %v2300_v44  ;;  %v9876_v17 = vpop.f32.mrb[26].mxu0 }
 0x2d8   : > { %v2446_v50 = vadd.f32 %v2445_v26, %v2444_v38  ;;  %v2303_v16 = vpop.f32.mrb[27].mxu0  ;;  %v2395_v25 = vadd.f32 %v9876_v17, %v11488_v2  ;;  %v2451_v35 = vsel %vm16509_vm6, %v2394_v37, 0.0 }
 0x2d9   : > { %v2447_v21 = vsel %vm16509_vm6, %v2392_v34, 0.0  ;;  %v2393_v15 = vadd.f32 %v11488_v2, %v2303_v16 }
 0x2da   : > { %v2448_v41 = vadd.f32 %v2447_v21, %v2446_v50  ;;  %v2453_v31 = vsel %vm16509_vm6, %v2395_v25, 0.0 }
 0x2db   : > { %v2449_v1 = vsel %vm16509_vm6, %v2393_v15, 0.0 }
 0x2dc   : > { %v2450_v19 = vadd.f32 %v2449_v1, %v2448_v41 }
 0x2dd   : > { %v9879_v40 = vpop.f32.mrb[28].mxu0 }
 0x2de   : > { %v2452_v39 = vadd.f32 %v2451_v35, %v2450_v19  ;;  %v2316_v42 = vpop.f32.mrb[29].mxu0  ;;  %v2398_v56 = vadd.f32 %v9879_v40, %v11488_v2 }
 0x2df   : > { %v2396_v29 = vadd.f32 %v11488_v2, %v2316_v42  ;;  %v9880_v55 = vpop.f32.mrb[30].mxu0 }
 0x2e0   : > { %v2454_v49 = vadd.f32 %v2453_v31, %v2452_v39  ;;  %v2319_v45 = vpop.f32.mrb[31].mxu0  ;;  %v2399_v61 = vadd.f32 %v9880_v55, %v11488_v2  ;;  %v2459_v63 = vsel %vm16509_vm6, %v2398_v56, 0.0 }
 0x2e1   : > { %v2455_v58 = vsel %vm16509_vm6, %v2396_v29, 0.0  ;;  %v2397_v46 = vadd.f32 %v11488_v2, %v2319_v45 }
 0x2e2   : > { %v2456_v11 = vadd.f32 %v2455_v58, %v2454_v49  ;;  %v2461_v10 = vsel %vm16509_vm6, %v2399_v61, 0.0 }
 0x2e3   : > { %v2457_v8 = vsel %vm16509_vm6, %v2397_v46, 0.0 }
 0x2e4   : > { %v2458_v27 = vadd.f32 %v2457_v8, %v2456_v11 }
 0x2e6   : > { %v2460_v7 = vadd.f32 %v2459_v63, %v2458_v27 }
 0x2e8   : > { %v2462_v4 = vadd.f32 %v2461_v10, %v2460_v7 }
 0x2ea   : > { %v2463_v52 = vrot.slane %v2462_v4, 4 }
 0x2ec   : > { %v2464_v23 = vadd.f32 %v2463_v52, %v2462_v4 }
 0x2ee   : > { %v2465_v38 = vrot.slane %v2464_v23, 2 }
 0x2f0   : > { %v2466_v44 = vadd.f32 %v2465_v38, %v2464_v23 }
 0x2f2   : > { %v2467_v26 = vrot.slane %v2466_v44, 1 }
 0x2f4   : > { %v2468_v17 = vadd.f32 %v2467_v26, %v2466_v44 }
 0x2f6   : > { %v2470_v50 = vmul.f32 0.00390625, %v2468_v17 }
 0x2f8   : > { %v11618_v16 = vsub.f32 %v11539_v13, %v2470_v50  ;;  %v11621_v2 = vsub.f32 %v11542_v9, %v2470_v50  ;;  %v11624_v21 = vsub.f32 %v11551_v33, %v2470_v50  ;;  %v11627_v41 = vsub.f32 %v11559_v36, %v2470_v50 }
 0x2f9   : > { %v11630_v1 = vsub.f32 %v11554_v12, %v2470_v50  ;;  %v11633_v19 = vsub.f32 %v11562_v54, %v2470_v50  ;;  %v11636_v35 = vsub.f32 %v11571_v20, %v2470_v50  ;;  %v11639_v13 = vsub.f32 %v11579_v32, %v2470_v50 }
 0x2fa   : > { %v11642_v9 = vsub.f32 %v11574_v14, %v2470_v50  ;;  %v11645_v33 = vsub.f32 %v11582_v48, %v2470_v50  ;;  %v11648_v36 = vsub.f32 %v11591_v18, %v2470_v50  ;;  %v11650_v12 = vsub.f32 %v2389_v3, %v2470_v50 }
 0x2fb   : > { %v11652_v40 = vsub.f32 %v2390_v5, %v2470_v50  ;;  %v11654_v54 = vsub.f32 %v2391_v22, %v2470_v50  ;;  %v11656_v20 = vsub.f32 %v2392_v34, %v2470_v50  ;;  %v11658_v39 = vsub.f32 %v2393_v15, %v2470_v50 }
 0x2fc   : > { %v11660_v32 = vsub.f32 %v2394_v37, %v2470_v50  ;;  %v11662_v14 = vsub.f32 %v2395_v25, %v2470_v50  ;;  %v11664_v42 = vsub.f32 %v2396_v29, %v2470_v50  ;;  %v11666_v48 = vsub.f32 %v2397_v46, %v2470_v50 }
 0x2fd   : > { %v11668_v18 = vsub.f32 %v2398_v56, %v2470_v50  ;;  %v11670_v3 = vsub.f32 %v2399_v61, %v2470_v50  ;;  %v11673_v5 = vsub.f32 %v11491_v24, %v2470_v50  ;;  %v11676_v22 = vsub.f32 %v11497_v62, %v2470_v50 }
 0x2fe   : > { %v11679_v34 = vsub.f32 %v11494_v28, %v2470_v50  ;;  %v11682_v37 = vsub.f32 %v11502_v30, %v2470_v50  ;;  %v11689_v31 = vsub.f32 %v11511_v47, %v2470_v50  ;;  %v11694_v62 = vsub.f32 %v11519_v53, %v2470_v50 }
 0x2ff   : > { %v2503_v15 = vmul.f32 %v11673_v5, %v11673_v5  ;;  %v2504_v25 = vmul.f32 %v11676_v22, %v11676_v22  ;;  %v11701_v49 = vsub.f32 %v11514_v51, %v2470_v50  ;;  %v11707_v53 = vsub.f32 %v11522_v57, %v2470_v50 }
 0x300   : > { %v2505_v24 = vmul.f32 %v11679_v34, %v11679_v34  ;;  %v2506_v28 = vmul.f32 %v11682_v37, %v11682_v37  ;;  %v2507_v47 = vmul.f32 %v11689_v31, %v11689_v31  ;;  %v2508_v58 = vmul.f32 %v11694_v62, %v11694_v62 }
 0x301   : > { %v2535_v30 = vsel %vm16509_vm6, %v2503_v15, 0.0  ;;  %v2536_v29 = vsel %vm16509_vm6, %v2504_v25, 0.0  ;;  %v11713_v61 = vsub.f32 %v11531_v0, %v2470_v50  ;;  %v2509_v51 = vmul.f32 %v11701_v49, %v11701_v49 }
 0x302   : > { %v2537_v55 = vadd.f32 %v2536_v29, %v2535_v30  ;;  %v2538_v45 = vsel %vm16509_vm6, %v2505_v24, 0.0  ;;  %v2540_v46 = vsel %vm16509_vm6, %v2506_v28, 0.0  ;;  %v2542_v8 = vsel %vm16509_vm6, %v2507_v47, 0.0 }
 0x303   : > { %v2510_v63 = vmul.f32 %v11707_v53, %v11707_v53  ;;  %v2544_v57 = vsel %vm16509_vm6, %v2508_v58, 0.0  ;;  %v11722_v10 = vsub.f32 %v11534_v6, %v2470_v50  ;;  %v2511_v4 = vmul.f32 %v11713_v61, %v11713_v61 }
 0x304   : > { %v2539_v56 = vadd.f32 %v2538_v45, %v2537_v55  ;;  %v2546_v0 = vsel %vm16509_vm6, %v2509_v51, 0.0  ;;  %v2512_v23 = vmul.f32 %v11618_v16, %v11618_v16  ;;  %v2514_v6 = vmul.f32 %v11621_v2, %v11621_v2 }
 0x305   : > { %v2548_v38 = vsel %vm16509_vm6, %v2510_v63, 0.0  ;;  %v2513_v26 = vmul.f32 %v11722_v10, %v11722_v10  ;;  %v2550_v17 = vsel %vm16509_vm6, %v2511_v4, 0.0  ;;  %v2515_v24 = vmul.f32 %v11624_v21, %v11624_v21 }
 0x306   : > { %v2541_v11 = vadd.f32 %v2540_v46, %v2539_v56  ;;  %v2552_v50 = vsel %vm16509_vm6, %v2512_v23, 0.0  ;;  %v2516_v29 = vmul.f32 %v11627_v41, %v11627_v41  ;;  %v2556_v55 = vsel %vm16509_vm6, %v2514_v6, 0.0 }
 0x307   : > { %v2554_v28 = vsel %vm16509_vm6, %v2513_v26, 0.0  ;;  %v2517_v45 = vmul.f32 %v11630_v1, %v11630_v1  ;;  %v2558_v56 = vsel %vm16509_vm6, %v2515_v24, 0.0  ;;  %v2518_v46 = vmul.f32 %v11633_v19, %v11633_v19 }
 0x308   : > { %v2543_v27 = vadd.f32 %v2542_v8, %v2541_v11  ;;  %v2560_v11 = vsel %vm16509_vm6, %v2516_v29, 0.0  ;;  %v2519_v8 = vmul.f32 %v11636_v35, %v11636_v35 }
 0x30a   : > { %v2545_v7 = vadd.f32 %v2544_v57, %v2543_v27  ;;  %v2562_v27 = vsel %vm16509_vm6, %v2517_v45, 0.0  ;;  %v2520_v57 = vmul.f32 %v11639_v13, %v11639_v13 }
 0x30c   : > { %v2547_v52 = vadd.f32 %v2546_v0, %v2545_v7  ;;  %v2564_v7 = vsel %vm16509_vm6, %v2518_v46, 0.0  ;;  %v2521_v0 = vmul.f32 %v11642_v9, %v11642_v9 }
 0x30e   : > { %v2549_v44 = vadd.f32 %v2548_v38, %v2547_v52  ;;  %v2566_v52 = vsel %vm16509_vm6, %v2519_v8, 0.0  ;;  %v2522_v38 = vmul.f32 %v11645_v33, %v11645_v33 }
 0x310   : > { %v2551_v15 = vadd.f32 %v2550_v17, %v2549_v44  ;;  %v2568_v44 = vsel %vm16509_vm6, %v2520_v57, 0.0  ;;  %v2523_v17 = vmul.f32 %v11648_v36, %v11648_v36 }
 0x312   : > { %v2553_v25 = vadd.f32 %v2552_v50, %v2551_v15  ;;  %v2570_v15 = vsel %vm16509_vm6, %v2521_v0, 0.0  ;;  %v2524_v50 = vmul.f32 %v11650_v12, %v11650_v12 }
 0x314   : > { %v2555_v30 = vadd.f32 %v2554_v28, %v2553_v25  ;;  %v2572_v25 = vsel %vm16509_vm6, %v2522_v38, 0.0  ;;  %v2525_v28 = vmul.f32 %v11652_v40, %v11652_v40 }
 0x316   : > { %v2557_v47 = vadd.f32 %v2556_v55, %v2555_v30  ;;  %v2574_v30 = vsel %vm16509_vm6, %v2523_v17, 0.0  ;;  %v2526_v55 = vmul.f32 %v11654_v54, %v11654_v54 }
 0x318   : > { %v2559_v58 = vadd.f32 %v2558_v56, %v2557_v47  ;;  %v2576_v47 = vsel %vm16509_vm6, %v2524_v50, 0.0  ;;  %v2527_v56 = vmul.f32 %v11656_v20, %v11656_v20 }
 0x31a   : > { %v2561_v51 = vadd.f32 %v2560_v11, %v2559_v58  ;;  %v2578_v58 = vsel %vm16509_vm6, %v2525_v28, 0.0  ;;  %v2528_v11 = vmul.f32 %v11658_v39, %v11658_v39 }
 0x31c   : > { %v2563_v63 = vadd.f32 %v2562_v27, %v2561_v51  ;;  %v2580_v51 = vsel %vm16509_vm6, %v2526_v55, 0.0  ;;  %v2529_v27 = vmul.f32 %v11660_v32, %v11660_v32 }
 0x31e   : > { %v2565_v4 = vadd.f32 %v2564_v7, %v2563_v63  ;;  %v2582_v63 = vsel %vm16509_vm6, %v2527_v56, 0.0  ;;  %v2530_v7 = vmul.f32 %v11662_v14, %v11662_v14 }
 0x320   : > { %v2567_v23 = vadd.f32 %v2566_v52, %v2565_v4  ;;  %v2584_v4 = vsel %vm16509_vm6, %v2528_v11, 0.0  ;;  %v2531_v52 = vmul.f32 %v11664_v42, %v11664_v42 }
 0x322   : > { %v2569_v26 = vadd.f32 %v2568_v44, %v2567_v23  ;;  %v2586_v23 = vsel %vm16509_vm6, %v2529_v27, 0.0  ;;  %v2532_v44 = vmul.f32 %v11666_v48, %v11666_v48 }
 0x324   : > { %v2571_v6 = vadd.f32 %v2570_v15, %v2569_v26  ;;  %v2588_v26 = vsel %vm16509_vm6, %v2530_v7, 0.0  ;;  %v2533_v15 = vmul.f32 %v11668_v18, %v11668_v18 }
 0x326   : > { %v2573_v24 = vadd.f32 %v2572_v25, %v2571_v6  ;;  %v2590_v6 = vsel %vm16509_vm6, %v2531_v52, 0.0  ;;  %v2534_v25 = vmul.f32 %v11670_v3, %v11670_v3 }
 0x328   : > { %v2575_v29 = vadd.f32 %v2574_v30, %v2573_v24  ;;  %v2592_v24 = vsel %vm16509_vm6, %v2532_v44, 0.0  ;;  %v2594_v30 = vsel %vm16509_vm6, %v2533_v15, 0.0  ;;  %v2596_v55 = vsel %vm16509_vm6, %v2534_v25, 0.0 }
 0x32a   : > { %v2577_v45 = vadd.f32 %v2576_v47, %v2575_v29 }
 0x32c   : > { %v2579_v46 = vadd.f32 %v2578_v58, %v2577_v45 }
 0x32e   : > { %v2581_v8 = vadd.f32 %v2580_v51, %v2579_v46 }
 0x330   : > { %v2583_v57 = vadd.f32 %v2582_v63, %v2581_v8  ;;  %v16414_v63 = vsub.s32 1, %v11477_v43 }
 0x332   : > { %v2585_v0 = vadd.f32 %v2584_v4, %v2583_v57  ;;  %v16413_v57 = vsub.s32 2, %v11477_v43  ;;  %v11803_v7 = vrot.slane %v11483_v60, %v16414_v63 }
 0x334   : > { %v2587_v38 = vadd.f32 %v2586_v23, %v2585_v0  ;;  %v11808_v0 = vrot.slane %v11483_v60, %v16413_v57 }
 0x336   : > { %v2589_v17 = vadd.f32 %v2588_v26, %v2587_v38 }
 0x338   : > { %v2591_v50 = vadd.f32 %v2590_v6, %v2589_v17 }
 0x33a   : > { %v2593_v28 = vadd.f32 %v2592_v24, %v2591_v50 }
 0x33c   : > { %v2595_v29 = vadd.f32 %v2594_v30, %v2593_v28 }
 0x33e   : > { %v2597_v47 = vadd.f32 %v2596_v55, %v2595_v29 }
 0x340   : > { %v2598_v45 = vrot.slane %v2597_v47, 4 }
 0x342   : > { %v2599_v56 = vadd.f32 %v2598_v45, %v2597_v47 }
 0x344   : > { %v2600_v58 = vrot.slane %v2599_v56, 2 }
 0x346   : > { %v2601_v46 = vadd.f32 %v2600_v58, %v2599_v56 }
 0x348   : > { %v2602_v11 = vrot.slane %v2601_v46, 1 }
 0x34a   : > { %v2603_v51 = vadd.f32 %v2602_v11, %v2601_v46 }
 0x34c   : > { %v2604_v8 = vmul.f32 0.00390625, %v2603_v51 }
 0x34e   : > { %v2605_v27 = vadd.f32 1e-05, %v2604_v8 }
 0x350   : > { %10641 = vrsqrt.f32 %v2605_v27 }
 0x35a   : > { %v10642_v4 = vpop.eup %10641 }
 0x35b   : > { %v2636_v52 = vmul.f32 %v10642_v4, %v11666_v48  ;;  %v2607_v23 = vmul.f32 %v10642_v4, %v11673_v5  ;;  %v2608_v38 = vmul.f32 %v10642_v4, %v11676_v22  ;;  %v2609_v44 = vmul.f32 %v10642_v4, %v11679_v34 }
 0x35c   : > { %v2610_v26 = vmul.f32 %v10642_v4, %v11682_v37  ;;  %v2611_v17 = vmul.f32 %v10642_v4, %v11689_v31  ;;  %v2612_v15 = vmul.f32 %v10642_v4, %v11694_v62  ;;  %v2613_v6 = vmul.f32 %v10642_v4, %v11701_v49 }
 0x35d   : > { %v2672_v50 = vmul.f32 %v11803_v7, %v2636_v52  ;;  %v2614_v60 = vmul.f32 %v10642_v4, %v11707_v53  ;;  %v2615_v48 = vmul.f32 %v10642_v4, %v11713_v61  ;;  %v2616_v5 = vmul.f32 %v10642_v4, %v11618_v16 }
 0x35e   : > { %v2617_v22 = vmul.f32 %v10642_v4, %v11722_v10  ;;  %v2618_v34 = vmul.f32 %v10642_v4, %v11621_v2  ;;  %v2619_v37 = vmul.f32 %v10642_v4, %v11624_v21  ;;  %v2620_v31 = vmul.f32 %v10642_v4, %v11627_v41 }
 0x35f   : > { %v11827_v62 = vadd.f32 %v11808_v0, %v2672_v50  ;;  %v2621_v49 = vmul.f32 %v10642_v4, %v11630_v1  ;;  %v2622_v25 = vmul.f32 %v10642_v4, %v11633_v19  ;;  %v2623_v53 = vmul.f32 %v10642_v4, %v11636_v35 }
 0x360   : > { %v2624_v61 = vmul.f32 %v10642_v4, %v11639_v13  ;;  %v2625_v16 = vmul.f32 %v10642_v4, %v11642_v9  ;;  %v2626_v10 = vmul.f32 %v10642_v4, %v11645_v33  ;;  %v2627_v2 = vmul.f32 %v10642_v4, %v11648_v36 }
 0x361   : > { %v11837_v21 = vmul.f32 0.2, %v11827_v62  ;;  %v2628_v41 = vmul.f32 %v10642_v4, %v11650_v12  ;;  %v2629_v24 = vmul.f32 %v10642_v4, %v11652_v40  ;;  %v2630_v1 = vmul.f32 %v10642_v4, %v11654_v54 }
 0x362   : > { %v2631_v19 = vmul.f32 %v10642_v4, %v11656_v20  ;;  %v2632_v35 = vmul.f32 %v10642_v4, %v11658_v39  ;;  %v2633_v13 = vmul.f32 %v10642_v4, %v11660_v32  ;;  %v2634_v9 = vmul.f32 %v10642_v4, %v11662_v14 }
 0x363   : > { %v2635_v33 = vmul.f32 %v10642_v4, %v11664_v42  ;;  %v2637_v36 = vmul.f32 %v10642_v4, %v11668_v18  ;;  %v2638_v28 = vmul.f32 %v10642_v4, %v11670_v3  ;;  %v2645_v12 = vmul.f32 %v11803_v7, %v2609_v44 }
 0x364   : > { %v2643_v40 = vmul.f32 %v11803_v7, %v2607_v23  ;;  %v2644_v54 = vmul.f32 %v11803_v7, %v2608_v38  ;;  %v2646_v20 = vmul.f32 %v11803_v7, %v2610_v26  ;;  %v2647_v39 = vmul.f32 %v11803_v7, %v2611_v17 }
 0x365   : > { %v2681_v32 = vadd.f32 %v11808_v0, %v2645_v12  ;;  %v2648_v14 = vmul.f32 %v11803_v7, %v2612_v15  ;;  %v11857_v42 = vmul.f32 %v11803_v7, %v2613_v6  ;;  %v2650_v18 = vmul.f32 %v11803_v7, %v2614_v60 }
 0x366   : > { %v2651_v3 = vmul.f32 %v11803_v7, %v2615_v48  ;;  %v2652_v30 = vmul.f32 %v11803_v7, %v2616_v5  ;;  %v11863_v29 = vmul.f32 %v11803_v7, %v2617_v22  ;;  %v2654_v55 = vmul.f32 %v11803_v7, %v2618_v34 }
 0x367   : > { %v2713_v47 = vmul.f32 0.2, %v2681_v32  ;;  %v11867_v45 = vmul.f32 %v11803_v7, %v2619_v37  ;;  %v2656_v56 = vmul.f32 %v11803_v7, %v2620_v31  ;;  %v11871_v58 = vmul.f32 %v11803_v7, %v2621_v49 }
 0x368   : > { %v2658_v46 = vmul.f32 %v11803_v7, %v2622_v25  ;;  %v11875_v11 = vmul.f32 %v11803_v7, %v2623_v53  ;;  %v2660_v51 = vmul.f32 %v11803_v7, %v2624_v61  ;;  %v11879_v8 = vmul.f32 %v11803_v7, %v2625_v16 }
 0x369   : > { %v2745_v27 = vmax.f32 %v2681_v32, %v2713_v47  ;;  %v2662_v4 = vmul.f32 %v11803_v7, %v2626_v10  ;;  %v11883_v52 = vmul.f32 %v11803_v7, %v2627_v2  ;;  %v2664_v23 = vmul.f32 %v11803_v7, %v2628_v41 }
 0x36a   : > { %v11887_v38 = vmul.f32 %v11803_v7, %v2629_v24  ;;  %v2666_v44 = vmul.f32 %v11803_v7, %v2630_v1  ;;  %v11891_v26 = vmul.f32 %v11803_v7, %v2631_v19  ;;  %v2668_v17 = vmul.f32 %v11803_v7, %v2632_v35 }
 0x36b   : > { %v9440_v15 = vpack.c.bf16 %v2745_v27, %v2745_v27  ;;  %v11895_v6 = vmul.f32 %v11803_v7, %v2633_v13  ;;  %v2670_v50 = vmul.f32 %v11803_v7, %v2634_v9  ;;  %v2671_v60 = vmul.f32 %v11803_v7, %v2635_v33 }
 0x36c   : > { %v2673_v48 = vmul.f32 %v11803_v7, %v2637_v36  ;;  %v2674_v5 = vmul.f32 %v11803_v7, %v2638_v28  ;;  %v2679_v22 = vadd.f32 %v11808_v0, %v2643_v40  ;;  %v11903_v34 = vadd.f32 %v11808_v0, %v2644_v54 }
 0x36d   : > { %v11905_v37 = vrot.slane %v9440_v15, 7  ;;  %v11908_v31 = vadd.f32 %v11808_v0, %v2646_v20  ;;  %v11911_v49 = vadd.f32 %v11808_v0, %v2648_v14  ;;  %v11914_v25 = vadd.f32 %v11808_v0, %v2650_v18 }
 0x36e   : > { %v2711_v53 = vmul.f32 0.2, %v2679_v22  ;;  %v11917_v61 = vadd.f32 %v11808_v0, %v2652_v30  ;;  %v11920_v7 = vadd.f32 %v11808_v0, %v2654_v55  ;;  %v11923_v16 = vadd.f32 %v11808_v0, %v2656_v56 }
 0x36f   : > { %5391 = vrot.lane.b32.xlu0 %v11905_v37, %s10685_s11  ;;  %3010 = vst.msk [vmem:[#allocation2 + $0x24] sm:$0xe] %vm16448_vm10, %v11905_v37  ;;  %3056 = vst.msk [vmem:[#allocation2 + $0xc] sm:$0xe] %vm16448_vm10, %v11905_v37  ;;  %v11932_v10 = vadd.f32 %v11808_v0, %v2658_v46  ;;  %v11935_v2 = vadd.f32 %v11808_v0, %v2660_v51  ;;  %v11938_v41 = vadd.f32 %v11808_v0, %v2662_v4 }
 0x370   : > { %v11941_v24 = vadd.f32 %v11808_v0, %v2664_v23  ;;  %v2743_v1 = vmax.f32 %v2679_v22, %v2711_v53  ;;  %v11944_v19 = vadd.f32 %v11808_v0, %v2666_v44  ;;  %v11947_v35 = vadd.f32 %v11808_v0, %v2668_v17 }
 0x371   : > { %v11950_v13 = vadd.f32 %v11808_v0, %v2670_v50  ;;  %v11953_v9 = vadd.f32 %v11808_v0, %v2671_v60  ;;  %v2709_v33 = vadd.f32 %v11808_v0, %v2673_v48  ;;  %v2710_v36 = vadd.f32 %v11808_v0, %v2674_v5 }
 0x372   : > { %v2683_v28 = vadd.f32 %v11808_v0, %v2647_v39  ;;  %v9438_v12 = vpack.c.bf16 %v2743_v1, %v2743_v1  ;;  %v11959_v40 = vmul.f32 0.2, %v11914_v25  ;;  %v11962_v54 = vmul.f32 0.2, %v11917_v61 }
 0x373   : > { %v11965_v20 = vmul.f32 0.2, %v11920_v7  ;;  %v11968_v14 = vmul.f32 0.2, %v11923_v16  ;;  %v11971_v18 = vmul.f32 0.2, %v11932_v10  ;;  %v2687_v39 = vadd.f32 %v11808_v0, %v2651_v3 }
 0x374   : > { %v2715_v32 = vmul.f32 0.2, %v2683_v28  ;;  %v11974_v30 = vrot.slane %v9438_v12, 7  ;;  %v11977_v55 = vmul.f32 0.2, %v11935_v2  ;;  %v2685_v56 = vadd.f32 %v11808_v0, %v11857_v42 }
 0x375   : > { %v11980_v47 = vmul.f32 0.2, %v11938_v41  ;;  %v11985_v51 = vmul.f32 0.2, %v11941_v24  ;;  %v11988_v27 = vmul.f32 0.2, %v11944_v19  ;;  %v2689_v44 = vadd.f32 %v11808_v0, %v11863_v29 }
 0x376   : > { %v2747_v46 = vmax.f32 %v2683_v28, %v2715_v32  ;;  %v11991_v3 = vmul.f32 0.2, %v11947_v35  ;;  %5385 = vrot.lane.b32.xlu1 %v11974_v30, %s10685_s11  ;;  %3005 = vst.msk [vmem:[#allocation2 + $0x18] sm:$0xe] %vm16448_vm10, %v11974_v30  ;;  %v11998_v42 = vmul.f32 0.2, %v11950_v13  ;;  %v2691_v60 = vadd.f32 %v11808_v0, %v11867_v45 }
 0x377   : > { %v2741_v4 = vmul.f32 0.2, %v2709_v33  ;;  %v2742_v23 = vmul.f32 0.2, %v2710_v36  ;;  %v2719_v15 = vmul.f32 0.2, %v2687_v39  ;;  %v2693_v53 = vadd.f32 %v11808_v0, %v11871_v58 }
 0x378   : > { %v9442_v17 = vpack.c.bf16 %v2747_v46, %v2747_v46  ;;  %v2717_v50 = vmul.f32 0.2, %v2685_v56  ;;  %v2721_v22 = vmul.f32 0.2, %v2689_v44  ;;  %v2723_v32 = vmul.f32 0.2, %v2691_v60 }
 0x379   : > { %v2773_v48 = vmax.f32 %v2709_v33, %v2741_v4  ;;  %v2774_v5 = vmax.f32 %v2710_v36, %v2742_v23  ;;  %v2751_v28 = vmax.f32 %v2687_v39, %v2719_v15  ;;  %v2725_v46 = vmul.f32 0.2, %v2693_v53 }
 0x37a   : > { %v12006_v1 = vrot.slane %v9442_v17, 7  ;;  %v2749_v12 = vmax.f32 %v2685_v56, %v2717_v50  ;;  %v2753_v29 = vmax.f32 %v2689_v44, %v2721_v22  ;;  %v2755_v36 = vmax.f32 %v2691_v60, %v2723_v32 }
 0x37b   : > { %v9468_v57 = vpack.c.bf16 %v2773_v48, %v2773_v48  ;;  %v9469_v63 = vpack.c.bf16 %v2774_v5, %v2774_v5  ;;  %v9446_v45 = vpack.c.bf16 %v2751_v28, %v2751_v28  ;;  %v2695_v58 = vadd.f32 %v11808_v0, %v11875_v11 }
 0x37c   : > { %3013 = vst.msk [vmem:[#allocation2 + $0x30] sm:$0xe] %vm16448_vm10, %v12006_v1  ;;  %5397 = vrot.lane.b32.xlu0 %v12006_v1, %s10685_s11  ;;  %v9444_v33 = vpack.c.bf16 %v2749_v12, %v2749_v12  ;;  %v9448_v4 = vpack.c.bf16 %v2753_v29, %v2753_v29  ;;  %v2757_v23 = vmax.f32 %v2693_v53, %v2725_v46 }
 0x37d   : > { %v12014_v39 = vrot.slane %v9468_v57, 7  ;;  %v12016_v56 = vrot.slane %v9469_v63, 7  ;;  %v12024_v17 = vrot.slane %v9446_v45, 7  ;;  %v9450_v50 = vpack.c.bf16 %v2755_v36, %v2755_v36 }
 0x37e   : > { %v12026_v15 = vrot.slane %v9444_v33, 7  ;;  %v2727_v60 = vmul.f32 0.2, %v2695_v58  ;;  %v12028_v48 = vrot.slane %v9448_v4, 7  ;;  %v9452_v11 = vpack.c.bf16 %v2757_v23, %v2757_v23 }
 0x37f   : > { %16553 = vst [vmem:[#allocation4_spill] sm:$0xff] %v12014_v39  ;;  %16554 = vst [vmem:[#allocation5_spill] sm:$0xff] %v12016_v56  ;;  %v2951_v57 = vrot.slane %v12014_v39, 4  ;;  %v16418_v63 = vrot.slane %v12016_v56, 4  ;;  %5409 = vrot.lane.b32.xlu1 %v12024_v17, %s10685_s11  ;;  %v12042_v5 = vrot.slane %v9450_v50, 7  ;;  %v2697_v53 = vadd.f32 %v11808_v0, %v11879_v8 }
 0x380   : > { %3052 = vst.msk [vmem:[#allocation2 + $0xcc] sm:$0xe] %vm16448_vm10, %v12014_v39  ;;  %3019 = vst.msk [vmem:[#allocation2 + $0x48] sm:$0xe] %vm16448_vm10, %v12024_v17  ;;  %5403 = vrot.lane.b32.xlu0 %v12026_v15, %s10685_s11  ;;  %v2759_v22 = vmax.f32 %v2695_v58, %v2727_v60  ;;  %v2699_v28 = vadd.f32 %v11808_v0, %v11883_v52  ;;  %v12050_v12 = vrot.slane %v9452_v11, 7 }
 0x381   : > { %3016 = vst.msk [vmem:[#allocation2 + $0x3c] sm:$0xe] %vm16448_vm10, %v12026_v15  ;;  %3022 = vst.msk [vmem:[#allocation2 + $0x54] sm:$0xe] %vm16448_vm10, %v12028_v48  ;;  %v12055_v32 = vsel %vm12020_vm15, %v2951_v57, %v12016_v56  ;;  %v2701_v8 = vadd.f32 %v11808_v0, %v11887_v38  ;;  %v2703_v52 = vadd.f32 %v11808_v0, %v11891_v26  ;;  %v2729_v46 = vmul.f32 0.2, %v2697_v53 }
 0x382   : > { %16557 = vst [vmem:[#allocation6_spill] sm:$0xff] %v12055_v32  ;;  %3054 = vst.msk [vmem:[#allocation2 + $0xd4] sm:$0x1] %vm3008_vm13, %v16418_v63  ;;  %v9454_v29 = vpack.c.bf16 %v2759_v22, %v2759_v22  ;;  %v2731_v45 = vmul.f32 0.2, %v2699_v28  ;;  %v2705_v33 = vadd.f32 %v11808_v0, %v11895_v6  ;;  %v2752_v26 = vmax.f32 %v11917_v61, %v11962_v54 }
 0x383   : > { %3025 = vst.msk [vmem:[#allocation2 + $0x60] sm:$0xe] %vm16448_vm10, %v12042_v5  ;;  %3028 = vst.msk [vmem:[#allocation2 + $0x6c] sm:$0xe] %vm16448_vm10, %v12050_v12  ;;  %v2733_v36 = vmul.f32 0.2, %v2701_v8  ;;  %5415 = vrot.lane.b32.xlu1 %v12028_v48, %s10685_s11  ;;  %v2761_v23 = vmax.f32 %v2697_v53, %v2729_v46 }
 0x384   : > { %3053 = vst.msk [vmem:[#allocation2 + $0xd0] sm:$0xf] %vm3006_vm14, %v12055_v32  ;;  %v2735_v38 = vmul.f32 0.2, %v2703_v52  ;;  %v2739_v58 = vmul.f32 0.2, %v11953_v9  ;;  %5421 = vrot.lane.b32.xlu0 %v12042_v5, %s10685_s11  ;;  %v2763_v0 = vmax.f32 %v2699_v28, %v2731_v45 }
 0x385   : > { %v12079_v4 = vrot.slane %v9454_v29, 7  ;;  %v2737_v6 = vmul.f32 0.2, %v2705_v33  ;;  %v2765_v50 = vmax.f32 %v2701_v8, %v2733_v36  ;;  %v2714_v11 = vmul.f32 0.2, %v11908_v31 }
 0x386   : > { %v2767_v60 = vmax.f32 %v2703_v52, %v2735_v38  ;;  %v2771_v57 = vmax.f32 %v11953_v9, %v2739_v58  ;;  %v9456_v61 = vpack.c.bf16 %v2761_v23, %v2761_v23  ;;  %v9458_v54 = vpack.c.bf16 %v2763_v0, %v2763_v0 }
 0x387   : > { %v12083_v22 = vld [vmem:[#allocation2 + $0xcc] sm:$0x2]  ;;  %3031 = vst.msk [vmem:[#allocation2 + $0x78] sm:$0xe] %vm16448_vm10, %v12079_v4  ;;  %v2769_v59 = vmax.f32 %v2705_v33, %v2737_v6  ;;  %v2712_v29 = vmul.f32 0.2, %v11903_v34  ;;  %v9460_v28 = vpack.c.bf16 %v2765_v50, %v2765_v50  ;;  %5427 = vrot.lane.b32.xlu1 %v12050_v12, %s10685_s11  ;;  %v2746_v36 = vmax.f32 %v11908_v31, %v2714_v11 }
 0x388   : > { %v9139_v53 = vrot.slane %v12083_v22, 9  ;;  %v9462_v46 = vpack.c.bf16 %v2767_v60, %v2767_v60  ;;  %v9466_v8 = vpack.c.bf16 %v2771_v57, %v2771_v57  ;;  %5433 = vrot.lane.b32.xlu0 %v12079_v4, %s10685_s11  ;;  %v12095_v52 = vrot.slane %v9456_v61, 7 }
 0x389   : > { %v12093_v9 = vld [vmem:[#allocation2 + $0xd4] sm:$0x1]  ;;  %v12097_v45 = vrot.slane %v9458_v54, 7  ;;  %v9464_v33 = vpack.c.bf16 %v2769_v59, %v2769_v59  ;;  %v12101_v58 = vrot.slane %v9460_v28, 7  ;;  %v9441_v50 = vpack.c.bf16 %v2746_v36, %v2746_v36 }
 0x38a   : > { %v3283_v38 = vrot.slane %v12093_v9, 7  ;;  %v12103_v23 = vrot.slane %v9462_v46, 7  ;;  %v12105_v0 = vrot.slane %v9466_v8, 7  ;;  %3034 = vst.msk [vmem:[#allocation2 + $0x84] sm:$0xe] %vm16448_vm10, %v12095_v52  ;;  %v2744_v59 = vmax.f32 %v11903_v34, %v2712_v29 }
 0x38b   : > { %3037 = vst.msk [vmem:[#allocation2 + $0x90] sm:$0xe] %vm16448_vm10, %v12097_v45  ;;  %v12111_v6 = vrot.slane %v9464_v33, 7  ;;  %v2716_v31 = vmul.f32 0.2, %v11911_v49  ;;  %v9447_v60 = vpack.c.bf16 %v2752_v26, %v2752_v26  ;;  %v2750_v34 = vmax.f32 %v11914_v25, %v11959_v40  ;;  %5439 = vrot.lane.b32.xlu1 %v12095_v52, %s10685_s11 }
 0x38c   : > { %3040 = vst.msk [vmem:[#allocation2 + $0x9c] sm:$0xe] %vm16448_vm10, %v12101_v58  ;;  %3043 = vst.msk [vmem:[#allocation2 + $0xa8] sm:$0xe] %vm16448_vm10, %v12103_v23  ;;  %v2754_v57 = vmax.f32 %v11920_v7, %v11965_v20  ;;  %v2762_v11 = vmax.f32 %v11938_v41, %v11980_v47  ;;  %5445 = vrot.lane.b32.xlu0 %v12097_v45, %s10685_s11  ;;  %v2882_v61 = vrot.slane %v9441_v50, 7 }
 0x38d   : > { %3049 = vst.msk [vmem:[#allocation2 + $0xc0] sm:$0xe] %vm16448_vm10, %v12105_v0  ;;  %3060 = vst.msk [vmem:[#allocation2 + $0xd8] sm:$0xe] %vm16448_vm10, %v12105_v0  ;;  %v9439_v26 = vpack.c.bf16 %v2744_v59, %v2744_v59  ;;  %v2748_v54 = vmax.f32 %v11911_v49, %v2716_v31  ;;  %v2756_v25 = vmax.f32 %v11923_v16, %v11968_v14  ;;  %v12138_v7 = vrot.slane %v9447_v60, 7 }
 0x38e   : > { %3046 = vst.msk [vmem:[#allocation2 + $0xb4] sm:$0xe] %vm16448_vm10, %v12111_v6  ;;  %v9445_v41 = vpack.c.bf16 %v2750_v34, %v2750_v34  ;;  %v9449_v40 = vpack.c.bf16 %v2754_v57, %v2754_v57  ;;  %v9457_v20 = vpack.c.bf16 %v2762_v11, %v2762_v11  ;;  %v2884_v47 = vrot.slane %v2882_v61, 4 }
 0x38f   : > { %v12140_v29 = vrot.slane %v9439_v26, 7  ;;  %v9443_v28 = vpack.c.bf16 %v2748_v54, %v2748_v54  ;;  %v9451_v46 = vpack.c.bf16 %v2756_v25, %v2756_v25  ;;  %v2899_v8 = vrot.slane %v12138_v7, 4  ;;  %5451 = vrot.lane.b32.xlu1 %v12101_v58, %s10685_s11 }
 0x390   : > { %v12143_v33 = vrot.slane %v9445_v41, 7  ;;  %v12145_v36 = vrot.slane %v9449_v40, 7  ;;  %v12147_v49 = vrot.slane %v9457_v20, 7  ;;  %5457 = vrot.lane.b32.xlu0 %v12103_v23, %s10685_s11  ;;  %3012 = vst.msk [vmem:[#allocation2 + $0x2c] sm:$0x1] %vm3008_vm13, %v2884_v47  ;;  %v2764_v59 = vmax.f32 %v11941_v24, %v11985_v51 }
 0x391   : > { %3058 = vst.msk [vmem:[#allocation2 + $0x14] sm:$0x1] %vm3008_vm13, %v2884_v47  ;;  %v2879_v16 = vrot.slane %v12140_v29, 4  ;;  %v12156_v14 = vrot.slane %v9443_v28, 7  ;;  %v12158_v50 = vrot.slane %v9451_v46, 7  ;;  %v2758_v57 = vmax.f32 %v11932_v10, %v11971_v18 }
 0x392   : > { %3021 = vst.msk [vmem:[#allocation2 + $0x50] sm:$0x1] %vm3008_vm13, %v2899_v8  ;;  %v2894_v31 = vrot.slane %v12143_v33, 4  ;;  %v16424_v60 = vrot.slane %v12145_v36, 4  ;;  %v16421_v34 = vrot.slane %v12147_v49, 4  ;;  %v9459_v24 = vpack.c.bf16 %v2764_v59, %v2764_v59 }
 0x393   : > { %3009 = vst.msk [vmem:[#allocation2 + $0x20] sm:$0x1] %vm3008_vm13, %v2879_v16  ;;  %v2889_v11 = vrot.slane %v12156_v14, 4  ;;  %v16420_v26 = vrot.slane %v12158_v50, 4  ;;  %v2766_v51 = vmax.f32 %v11944_v19, %v11988_v27  ;;  %v9453_v10 = vpack.c.bf16 %v2758_v57, %v2758_v57  ;;  %5463 = vrot.lane.b32.xlu1 %v12111_v6, %s10685_s11  ;;  %v3318_v27 = vld [vmem:[#allocation2 + $0x2c] sm:$0x2] }
 0x394   : > { %3018 = vst.msk [vmem:[#allocation2 + $0x44] sm:$0x1] %vm3008_vm13, %v2894_v31  ;;  %3024 = vst.msk [vmem:[#allocation2 + $0x5c] sm:$0x1] %vm3008_vm13, %v16424_v60  ;;  %v2760_v18 = vmax.f32 %v11935_v2, %v11977_v55  ;;  %v2768_v54 = vmax.f32 %v11947_v35, %v11991_v3  ;;  %v2881_v19 = vrot.slane %v11905_v37, 4  ;;  %5469 = vrot.lane.b32.xlu0 %v12105_v0, %s10685_s11  ;;  %v12199_v2 = vrot.slane %v9459_v24, 7 }
 0x395   : > { %3036 = vst.msk [vmem:[#allocation2 + $0x8c] sm:$0x1] %vm3008_vm13, %v16421_v34  ;;  %3015 = vst.msk [vmem:[#allocation2 + $0x38] sm:$0x1] %vm3008_vm13, %v2889_v11  ;;  %v9461_v55 = vpack.c.bf16 %v2766_v51, %v2766_v51  ;;  %v2770_v37 = vmax.f32 %v11950_v13, %v11998_v42  ;;  %v2772_v35 = vmax.f32 %v11827_v62, %v11837_v21  ;;  %v12205_v3 = vrot.slane %v9453_v10, 7 }
 0x396   : > { %3027 = vst.msk [vmem:[#allocation2 + $0x68] sm:$0x1] %vm3008_vm13, %v16420_v26  ;;  %v9455_v25 = vpack.c.bf16 %v2760_v18, %v2760_v18  ;;  %v9463_v41 = vpack.c.bf16 %v2768_v54, %v2768_v54  ;;  %v12209_v40 = vsel %vm12020_vm15, %v2881_v19, %v2882_v61  ;;  %v16558_v20 = vmov 0  ;;  %v3327_v28 = vld [vmem:[#allocation2 + $0x50] sm:$0x2] }
 0x397   : > { %v16559_v20 = vsel %vm12213_vm8, 4294967295, %v16558_v20  ;;  %v16419_v13 = vrot.slane %v12199_v2, 4  ;;  %v12218_v42 = vrot.slane %v9461_v55, 7  ;;  %3011 = vst.msk [vmem:[#allocation2 + $0x28] sm:$0xf] %vm3006_vm14, %v12209_v40  ;;  %v9465_v62 = vpack.c.bf16 %v2770_v37, %v2770_v37  ;;  %5395 = vrot.lane.b32.xlu1 %v2884_v47, %s10685_s11 }
 0x398   : > { %16560 = vst [vmem:[#allocation7_spill] sm:$0xff] %v16559_v20  ;;  %3057 = vst.msk [vmem:[#allocation2 + $0x10] sm:$0xf] %vm3006_vm14, %v12209_v40  ;;  %v9467_v21 = vpack.c.bf16 %v2772_v35, %v2772_v35  ;;  %v3217_v61 = vld [vmem:[#allocation2 + $0xcc] sm:$0x1]  ;;  %v16422_v57 = vrot.slane %v12205_v3, 4  ;;  %5389 = vrot.lane.b32.xlu0 %v2879_v16, %s10685_s11 }
 0x399   : > { %v3360_v46 = vld [vmem:[#allocation2 + $0xd4] sm:$0x2]  ;;  %v3229_v59 = vld [vmem:[#allocation2 + $0x2c] sm:$0x1]  ;;  %v12225_v24 = vrot.slane %v9455_v25, 7  ;;  %v12227_v51 = vrot.slane %v9463_v41, 7 }
 0x39a   : > { %v2876_v10 = vrot.slane %v11974_v30, 4  ;;  %v16561_v18 = vmov 0  ;;  %v3269_v54 = vrot.slane %v3229_v59, 7  ;;  %v3232_v19 = vld [vmem:[#allocation2 + $0x50] sm:$0x1]  ;;  %v16423_v30 = vrot.slane %v12218_v42, 4 }
 0x39b   : > { %v16562_v18 = vsel %vm12232_vm12, 4294967295, %v16561_v18  ;;  %v3324_v55 = vld [vmem:[#allocation2 + $0x44] sm:$0x2]  ;;  %v3330_v37 = vld [vmem:[#allocation2 + $0x5c] sm:$0x2]  ;;  %v12242_v35 = vrot.slane %v9465_v62, 7  ;;  %5401 = vrot.lane.b32.xlu1 %v2889_v11, %s10685_s11 }
 0x39c   : > { %16563 = vst [vmem:[#allocation8_spill] sm:$0xff] %v16562_v18  ;;  %3039 = vst.msk [vmem:[#allocation2 + $0x98] sm:$0x1] %vm3008_vm13, %v16419_v13  ;;  %v12244_v25 = vrot.slane %v9467_v21, 7  ;;  %v3321_v41 = vld [vmem:[#allocation2 + $0x38] sm:$0x2]  ;;  %v12254_v13 = vsel %vm12020_vm15, %v2876_v10, %v12140_v29  ;;  %v3319_v62 = vsel %vm12213_vm8, %v3269_v54, %v3318_v27  ;;  %v3218_v29 = vsel %vm12232_vm12, %v9139_v53, %v3217_v61 }
 0x39d   : > { %v3272_v63 = vrot.slane %v3232_v19, 7  ;;  %v3342_v59 = vld [vmem:[#allocation2 + $0x8c] sm:$0x2]  ;;  %3030 = vst.msk [vmem:[#allocation2 + $0x74] sm:$0x1] %vm3008_vm13, %v16422_v57  ;;  %v2919_v47 = vrot.slane %v12225_v24, 4  ;;  %v3361_v27 = vsel %vm12213_vm8, %v3283_v38, %v3360_v46  ;;  %5413 = vrot.lane.b32.xlu0 %v2899_v8, %s10685_s11 }
 0x39e   : > { %v2939_v16 = vrot.slane %v12227_v51, 4  ;;  %v3231_v21 = vld [vmem:[#allocation2 + $0x44] sm:$0x1]  ;;  %v3233_v26 = vld [vmem:[#allocation2 + $0x5c] sm:$0x1]  ;;  %v2944_v53 = vrot.slane %v12242_v35, 4 }
 0x39f   : > { %v3237_v19 = vld [vmem:[#allocation2 + $0x8c] sm:$0x1]  ;;  %v3333_v34 = vld [vmem:[#allocation2 + $0x68] sm:$0x2]  ;;  %3042 = vst.msk [vmem:[#allocation2 + $0xa4] sm:$0x1] %vm3008_vm13, %v16423_v30  ;;  %v3328_v54 = vsel %vm12213_vm8, %v3272_v63, %v3327_v28  ;;  %5407 = vrot.lane.b32.xlu1 %v2894_v31, %s10685_s11 }
 0x3a0   : > { %3007 = vst.msk [vmem:[#allocation2 + $0x1c] sm:$0xf] %vm3006_vm14, %v12254_v13  ;;  %3320 = vst [vmem:[#allocation2 + $0x2c] sm:$0x2] %v3319_v62  ;;  %v3230_v10 = vld [vmem:[#allocation2 + $0x38] sm:$0x1] }
 0x3a1   : > { %v3271_v57 = vrot.slane %v3231_v21, 7  ;;  %v3273_v30 = vrot.slane %v3233_v26, 7  ;;  %v3277_v60 = vrot.slane %v3237_v19, 7  ;;  %3033 = vst.msk [vmem:[#allocation2 + $0x80] sm:$0x1] %vm3008_vm13, %v2919_v47  ;;  %v3270_v22 = vrot.slane %v3230_v10, 7 }
 0x3a2   : > { %3045 = vst.msk [vmem:[#allocation2 + $0xb0] sm:$0x1] %vm3008_vm13, %v2939_v16  ;;  %3219 = vst [vmem:[#allocation2 + $0xcc] sm:$0x1] %v3218_v29  ;;  %v3234_v63 = vld [vmem:[#allocation2 + $0x68] sm:$0x1] }
 0x3a3   : > { %3362 = vst [vmem:[#allocation2 + $0xd4] sm:$0x2] %v3361_v27  ;;  %3329 = vst [vmem:[#allocation2 + $0x50] sm:$0x2] %v3328_v54  ;;  %v12287_v9 = vrot.slane %v12244_v25, 4  ;;  %v2886_v38 = vrot.slane %v12006_v1, 4  ;;  %v3325_v26 = vsel %vm12213_vm8, %v3271_v57, %v3324_v55  ;;  %v3331_v28 = vsel %vm12213_vm8, %v3273_v30, %v3330_v37 }
 0x3a4   : > { %v3343_v11 = vsel %vm12213_vm8, %v3277_v60, %v3342_v59  ;;  %v3274_v61 = vrot.slane %v3234_v63, 7  ;;  %v3322_v8 = vsel %vm12213_vm8, %v3270_v22, %v3321_v41  ;;  %3326 = vst [vmem:[#allocation2 + $0x44] sm:$0x2] %v3325_v26  ;;  %3332 = vst [vmem:[#allocation2 + $0x5c] sm:$0x2] %v3331_v28  ;;  %v2911_v60 = vrot.slane %v12050_v12, 4 }
 0x3a5   : > { %3344 = vst [vmem:[#allocation2 + $0x8c] sm:$0x2] %v3343_v11  ;;  %v3345_v46 = vld [vmem:[#allocation2 + $0x98] sm:$0x2]  ;;  %v3336_v62 = vld [vmem:[#allocation2 + $0x74] sm:$0x2]  ;;  %v12308_v1 = vsel %vm12020_vm15, %v2886_v38, %v12156_v14 }
 0x3a6   : > { %3048 = vst.msk [vmem:[#allocation2 + $0xbc] sm:$0x1] %vm3008_vm13, %v2944_v53  ;;  %3051 = vst.msk [vmem:[#allocation2 + $0xc8] sm:$0x1] %vm3008_vm13, %v12287_v9  ;;  %v2891_v57 = vrot.slane %v12026_v15, 4  ;;  %v3334_v55 = vsel %vm12213_vm8, %v3274_v61, %v3333_v34  ;;  %v2916_v41 = vrot.slane %v12079_v4, 4  ;;  %v12328_v4 = vsel %vm12020_vm15, %v2911_v60, %v12205_v3 }
 0x3a7   : > { %3062 = vst.msk [vmem:[#allocation2 + $0xe0] sm:$0x1] %vm3008_vm13, %v12287_v9  ;;  %3323 = vst [vmem:[#allocation2 + $0x38] sm:$0x2] %v3322_v8  ;;  %v3238_v37 = vld [vmem:[#allocation2 + $0x98] sm:$0x1] }
 0x3a8   : > { %v3348_v30 = vld [vmem:[#allocation2 + $0xa4] sm:$0x2]  ;;  %3014 = vst.msk [vmem:[#allocation2 + $0x34] sm:$0xf] %vm3006_vm14, %v12308_v1  ;;  %v2896_v59 = vrot.slane %v12024_v17, 4  ;;  %v2921_v14 = vrot.slane %v12095_v52, 4  ;;  %v12333_v17 = vsel %vm12020_vm15, %v2891_v57, %v12143_v33  ;;  %v12343_v27 = vsel %vm12020_vm15, %v2916_v41, %v12225_v24 }
 0x3a9   : > { %v16564_v15 = vrot.slane %v12145_v36, 4  ;;  %3335 = vst [vmem:[#allocation2 + $0x68] sm:$0x2] %v3334_v55  ;;  %v3278_v12 = vrot.slane %v3238_v37, 7  ;;  %v3235_v34 = vld [vmem:[#allocation2 + $0x74] sm:$0x1] }
 0x3aa   : > { %v3339_v21 = vld [vmem:[#allocation2 + $0x80] sm:$0x2]  ;;  %v2901_v52 = vrot.slane %v12028_v48, 4  ;;  %v3275_v31 = vrot.slane %v3235_v34, 7  ;;  %v3239_v19 = vld [vmem:[#allocation2 + $0xa4] sm:$0x1]  ;;  %v12348_v33 = vsel %vm12020_vm15, %v2896_v59, %v12138_v7  ;;  %v12353_v48 = vsel %vm12020_vm15, %v2921_v14, %v12147_v49 }
 0x3ab   : > { %5419 = vrot.lane.b32.xlu0 %v16564_v15, %s10685_s11  ;;  %v3351_v29 = vld [vmem:[#allocation2 + $0xb0] sm:$0x2]  ;;  %3029 = vst.msk [vmem:[#allocation2 + $0x70] sm:$0xf] %vm3006_vm14, %v12328_v4  ;;  %3017 = vst.msk [vmem:[#allocation2 + $0x40] sm:$0xf] %vm3006_vm14, %v12333_v17  ;;  %v3346_v10 = vsel %vm12213_vm8, %v3278_v12, %v3345_v46 }
 0x3ac   : > { %v3279_v54 = vrot.slane %v3239_v19, 7  ;;  %v3236_v22 = vld [vmem:[#allocation2 + $0x80] sm:$0x1]  ;;  %v3240_v63 = vld [vmem:[#allocation2 + $0xb0] sm:$0x1]  ;;  %v12366_v7 = vsel %vm12020_vm15, %v2901_v52, %v12145_v36  ;;  %v2926_v38 = vrot.slane %v12097_v45, 4  ;;  %v3337_v26 = vsel %vm12213_vm8, %v3275_v31, %v3336_v62 }
 0x3ad   : > { %3032 = vst.msk [vmem:[#allocation2 + $0x7c] sm:$0xf] %vm3006_vm14, %v12343_v27  ;;  %3020 = vst.msk [vmem:[#allocation2 + $0x4c] sm:$0xf] %vm3006_vm14, %v12348_v33  ;;  %v3276_v28 = vrot.slane %v3236_v22, 7  ;;  %v3280_v11 = vrot.slane %v3240_v63, 7 }
 0x3ae   : > { %3035 = vst.msk [vmem:[#allocation2 + $0x88] sm:$0xf] %vm3006_vm14, %v12353_v48  ;;  %3347 = vst [vmem:[#allocation2 + $0x98] sm:$0x2] %v3346_v10  ;;  %v2906_v61 = vrot.slane %v12042_v5, 4  ;;  %v16565_v8 = vrot.slane %v12147_v49, 4  ;;  %v3349_v45 = vsel %vm12213_vm8, %v3279_v54, %v3348_v30  ;;  %v12385_v60 = vsel %vm12020_vm15, %v2926_v38, %v12199_v2 }
 0x3af   : > { %3023 = vst.msk [vmem:[#allocation2 + $0x58] sm:$0xf] %vm3006_vm14, %v12366_v7  ;;  %v16566_v36 = vrot.slane %v12158_v50, 4  ;;  %3338 = vst [vmem:[#allocation2 + $0x74] sm:$0x2] %v3337_v26  ;;  %v2931_v5 = vrot.slane %v12101_v58, 4  ;;  %v3340_v57 = vsel %vm12213_vm8, %v3276_v28, %v3339_v21  ;;  %v3352_v55 = vsel %vm12213_vm8, %v3280_v11, %v3351_v29 }
 0x3b0   : > { %5443 = vrot.lane.b32.xlu1 %v16565_v8, %s10685_s11  ;;  %v3354_v46 = vld [vmem:[#allocation2 + $0xbc] sm:$0x2]  ;;  %v3357_v62 = vld [vmem:[#allocation2 + $0xc8] sm:$0x2]  ;;  %v2941_v49 = vrot.slane %v12111_v6, 4  ;;  %v12398_v41 = vsel %vm12020_vm15, %v2906_v61, %v12158_v50  ;;  %v2936_v58 = vrot.slane %v12103_v23, 4 }
 0x3b1   : > { %5425 = vrot.lane.b32.xlu0 %v16566_v36, %s10685_s11  ;;  %3350 = vst [vmem:[#allocation2 + $0xa4] sm:$0x2] %v3349_v45  ;;  %v3241_v37 = vld [vmem:[#allocation2 + $0xbc] sm:$0x1]  ;;  %v3242_v30 = vld [vmem:[#allocation2 + $0xc8] sm:$0x1]  ;;  %v12406_v14 = vsel %vm12020_vm15, %v2931_v5, %v12218_v42 }
 0x3b2   : > { %3038 = vst.msk [vmem:[#allocation2 + $0x94] sm:$0xf] %vm3006_vm14, %v12385_v60  ;;  %3341 = vst [vmem:[#allocation2 + $0x80] sm:$0x2] %v3340_v57  ;;  %v3281_v6 = vrot.slane %v3241_v37, 7  ;;  %v3282_v59 = vrot.slane %v3242_v30, 7  ;;  %v12411_v15 = vsel %vm12020_vm15, %v2941_v49, %v12242_v35  ;;  %v12420_v23 = vsel %vm12020_vm15, %v2936_v58, %v12227_v51 }
 0x3b3   : > { %3353 = vst [vmem:[#allocation2 + $0xb0] sm:$0x2] %v3352_v55  ;;  %3026 = vst.msk [vmem:[#allocation2 + $0x64] sm:$0xf] %vm3006_vm14, %v12398_v41  ;;  %v2946_v50 = vrot.slane %v12105_v0, 4  ;;  %v16567_v12 = vrot.slane %v12199_v2, 4 }
 0x3b4   : > { %3041 = vst.msk [vmem:[#allocation2 + $0xa0] sm:$0xf] %vm3006_vm14, %v12406_v14  ;;  %3047 = vst.msk [vmem:[#allocation2 + $0xb8] sm:$0xf] %vm3006_vm14, %v12411_v15  ;;  %v16568_v34 = vrot.slane %v12205_v3, 4  ;;  %v3355_v21 = vsel %vm12213_vm8, %v3281_v6, %v3354_v46  ;;  %v3358_v52 = vsel %vm12213_vm8, %v3282_v59, %v3357_v62  ;;  %v16569_v44 = vrot.slane %v12218_v42, 4 }
 0x3b5   : > { %5449 = vrot.lane.b32.xlu1 %v16567_v12, %s10685_s11  ;;  %3044 = vst.msk [vmem:[#allocation2 + $0xac] sm:$0xf] %vm3006_vm14, %v12420_v23  ;;  %v3169_v31 = vld [vmem:[#allocation2 + $0xc] sm:$0x1]  ;;  %v3064_v19 = vld [vmem:[#allocation2 + $0xc] sm:$0x2]  ;;  %v12438_v0 = vsel %vm12020_vm15, %v2946_v50, %v12244_v25  ;;  %vm12667_vm15 = vmand %vm3008_vm13, %vm5990_vm9 }
 0x3b6   : > { %5431 = vrot.lane.b32.xlu0 %v16568_v34, %s10685_s11  ;;  %3356 = vst [vmem:[#allocation2 + $0xbc] sm:$0x2] %v3355_v21  ;;  %3359 = vst [vmem:[#allocation2 + $0xc8] sm:$0x2] %v3358_v52  ;;  %v3175_v2 = vld [vmem:[#allocation2 + $0x24] sm:$0x1] }
 0x3b7   : > { %v3066_v3 = vld [vmem:[#allocation2 + $0x24] sm:$0x2]  ;;  %v3065_v29 = vld [vmem:[#allocation2 + $0x18] sm:$0x2]  ;;  %3050 = vst.msk [vmem:[#allocation2 + $0xc4] sm:$0xf] %vm3006_vm14, %v12438_v0 }
 0x3b8   : > { %3061 = vst.msk [vmem:[#allocation2 + $0xdc] sm:$0xf] %vm3006_vm14, %v12438_v0  ;;  %v3172_v10 = vld [vmem:[#allocation2 + $0x18] sm:$0x1]  ;;  %v3063_v54 = vld [vmem:[#allocation2] sm:$0x2] }
 0x3b9   : > { %v3067_v22 = vld [vmem:[#allocation2 + $0x30] sm:$0x2]  ;;  %v9123_v63 = vrot.slane %v3064_v19, 9  ;;  %v3166_v38 = vld [vmem:[#allocation2] sm:$0x1]  ;;  %5455 = vrot.lane.b32.xlu1 %v16569_v44, %s10685_s11  ;;  %v9125_v25 = vrot.slane %v3066_v3, 9 }
 0x3ba   : > { %v3069_v26 = vld [vmem:[#allocation2 + $0x48] sm:$0x2]  ;;  %5437 = vrot.lane.b32.xlu0 %v2919_v47, %s10685_s11  ;;  %v3178_v28 = vld [vmem:[#allocation2 + $0x30] sm:$0x1]  ;;  %v3184_v11 = vld [vmem:[#allocation2 + $0x48] sm:$0x1] }
 0x3bb   : > { %v3068_v61 = vld [vmem:[#allocation2 + $0x3c] sm:$0x2]  ;;  %v3170_v8 = vsel %vm12232_vm12, %v9123_v63, %v3169_v31  ;;  %v9124_v36 = vrot.slane %v3065_v29, 9  ;;  %v3070_v45 = vld [vmem:[#allocation2 + $0x54] sm:$0x2]  ;;  %v3176_v46 = vsel %vm12232_vm12, %v9125_v25, %v3175_v2  ;;  %v9122_v62 = vrot.slane %v3063_v54, 9 }
 0x3bc   : > { %3171 = vst [vmem:[#allocation2 + $0xc] sm:$0x1] %v3170_v8  ;;  %v3181_v42 = vld [vmem:[#allocation2 + $0x3c] sm:$0x1]  ;;  %v3187_v5 = vld [vmem:[#allocation2 + $0x54] sm:$0x1] }
 0x3bd   : > { %3177 = vst [vmem:[#allocation2 + $0x24] sm:$0x1] %v3176_v46  ;;  %v3173_v24 = vsel %vm12232_vm12, %v9124_v36, %v3172_v10  ;;  %v9126_v47 = vrot.slane %v3067_v22, 9  ;;  %v9128_v49 = vrot.slane %v3069_v26, 9  ;;  %v9127_v57 = vrot.slane %v3068_v61, 9  ;;  %5461 = vrot.lane.b32.xlu1 %v2939_v16, %s10685_s11 }
 0x3be   : > { %v3071_v55 = vld [vmem:[#allocation2 + $0x60] sm:$0x2]  ;;  %5393 = vrot.lane.b32.xlu0 %v12209_v40, %s10685_s11  ;;  %3174 = vst [vmem:[#allocation2 + $0x18] sm:$0x1] %v3173_v24  ;;  %v3167_v37 = vsel %vm12232_vm12, %v9122_v62, %v3166_v38  ;;  %v9129_v30 = vrot.slane %v3070_v45, 9 }
 0x3bf   : > { %v3072_v58 = vld [vmem:[#allocation2 + $0x6c] sm:$0x2]  ;;  %3168 = vst [vmem:[#allocation2] sm:$0x1] %v3167_v37  ;;  %v3179_v6 = vsel %vm12232_vm12, %v9126_v47, %v3178_v28  ;;  %v3185_v59 = vsel %vm12232_vm12, %v9128_v49, %v3184_v11  ;;  %v3190_v50 = vld [vmem:[#allocation2 + $0x60] sm:$0x1]  ;;  %v3182_v51 = vsel %vm12232_vm12, %v9127_v57, %v3181_v42 }
 0x3c0   : > { %3180 = vst [vmem:[#allocation2 + $0x30] sm:$0x1] %v3179_v6  ;;  %3186 = vst [vmem:[#allocation2 + $0x48] sm:$0x1] %v3185_v59  ;;  %v3188_v40 = vsel %vm12232_vm12, %v9129_v30, %v3187_v5  ;;  %v9130_v16 = vrot.slane %v3071_v55, 9  ;;  %v9131_v34 = vrot.slane %v3072_v58, 9 }
 0x3c1   : > { %v3193_v12 = vld [vmem:[#allocation2 + $0x6c] sm:$0x1]  ;;  %3183 = vst [vmem:[#allocation2 + $0x3c] sm:$0x1] %v3182_v51  ;;  %3189 = vst [vmem:[#allocation2 + $0x54] sm:$0x1] %v3188_v40  ;;  %5467 = vrot.lane.b32.xlu1 %v2944_v53, %s10685_s11 }
 0x3c2   : > { %v3073_v21 = vld [vmem:[#allocation2 + $0x78] sm:$0x2]  ;;  %v3074_v52 = vld [vmem:[#allocation2 + $0x84] sm:$0x2]  ;;  %5387 = vrot.lane.b32.xlu0 %v12254_v13, %s10685_s11  ;;  %v3191_v31 = vsel %vm12232_vm12, %v9130_v16, %v3190_v50  ;;  %v3075_v19 = vld [vmem:[#allocation2 + $0x90] sm:$0x2]  ;;  %v3194_v2 = vsel %vm12232_vm12, %v9131_v34, %v3193_v12 }
 0x3c3   : > { %3192 = vst [vmem:[#allocation2 + $0x60] sm:$0x1] %v3191_v31  ;;  %v3196_v3 = vld [vmem:[#allocation2 + $0x78] sm:$0x1]  ;;  %v3199_v29 = vld [vmem:[#allocation2 + $0x84] sm:$0x1] }
 0x3c4   : > { %v3076_v10 = vld [vmem:[#allocation2 + $0x9c] sm:$0x2]  ;;  %3195 = vst [vmem:[#allocation2 + $0x6c] sm:$0x1] %v3194_v2  ;;  %v9132_v54 = vrot.slane %v3073_v21, 9  ;;  %v9133_v22 = vrot.slane %v3074_v52, 9 }
 0x3c5   : > { %v3202_v63 = vld [vmem:[#allocation2 + $0x90] sm:$0x1]  ;;  %v9134_v35 = vrot.slane %v3075_v19, 9  ;;  %v3205_v53 = vld [vmem:[#allocation2 + $0x9c] sm:$0x1]  ;;  %5473 = vrot.lane.b32.xlu1 %v12287_v9, %s10685_s11  ;;  %v9135_v26 = vrot.slane %v3076_v10, 9 }
 0x3c6   : > { %5429 = vrot.lane.b32.xlu0 %v12328_v4, %s10685_s11  ;;  %v3197_v13 = vsel %vm12232_vm12, %v9132_v54, %v3196_v3  ;;  %v3200_v38 = vsel %vm12232_vm12, %v9133_v22, %v3199_v29  ;;  %v3077_v44 = vld [vmem:[#allocation2 + $0xa8] sm:$0x2]  ;;  %v3208_v25 = vld [vmem:[#allocation2 + $0xa8] sm:$0x1]  ;;  %v3078_v11 = vld [vmem:[#allocation2 + $0xb4] sm:$0x2] }
 0x3c7   : > { %3198 = vst [vmem:[#allocation2 + $0x78] sm:$0x1] %v3197_v13  ;;  %3201 = vst [vmem:[#allocation2 + $0x84] sm:$0x1] %v3200_v38  ;;  %v3203_v28 = vsel %vm12232_vm12, %v9134_v35, %v3202_v63  ;;  %v3082_v61 = vld [vmem:[#allocation2 + $0xe4] sm:$0x2]  ;;  %v3206_v4 = vsel %vm12232_vm12, %v9135_v26, %v3205_v53 }
 0x3c8   : > { %v3079_v9 = vld [vmem:[#allocation2 + $0xc0] sm:$0x2]  ;;  %3204 = vst [vmem:[#allocation2 + $0x90] sm:$0x1] %v3203_v28  ;;  %v3211_v8 = vld [vmem:[#allocation2 + $0xb4] sm:$0x1] }
 0x3c9   : > { %v3081_v36 = vld [vmem:[#allocation2 + $0xd8] sm:$0x2]  ;;  %v3214_v45 = vld [vmem:[#allocation2 + $0xc0] sm:$0x1]  ;;  %3207 = vst [vmem:[#allocation2 + $0x9c] sm:$0x1] %v3206_v4  ;;  %5399 = vrot.lane.b32.xlu1 %v12308_v1, %s10685_s11 }
 0x3ca   : > { %v9136_v46 = vrot.slane %v3077_v44, 9  ;;  %v3223_v62 = vld [vmem:[#allocation2 + $0xe4] sm:$0x1]  ;;  %v3220_v42 = vld [vmem:[#allocation2 + $0xd8] sm:$0x1]  ;;  %5435 = vrot.lane.b32.xlu0 %v12343_v27, %s10685_s11  ;;  %v9137_v5 = vrot.slane %v3078_v11, 9 }
 0x3cb   : > { %v9141_v24 = vrot.slane %v3082_v61, 9  ;;  %v9138_v47 = vrot.slane %v3079_v9, 9  ;;  %v3227_v49 = vld [vmem:[#allocation2 + $0x14] sm:$0x1]  ;;  %v9140_v55 = vrot.slane %v3081_v36, 9 }
 0x3cc   : > { %v3209_v57 = vsel %vm12232_vm12, %v9136_v46, %v3208_v25  ;;  %v3212_v37 = vsel %vm12232_vm12, %v9137_v5, %v3211_v8  ;;  %v3312_v58 = vld [vmem:[#allocation2 + $0x14] sm:$0x2]  ;;  %v3228_v27 = vld [vmem:[#allocation2 + $0x20] sm:$0x1]  ;;  %v3267_v59 = vrot.slane %v3227_v49, 7 }
 0x3cd   : > { %3210 = vst [vmem:[#allocation2 + $0xa8] sm:$0x1] %v3209_v57  ;;  %v3224_v30 = vsel %vm12232_vm12, %v9141_v24, %v3223_v62  ;;  %v3215_v1 = vsel %vm12232_vm12, %v9138_v47, %v3214_v45  ;;  %3213 = vst [vmem:[#allocation2 + $0xb4] sm:$0x1] %v3212_v37  ;;  %v3221_v6 = vsel %vm12232_vm12, %v9140_v55, %v3220_v42  ;;  %v3226_v50 = vld [vmem:[#allocation2 + $0x8] sm:$0x1]  ;;  %5405 = vrot.lane.b32.xlu1 %v12333_v17, %s10685_s11 }
 0x3ce   : > { %3225 = vst [vmem:[#allocation2 + $0xe4] sm:$0x1] %v3224_v30  ;;  %3216 = vst [vmem:[#allocation2 + $0xc0] sm:$0x1] %v3215_v1  ;;  %5441 = vrot.lane.b32.xlu0 %v12353_v48, %s10685_s11  ;;  %v3313_v51 = vsel %vm12213_vm8, %v3267_v59, %v3312_v58  ;;  %v3315_v40 = vld [vmem:[#allocation2 + $0x20] sm:$0x2] }
 0x3cf   : > { %3222 = vst [vmem:[#allocation2 + $0xd8] sm:$0x1] %v3221_v6  ;;  %v3309_v16 = vld [vmem:[#allocation2 + $0x8] sm:$0x2]  ;;  %3314 = vst [vmem:[#allocation2 + $0x14] sm:$0x2] %v3313_v51 }
 0x3d0   : > { %v3268_v12 = vrot.slane %v3228_v27, 7  ;;  %v3266_v34 = vrot.slane %v3226_v50, 7  ;;  %v3366_v21 = vld [vmem:[#allocation2 + $0xec] sm:$0x2]  ;;  %v3363_v52 = vld [vmem:[#allocation2 + $0xe0] sm:$0x2] }
 0x3d1   : > { %5411 = vrot.lane.b32.xlu1 %v12348_v33, %s10685_s11  ;;  %v12528_v33 = vld [vmem:[#allocation2 + $0x5c] ss:$0 sps:$4 sm:$0x33]   ;;  %v12534_v31 = vld [vmem:[#allocation2 + $0x68] ss:$0 sps:$4 sm:$0x33]  }
 0x3d2   : > { %5447 = vrot.lane.b32.xlu0 %v12385_v60, %s10685_s11  ;;  %v3316_v17 = vsel %vm12213_vm8, %v3268_v12, %v3315_v40  ;;  %v3310_v48 = vsel %vm12213_vm8, %v3266_v34, %v3309_v16  ;;  %16570 = vst [vmem:[#allocation9_spill] sm:$0xff] %v12528_v33  ;;  %v3245_v60 = vld [vmem:[#allocation2 + $0xec] sm:$0x1]  ;;  %16571 = vst [vmem:[#allocation10_spill] sm:$0xff] %v12534_v31  ;;  %v3858_v19 = vrot.slane %v12528_v33, 1  ;;  %v16432_v54 = vrot.slane %v12534_v31, 1 }
 0x3d3   : > { %3317 = vst [vmem:[#allocation2 + $0x20] sm:$0x2] %v3316_v17  ;;  %3311 = vst [vmem:[#allocation2 + $0x8] sm:$0x2] %v3310_v48  ;;  %v12578_v11 = vld [vmem:[#allocation2 + $0xc] sm:$0xf] }
 0x3d4   : > { %v12550_v10 = vld [vmem:[#allocation2 + $0x8c] ss:$0 sps:$4 sm:$0x33]   ;;  %v12558_v63 = vld [vmem:[#allocation2 + $0xa4] ss:$0 sps:$4 sm:$0x33]  }
 0x3d5   : > { %5417 = vrot.lane.b32.xlu1 %v12366_v7, %s10685_s11  ;;  %v3285_v7 = vrot.slane %v3245_v60, 7  ;;  %v16426_v22 = vrot.slane %v12550_v10, 1  ;;  %v12567_v53 = vld [vmem:[#allocation2 + $0x80] ss:$0 sps:$4 sm:$0x33]   ;;  %v3731_v13 = vshrl.u32 %v12558_v63, 16 }
 0x3d6   : > { %5453 = vrot.lane.b32.xlu0 %v12406_v14, %s10685_s11  ;;  %v3244_v14 = vld [vmem:[#allocation2 + $0xe0] sm:$0x1]  ;;  %16572 = vst [vmem:[#allocation11_spill] sm:$0xff] %v12567_v53  ;;  %v12572_v38 = vld [vmem:[#allocation2 + $0xc8] ss:$0 sps:$4 sm:$0x33]  }
 0x3d7   : > { %v3367_v2 = vsel %vm12213_vm8, %v3285_v7, %v3366_v21  ;;  %v3284_v3 = vrot.slane %v3244_v14, 7  ;;  %16573 = vst [vmem:[#allocation12_spill] sm:$0xff] %v12572_v38  ;;  %v12574_v26 = vld [vmem:[#allocation2 + $0x98] ss:$0 sps:$4 sm:$0x33]   ;;  %v3689_v44 = vshrl.u32 %v12567_v53, 16 }
 0x3d8   : > { %3368 = vst [vmem:[#allocation2 + $0xec] sm:$0x2] %v3367_v2  ;;  %v16425_v25 = vrot.slane %v12558_v63, 1  ;;  %16574 = vst [vmem:[#allocation13_spill] sm:$0xff] %v12578_v11  ;;  %v3375_v61 = vld [vmem:[#allocation2 + $0x24] sm:$0xf] }
 0x3d9   : > { %5423 = vrot.lane.b32.xlu1 %v12398_v41, %s10685_s11  ;;  %v3647_v41 = vshrl.u32 %v12528_v33, 16  ;;  %v12582_v9 = vld [vmem:[#allocation2 + $0x38] ss:$0 sps:$4 sm:$0x33]   ;;  %v16428_v8 = vrot.slane %v12567_v53, 1  ;;  %v3703_v36 = vshrl.u32 %v12550_v10, 16 }
 0x3da   : > { %5459 = vrot.lane.b32.xlu0 %v12420_v23, %s10685_s11  ;;  %v12538_v23 = vld [vmem:[#allocation2 + $0x74] ss:$0 sps:$4 sm:$0x33]   ;;  %v12588_v4 = vld [vmem:[#allocation2 + $0x50] ss:$0 sps:$4 sm:$0x33]  }
 0x3db   : > { %v16429_v29 = vrot.slane %v12538_v23, 1  ;;  %v3675_v35 = vshrl.u32 %v12538_v23, 16  ;;  %16575 = vst [vmem:[#allocation14_spill] sm:$0xff] %v12588_v4  ;;  %v3773_v45 = vshrl.u32 %v12572_v38, 16  ;;  %v3717_v46 = vshrl.u32 %v12574_v26, 16  ;;  %v12599_v47 = vld [vmem:[#allocation2 + $0x54] sm:$0xff]  }
 0x3dc   : > { %v16431_v62 = vrot.slane %v12574_v26, 1  ;;  %v12595_v42 = vld [vmem:[#allocation2 + $0xb0] ss:$0 sps:$4 sm:$0x33]   ;;  %v16427_v5 = vrot.slane %v12572_v38, 1  ;;  %v3605_v24 = vshrl.u32 %v12582_v9, 16 }
 0x3dd   : > { %5465 = vrot.lane.b32.xlu1 %v12411_v15, %s10685_s11  ;;  %v3364_v15 = vsel %vm12213_vm8, %v3284_v3, %v3363_v52  ;;  %16576 = vst [vmem:[#allocation15_spill] sm:$0xff] %v12595_v42  ;;  %16577 = vst [vmem:[#allocation16_spill] sm:$0xff] %v12599_v47  ;;  %v16430_v49 = vrot.slane %v12582_v9, 1  ;;  %v12602_v57 = vld [vmem:[#allocation2 + $0x60] sm:$0xff]   ;;  %v12604_v55 = vld [vmem:[#allocation2 + $0x6c] sm:$0xff]   ;;  %v3633_v37 = vshrl.u32 %v12588_v4, 16 }
 0x3de   : > { %5471 = vrot.lane.b32.xlu0 %v12438_v0, %s10685_s11  ;;  %v3661_v0 = vshrl.u32 %v12534_v31, 16  ;;  %3365 = vst [vmem:[#allocation2 + $0xe0] sm:$0x2] %v3364_v15  ;;  %16578 = vst [vmem:[#allocation17_spill] sm:$0xff] %v12602_v57  ;;  %v12611_v30 = vld [vmem:[#allocation2 + $0x78] sm:$0xff]   ;;  %v12615_v58 = vld [vmem:[#allocation2 + $0x90] sm:$0xff]  }
 0x3df   : > { %16579 = vst [vmem:[#allocation18_spill] sm:$0xff] %v12604_v55  ;;  %16580 = vst [vmem:[#allocation19_spill] sm:$0xff] %v12611_v30  ;;  %v12613_v1 = vld [vmem:[#allocation2 + $0xbc] ss:$0 sps:$4 sm:$0x33]   ;;  %v3745_v12 = vshrl.u32 %v12595_v42, 16 }
 0x3e0   : > { %16581 = vst [vmem:[#allocation20_spill] sm:$0xff] %v12613_v1  ;;  %16582 = vst [vmem:[#allocation21_spill] sm:$0xff] %v12615_v58  ;;  %v12617_v6 = vld [vmem:[#allocation2 + $0x18] sm:$0xf]  ;;  %v12619_v59 = vld [vmem:[#allocation2 + $0x9c] sm:$0xff]   ;;  %v16434_v21 = vrot.slane %v12595_v42, 1 }
 0x3e1   : > { %3801 = vrot.lane.b32.xlu1 %v3647_v41, %s10683_s7  ;;  %v5392_v28 = vpop.permute.xlu0 %5391  ;;  %16583 = vst [vmem:[#allocation22_spill] sm:$0xff] %v12617_v6  ;;  %16584 = vst [vmem:[#allocation23_spill] sm:$0xff] %v12619_v59  ;;  %v12621_v50 = vld [vmem:[#allocation2 + $0x2c] ss:$0 sps:$4 sm:$0x33]   ;;  %v16433_v7 = vrot.slane %v12588_v4, 1 }
 0x3e2   : > { %3913 = vrot.lane.b32.xlu0 %v3858_v19, %s10682_s30  ;;  %5532 = vst.msk [vmem:[#allocation2 + $0x24] sm:$0xe] %vm16448_vm10, %v5392_v28  ;;  %5577 = vst.msk [vmem:[#allocation2 + $0xc] sm:$0xe] %vm16448_vm10, %v5392_v28  ;;  %v3376_v51 = vld [vmem:[#allocation2 + $0x28] sm:$0xf] }
 0x3e3   : > { %16585 = vst [vmem:[#allocation24_spill] sm:$0xff] %v12621_v50  ;;  %v5693_v48 = vld [vmem:[#allocation2 + $0xc] sm:$0x1]  ;;  %v5699_v60 = vld [vmem:[#allocation2 + $0x24] sm:$0x1]  ;;  %v12635_v41 = vcombine.low %v3375_v61, %v3376_v51  ;;  %v3857_v28 = vrot.slane %v12599_v47, 1 }
 0x3e4   : > { %v12631_v52 = vld [vmem:[#allocation2 + $0xc0] sm:$0xff]   ;;  %v3378_v15 = vld [vmem:[#allocation2 + $0x30] sm:$0xf]  ;;  %v16598_v43 = vshrl.u32 %v12613_v1, 16  ;;  %vm6152_vm9 = vsmask.f32 7942 }
 0x3e5   : > { %3805 = vrot.lane.b32.xlu1 %v3661_v0, %s10683_s7  ;;  %16586 = vst [vmem:[#allocation25_spill] sm:$0xff] %v12631_v52  ;;  %v12633_v14 = vld [vmem:[#allocation2 + $0x44] ss:$0 sps:$4 sm:$0x33]   ;;  %16588 = vst [vmem:[#allocation27_spill] sm:$0xff] %v12635_v41 }
 0x3e6   : > { %3921 = vrot.lane.b32.xlu0 %v16429_v29, %s10682_s30  ;;  %16587 = vst [vmem:[#allocation26_spill] sm:$0xff] %v12633_v14  ;;  %v3399_v51 = vld [vmem:[#allocation2 + $0x84] sm:$0xf] }
 0x3e8   : > { %v5386_v27 = vpop.permute.xlu1 %5385 }
 0x3e9   : > { %3917 = vrot.lane.b32.xlu1 %v16432_v54, %s10682_s30  ;;  %v5591_v40 = vld [vmem:[#allocation2 + $0xc] sm:$0x2]  ;;  %v5593_v16 = vld [vmem:[#allocation2 + $0x24] sm:$0x2]  ;;  %5529 = vst.msk [vmem:[#allocation2 + $0x18] sm:$0xe] %vm16448_vm10, %v5386_v27 }
 0x3ea   : > { %3929 = vrot.lane.b32.xlu0 %v16426_v22, %s10682_s30  ;;  %v9234_v34 = vrot.slane %v5591_v40, 9  ;;  %v9236_v17 = vrot.slane %v5593_v16, 9  ;;  %v12651_v40 = vld [vmem:[#allocation2 + $0xb4] sm:$0xff]   ;;  %v5891_v22 = vld [vmem:[#allocation2 + $0xc] sm:$0x4] }
 0x3eb   : > { %16590 = vst [vmem:[#allocation29_spill] sm:$0xff] %v12651_v40  ;;  %v3382_v16 = vld [vmem:[#allocation2 + $0x40] sm:$0xf] }
 0x3ec   : > { %v5694_v2 = vsel %vm12232_vm12, %v9234_v34, %v5693_v48  ;;  %v5700_v3 = vsel %vm12232_vm12, %v9236_v17, %v5699_v60  ;;  %v3384_v48 = vld [vmem:[#allocation2 + $0x48] sm:$0xf] }
 0x3ed   : > { %3809 = vrot.lane.b32.xlu1 %v3675_v35, %s10683_s7  ;;  %5695 = vst [vmem:[#allocation2 + $0xc] sm:$0x1] %v5694_v2  ;;  %5701 = vst [vmem:[#allocation2 + $0x24] sm:$0x1] %v5700_v3  ;;  %v3400_v3 = vld [vmem:[#allocation2 + $0x88] sm:$0xf] }
 0x3ee   : > { %3825 = vrot.lane.b32.xlu0 %v3731_v13, %s10683_s7  ;;  %v5398_v13 = vpop.permute.xlu0 %5397  ;;  %v12662_v61 = vcombine.low %v3399_v51, %v3400_v3  ;;  %v16592_v2 = vmov 0  ;;  %v3652_v3 = vshll.u32 %v12602_v57, 16  ;;  %v5690_v35 = vld [vmem:[#allocation2] sm:$0x1] }
 0x3ef   : > { %5535 = vst.msk [vmem:[#allocation2 + $0x30] sm:$0xe] %vm16448_vm10, %v5398_v13  ;;  %5583 = vst.msk [vmem:[#allocation2] sm:$0xe] %vm16448_vm10, %v5398_v13  ;;  %v16593_v2 = vsel %vm12667_vm15, 4294967295, %v16592_v2 }
 0x3f0   : > { %v5592_v27 = vld [vmem:[#allocation2 + $0x18] sm:$0x2]  ;;  %16591 = vst [vmem:[#allocation30_spill] sm:$0xff] %v12662_v61  ;;  %16594 = vst [vmem:[#allocation31_spill] sm:$0xff] %v16593_v2  ;;  %v5696_v13 = vld [vmem:[#allocation2 + $0x18] sm:$0x1] }
 0x3f1   : > { %3813 = vrot.lane.b32.xlu1 %v3689_v44, %s10683_s7  ;;  %v3381_v44 = vld [vmem:[#allocation2 + $0x3c] sm:$0xf]  ;;  %v9235_v34 = vrot.slane %v5592_v27, 9 }
 0x3f2   : > { %3937 = vrot.lane.b32.xlu0 %v16425_v25, %s10682_s30  ;;  %v5404_v17 = vpop.permute.xlu0 %5403  ;;  %v12676_v51 = vcombine.low %v3381_v44, %v3382_v16 }
 0x3f3   : > { %5538 = vst.msk [vmem:[#allocation2 + $0x3c] sm:$0xe] %vm16448_vm10, %v5404_v17  ;;  %v5697_v29 = vsel %vm12232_vm12, %v9235_v34, %v5696_v13 }
 0x3f4   : > { %16596 = vst [vmem:[#allocation33_spill] sm:$0xff] %v12676_v51  ;;  %v5995_v44 = vld [vmem:[#allocation2 + $0xc] sm:$0x1]  ;;  %v6001_v16 = vld [vmem:[#allocation2 + $0x24] sm:$0x1] }
 0x3f5   : > { %3925 = vrot.lane.b32.xlu1 %v16428_v8, %s10682_s30  ;;  %v5410_v8 = vpop.permute.xlu1 %5409  ;;  %5698 = vst [vmem:[#allocation2 + $0x18] sm:$0x1] %v5697_v29  ;;  %v5702_v29 = vld [vmem:[#allocation2 + $0x30] sm:$0x1] }
 0x3f6   : > { %3837 = vrot.lane.b32.xlu0 %v3773_v45, %s10683_s7  ;;  %5541 = vst.msk [vmem:[#allocation2 + $0x48] sm:$0xe] %vm16448_vm10, %v5410_v8  ;;  %v3657_v8 = vshll.u32 %v12534_v31, 16  ;;  %v5590_v13 = vld [vmem:[#allocation2] sm:$0x2] }
 0x3f9   : > { %3817 = vrot.lane.b32.xlu1 %v3703_v36, %s10683_s7  ;;  %v12644_v36 = vld [vmem:[#allocation2 + $0xa8] sm:$0xff]   ;;  %v5416_v27 = vpop.permute.xlu1 %5415 }
 0x3fa   : > { %3949 = vrot.lane.b32.xlu0 %v16427_v5, %s10682_s30  ;;  %16589 = vst [vmem:[#allocation28_spill] sm:$0xff] %v12644_v36  ;;  %v5893_v5 = vld [vmem:[#allocation2 + $0x24] sm:$0x4]  ;;  %5544 = vst.msk [vmem:[#allocation2 + $0x54] sm:$0xe] %vm16448_vm10, %v5416_v27  ;;  %v12710_v27 = vrot.slane %v3657_v8, 1 }
 0x3fb   : > { %v9256_v60 = vrot.slane %v5893_v5, 10  ;;  %v3680_v5 = vshll.u32 %v12611_v30, 16 }
 0x3fd   : > { %3821 = vrot.lane.b32.xlu1 %v3717_v46, %s10683_s7  ;;  %v3379_v46 = vld [vmem:[#allocation2 + $0x34] sm:$0xf]  ;;  %v6002_v17 = vsel %vm12667_vm15, %v9256_v60, %v6001_v16 }
 0x3fe   : > { %3789 = vrot.lane.b32.xlu0 %v3605_v24, %s10683_s7  ;;  %v12674_v25 = vcombine.low %v3378_v15, %v3379_v46  ;;  %v9254_v24 = vrot.slane %v5891_v22, 10  ;;  %v3385_v15 = vld [vmem:[#allocation2 + $0x4c] sm:$0xf]  ;;  %v5594_v46 = vld [vmem:[#allocation2 + $0x30] sm:$0x2]  ;;  %v9233_v22 = vrot.slane %v5590_v13, 9 }
 0x3ff   : > { %v12695_v45 = vcombine.low %v3384_v48, %v3385_v15  ;;  %6003 = vst [vmem:[#allocation2 + $0x24] sm:$0x1] %v6002_v17  ;;  %v9237_v54 = vrot.slane %v5594_v46, 9  ;;  %v12708_v15 = vrot.slane %v3652_v3, 1  ;;  %v12717_v17 = vrot.slane %v3680_v5, 1  ;;  %v5428_v46 = vpop.permute.xlu1 %5427 }
 0x400   : > { %16595 = vst [vmem:[#allocation32_spill] sm:$0xff] %v12674_v25  ;;  %v5996_v34 = vsel %vm12667_vm15, %v9254_v24, %v5995_v44  ;;  %v5892_v44 = vld [vmem:[#allocation2 + $0x18] sm:$0x4]  ;;  %v5691_v16 = vsel %vm12232_vm12, %v9233_v22, %v5690_v35  ;;  %v5596_v13 = vld [vmem:[#allocation2 + $0x48] sm:$0x2] }
 0x401   : > { %3933 = vrot.lane.b32.xlu1 %v16431_v62, %s10682_s30  ;;  %16597 = vst [vmem:[#allocation34_spill] sm:$0xff] %v12695_v45  ;;  %5997 = vst [vmem:[#allocation2 + $0xc] sm:$0x1] %v5996_v34  ;;  %v5703_v34 = vsel %vm12232_vm12, %v9237_v54, %v5702_v29  ;;  %v5595_v3 = vld [vmem:[#allocation2 + $0x3c] sm:$0x2]  ;;  %v9255_v48 = vrot.slane %v5892_v44, 10 }
 0x402   : > { %3901 = vrot.lane.b32.xlu0 %v16430_v49, %s10682_s30  ;;  %v5422_v49 = vpop.permute.xlu0 %5421  ;;  %5692 = vst [vmem:[#allocation2] sm:$0x1] %v5691_v16  ;;  %5704 = vst [vmem:[#allocation2 + $0x30] sm:$0x1] %v5703_v34  ;;  %v9239_v35 = vrot.slane %v5596_v13, 9  ;;  %v9238_v24 = vrot.slane %v5595_v3, 9 }
 0x403   : > { %5547 = vst.msk [vmem:[#allocation2 + $0x60] sm:$0xe] %vm16448_vm10, %v5422_v49  ;;  %v3638_v49 = vshll.u32 %v12599_v47, 16  ;;  %v5705_v22 = vld [vmem:[#allocation2 + $0x3c] sm:$0x1]  ;;  %v12731_v44 = vld [vmem:[#allocation2 + $0xcc] sm:$0xff]   ;;  %v5440_v0 = vpop.permute.xlu1 %5439 }
 0x404   : > { %5550 = vst.msk [vmem:[#allocation2 + $0x6c] sm:$0xe] %vm16448_vm10, %v5428_v46  ;;  %v5998_v5 = vld [vmem:[#allocation2 + $0x18] sm:$0x1]  ;;  %v5890_v29 = vld [vmem:[#allocation2] sm:$0x4]  ;;  %v5706_v3 = vsel %vm12232_vm12, %v9238_v24, %v5705_v22  ;;  %v3859_v24 = vsel %vm666_vm1, %v3857_v28, %v3858_v19 }
 0x405   : > { %3829 = vrot.lane.b32.xlu1 %v3745_v12, %s10683_s7  ;;  %v3685_v12 = vshll.u32 %v12567_v53, 16  ;;  %v5894_v16 = vld [vmem:[#allocation2 + $0x30] sm:$0x4]  ;;  %v5999_v34 = vsel %vm12667_vm15, %v9255_v48, %v5998_v5  ;;  %v3420_v46 = vld [vmem:[#allocation2 + $0xd8] sm:$0xf] }
 0x406   : > { %3797 = vrot.lane.b32.xlu0 %v3633_v37, %s10683_s7  ;;  %v5708_v37 = vld [vmem:[#allocation2 + $0x48] sm:$0x1]  ;;  %v5434_v8 = vpop.permute.xlu0 %5433  ;;  %v12741_v54 = vld [vmem:[#allocation2 + $0xd4] ss:$0 sps:$4 sm:$0x33]   ;;  %v9257_v22 = vrot.slane %v5894_v16, 10 }
 0x407   : > { %5553 = vst.msk [vmem:[#allocation2 + $0x78] sm:$0xe] %vm16448_vm10, %v5434_v8  ;;  %v5709_v13 = vsel %vm12232_vm12, %v9239_v35, %v5708_v37  ;;  %v12739_v8 = vrot.slane %v3685_v12, 1  ;;  %6000 = vst [vmem:[#allocation2 + $0x18] sm:$0x1] %v5999_v34  ;;  %v12748_v37 = vrot.slane %v3638_v49, 1 }
 0x408   : > { %5710 = vst [vmem:[#allocation2 + $0x48] sm:$0x1] %v5709_v13  ;;  %5707 = vst [vmem:[#allocation2 + $0x3c] sm:$0x1] %v5706_v3  ;;  %v5711_v60 = vld [vmem:[#allocation2 + $0x54] sm:$0x1] }
 0x409   : > { %3941 = vrot.lane.b32.xlu1 %v16434_v21, %s10682_s30  ;;  %v5714_v21 = vld [vmem:[#allocation2 + $0x60] sm:$0x1]  ;;  %v3643_v12 = vshll.u32 %v12528_v33, 16  ;;  %v9253_v35 = vrot.slane %v5890_v29, 10  ;;  %5556 = vst.msk [vmem:[#allocation2 + $0x84] sm:$0xe] %vm16448_vm10, %v5440_v0 }
 0x40a   : > { %3909 = vrot.lane.b32.xlu0 %v16433_v7, %s10682_s30  ;;  %v5597_v7 = vld [vmem:[#allocation2 + $0x54] sm:$0x2]  ;;  %v5598_v62 = vld [vmem:[#allocation2 + $0x60] sm:$0x2]  ;;  %v5446_v48 = vpop.permute.xlu0 %5445  ;;  %v3421_v13 = vld [vmem:[#allocation2 + $0xdc] sm:$0xf] }
 0x40b   : > { %v9240_v5 = vrot.slane %v5597_v7, 9  ;;  %v9241_v34 = vrot.slane %v5598_v62, 9  ;;  %5559 = vst.msk [vmem:[#allocation2 + $0x90] sm:$0xe] %vm16448_vm10, %v5446_v48  ;;  %v5896_v3 = vld [vmem:[#allocation2 + $0x48] sm:$0x4] }
 0x40c   : > { %v5992_v19 = vld [vmem:[#allocation2] sm:$0x1]  ;;  %v6004_v28 = vld [vmem:[#allocation2 + $0x30] sm:$0x1]  ;;  %v5895_v49 = vld [vmem:[#allocation2 + $0x3c] sm:$0x4] }
 0x40d   : > { %3833 = vrot.lane.b32.xlu1 %v16598_v43, %s10683_s7  ;;  %v5712_v29 = vsel %vm12232_vm12, %v9240_v5, %v5711_v60  ;;  %v5715_v62 = vsel %vm12232_vm12, %v9241_v34, %v5714_v21  ;;  %v16599_v7 = vrot.slane %v12534_v31, 1  ;;  %v16600_v0 = vrot.slane %v12602_v57, 1  ;;  %v5599_v11 = vld [vmem:[#allocation2 + $0x6c] sm:$0x2]  ;;  %v5452_v5 = vpop.permute.xlu1 %5451 }
 0x40e   : > { %3911 = vrot.lane.b32.xlu0 %v3859_v24, %s10682_s30  ;;  %v5993_v43 = vsel %vm12667_vm15, %v9253_v35, %v5992_v19  ;;  %v6005_v48 = vsel %vm12667_vm15, %v9257_v22, %v6004_v28  ;;  %5713 = vst [vmem:[#allocation2 + $0x54] sm:$0x1] %v5712_v29  ;;  %5716 = vst [vmem:[#allocation2 + $0x60] sm:$0x1] %v5715_v62  ;;  %v5717_v24 = vld [vmem:[#allocation2 + $0x6c] sm:$0x1]  ;;  %v5458_v6 = vpop.permute.xlu0 %5457  ;;  %v12770_v21 = vcombine.low %v3420_v46, %v3421_v13 }
 0x40f   : > { %v3862_v16 = vsel %vm666_vm1, %v16600_v0, %v16599_v7  ;;  %v5600_v60 = vld [vmem:[#allocation2 + $0x78] sm:$0x2]  ;;  %5994 = vst [vmem:[#allocation2] sm:$0x1] %v5993_v43  ;;  %6006 = vst [vmem:[#allocation2 + $0x30] sm:$0x1] %v6005_v48 }
 0x410   : > { %16601 = vst [vmem:[#allocation35_spill] sm:$0xff] %v12770_v21  ;;  %v9242_v7 = vrot.slane %v5599_v11, 9  ;;  %v5720_v0 = vld [vmem:[#allocation2 + $0x78] sm:$0x1]  ;;  %v9243_v32 = vrot.slane %v5600_v60, 9  ;;  %v12775_v35 = vrot.slane %v3643_v12, 1 }
 0x411   : > { %5562 = vst.msk [vmem:[#allocation2 + $0x9c] sm:$0xe] %vm16448_vm10, %v5452_v5  ;;  %5565 = vst.msk [vmem:[#allocation2 + $0xa8] sm:$0xe] %vm16448_vm10, %v5458_v6  ;;  %v9259_v19 = vrot.slane %v5896_v3, 10  ;;  %v9258_v28 = vrot.slane %v5895_v49, 10 }
 0x412   : > { %v5897_v29 = vld [vmem:[#allocation2 + $0x54] sm:$0x4]  ;;  %v5898_v46 = vld [vmem:[#allocation2 + $0x60] sm:$0x4]  ;;  %v16602_v13 = vrot.slane %v12613_v1, 1  ;;  %3915 = vrot.lane.b32.xlu0 %v3862_v16, %s10682_s30  ;;  %v5718_v43 = vsel %vm12232_vm12, %v9242_v7, %v5717_v24  ;;  %v5721_v6 = vsel %vm12232_vm12, %v9243_v32, %v5720_v0  ;;  %v16603_v12 = vrot.slane %v12538_v23, 1  ;;  %v5464_v7 = vpop.permute.xlu1 %5463 }
 0x413   : > { %v6010_v11 = vld [vmem:[#allocation2 + $0x48] sm:$0x1]  ;;  %v6007_v62 = vld [vmem:[#allocation2 + $0x3c] sm:$0x1]  ;;  %v16604_v3 = vrot.slane %v12604_v55, 1 }
 0x414   : > { %3945 = vrot.lane.b32.xlu1 %v16602_v13, %s10682_s30  ;;  %v6011_v48 = vsel %vm12667_vm15, %v9259_v19, %v6010_v11  ;;  %v6008_v16 = vsel %vm12667_vm15, %v9258_v28, %v6007_v62  ;;  %5719 = vst [vmem:[#allocation2 + $0x6c] sm:$0x1] %v5718_v43  ;;  %5722 = vst [vmem:[#allocation2 + $0x78] sm:$0x1] %v5721_v6  ;;  %v5723_v60 = vld [vmem:[#allocation2 + $0x84] sm:$0x1]  ;;  %v5470_v13 = vpop.permute.xlu0 %5469 }
 0x415   : > { %v3865_v49 = vsel %vm666_vm1, %v16604_v3, %v16603_v12  ;;  %v5601_v5 = vld [vmem:[#allocation2 + $0x84] sm:$0x2]  ;;  %v5602_v24 = vld [vmem:[#allocation2 + $0x90] sm:$0x2]  ;;  %6012 = vst [vmem:[#allocation2 + $0x48] sm:$0x1] %v6011_v48 }
 0x416   : > { %6009 = vst [vmem:[#allocation2 + $0x3c] sm:$0x1] %v6008_v16  ;;  %v9244_v12 = vrot.slane %v5601_v5, 9  ;;  %v5726_v3 = vld [vmem:[#allocation2 + $0x90] sm:$0x1]  ;;  %v9245_v34 = vrot.slane %v5602_v24, 9  ;;  %3919 = vrot.lane.b32.xlu0 %v3865_v49, %s10682_s30  ;;  %v5396_v19 = vpop.permute.xlu1 %5395 }
 0x417   : > { %5568 = vst.msk [vmem:[#allocation2 + $0xb4] sm:$0xe] %vm16448_vm10, %v5464_v7  ;;  %5587 = vst.msk [vmem:[#allocation2 + $0xe4] sm:$0xe] %vm16448_vm10, %v5464_v7  ;;  %v9260_v11 = vrot.slane %v5897_v29, 10  ;;  %v9261_v62 = vrot.slane %v5898_v46, 10 }
 0x418   : > { %5571 = vst.msk [vmem:[#allocation2 + $0xc0] sm:$0xe] %vm16448_vm10, %v5470_v13  ;;  %5580 = vst.msk [vmem:[#allocation2 + $0xd8] sm:$0xe] %vm16448_vm10, %v5470_v13  ;;  %v5899_v43 = vld [vmem:[#allocation2 + $0x6c] sm:$0x4]  ;;  %v5724_v13 = vsel %vm12232_vm12, %v9244_v12, %v5723_v60  ;;  %v5727_v29 = vsel %vm12232_vm12, %v9245_v34, %v5726_v3  ;;  %v5390_v60 = vpop.permute.xlu0 %5389 }
 0x419   : > { %v5900_v6 = vld [vmem:[#allocation2 + $0x78] sm:$0x4]  ;;  %v16605_v48 = vshrl.u32 %v12621_v50, 16  ;;  %v12806_v16 = vld [vmem:[#allocation2 + $0x14] sm:$0x3]  ;;  %v16608_v12 = vrot.slane %v12567_v53, 1  ;;  %vm13070_vm10 = vmand %vm3306_vm11, %vm6152_vm9 }
 0x41a   : > { %16606 = vst [vmem:[#allocation36_spill] sm:$0xff] %v12806_v16  ;;  %v12809_v5 = vld [vmem:[#allocation2 + $0x20] sm:$0x3]  ;;  %v6013_v24 = vld [vmem:[#allocation2 + $0x54] sm:$0x1]  ;;  %v16609_v16 = vrot.slane %v12611_v30, 1 }
 0x41b   : > { %3785 = vrot.lane.b32.xlu1 %v16605_v48, %s10683_s7  ;;  %16607 = vst [vmem:[#allocation37_spill] sm:$0xff] %v12809_v5  ;;  %v6016_v7 = vld [vmem:[#allocation2 + $0x60] sm:$0x1]  ;;  %v12813_v0 = vld [vmem:[#allocation2 + $0x84] sm:$0x4]  ;;  %v6014_v46 = vsel %vm12667_vm15, %v9260_v11, %v6013_v24  ;;  %vm16788_vm11 = vcmask 130048  }
 0x41c   : > { %v6017_v48 = vsel %vm12667_vm15, %v9261_v62, %v6016_v7  ;;  %5725 = vst [vmem:[#allocation2 + $0x84] sm:$0x1] %v5724_v13  ;;  %5728 = vst [vmem:[#allocation2 + $0x90] sm:$0x1] %v5727_v29  ;;  %v12821_v49 = vld [vmem:[#allocation2 + $0x90] sm:$0x4]  ;;  %v3868_v34 = vsel %vm666_vm1, %v16609_v16, %v16608_v12  ;;  %v5414_v24 = vpop.permute.xlu0 %5413 }
 0x41d   : > { %v5729_v32 = vld [vmem:[#allocation2 + $0x9c] sm:$0x1]  ;;  %v5603_v22 = vld [vmem:[#allocation2 + $0x9c] sm:$0x2]  ;;  %v5604_v28 = vld [vmem:[#allocation2 + $0xa8] sm:$0x2]  ;;  %3923 = vrot.lane.b32.xlu0 %v3868_v34, %s10682_s30 }
 0x41e   : > { %6015 = vst [vmem:[#allocation2 + $0x54] sm:$0x1] %v6014_v46  ;;  %6018 = vst [vmem:[#allocation2 + $0x60] sm:$0x1] %v6017_v48  ;;  %v9246_v3 = vrot.slane %v5603_v22, 9  ;;  %v9247_v62 = vrot.slane %v5604_v28, 9 }
 0x41f   : > { %v5732_v11 = vld [vmem:[#allocation2 + $0xa8] sm:$0x1]  ;;  %5534 = vst.msk [vmem:[#allocation2 + $0x2c] sm:$0x1] %vm3008_vm13, %v5396_v19  ;;  %5579 = vst.msk [vmem:[#allocation2 + $0x14] sm:$0x1] %vm3008_vm13, %v5396_v19 }
 0x420   : > { %5531 = vst.msk [vmem:[#allocation2 + $0x20] sm:$0x1] %vm3008_vm13, %v5390_v60  ;;  %v9262_v13 = vrot.slane %v5899_v43, 10  ;;  %v9263_v29 = vrot.slane %v5900_v6, 10  ;;  %v5747_v5 = vld [vmem:[#allocation2 + $0xe4] sm:$0x1]  ;;  %v5730_v48 = vsel %vm12232_vm12, %v9246_v3, %v5729_v32  ;;  %v5733_v43 = vsel %vm12232_vm12, %v9247_v62, %v5732_v11  ;;  %vm16789_vm9 = vmmov %vm16788_vm11 }
 0x421   : > { %v16610_v16 = vrot.slane %v12621_v50, 1  ;;  %v6019_v22 = vld [vmem:[#allocation2 + $0x6c] sm:$0x1]  ;;  %v6022_v28 = vld [vmem:[#allocation2 + $0x78] sm:$0x1]  ;;  %v9264_v46 = vrot.slane %v12813_v0, 10 }
 0x422   : > { %v9265_v19 = vrot.slane %v12821_v49, 10  ;;  %v6020_v6 = vsel %vm12667_vm15, %v9262_v13, %v6019_v22  ;;  %v6023_v60 = vsel %vm12667_vm15, %v9263_v29, %v6022_v28  ;;  %5731 = vst [vmem:[#allocation2 + $0x9c] sm:$0x1] %v5730_v48  ;;  %v12847_v12 = vld [vmem:[#allocation2 + $0x9c] sm:$0x4]  ;;  %v5402_v49 = vpop.permute.xlu1 %5401  ;;  %v16611_v13 = vrot.slane %v12574_v26, 1 }
 0x423   : > { %3897 = vrot.lane.b32.xlu1 %v16610_v16, %s10682_s30  ;;  %5734 = vst [vmem:[#allocation2 + $0xa8] sm:$0x1] %v5733_v43  ;;  %v5735_v34 = vld [vmem:[#allocation2 + $0xb4] sm:$0x1]  ;;  %v5605_v0 = vld [vmem:[#allocation2 + $0xb4] sm:$0x2] }
 0x424   : > { %v5609_v16 = vld [vmem:[#allocation2 + $0xe4] sm:$0x2]  ;;  %6021 = vst [vmem:[#allocation2 + $0x6c] sm:$0x1] %v6020_v6  ;;  %6024 = vst [vmem:[#allocation2 + $0x78] sm:$0x1] %v6023_v60 }
 0x425   : > { %v5904_v32 = vld [vmem:[#allocation2 + $0xa8] sm:$0x4]  ;;  %v9248_v3 = vrot.slane %v5605_v0, 9  ;;  %v9252_v11 = vrot.slane %v5609_v16, 9  ;;  %v12849_v62 = vld [vmem:[#allocation2 + $0xb4] sm:$0x4] }
 0x426   : > { %5537 = vst.msk [vmem:[#allocation2 + $0x38] sm:$0x1] %vm3008_vm13, %v5402_v49  ;;  %5585 = vst.msk [vmem:[#allocation2 + $0x8] sm:$0x1] %vm3008_vm13, %v5402_v49  ;;  %v16612_v29 = vrot.slane %v12615_v58, 1  ;;  %v16613_v0 = vshrl.u32 %v12633_v14, 16 }
 0x427   : > { %5543 = vst.msk [vmem:[#allocation2 + $0x50] sm:$0x1] %vm3008_vm13, %v5414_v24  ;;  %v12859_v28 = vld [vmem:[#allocation2 + $0xe4] sm:$0x4]  ;;  %v5738_v48 = vld [vmem:[#allocation2 + $0xc0] sm:$0x1]  ;;  %v5748_v56 = vsel %vm12232_vm12, %v9252_v11, %v5747_v5 }
 0x428   : > { %v3874_v22 = vsel %vm666_vm1, %v16612_v29, %v16611_v13  ;;  %v5744_v43 = vld [vmem:[#allocation2 + $0xd8] sm:$0x1]  ;;  %v5606_v6 = vld [vmem:[#allocation2 + $0xc0] sm:$0x2]  ;;  %v5608_v60 = vld [vmem:[#allocation2 + $0xd8] sm:$0x2]  ;;  %3793 = vrot.lane.b32.xlu1 %v16613_v0, %s10683_s7  ;;  %v5736_v29 = vsel %vm12232_vm12, %v9248_v3, %v5735_v34  ;;  %v5408_v34 = vpop.permute.xlu1 %5407  ;;  %v5420_v3 = vpop.permute.xlu0 %5419 }
 0x429   : > { %3931 = vrot.lane.b32.xlu0 %v3874_v22, %s10682_s30  ;;  %v16614_v24 = vrot.slane %v12572_v38, 1  ;;  %v16615_v16 = vrot.slane %v12631_v52, 1  ;;  %v6025_v7 = vld [vmem:[#allocation2 + $0x84] sm:$0x1]  ;;  %v6028_v13 = vld [vmem:[#allocation2 + $0x90] sm:$0x1] }
 0x42a   : > { %v9249_v39 = vrot.slane %v5606_v6, 9  ;;  %v9251_v53 = vrot.slane %v5608_v60, 9  ;;  %v6026_v0 = vsel %vm12667_vm15, %v9264_v46, %v6025_v7  ;;  %v6029_v22 = vsel %vm12667_vm15, %v9265_v19, %v6028_v13  ;;  %5737 = vst [vmem:[#allocation2 + $0xb4] sm:$0x1] %v5736_v29  ;;  %5749 = vst [vmem:[#allocation2 + $0xe4] sm:$0x1] %v5748_v56 }
 0x42b   : > { %v3886_v49 = vsel %vm666_vm1, %v16615_v16, %v16614_v24  ;;  %v9266_v31 = vrot.slane %v12847_v12, 10  ;;  %v9267_v33 = vrot.slane %v5904_v32, 10  ;;  %v12879_v24 = vld [vmem:[#allocation2 + $0xc0] sm:$0x4]  ;;  %v5751_v16 = vld [vmem:[#allocation2 + $0x14] sm:$0x1] }
 0x42c   : > { %6027 = vst [vmem:[#allocation2 + $0x84] sm:$0x1] %v6026_v0  ;;  %6030 = vst [vmem:[#allocation2 + $0x90] sm:$0x1] %v6029_v22  ;;  %v9268_v5 = vrot.slane %v12849_v62, 10  ;;  %v9272_v11 = vrot.slane %v12859_v28, 10  ;;  %v5739_v7 = vsel %vm12232_vm12, %v9249_v39, %v5738_v48  ;;  %v5745_v46 = vsel %vm12232_vm12, %v9251_v53, %v5744_v43  ;;  %v5444_v38 = vpop.permute.xlu1 %5443  ;;  %v5426_v52 = vpop.permute.xlu0 %5425 }
 0x42d   : > { %v5833_v19 = vld [vmem:[#allocation2 + $0x14] sm:$0x2]  ;;  %v5839_v12 = vld [vmem:[#allocation2 + $0x2c] sm:$0x2]  ;;  %v5753_v56 = vld [vmem:[#allocation2 + $0x2c] sm:$0x1]  ;;  %3947 = vrot.lane.b32.xlu0 %v3886_v49, %s10682_s30 }
 0x42e   : > { %v5752_v32 = vld [vmem:[#allocation2 + $0x20] sm:$0x1]  ;;  %5540 = vst.msk [vmem:[#allocation2 + $0x44] sm:$0x1] %vm3008_vm13, %v5408_v34  ;;  %5546 = vst.msk [vmem:[#allocation2 + $0x5c] sm:$0x1] %vm3008_vm13, %v5420_v3 }
 0x42f   : > { %5740 = vst [vmem:[#allocation2 + $0xc0] sm:$0x1] %v5739_v7  ;;  %5746 = vst [vmem:[#allocation2 + $0xd8] sm:$0x1] %v5745_v46  ;;  %v12889_v6 = vld [vmem:[#allocation2 + $0xd8] sm:$0x4] }
 0x430   : > { %v5791_v28 = vrot.slane %v5751_v16, 7  ;;  %v5793_v60 = vrot.slane %v5753_v56, 7  ;;  %v5792_v39 = vrot.slane %v5752_v32, 7  ;;  %v5836_v48 = vld [vmem:[#allocation2 + $0x20] sm:$0x2]  ;;  %v16616_v53 = vrot.slane %v12633_v14, 1 }
 0x431   : > { %v5830_v13 = vld [vmem:[#allocation2 + $0x8] sm:$0x2]  ;;  %v6031_v43 = vld [vmem:[#allocation2 + $0x9c] sm:$0x1]  ;;  %v6034_v29 = vld [vmem:[#allocation2 + $0xa8] sm:$0x1] }
 0x432   : > { %3905 = vrot.lane.b32.xlu1 %v16616_v53, %s10682_s30  ;;  %v16617_v0 = vrot.slane %v12550_v10, 1  ;;  %v16618_v22 = vrot.slane %v12662_v61, 1  ;;  %v16619_v16 = vrot.slane %v12621_v50, 1  ;;  %v16620_v3 = vrot.slane %v12635_v41, 1  ;;  %v5842_v53 = vld [vmem:[#allocation2 + $0x38] sm:$0x2] }
 0x433   : > { %v6032_v46 = vsel %vm12667_vm15, %v9266_v31, %v6031_v43  ;;  %v6035_v49 = vsel %vm12667_vm15, %v9267_v33, %v6034_v29  ;;  %v5834_v56 = vsel %vm12213_vm8, %v5791_v28, %v5833_v19  ;;  %v5840_v32 = vsel %vm12213_vm8, %v5793_v60, %v5839_v12  ;;  %v5848_v62 = vld [vmem:[#allocation2 + $0x50] sm:$0x2]  ;;  %v5756_v18 = vld [vmem:[#allocation2 + $0x50] sm:$0x1]  ;;  %5558 = vst.msk [vmem:[#allocation2 + $0x8c] sm:$0x1] %vm3008_vm13, %v5444_v38 }
 0x434   : > { %v3871_v34 = vsel %vm666_vm1, %v16618_v22, %v16617_v0  ;;  %v3847_v7 = vsel %vm666_vm1, %v16620_v3, %v16619_v16  ;;  %v5750_v0 = vld [vmem:[#allocation2 + $0x8] sm:$0x1]  ;;  %v5754_v22 = vld [vmem:[#allocation2 + $0x38] sm:$0x1]  ;;  %6033 = vst [vmem:[#allocation2 + $0x9c] sm:$0x1] %v6032_v46  ;;  %v5837_v33 = vsel %vm12213_vm8, %v5792_v39, %v5836_v48  ;;  %v5450_v16 = vpop.permute.xlu1 %5449 }
 0x435   : > { %6036 = vst [vmem:[#allocation2 + $0xa8] sm:$0x1] %v6035_v49  ;;  %5835 = vst [vmem:[#allocation2 + $0x14] sm:$0x2] %v5834_v56  ;;  %v5790_v31 = vrot.slane %v5750_v0, 7  ;;  %v5794_v43 = vrot.slane %v5754_v22, 7  ;;  %3895 = vrot.lane.b32.xlu0 %v3847_v7, %s10682_s30 }
 0x436   : > { %5841 = vst [vmem:[#allocation2 + $0x2c] sm:$0x2] %v5840_v32  ;;  %v5796_v19 = vrot.slane %v5756_v18, 7  ;;  %5549 = vst.msk [vmem:[#allocation2 + $0x68] sm:$0x1] %vm3008_vm13, %v5426_v52  ;;  %3927 = vrot.lane.b32.xlu1 %v3871_v34, %s10682_s30  ;;  %v9271_v60 = vrot.slane %v12889_v6, 10 }
 0x437   : > { %5838 = vst [vmem:[#allocation2 + $0x20] sm:$0x2] %v5837_v33  ;;  %v6037_v12 = vld [vmem:[#allocation2 + $0xb4] sm:$0x1]  ;;  %v6049_v28 = vld [vmem:[#allocation2 + $0xe4] sm:$0x1]  ;;  %v5831_v29 = vsel %vm12213_vm8, %v5790_v31, %v5830_v13  ;;  %v5843_v39 = vsel %vm12213_vm8, %v5794_v43, %v5842_v53  ;;  %v5432_v13 = vpop.permute.xlu0 %5431 }
 0x438   : > { %v5849_v18 = vsel %vm12213_vm8, %v5796_v19, %v5848_v62  ;;  %v6038_v38 = vsel %vm12667_vm15, %v9268_v5, %v6037_v12  ;;  %v6050_v52 = vsel %vm12667_vm15, %v9272_v11, %v6049_v28  ;;  %5832 = vst [vmem:[#allocation2 + $0x8] sm:$0x2] %v5831_v29  ;;  %5844 = vst [vmem:[#allocation2 + $0x38] sm:$0x2] %v5843_v39  ;;  %v5845_v48 = vld [vmem:[#allocation2 + $0x44] sm:$0x2] }
 0x439   : > { %5850 = vst [vmem:[#allocation2 + $0x50] sm:$0x2] %v5849_v18  ;;  %v5755_v6 = vld [vmem:[#allocation2 + $0x44] sm:$0x1]  ;;  %v5757_v34 = vld [vmem:[#allocation2 + $0x5c] sm:$0x1] }
 0x43a   : > { %6039 = vst [vmem:[#allocation2 + $0xb4] sm:$0x1] %v6038_v38  ;;  %6051 = vst [vmem:[#allocation2 + $0xe4] sm:$0x1] %v6050_v52  ;;  %v6040_v3 = vld [vmem:[#allocation2 + $0xc0] sm:$0x1] }
 0x43b   : > { %v6046_v7 = vld [vmem:[#allocation2 + $0xd8] sm:$0x1]  ;;  %v5795_v46 = vrot.slane %v5755_v6, 7  ;;  %v5797_v62 = vrot.slane %v5757_v34, 7  ;;  %5561 = vst.msk [vmem:[#allocation2 + $0x98] sm:$0x1] %vm3008_vm13, %v5450_v16  ;;  %v5456_v34 = vpop.permute.xlu1 %5455 }
 0x43c   : > { %v16621_v5 = vrot.slane %v12558_v63, 1  ;;  %v16622_v11 = vrot.slane %v12619_v59, 1  ;;  %5552 = vst.msk [vmem:[#allocation2 + $0x74] sm:$0x1] %vm3008_vm13, %v5432_v13  ;;  %v16623_v56 = vrot.slane %v12582_v9, 1  ;;  %v16624_v32 = vrot.slane %v12674_v25, 1 }
 0x43d   : > { %v16625_v0 = vrot.slane %v12879_v24, 10  ;;  %v6047_v33 = vsel %vm12667_vm15, %v9271_v60, %v6046_v7  ;;  %v5851_v31 = vld [vmem:[#allocation2 + $0x5c] sm:$0x2]  ;;  %v16626_v43 = vshll.u32 %v12619_v59, 16  ;;  %v3671_v12 = vshll.u32 %v12538_v23, 16 }
 0x43e   : > { %v3877_v49 = vsel %vm666_vm1, %v16622_v11, %v16621_v5  ;;  %v3850_v53 = vsel %vm666_vm1, %v16624_v32, %v16623_v56  ;;  %6048 = vst [vmem:[#allocation2 + $0xd8] sm:$0x1] %v6047_v33  ;;  %v5846_v24 = vsel %vm12213_vm8, %v5795_v46, %v5845_v48  ;;  %v5852_v28 = vsel %vm12213_vm8, %v5797_v62, %v5851_v31  ;;  %v5863_v18 = vld [vmem:[#allocation2 + $0x8c] sm:$0x2]  ;;  %v5761_v38 = vld [vmem:[#allocation2 + $0x8c] sm:$0x1] }
 0x43f   : > { %v6041_v22 = vsel %vm12667_vm15, %v16625_v0, %v6040_v3  ;;  %3935 = vrot.lane.b32.xlu1 %v3877_v49, %s10682_s30  ;;  %3899 = vrot.lane.b32.xlu0 %v3850_v53, %s10682_s30  ;;  %v12953_v19 = vrot.slane %v16626_v43, 1  ;;  %v16627_v60 = vshll.u32 %v12558_v63, 16  ;;  %v3694_v39 = vshll.u32 %v12662_v61, 16  ;;  %5847 = vst [vmem:[#allocation2 + $0x44] sm:$0x2] %v5846_v24  ;;  %v5438_v3 = vpop.permute.xlu0 %5437 }
 0x440   : > { %6042 = vst [vmem:[#allocation2 + $0xc0] sm:$0x1] %v6041_v22  ;;  %5853 = vst [vmem:[#allocation2 + $0x5c] sm:$0x2] %v5852_v28  ;;  %v5854_v52 = vld [vmem:[#allocation2 + $0x68] sm:$0x2] }
 0x441   : > { %v12962_v29 = vrot.slane %v16627_v60, 1  ;;  %v5758_v6 = vld [vmem:[#allocation2 + $0x68] sm:$0x1]  ;;  %v16628_v16 = vrot.slane %v12595_v42, 1  ;;  %v16629_v48 = vrot.slane %v12644_v36, 1  ;;  %v16630_v7 = vrot.slane %v12633_v14, 1 }
 0x442   : > { %v16631_v46 = vrot.slane %v12676_v51, 1  ;;  %v16632_v5 = vshll.u32 %v12604_v55, 16  ;;  %v5801_v56 = vrot.slane %v5761_v38, 7  ;;  %v5798_v32 = vrot.slane %v5758_v6, 7  ;;  %5564 = vst.msk [vmem:[#allocation2 + $0xa4] sm:$0x1] %vm3008_vm13, %v5456_v34 }
 0x443   : > { %v3880_v13 = vsel %vm666_vm1, %v16629_v48, %v16628_v16  ;;  %5555 = vst.msk [vmem:[#allocation2 + $0x80] sm:$0x1] %vm3008_vm13, %v5438_v3  ;;  %v3422_v53 = vld [vmem:[#allocation2 + $0xe0] sm:$0x3]  ;;  %v3699_v0 = vshll.u32 %v12550_v10, 16  ;;  %v3582_v22 = vshll.u32 %v12635_v41, 16 }
 0x444   : > { %v3853_v62 = vsel %vm666_vm1, %v16631_v46, %v16630_v7  ;;  %v12977_v11 = vrot.slane %v16632_v5, 1  ;;  %3939 = vrot.lane.b32.xlu1 %v3880_v13, %s10682_s30  ;;  %v16633_v33 = vshrl.u32 %v12602_v57, 16  ;;  %v12989_v43 = vrot.slane %v3671_v12, 1  ;;  %v12996_v38 = vld [vmem:[#allocation2 + $0x10] sm:$0xf]  ;;  %v5462_v13 = vpop.permute.xlu1 %5461 }
 0x445   : > { %3903 = vrot.lane.b32.xlu0 %v3853_v62, %s10682_s30  ;;  %v5864_v28 = vsel %vm12213_vm8, %v5801_v56, %v5863_v18  ;;  %v5855_v60 = vsel %vm12213_vm8, %v5798_v32, %v5854_v52  ;;  %16634 = vst [vmem:[#allocation38_spill] sm:$0xff] %v12996_v38  ;;  %v12998_v6 = vrot.slane %v3694_v39, 1  ;;  %v3587_v34 = vshll.u32 %v12621_v50, 16  ;;  %v5866_v16 = vld [vmem:[#allocation2 + $0x98] sm:$0x2]  ;;  %v5394_v52 = vpop.permute.xlu0 %5393 }
 0x446   : > { %v3655_v31 = vor.u32 %v12708_v15, %v16633_v33  ;;  %5865 = vst [vmem:[#allocation2 + $0x8c] sm:$0x2] %v5864_v28  ;;  %5856 = vst [vmem:[#allocation2 + $0x68] sm:$0x2] %v5855_v60  ;;  %v5762_v15 = vld [vmem:[#allocation2 + $0x98] sm:$0x1]  ;;  %v13014_v32 = vcombine.low %v3422_v53, %v3422_v53 }
 0x447   : > { %v5857_v12 = vld [vmem:[#allocation2 + $0x74] sm:$0x2]  ;;  %v5759_v48 = vld [vmem:[#allocation2 + $0x74] sm:$0x1]  ;;  %v16635_v3 = vrot.slane %v12613_v1, 1  ;;  %v16636_v18 = vrot.slane %v12651_v40, 1 }
 0x448   : > { %v16637_v46 = vrot.slane %v12588_v4, 1  ;;  %v16638_v39 = vrot.slane %v12695_v45, 1  ;;  %v16639_v5 = vshrl.u32 %v12599_v47, 16  ;;  %16640 = vst [vmem:[#allocation39_spill] sm:$0xff] %v13014_v32  ;;  %v5802_v33 = vrot.slane %v5762_v15, 7 }
 0x449   : > { %v3883_v7 = vsel %vm666_vm1, %v16636_v18, %v16635_v3  ;;  %v5799_v28 = vrot.slane %v5759_v48, 7  ;;  %5567 = vst.msk [vmem:[#allocation2 + $0xb0] sm:$0x1] %vm3008_vm13, %v5462_v13  ;;  %v13019_v60 = vrot.slane %v3699_v0, 1  ;;  %v13021_v3 = vrot.slane %v3582_v22, 1 }
 0x44a   : > { %v3856_v62 = vsel %vm666_vm1, %v16638_v39, %v16637_v46  ;;  %v3641_v56 = vor.u32 %v12748_v37, %v16639_v5  ;;  %5533 = vst.msk [vmem:[#allocation2 + $0x28] sm:$0xf] %vm3006_vm14, %v5394_v52  ;;  %5578 = vst.msk [vmem:[#allocation2 + $0x10] sm:$0xf] %vm3006_vm14, %v5394_v52  ;;  %3943 = vrot.lane.b32.xlu1 %v3883_v7, %s10682_s30  ;;  %v3660_v18 = vsel %vm441_vm2, %v3655_v31, %v12710_v27  ;;  %v13033_v48 = vld [vmem:[#allocation2 + $0x1c] sm:$0xf]  ;;  %v5468_v52 = vpop.permute.xlu1 %5467  ;;  %v5388_v46 = vpop.permute.xlu0 %5387 }
 0x44b   : > { %3907 = vrot.lane.b32.xlu0 %v3856_v62, %s10682_s30  ;;  %v3708_v37 = vshll.u32 %v12615_v58, 16  ;;  %v3713_v53 = vshll.u32 %v12574_v26, 16  ;;  %v5867_v15 = vsel %vm12213_vm8, %v5802_v33, %v5866_v16  ;;  %v5858_v0 = vsel %vm12213_vm8, %v5799_v28, %v5857_v12  ;;  %16641 = vst [vmem:[#allocation40_spill] sm:$0xff] %v13033_v48  ;;  %v10605_v27 = vld [vmem:[%s16410_s4] sm:$0x3f]  }
 0x44c   : > { %v13035_v22 = vrot.slane %v3587_v34, 1  ;;  %v3596_v13 = vshll.u32 %v12674_v25, 16  ;;  %5868 = vst [vmem:[#allocation2 + $0x98] sm:$0x2] %v5867_v15  ;;  %5859 = vst [vmem:[#allocation2 + $0x74] sm:$0x2] %v5858_v0  ;;  %v3646_v34 = vsel %vm441_vm2, %v3641_v56, %v12775_v35  ;;  %10492 = vmatprep.subr.msk.bf16.mxu1 %vm16508_vm0, %v10605_v27 }
 0x44d   : > { %v5763_v31 = vld [vmem:[#allocation2 + $0xa4] sm:$0x1]  ;;  %v5760_v7 = vld [vmem:[#allocation2 + $0x80] sm:$0x1]  ;;  %v16642_v16 = vshrl.u32 %v12611_v30, 16  ;;  %v16449_v39 = vrot.slane %v13014_v32, 1 }
 0x44e   : > { %v5869_v5 = vld [vmem:[#allocation2 + $0xa4] sm:$0x2]  ;;  %v5803_v33 = vrot.slane %v5763_v31, 7  ;;  %v5800_v28 = vrot.slane %v5760_v7, 7  ;;  %5570 = vst.msk [vmem:[#allocation2 + $0xbc] sm:$0x1] %vm3008_vm13, %v5468_v52  ;;  %3803 = vrot.lane.b32.xlu1 %v3660_v18, %s10683_s7 }
 0x44f   : > { %v3683_v12 = vor.u32 %v12717_v17, %v16642_v16  ;;  %5589 = vst.msk [vmem:[#allocation2 + $0xec] sm:$0x1] %vm3008_vm13, %v5468_v52  ;;  %v13054_v17 = vsel %vm16508_vm0, %v10605_v27, 0  ;;  %v5860_v35 = vld [vmem:[#allocation2 + $0x80] sm:$0x2]  ;;  %3799 = vrot.lane.b32.xlu0 %v3646_v34, %s10683_s7  ;;  %v13058_v56 = vrot.slane %v3708_v37, 1 }
 0x450   : > { %5530 = vst.msk [vmem:[#allocation2 + $0x1c] sm:$0xf] %vm3006_vm14, %v5388_v46  ;;  %16643 = vst [vmem:[#allocation41_spill] sm:$0xff] %v13054_v17  ;;  %v13060_v0 = vrot.slane %v3713_v53, 1  ;;  %v3601_v7 = vshll.u32 %v12582_v9, 16  ;;  %v5870_v52 = vsel %vm12213_vm8, %v5803_v33, %v5869_v5  ;;  %v5861_v27 = vsel %vm12213_vm8, %v5800_v28, %v5860_v35  ;;  %10164 = vmatpush3.bf16.msra.mxu1 %v13054_v17  ;;  %v5474_v33 = vpop.permute.xlu1 %5473  ;;  %v5430_v35 = vpop.permute.xlu0 %5429 }
 0x451   : > { %v16644_v18 = vmov 0  ;;  %v13074_v37 = vrot.slane %v3596_v13, 1  ;;  %5871 = vst [vmem:[#allocation2 + $0xa4] sm:$0x2] %v5870_v52  ;;  %5862 = vst [vmem:[#allocation2 + $0x80] sm:$0x2] %v5861_v27  ;;  %v3688_v28 = vsel %vm441_vm2, %v3683_v12, %v12739_v8 }
 0x452   : > { %v16645_v18 = vsel %vm13070_vm10, 4294967295, %v16644_v18  ;;  %v5872_v46 = vld [vmem:[#allocation2 + $0xb0] sm:$0x2]  ;;  %v5764_v16 = vld [vmem:[#allocation2 + $0xb0] sm:$0x1]  ;;  %v16647_v31 = vrot.slane %v12741_v54, 1  ;;  %3811 = vrot.lane.b32.xlu1 %v3688_v28, %s10683_s7 }
 0x453   : > { %16646 = vst [vmem:[#allocation42_spill] sm:$0xff] %v16645_v18  ;;  %v6053_v34 = vld [vmem:[#allocation2 + $0x10] sm:$0x8]  ;;  %v6055_v5 = vld [vmem:[#allocation2 + $0x28] sm:$0x8]  ;;  %v16648_v13 = vrot.slane %v12731_v44, 1 }
 0x454   : > { %v16649_v53 = vshrl.u32 %v12604_v55, 16  ;;  %v5804_v27 = vrot.slane %v5764_v16, 7  ;;  %v9274_v24 = vrot.slane %v6053_v34, 10  ;;  %v9276_v62 = vrot.slane %v6055_v5, 10  ;;  %5573 = vst.msk [vmem:[#allocation2 + $0xc8] sm:$0x1] %vm3008_vm13, %v5474_v33 }
 0x455   : > { %v4269_v15 = vsel %vm666_vm1, %v16648_v13, %v16647_v31  ;;  %5582 = vst.msk [vmem:[#allocation2 + $0xe0] sm:$0x1] %vm3008_vm13, %v5474_v33  ;;  %v3608_v8 = vshrl.u32 %v12676_v51, 16  ;;  %v6157_v12 = vld [vmem:[#allocation2 + $0x14] sm:$0x2]  ;;  %v3610_v16 = vshll.u32 %v12676_v51, 16 }
 0x456   : > { %v3669_v52 = vor.u32 %v12977_v11, %v16649_v53  ;;  %5551 = vst.msk [vmem:[#allocation2 + $0x70] sm:$0xf] %vm3006_vm14, %v5430_v35  ;;  %v6163_v49 = vld [vmem:[#allocation2 + $0x2c] sm:$0x2]  ;;  %4270 = vrot.lane.b32.xlu0 %v4269_v15, %s10682_s30  ;;  %v5873_v44 = vsel %vm12213_vm8, %v5804_v27, %v5872_v46  ;;  %v6158_v11 = vsel %vm13070_vm10, %v9274_v24, %v6157_v12  ;;  %v5875_v34 = vld [vmem:[#allocation2 + $0xbc] sm:$0x2]  ;;  %v5400_v15 = vpop.permute.xlu1 %5399  ;;  %v5436_v35 = vpop.permute.xlu0 %5435 }
 0x457   : > { %v6164_v31 = vsel %vm13070_vm10, %v9276_v62, %v6163_v49  ;;  %v5887_v53 = vld [vmem:[#allocation2 + $0xec] sm:$0x2]  ;;  %5874 = vst [vmem:[#allocation2 + $0xb0] sm:$0x2] %v5873_v44  ;;  %6159 = vst [vmem:[#allocation2 + $0x14] sm:$0x2] %v6158_v11 }
 0x458   : > { %6165 = vst [vmem:[#allocation2 + $0x2c] sm:$0x2] %v6164_v31  ;;  %v5765_v5 = vld [vmem:[#allocation2 + $0xbc] sm:$0x1]  ;;  %v5769_v33 = vld [vmem:[#allocation2 + $0xec] sm:$0x1]  ;;  %v3674_v13 = vsel %vm441_vm2, %v3669_v52, %v12989_v43 }
 0x459   : > { %v6054_v28 = vld [vmem:[#allocation2 + $0x1c] sm:$0x8]  ;;  %v16650_v46 = vrot.slane %v12770_v21, 1  ;;  %v16651_v49 = vshrl.u32 %v12619_v59, 16  ;;  %v16652_v27 = vshrl.u32 %v12662_v61, 16  ;;  %v5805_v44 = vrot.slane %v5765_v5, 7 }
 0x45a   : > { %v5809_v11 = vrot.slane %v5769_v33, 7  ;;  %v9275_v31 = vrot.slane %v6054_v28, 10  ;;  %5536 = vst.msk [vmem:[#allocation2 + $0x34] sm:$0xf] %vm3006_vm14, %v5400_v15  ;;  %5584 = vst.msk [vmem:[#allocation2 + $0x4] sm:$0xf] %vm3006_vm14, %v5400_v15  ;;  %3807 = vrot.lane.b32.xlu0 %v3674_v13, %s10683_s7 }
 0x45b   : > { %v4713_v24 = vsel %vm666_vm1, %v16650_v46, %v16449_v39  ;;  %v3725_v62 = vor.u32 %v12953_v19, %v16651_v49  ;;  %v3697_v12 = vor.u32 %v12998_v6, %v16652_v27  ;;  %5554 = vst.msk [vmem:[#allocation2 + $0x7c] sm:$0xf] %vm3006_vm14, %v5436_v35  ;;  %v3615_v46 = vshll.u32 %v12633_v14, 16  ;;  %v6160_v39 = vld [vmem:[#allocation2 + $0x20] sm:$0x2]  ;;  %v5406_v27 = vpop.permute.xlu1 %5405 }
 0x45c   : > { %4714 = vrot.lane.b32.xlu1 %v4713_v24, %s10682_s30  ;;  %v13120_v19 = vrot.slane %v3601_v7, 1  ;;  %v3734_v43 = vshrl.u32 %v12644_v36, 16  ;;  %v3736_v6 = vshll.u32 %v12644_v36, 16  ;;  %v3741_v52 = vshll.u32 %v12595_v42, 16  ;;  %v5878_v7 = vld [vmem:[#allocation2 + $0xc8] sm:$0x2] }
 0x45d   : > { %v5876_v5 = vsel %vm12213_vm8, %v5805_v44, %v5875_v34  ;;  %v5888_v33 = vsel %vm12213_vm8, %v5809_v11, %v5887_v53  ;;  %v6161_v28 = vsel %vm13070_vm10, %v9275_v31, %v6160_v39  ;;  %v13131_v15 = vrot.slane %v3610_v16, 1  ;;  %v5884_v24 = vld [vmem:[#allocation2 + $0xe0] sm:$0x2]  ;;  %v5766_v35 = vld [vmem:[#allocation2 + $0xc8] sm:$0x1]  ;;  %v5442_v44 = vpop.permute.xlu0 %5441 }
 0x45e   : > { %5877 = vst [vmem:[#allocation2 + $0xbc] sm:$0x2] %v5876_v5  ;;  %5889 = vst [vmem:[#allocation2 + $0xec] sm:$0x2] %v5888_v33  ;;  %v5768_v49 = vld [vmem:[#allocation2 + $0xe0] sm:$0x1]  ;;  %v3730_v34 = vsel %vm441_vm2, %v3725_v62, %v12962_v29  ;;  %v3702_v53 = vsel %vm441_vm2, %v3697_v12, %v13019_v60 }
 0x45f   : > { %6162 = vst [vmem:[#allocation2 + $0x20] sm:$0x2] %v6161_v28  ;;  %v6061_v13 = vld [vmem:[#allocation2 + $0x70] sm:$0x8]  ;;  %v16653_v39 = vshrl.u32 %v12615_v58, 16  ;;  %v5806_v11 = vrot.slane %v5766_v35, 7  ;;  %3815 = vrot.lane.b32.xlu0 %v3702_v53, %s10683_s7 }
 0x460   : > { %v5808_v31 = vrot.slane %v5768_v49, 7  ;;  %v9282_v5 = vrot.slane %v6061_v13, 10  ;;  %5539 = vst.msk [vmem:[#allocation2 + $0x40] sm:$0xf] %vm3006_vm14, %v5406_v27  ;;  %5557 = vst.msk [vmem:[#allocation2 + $0x88] sm:$0xf] %vm3006_vm14, %v5442_v44  ;;  %3823 = vrot.lane.b32.xlu1 %v3730_v34, %s10683_s7  ;;  %v5412_v27 = vpop.permute.xlu1 %5411 }
 0x461   : > { %v3711_v16 = vor.u32 %v13058_v56, %v16653_v39  ;;  %v13142_v33 = vrot.slane %v3615_v46, 1  ;;  %v6181_v28 = vld [vmem:[#allocation2 + $0x74] sm:$0x2]  ;;  %v3738_v29 = vrot.slane %v3736_v6, 1  ;;  %v13146_v60 = vrot.slane %v3741_v52, 1  ;;  %v5448_v34 = vpop.permute.xlu0 %5447 }
 0x462   : > { %v3622_v62 = vshrl.u32 %v12695_v45, 16  ;;  %v3624_v56 = vshll.u32 %v12695_v45, 16  ;;  %v5879_v12 = vsel %vm12213_vm8, %v5806_v11, %v5878_v7  ;;  %v5885_v35 = vsel %vm12213_vm8, %v5808_v31, %v5884_v24  ;;  %v6052_v6 = vld [vmem:[#allocation2 + $0x4] sm:$0x8]  ;;  %v6056_v52 = vld [vmem:[#allocation2 + $0x34] sm:$0x8] }
 0x463   : > { %v6182_v46 = vsel %vm13070_vm10, %v9282_v5, %v6181_v28  ;;  %v3750_v49 = vshll.u32 %v12651_v40, 16  ;;  %5880 = vst [vmem:[#allocation2 + $0xc8] sm:$0x2] %v5879_v12  ;;  %5886 = vst [vmem:[#allocation2 + $0xe0] sm:$0x2] %v5885_v35  ;;  %v16654_v44 = vshrl.u32 %v12635_v41, 16  ;;  %v3716_v24 = vsel %vm441_vm2, %v3711_v16, %v13060_v0 }
 0x464   : > { %6183 = vst [vmem:[#allocation2 + $0x74] sm:$0x2] %v6182_v46  ;;  %v6062_v13 = vld [vmem:[#allocation2 + $0x7c] sm:$0x8]  ;;  %v6154_v53 = vld [vmem:[#allocation2 + $0x8] sm:$0x2]  ;;  %3819 = vrot.lane.b32.xlu0 %v3716_v24, %s10683_s7  ;;  %v3739_v24 = vor.u32 %v3738_v29, %v3734_v43  ;;  %v3613_v29 = vor.u32 %v13131_v15, %v3608_v8 }
 0x465   : > { %v3585_v7 = vor.u32 %v13021_v3, %v16654_v44  ;;  %v9273_v39 = vrot.slane %v6052_v6, 10  ;;  %v9277_v11 = vrot.slane %v6056_v52, 10  ;;  %v9283_v31 = vrot.slane %v6062_v13, 10  ;;  %5542 = vst.msk [vmem:[#allocation2 + $0x4c] sm:$0xf] %vm3006_vm14, %v5412_v27  ;;  %v16666_v41 = vld [vmem:[#allocation10_spill] sm:$0xff] }
 0x466   : > { %5560 = vst.msk [vmem:[#allocation2 + $0x94] sm:$0xf] %vm3006_vm14, %v5448_v34  ;;  %v3629_v5 = vshll.u32 %v12588_v4, 16  ;;  %v6166_v28 = vld [vmem:[#allocation2 + $0x38] sm:$0x2]  ;;  %v16655_v35 = vshrl.u32 %v13014_v32, 16  ;;  %v5418_v34 = vpop.permute.xlu1 %5417 }
 0x467   : > { %v6184_v12 = vld [vmem:[#allocation2 + $0x80] sm:$0x2]  ;;  %v16656_v3 = vshrl.u32 %v12674_v25, 16  ;;  %v6155_v16 = vsel %vm13070_vm10, %v9273_v39, %v6154_v53  ;;  %v6167_v46 = vsel %vm13070_vm10, %v9277_v11, %v6166_v28  ;;  %v3626_v52 = vrot.slane %v3624_v56, 1  ;;  %v6057_v13 = vld [vmem:[#allocation2 + $0x40] sm:$0x8] }
 0x468   : > { %4709 = vrot.lane.b32.xlu1 %v16655_v35, %s10683_s7  ;;  %v6185_v6 = vsel %vm13070_vm10, %v9283_v31, %v6184_v12  ;;  %6156 = vst [vmem:[#allocation2 + $0x8] sm:$0x2] %v6155_v16  ;;  %6168 = vst [vmem:[#allocation2 + $0x38] sm:$0x2] %v6167_v46  ;;  %v6063_v27 = vld [vmem:[#allocation2 + $0x88] sm:$0x8]  ;;  %v3590_v44 = vsel %vm441_vm2, %v3585_v7, %v13035_v22 }
 0x469   : > { %v3599_v0 = vor.u32 %v13074_v37, %v16656_v3  ;;  %6186 = vst [vmem:[#allocation2 + $0x80] sm:$0x2] %v6185_v6  ;;  %v5454_v37 = vpop.permute.xlu0 %5453  ;;  %v3752_v53 = vrot.slane %v3750_v49, 1  ;;  %v3755_v39 = vshll.u32 %v12613_v1, 16  ;;  %v9278_v11 = vrot.slane %v6057_v13, 10  ;;  %v16657_v31 = vld [vmem:[#allocation25_spill] sm:$0xff] }
 0x46a   : > { %v9284_v28 = vrot.slane %v6063_v27, 10  ;;  %5545 = vst.msk [vmem:[#allocation2 + $0x58] sm:$0xf] %vm3006_vm14, %v5418_v34  ;;  %5563 = vst.msk [vmem:[#allocation2 + $0xa0] sm:$0xf] %vm3006_vm14, %v5454_v37  ;;  %v3748_v56 = vshrl.u32 %v12651_v40, 16  ;;  %v3744_v34 = vsel %vm441_vm2, %v3739_v24, %v13146_v60 }
 0x46b   : > { %v3764_v12 = vshll.u32 %v16657_v31, 16  ;;  %v6169_v35 = vld [vmem:[#allocation2 + $0x44] sm:$0x2]  ;;  %v6187_v3 = vld [vmem:[#allocation2 + $0x8c] sm:$0x2]  ;;  %v3604_v22 = vsel %vm441_vm2, %v3599_v0, %v13120_v19  ;;  %v16658_v43 = vshrl.u32 %v12741_v54, 16  ;;  %v5424_v0 = vpop.permute.xlu1 %5423 }
 0x46c   : > { %3783 = vrot.lane.b32.xlu1 %v3590_v44, %s10683_s7  ;;  %v6170_v49 = vsel %vm13070_vm10, %v9278_v11, %v6169_v35  ;;  %v6188_v7 = vsel %vm13070_vm10, %v9284_v28, %v6187_v3  ;;  %v3631_v16 = vrot.slane %v3629_v5, 1  ;;  %v10653_v46 = vld [vmem:[#allocation2 + $0xcc] sm:$0xff]   ;;  %v3753_v44 = vor.u32 %v3752_v53, %v3748_v56  ;;  %5548 = vst.msk [vmem:[#allocation2 + $0x64] sm:$0xf] %vm3006_vm14, %v5424_v0  ;;  %v16659_v28 = vld [vmem:[#allocation12_spill] sm:$0xff] }
 0x46d   : > { %4265 = vrot.lane.b32.xlu0 %v16658_v43, %s10683_s7  ;;  %v4250_v6 = vshrl.u32 %v10653_v46, 16  ;;  %6171 = vst [vmem:[#allocation2 + $0x44] sm:$0x2] %v6170_v49  ;;  %v6058_v13 = vld [vmem:[#allocation2 + $0x4c] sm:$0x8]  ;;  %v5460_v27 = vpop.permute.xlu0 %5459  ;;  %v3757_v8 = vrot.slane %v3755_v39, 1  ;;  %v3618_v49 = vsel %vm441_vm2, %v3613_v29, %v13142_v33  ;;  %v3627_v33 = vor.u32 %v3626_v52, %v3622_v62 }
 0x46e   : > { %6189 = vst [vmem:[#allocation2 + $0x8c] sm:$0x2] %v6188_v7  ;;  %v6064_v19 = vld [vmem:[#allocation2 + $0x94] sm:$0x8]  ;;  %v4252_v15 = vshll.u32 %v10653_v46, 16  ;;  %v9279_v37 = vrot.slane %v6058_v13, 10 }
 0x46f   : > { %v9285_v11 = vrot.slane %v6064_v19, 10  ;;  %5566 = vst.msk [vmem:[#allocation2 + $0xac] sm:$0xf] %vm3006_vm14, %v5460_v27  ;;  %v3766_v5 = vrot.slane %v3764_v12, 1  ;;  %v3769_v35 = vshll.u32 %v16659_v28, 16  ;;  %v3762_v56 = vshrl.u32 %v16657_v31, 16 }
 0x470   : > { %v6172_v3 = vld [vmem:[#allocation2 + $0x50] sm:$0x2]  ;;  %v6190_v43 = vld [vmem:[#allocation2 + $0x98] sm:$0x2]  ;;  %3787 = vrot.lane.b32.xlu1 %v3604_v22, %s10683_s7  ;;  %v5466_v22 = vpop.permute.xlu1 %5465  ;;  %v3758_v29 = vsel %vm441_vm2, %v3753_v44, %v3757_v8  ;;  %v4254_v13 = vrot.slane %v4252_v15, 1  ;;  %v4696_v19 = vshll.u32 %v12770_v21, 16 }
 0x471   : > { %3827 = vrot.lane.b32.xlu0 %v3744_v34, %s10683_s7  ;;  %v6173_v60 = vsel %vm13070_vm10, %v9279_v37, %v6172_v3  ;;  %v6191_v24 = vsel %vm13070_vm10, %v9285_v11, %v6190_v43  ;;  %v10654_v53 = vld [vmem:[#allocation2 + $0xd4] ss:$0 sps:$4 sm:$0x33]   ;;  %v6059_v12 = vld [vmem:[#allocation2 + $0x58] sm:$0x8]  ;;  %v5472_v46 = vpop.permute.xlu0 %5471  ;;  %v3767_v34 = vor.u32 %v3766_v5, %v3762_v56  ;;  %v3771_v37 = vrot.slane %v3769_v35, 1 }
 0x472   : > { %v4257_v39 = vshll.u32 %v10654_v53, 16  ;;  %6174 = vst [vmem:[#allocation2 + $0x50] sm:$0x2] %v6173_v60  ;;  %6192 = vst [vmem:[#allocation2 + $0x98] sm:$0x2] %v6191_v24  ;;  %v9280_v0 = vrot.slane %v6059_v12, 10  ;;  %v3632_v43 = vsel %vm441_vm2, %v3627_v33, %v3631_v16  ;;  %v4255_v60 = vor.u32 %v4254_v13, %v4250_v6 }
 0x473   : > { %v6065_v7 = vld [vmem:[#allocation2 + $0xa0] sm:$0x8]  ;;  %5569 = vst.msk [vmem:[#allocation2 + $0xb8] sm:$0xf] %vm3006_vm14, %v5466_v22  ;;  %5588 = vst.msk [vmem:[#allocation2 + $0xe8] sm:$0xf] %vm3006_vm14, %v5466_v22  ;;  %v3772_v56 = vsel %vm441_vm2, %v3767_v34, %v3771_v37 }
 0x474   : > { %v9286_v27 = vrot.slane %v6065_v7, 10  ;;  %5572 = vst.msk [vmem:[#allocation2 + $0xc4] sm:$0xf] %vm3006_vm14, %v5472_v46  ;;  %5581 = vst.msk [vmem:[#allocation2 + $0xdc] sm:$0xf] %vm3006_vm14, %v5472_v46  ;;  %3791 = vrot.lane.b32.xlu1 %v3618_v49, %s10683_s7  ;;  %v4259_v44 = vrot.slane %v4257_v39, 1  ;;  %v13229_v35 = vpop.permute.xlu1 %3801 }
 0x475   : > { %v6175_v11 = vld [vmem:[#allocation2 + $0x5c] sm:$0x2]  ;;  %v6193_v3 = vld [vmem:[#allocation2 + $0xa4] sm:$0x2]  ;;  %3831 = vrot.lane.b32.xlu0 %v3758_v29, %s10683_s7  ;;  %v4701_v8 = vshll.u32 %v13014_v32, 16  ;;  %v13232_v49 = vpop.permute.xlu0 %3913  ;;  %v4698_v12 = vrot.slane %v4696_v19, 1 }
 0x476   : > { %v6176_v62 = vsel %vm13070_vm10, %v9280_v0, %v6175_v11  ;;  %v6194_v52 = vsel %vm13070_vm10, %v9286_v27, %v6193_v3  ;;  %v6060_v15 = vld [vmem:[#allocation2 + $0x64] sm:$0x8]  ;;  %v6066_v5 = vld [vmem:[#allocation2 + $0xac] sm:$0x8]  ;;  %v6178_v7 = vld [vmem:[#allocation2 + $0x68] sm:$0x2]  ;;  %v4260_v11 = vsel %vm441_vm2, %v4255_v60, %v4259_v44 }
 0x477   : > { %6177 = vst [vmem:[#allocation2 + $0x5c] sm:$0x2] %v6176_v62  ;;  %6195 = vst [vmem:[#allocation2 + $0xa4] sm:$0x2] %v6194_v52  ;;  %v9281_v24 = vrot.slane %v6060_v15, 10  ;;  %v9287_v53 = vrot.slane %v6066_v5, 10 }
 0x478   : > { %v6196_v39 = vld [vmem:[#allocation2 + $0xb0] sm:$0x2]  ;;  %3795 = vrot.lane.b32.xlu1 %v3632_v43, %s10683_s7  ;;  %v4694_v22 = vshrl.u32 %v12770_v21, 16  ;;  %v4703_v6 = vrot.slane %v4701_v8, 1  ;;  %v6199_v13 = vld [vmem:[#allocation2 + $0xbc] sm:$0x2]  ;;  %v13246_v37 = vpop.permute.xlu1 %3805 }
 0x479   : > { %3835 = vrot.lane.b32.xlu0 %v3772_v56, %s10683_s7  ;;  %v6179_v46 = vsel %vm13070_vm10, %v9281_v24, %v6178_v7  ;;  %v6197_v16 = vsel %vm13070_vm10, %v9287_v53, %v6196_v39  ;;  %v13242_v33 = vld [vmem:[#allocation2 + $0x14] ss:$0 sps:$4 sm:$0x33]   ;;  %v13244_v29 = vld [vmem:[#allocation2 + $0x20] ss:$0 sps:$4 sm:$0x33]   ;;  %v13249_v3 = vpop.permute.xlu0 %3921 }
 0x47a   : > { %6180 = vst [vmem:[#allocation2 + $0x68] sm:$0x2] %v6179_v46  ;;  %v6211_v19 = vld [vmem:[#allocation2 + $0xec] sm:$0x2]  ;;  %v6067_v0 = vld [vmem:[#allocation2 + $0xb8] sm:$0x8]  ;;  %v4699_v5 = vor.u32 %v4698_v12, %v4694_v22 }
 0x47b   : > { %v6071_v27 = vld [vmem:[#allocation2 + $0xe8] sm:$0x8]  ;;  %6198 = vst [vmem:[#allocation2 + $0xb0] sm:$0x2] %v6197_v16  ;;  %v6068_v34 = vld [vmem:[#allocation2 + $0xc4] sm:$0x8] }
 0x47c   : > { %v9288_v62 = vrot.slane %v6067_v0, 10  ;;  %v9292_v52 = vrot.slane %v6071_v27, 10  ;;  %v6070_v8 = vld [vmem:[#allocation2 + $0xdc] sm:$0x8]  ;;  %v9289_v15 = vrot.slane %v6068_v34, 10  ;;  %4263 = vrot.lane.b32.xlu1 %v4260_v11, %s10683_s7  ;;  %v16660_v53 = vrot.slane %v12741_v54, 1  ;;  %v13267_v22 = vpop.permute.xlu1 %3917 }
 0x47d   : > { %v6202_v43 = vld [vmem:[#allocation2 + $0xc8] sm:$0x2]  ;;  %v9291_v24 = vrot.slane %v6070_v8, 10  ;;  %v13255_v56 = vld [vmem:[#allocation2 + $0xc] sm:$0xff]   ;;  %v6208_v7 = vld [vmem:[#allocation2 + $0xe0] sm:$0x2]  ;;  %v13269_v46 = vpop.permute.xlu0 %3929 }
 0x47e   : > { %4272 = vrot.lane.b32.xlu0 %v16660_v53, %s10682_s30  ;;  %16661 = vst [vmem:[#allocation12_spill] sm:$0xff] %v13255_v56  ;;  %v6200_v44 = vsel %vm13070_vm10, %v9288_v62, %v6199_v13  ;;  %v6212_v60 = vsel %vm13070_vm10, %v9292_v52, %v6211_v19  ;;  %v6203_v12 = vsel %vm13070_vm10, %v9289_v15, %v6202_v43  ;;  %v13263_v39 = vld [vmem:[#allocation2 + $0x18] sm:$0xff]   ;;  %v13271_v16 = vld [vmem:[#allocation2 + $0x24] sm:$0xff]   ;;  %v6630_v19 = vrot.slane %v13242_v33, 1  ;;  %v13357_v25 = vld [vmem:[%s16410_s4 + $0x10] sm:$0x3f]  }
 0x47f   : > { %6201 = vst [vmem:[#allocation2 + $0xbc] sm:$0x2] %v6200_v44  ;;  %6213 = vst [vmem:[#allocation2 + $0xec] sm:$0x2] %v6212_v60  ;;  %v6209_v54 = vsel %vm13070_vm10, %v9291_v24, %v6208_v7  ;;  %v4704_v13 = vsel %vm441_vm2, %v4699_v5, %v4703_v6  ;;  %v6633_v0 = vrot.slane %v13244_v29, 1  ;;  %v6629_v27 = vrot.slane %v13255_v56, 1  ;;  %10493 = vmatprep.subr.msk.bf16.mxu1 %vm16508_vm0, %v13357_v25 }
 0x480   : > { %6204 = vst [vmem:[#allocation2 + $0xc8] sm:$0x2] %v6203_v12  ;;  %6210 = vst [vmem:[#allocation2 + $0xe0] sm:$0x2] %v6209_v54  ;;  %4707 = vrot.lane.b32.xlu1 %v4704_v13, %s10683_s7  ;;  %v16662_v34 = vrot.slane %v13014_v32, 1  ;;  %v6885_v11 = vrot.slane %v13255_v56, 2  ;;  %v13286_v6 = vpop.permute.xlu1 %3809 }
 0x481   : > { %v6632_v52 = vrot.slane %v13263_v39, 1  ;;  %v13284_v8 = vld [vmem:[#allocation2 + $0x2c] ss:$0 sps:$4 sm:$0x33]   ;;  %v13288_v15 = vpop.permute.xlu0 %3825  ;;  %v6886_v5 = vrot.slane %v13242_v33, 2  ;;  %v6635_v43 = vrot.slane %v13271_v16, 1  ;;  %v6631_v44 = vsel %vm666_vm1, %v6629_v27, %v6630_v19 }
 0x482   : > { %4716 = vrot.lane.b32.xlu0 %v16662_v34, %s10682_s30  ;;  %v13292_v24 = vld [vmem:[#allocation2 + $0x30] sm:$0xff]   ;;  %v13294_v53 = vld [vmem:[#allocation2 + $0x38] ss:$0 sps:$4 sm:$0x33]   ;;  %v6889_v7 = vrot.slane %v13244_v29, 2  ;;  %v13299_v12 = vld [vmem:[#allocation2 + $0x3c] sm:$0xff]   ;;  %v3986_v14 = vsel %vm1005_vm5, %v12538_v23, %v13286_v6 }
 0x483   : > { %v6634_v60 = vsel %vm666_vm1, %v6632_v52, %v6633_v0  ;;  %v6888_v54 = vrot.slane %v13263_v39, 2  ;;  %v6891_v13 = vrot.slane %v13271_v16, 2  ;;  %v13305_v34 = vld [vmem:[#allocation2 + $0x6c] sm:$0xff]   ;;  %v16663_v0 = vshll.u32 %v13255_v56, 16  ;;  %v13326_v20 = vld [vmem:[#allocation2 + $0x54] sm:$0xff]   ;;  %v13379_v55 = vld [vmem:[#allocation2 + $0x60] sm:$0xff]  }
 0x484   : > { %6676 = vrot.lane.b32.xlu1 %v6631_v44, %s10682_s30  ;;  %v13312_v17 = vpop.permute.xlu1 %3813  ;;  %v6887_v44 = vsel %vm16508_vm0, %v6885_v11, %v6886_v5  ;;  %v6636_v38 = vrot.slane %v13284_v8, 1  ;;  %v6892_v48 = vrot.slane %v13284_v8, 2  ;;  %v13319_v18 = vld [vmem:[#allocation2 + $0x48] sm:$0xff]   ;;  %v6639_v52 = vrot.slane %v13294_v53, 1  ;;  %v16664_v11 = vld [vmem:[#allocation9_spill] sm:$0xff]  ;;  %v13381_v30 = vld [vmem:[#allocation2 + $0x78] sm:$0xff]  }
 0x485   : > { %v6419_v27 = vrot.slane %v16663_v0, 1  ;;  %v6890_v19 = vsel %vm16508_vm0, %v6888_v54, %v6889_v7  ;;  %v6638_v0 = vrot.slane %v13292_v24, 1  ;;  %v6641_v2 = vrot.slane %v13299_v12, 1  ;;  %v13333_v32 = vld [vmem:[#allocation2 + $0x44] ss:$0 sps:$4 sm:$0x33]  }
 0x486   : > { %6678 = vrot.lane.b32.xlu0 %v6634_v60, %s10682_s30  ;;  %v13315_v60 = vpop.permute.xlu0 %3937  ;;  %v3978_v5 = vsel %vm1005_vm5, %v16664_v11, %v13229_v35  ;;  %v13335_v62 = vld [vmem:[#allocation2 + $0x74] ss:$0 sps:$4 sm:$0x33]   ;;  %v6894_v54 = vrot.slane %v13292_v24, 2  ;;  %v6897_v21 = vrot.slane %v13299_v12, 2  ;;  %v6653_v4 = vrot.slane %v13305_v34, 1 }
 0x487   : > { %v4042_v7 = vsel %vm16509_vm6, %v3978_v5, %v13232_v49  ;;  %v6637_v35 = vsel %vm666_vm1, %v6635_v43, %v6636_v38  ;;  %v6644_v11 = vrot.slane %v13319_v18, 1  ;;  %v6640_v31 = vsel %vm666_vm1, %v6638_v0, %v6639_v52  ;;  %16665 = vst [vmem:[#allocation9_spill] sm:$0xff] %v13357_v25  ;;  %v13364_v40 = vld [vmem:[#allocation2 + $0x5c] ss:$0 sps:$4 sm:$0x33]  }
 0x488   : > { %6932 = vrot.lane.b32.xlu1 %v6887_v44, %s10681_s29  ;;  %v13342_v45 = vpop.permute.xlu1 %3925  ;;  %v6895_v49 = vrot.slane %v13294_v53, 2  ;;  %v6647_v5 = vrot.slane %v13326_v20, 1  ;;  %v6900_v51 = vrot.slane %v13319_v18, 2  ;;  %v4145_v38 = vshll.u32 %v4042_v7, 16 }
 0x489   : > { %v6642_v43 = vrot.slane %v13333_v32, 1  ;;  %v6898_v52 = vrot.slane %v13333_v32, 2  ;;  %v6654_v0 = vrot.slane %v13335_v62, 1  ;;  %v6910_v36 = vrot.slane %v13335_v62, 2 }
 0x48a   : > { %6934 = vrot.lane.b32.xlu0 %v6890_v19, %s10681_s29  ;;  %v13345_v44 = vpop.permute.xlu0 %3837  ;;  %v13347_v19 = vld [vmem:[#allocation2 + $0x50] ss:$0 sps:$4 sm:$0x33]   ;;  %v3982_v7 = vsel %vm1005_vm5, %v16666_v41, %v13246_v37  ;;  %v6903_v59 = vrot.slane %v13326_v20, 2  ;;  %v6896_v41 = vsel %vm16508_vm0, %v6894_v54, %v6895_v49  ;;  %v13392_v57 = vrot.slane %v4145_v38, 1 }
 0x48b   : > { %v6645_v61 = vrot.slane %v13347_v19, 1  ;;  %v13383_v47 = vld [vmem:[#allocation2 + $0x80] ss:$0 sps:$4 sm:$0x33]   ;;  %v4046_v25 = vsel %vm16509_vm6, %v3982_v7, %v13267_v22  ;;  %v6901_v37 = vrot.slane %v13347_v19, 2  ;;  %v13400_v22 = vsel %vm666_vm1, %v6653_v4, %v6654_v0 }
 0x48c   : > { %6680 = vrot.lane.b32.xlu1 %v6637_v35, %s10682_s30  ;;  %v13372_v35 = vpop.permute.xlu1 %3817  ;;  %16667 = vst [vmem:[#allocation10_spill] sm:$0xff] %v13383_v47  ;;  %16668 = vst [vmem:[#allocation43_spill] sm:$0xff] %v13392_v57  ;;  %v13402_v54 = vld [vmem:[#allocation2 + $0x8c] ss:$0 sps:$4 sm:$0x33]   ;;  %v16670_v49 = vshrl.u32 %v13255_v56, 16  ;;  %v6643_v50 = vsel %vm666_vm1, %v6641_v2, %v6642_v43  ;;  %v6899_v38 = vsel %vm16508_vm0, %v6897_v21, %v6898_v52 }
 0x48d   : > { %16669 = vst [vmem:[#allocation44_spill] sm:$0xff] %v13402_v54  ;;  %v6648_v57 = vrot.slane %v13364_v40, 1  ;;  %v13409_v1 = vld [vmem:[#allocation2 + $0x68] ss:$0 sps:$4 sm:$0x33]   ;;  %v4155_v6 = vshll.u32 %v4046_v25, 16  ;;  %v6646_v0 = vsel %vm666_vm1, %v6644_v11, %v6645_v61  ;;  %v4050_v21 = vsel %vm16509_vm6, %v3986_v14, %v13249_v3 }
 0x48e   : > { %6682 = vrot.lane.b32.xlu0 %v6640_v31, %s10682_s30  ;;  %v6893_v31 = vsel %vm16508_vm0, %v6891_v13, %v6892_v48  ;;  %v13375_v58 = vpop.permute.xlu0 %3949  ;;  %v6909_v48 = vrot.slane %v13305_v34, 2  ;;  %v13390_v13 = vld [vmem:[#allocation2 + $0x84] sm:$0xff]   ;;  %v6420_v7 = vor.u32 %v6419_v27, %v16670_v49  ;;  %v6904_v27 = vrot.slane %v13364_v40, 2  ;;  %v13426_v25 = vld [vmem:[#allocation2 + $0x98] ss:$0 sps:$4 sm:$0x33]  }
 0x48f   : > { %v6650_v2 = vrot.slane %v13379_v55, 1  ;;  %v6902_v43 = vsel %vm16508_vm0, %v6900_v51, %v6901_v37  ;;  %v6657_v52 = vrot.slane %v13383_v47, 1  ;;  %v6906_v61 = vrot.slane %v13379_v55, 2  ;;  %v13438_v49 = vld [vmem:[#allocation2 + $0x90] sm:$0xff]  }
 0x490   : > { %6936 = vrot.lane.b32.xlu1 %v6893_v31, %s10681_s29  ;;  %v13412_v23 = vsel %vm16508_vm0, %v6909_v48, %v6910_v36  ;;  %v13414_v31 = vpop.permute.xlu1 %3821  ;;  %v6656_v11 = vrot.slane %v13381_v30, 1  ;;  %v6913_v14 = vrot.slane %v13383_v47, 2  ;;  %v6649_v51 = vsel %vm666_vm1, %v6647_v5, %v6648_v57 }
 0x491   : > { %v6651_v3 = vrot.slane %v13409_v1, 1  ;;  %v6907_v37 = vrot.slane %v13409_v1, 2  ;;  %v6659_v48 = vrot.slane %v13390_v13, 1  ;;  %v6905_v42 = vsel %vm16508_vm0, %v6903_v59, %v6904_v27 }
 0x492   : > { %6938 = vrot.lane.b32.xlu0 %v6896_v41, %s10681_s29  ;;  %v13416_v4 = vpop.permute.xlu0 %3789  ;;  %v6660_v41 = vrot.slane %v13402_v54, 1  ;;  %v6912_v47 = vrot.slane %v13381_v30, 2  ;;  %v4002_v57 = vsel %vm1005_vm5, %v12558_v63, %v13288_v15  ;;  %v13452_v5 = vsel %vm666_vm1, %v6656_v11, %v6657_v52 }
 0x493   : > { %v16672_v54 = vshll.u32 %v13242_v33, 16  ;;  %v16673_v15 = vshll.u32 %v13271_v16, 16  ;;  %v6908_v52 = vsel %vm16508_vm0, %v6906_v61, %v6907_v37  ;;  %v6662_v11 = vrot.slane %v13438_v49, 1 }
 0x494   : > { %6684 = vrot.lane.b32.xlu1 %v6643_v50, %s10682_s30  ;;  %v13440_v50 = vrot.slane %v4155_v6, 1  ;;  %v13442_v36 = vpop.permute.xlu1 %3933  ;;  %v13462_v59 = vsel %vm666_vm1, %v6659_v48, %v6660_v41  ;;  %v13465_v63 = vsel %vm16508_vm0, %v6912_v47, %v6913_v14  ;;  %v16483_v14 = vshll.u32 %v13284_v8, 16 }
 0x495   : > { %v6424_v6 = vrot.slane %v16672_v54, 1  ;;  %v6443_v27 = vrot.slane %v16673_v15, 1  ;;  %v6652_v54 = vsel %vm666_vm1, %v6650_v2, %v6651_v3  ;;  %v16482_v2 = vshll.u32 %v13299_v12, 16 }
 0x496   : > { %6686 = vrot.lane.b32.xlu0 %v6646_v0, %s10682_s30  ;;  %16671 = vst [vmem:[#allocation45_spill] sm:$0xff] %v13440_v50  ;;  %v4165_v0 = vshll.u32 %v4050_v21, 16  ;;  %v13444_v56 = vpop.permute.xlu0 %3901  ;;  %v6663_v21 = vrot.slane %v13426_v25, 1  ;;  %v4066_v50 = vsel %vm16509_vm6, %v4002_v57, %v13315_v60  ;;  %v16485_v60 = vshll.u32 %v13263_v39, 16 }
 0x497   : > { %v4205_v3 = vshll.u32 %v4066_v50, 16  ;;  %v13485_v61 = vsel %vm441_vm2, %v6420_v7, %v6424_v6  ;;  %v16676_v57 = vshrl.u32 %v13271_v16, 16  ;;  %v16486_v50 = vshll.u32 %v13333_v32, 16 }
 0x498   : > { %6940 = vrot.lane.b32.xlu1 %v6899_v38, %s10681_s29  ;;  %v13473_v38 = vrot.slane %v4165_v0, 1  ;;  %v13478_v48 = vpop.permute.xlu1 %3829  ;;  %v13488_v37 = vsel %vm666_vm1, %v6662_v11, %v6663_v21  ;;  %v16484_v0 = vshll.u32 %v13244_v29, 16  ;;  %v16488_v7 = vshll.u32 %v13292_v24, 16 }
 0x499   : > { %v6444_v15 = vor.u32 %v6443_v27, %v16676_v57  ;;  %v4014_v21 = vsel %vm1005_vm5, %v16659_v28, %v13345_v44  ;;  %v6448_v11 = vrot.slane %v16483_v14, 1  ;;  %v16494_v28 = vshll.u32 %v13294_v53, 16 }
 0x49a   : > { %6942 = vrot.lane.b32.xlu0 %v6902_v43, %s10681_s29  ;;  %v16674_v43 = vld [vmem:[#allocation11_spill] sm:$0xff]  ;;  %v13480_v47 = vpop.permute.xlu0 %3797  ;;  %v16679_v14 = vshrl.u32 %v13263_v39, 16 }
 0x49b   : > { %v3990_v41 = vsel %vm1005_vm5, %v16674_v43, %v13312_v17  ;;  %16675 = vst [vmem:[#allocation11_spill] sm:$0xff] %v13480_v47  ;;  %v3994_v17 = vsel %vm1005_vm5, %v12550_v10, %v13372_v35  ;;  %v6431_v10 = vrot.slane %v16485_v60, 1  ;;  %v16487_v35 = vshll.u32 %v13326_v20, 16 }
 0x49c   : > { %6688 = vrot.lane.b32.xlu1 %v6649_v51, %s10682_s30  ;;  %v4054_v6 = vsel %vm16509_vm6, %v3990_v41, %v13342_v45  ;;  %v4078_v51 = vsel %vm16509_vm6, %v4014_v21, %v13375_v58  ;;  %v13510_v27 = vpop.permute.xlu1 %3941  ;;  %v6467_v45 = vrot.slane %v16482_v2, 1  ;;  %v4058_v44 = vsel %vm16509_vm6, %v3994_v17, %v13269_v46 }
 0x49d   : > { %v6436_v43 = vrot.slane %v16484_v0, 1  ;;  %v16489_v58 = vshrl.u32 %v13299_v12, 16  ;;  %v4175_v57 = vshll.u32 %v4054_v6, 16  ;;  %v13525_v21 = vrot.slane %v4205_v3, 1 }
 0x49e   : > { %6690 = vrot.lane.b32.xlu0 %v6652_v54, %s10682_s30  ;;  %v13512_v54 = vpop.permute.xlu0 %3909  ;;  %v6472_v2 = vrot.slane %v16486_v50, 1  ;;  %v6455_v46 = vrot.slane %v16488_v7, 1  ;;  %v4235_v17 = vshll.u32 %v4078_v51, 16  ;;  %v6432_v0 = vor.u32 %v6431_v10, %v16679_v14 }
 0x49f   : > { %16677 = vst [vmem:[#allocation46_spill] sm:$0xff] %v13512_v54  ;;  %16678 = vst [vmem:[#allocation47_spill] sm:$0xff] %v13525_v21  ;;  %v6491_v3 = vrot.slane %v16487_v35, 1  ;;  %v4185_v6 = vshll.u32 %v4058_v44, 16  ;;  %v6460_v50 = vrot.slane %v16494_v28, 1  ;;  %v16491_v51 = vshll.u32 %v13319_v18, 16 }
 0x4a0   : > { %6944 = vrot.lane.b32.xlu1 %v6905_v42, %s10681_s29  ;;  %v13538_v41 = vpop.permute.xlu1 %3833  ;;  %v13548_v14 = vsel %vm441_vm2, %v6444_v15, %v6448_v11  ;;  %v13551_v10 = vsel %vm441_vm2, %v6432_v0, %v6436_v43  ;;  %v16490_v44 = vshrl.u32 %v13326_v20, 16  ;;  %v16680_v35 = vshll.u32 %v13364_v40, 16  ;;  %v16688_v28 = vld [vmem:[#allocation10_spill] sm:$0xff] }
 0x4a1   : > { %v13556_v60 = vrot.slane %v4175_v57, 1  ;;  %v16682_v15 = vshrl.u32 %v13292_v24, 16  ;;  %v16492_v11 = vshll.u32 %v13347_v19, 16  ;;  %v13568_v43 = vrot.slane %v4235_v17, 1 }
 0x4a2   : > { %6946 = vrot.lane.b32.xlu0 %v6908_v52, %s10681_s29  ;;  %v13540_v42 = vpop.permute.xlu0 %3911  ;;  %v6468_v52 = vor.u32 %v6467_v45, %v16489_v58  ;;  %v6496_v7 = vrot.slane %v16680_v35, 1  ;;  %v6492_v35 = vor.u32 %v6491_v3, %v16490_v44  ;;  %v16497_v57 = vshrl.u32 %v13319_v18, 16 }
 0x4a3   : > { %16681 = vst [vmem:[#allocation48_spill] sm:$0xff] %v13556_v60  ;;  %v6456_v0 = vor.u32 %v6455_v46, %v16682_v15  ;;  %16683 = vst [vmem:[#allocation49_spill] sm:$0xff] %v13568_v43  ;;  %v13574_v58 = vrot.slane %v4185_v6, 1  ;;  %v6479_v46 = vrot.slane %v16491_v51, 1  ;;  %v16496_v17 = vshll.u32 %v13379_v55, 16 }
 0x4a4   : > { %6692 = vrot.lane.b32.xlu1 %v13400_v22, %s10682_s30  ;;  %v13563_v45 = vsel %vm441_vm2, %v6468_v52, %v6472_v2  ;;  %v16493_v22 = vshll.u32 %v13305_v34, 16  ;;  %v3998_v3 = vsel %vm1005_vm5, %v12574_v26, %v13414_v31  ;;  %v3966_v6 = vsel %vm1005_vm5, %v12582_v9, %v13416_v4 }
 0x4a5   : > { %16684 = vst [vmem:[#allocation50_spill] sm:$0xff] %v13574_v58  ;;  %v13581_v52 = vsel %vm441_vm2, %v6456_v0, %v6460_v50  ;;  %v13593_v15 = vsel %vm441_vm2, %v6492_v35, %v6496_v7  ;;  %v16495_v44 = vshll.u32 %v13335_v62, 16  ;;  %v4062_v50 = vsel %vm16509_vm6, %v3998_v3, %v13442_v36  ;;  %v16686_v36 = vld [vmem:[#allocation15_spill] sm:$0xff] }
 0x4a6   : > { %6694 = vrot.lane.b32.xlu0 %v13452_v5, %s10682_s30  ;;  %v13576_v5 = vpop.permute.xlu1 %3945  ;;  %v13578_v2 = vpop.permute.xlu0 %3915  ;;  %v6484_v26 = vrot.slane %v16492_v11, 1  ;;  %v16498_v9 = vshll.u32 %v13390_v13, 16  ;;  %v4030_v4 = vsel %vm16509_vm6, %v3966_v6, %v13444_v56  ;;  %v6515_v7 = vrot.slane %v16493_v22, 1  ;;  %v16685_v56 = vld [vmem:[#allocation44_spill] sm:$0xff] }
 0x4a7   : > { %v6480_v35 = vor.u32 %v6479_v46, %v16497_v57  ;;  %v6503_v3 = vrot.slane %v16496_v17, 1  ;;  %v16499_v6 = vshll.u32 %v16685_v56, 16  ;;  %v4195_v11 = vshll.u32 %v4062_v50, 16 }
 0x4a8   : > { %6948 = vrot.lane.b32.xlu1 %v13412_v23, %s10681_s29  ;;  %v6520_v22 = vrot.slane %v16495_v44, 1  ;;  %v6718_v23 = vshrl.u32 %v13242_v33, 16  ;;  %v4006_v31 = vsel %vm1005_vm5, %v16686_v36, %v13478_v48  ;;  %v4115_v46 = vshll.u32 %v4030_v4, 16 }
 0x4a9   : > { %v6485_v50 = vsel %vm441_vm2, %v6480_v35, %v6484_v26  ;;  %v6539_v44 = vrot.slane %v16498_v9, 1  ;;  %v4070_v17 = vsel %vm16509_vm6, %v4006_v31, %v13510_v27  ;;  %v16687_v57 = vshrl.u32 %v13305_v34, 16  ;;  %v16691_v31 = vld [vmem:[#allocation12_spill] sm:$0xff] }
 0x4aa   : > { %6950 = vrot.lane.b32.xlu0 %v13465_v63, %s10681_s29  ;;  %v13612_v0 = vpop.permute.xlu1 %3785  ;;  %v13614_v63 = vpop.permute.xlu0 %3919  ;;  %v16690_v35 = vshll.u32 %v13409_v1, 16  ;;  %v6544_v27 = vrot.slane %v16499_v6, 1  ;;  %v16692_v54 = vshrl.u32 %v16691_v31, 16  ;;  %v16694_v4 = vshll.u32 %v16691_v31, 16 }
 0x4ab   : > { %v6516_v51 = vor.u32 %v6515_v7, %v16687_v57  ;;  %v16693_v7 = vshll.u32 %v13381_v30, 16  ;;  %v6720_v43 = vrot.slane %v6718_v23, 1  ;;  %v16695_v21 = vshll.u32 %v13242_v33, 16 }
 0x4ac   : > { %6696 = vrot.lane.b32.xlu1 %v13462_v59, %s10682_s30  ;;  %v6508_v9 = vrot.slane %v16690_v35, 1  ;;  %v6715_v57 = vrot.slane %v16692_v54, 1  ;;  %v6716_v47 = vrot.slane %v16694_v4, 2  ;;  %v4215_v35 = vshll.u32 %v4070_v17, 16 }
 0x4ad   : > { %v6527_v48 = vrot.slane %v16693_v7, 1  ;;  %v6721_v58 = vrot.slane %v16695_v21, 2  ;;  %v16698_v54 = vshrl.u32 %v13390_v13, 16  ;;  %v16501_v4 = vshrl.u32 %v13381_v30, 16 }
 0x4ae   : > { %6698 = vrot.lane.b32.xlu0 %v13488_v37, %s10682_s30  ;;  %v13642_v36 = vpop.permute.xlu1 %3897  ;;  %v13644_v59 = vpop.permute.xlu0 %3923  ;;  %v16689_v37 = vshrl.u32 %v13379_v55, 16  ;;  %v16699_v23 = vshll.u32 %v16688_v28, 16  ;;  %v16700_v21 = vshll.u32 %v13438_v49, 16  ;;  %v6717_v6 = vor.u32 %v6716_v47, %v6715_v57 }
 0x4af   : > { %v6540_v7 = vor.u32 %v6539_v44, %v16698_v54  ;;  %v16500_v54 = vshrl.u32 %v13438_v49, 16 }
 0x4b0   : > { %v6504_v26 = vor.u32 %v6503_v3, %v16689_v37  ;;  %v13660_v3 = vrot.slane %v4195_v11, 1  ;;  %v13662_v37 = vrot.slane %v4115_v46, 1  ;;  %6596 = vrot.lane.b32.xlu1 %v13485_v61, %s10683_s7  ;;  %v6532_v33 = vrot.slane %v16699_v23, 1  ;;  %v13688_v23 = vld [vmem:[#allocation2 + $0x9c] sm:$0xff]  }
 0x4b1   : > { %v6551_v11 = vrot.slane %v16700_v21, 1  ;;  %v13681_v61 = vsel %vm441_vm2, %v6516_v51, %v6520_v22  ;;  %v13685_v44 = vsel %vm441_vm2, %v6540_v7, %v6544_v27  ;;  %v6528_v21 = vor.u32 %v6527_v48, %v16501_v4  ;;  %v13709_v27 = vld [vmem:[#allocation2 + $0xa4] ss:$0 sps:$4 sm:$0x33]   ;;  %v16708_v4 = vld [vmem:[#allocation20_spill] sm:$0xff] }
 0x4b2   : > { %16696 = vst [vmem:[#allocation44_spill] sm:$0xff] %v13660_v3  ;;  %16697 = vst [vmem:[#allocation15_spill] sm:$0xff] %v13662_v37  ;;  %6598 = vrot.lane.b32.xlu0 %v13551_v10, %s10683_s7  ;;  %v13676_v17 = vpop.permute.xlu1 %3793  ;;  %v13678_v31 = vpop.permute.xlu0 %3931  ;;  %v6509_v10 = vsel %vm441_vm2, %v6504_v26, %v6508_v9  ;;  %v6722_v46 = vor.u32 %v6721_v58, %v6720_v43  ;;  %v6727_v37 = vshrl.u32 %v13244_v29, 16  ;;  %v13693_v3 = vrot.slane %v4215_v35, 1 }
 0x4b3   : > { %v6915_v51 = vrot.slane %v13390_v13, 2  ;;  %v6916_v22 = vrot.slane %v16685_v56, 2  ;;  %v6736_v9 = vshrl.u32 %v13284_v8, 16  ;;  %v6533_v48 = vsel %vm441_vm2, %v6528_v21, %v6532_v33 }
 0x4b4   : > { %16701 = vst [vmem:[#allocation10_spill] sm:$0xff] %v13693_v3  ;;  %6600 = vrot.lane.b32.xlu1 %v13548_v14, %s10683_s7  ;;  %v6552_v47 = vor.u32 %v6551_v11, %v16500_v54  ;;  %v16702_v58 = vshll.u32 %v13426_v25, 16  ;;  %v16703_v26 = vshrl.u32 %v13263_v39, 16  ;;  %v16705_v35 = vshll.u32 %v13263_v39, 16 }
 0x4b5   : > { %v16706_v33 = vshrl.u32 %v13271_v16, 16  ;;  %v16707_v11 = vshll.u32 %v13271_v16, 16  ;;  %v13726_v3 = vsel %vm16507_vm3, %v6717_v6, %v6722_v46  ;;  %v6729_v60 = vrot.slane %v6727_v37, 1 }
 0x4b6   : > { %6602 = vrot.lane.b32.xlu0 %v13581_v52, %s10683_s7  ;;  %v6556_v43 = vrot.slane %v16702_v58, 1  ;;  %v6724_v14 = vrot.slane %v16703_v26, 1  ;;  %v13711_v52 = vpop.permute.xlu1 %3905  ;;  %v13713_v57 = vpop.permute.xlu0 %3947  ;;  %v6725_v7 = vrot.slane %v16705_v35, 2  ;;  %v16502_v58 = vshll.u32 %v13688_v23, 16 }
 0x4b7   : > { %16704 = vst [vmem:[#allocation12_spill] sm:$0xff] %v13713_v57  ;;  %v6733_v21 = vrot.slane %v16706_v33, 1  ;;  %v6734_v54 = vrot.slane %v16707_v11, 2  ;;  %v4010_v26 = vsel %vm1005_vm5, %v16708_v4, %v13538_v41  ;;  %v16709_v57 = vshll.u32 %v13244_v29, 16  ;;  %v13744_v4 = vld [vmem:[#allocation2 + $0xa8] sm:$0xff]  }
 0x4b8   : > { %v4074_v35 = vsel %vm16509_vm6, %v4010_v26, %v13576_v5  ;;  %6604 = vrot.lane.b32.xlu1 %v13563_v45, %s10683_s7  ;;  %v6738_v16 = vrot.slane %v6736_v9, 1  ;;  %v16710_v33 = vshll.u32 %v13284_v8, 16  ;;  %v6919_v41 = vrot.slane %v13426_v25, 2  ;;  %v13755_v26 = vld [vmem:[#allocation2 + $0xb0] ss:$0 sps:$4 sm:$0x33]  }
 0x4b9   : > { %v6730_v39 = vrot.slane %v16709_v57, 2  ;;  %v6557_v6 = vsel %vm441_vm2, %v6552_v47, %v6556_v43  ;;  %v13740_v37 = vsel %vm16508_vm0, %v6915_v51, %v6916_v22  ;;  %v16503_v29 = vshll.u32 %v13709_v27, 16 }
 0x4ba   : > { %6606 = vrot.lane.b32.xlu0 %v6485_v50, %s10683_s7  ;;  %v6739_v11 = vrot.slane %v16710_v33, 2  ;;  %v6745_v5 = vshrl.u32 %v13294_v53, 16  ;;  %v13746_v45 = vpop.permute.xlu1 %3927  ;;  %v13748_v50 = vpop.permute.xlu0 %3895  ;;  %v6726_v46 = vor.u32 %v6725_v7, %v6724_v14  ;;  %v6735_v8 = vor.u32 %v6734_v54, %v6733_v21 }
 0x4bb   : > { %16711 = vst [vmem:[#allocation20_spill] sm:$0xff] %v13748_v50  ;;  %v6918_v9 = vrot.slane %v13438_v49, 2  ;;  %v6563_v47 = vrot.slane %v16502_v58, 1  ;;  %v4225_v43 = vshll.u32 %v4074_v35, 16  ;;  %v6731_v51 = vor.u32 %v6730_v39, %v6729_v60 }
 0x4bc   : > { %v6754_v57 = vshrl.u32 %v13333_v32, 16  ;;  %6608 = vrot.lane.b32.xlu1 %v13593_v15, %s10683_s7  ;;  %v6740_v14 = vor.u32 %v6739_v11, %v6738_v16  ;;  %v16712_v7 = vshrl.u32 %v13292_v24, 16  ;;  %v16713_v60 = vshll.u32 %v13292_v24, 16 }
 0x4bd   : > { %v13761_v54 = vsel %vm16508_vm0, %v6918_v9, %v6919_v41  ;;  %v6568_v35 = vrot.slane %v16503_v29, 1  ;;  %v6747_v33 = vrot.slane %v6745_v5, 1  ;;  %v16714_v58 = vshll.u32 %v13294_v53, 16 }
 0x4be   : > { %6610 = vrot.lane.b32.xlu0 %v6509_v10, %s10683_s7  ;;  %v6742_v21 = vrot.slane %v16712_v7, 1  ;;  %v6743_v39 = vrot.slane %v16713_v60, 2  ;;  %v16715_v10 = vld [vmem:[#allocation24_spill] sm:$0xff]  ;;  %v13775_v11 = vpop.permute.xlu1 %3935  ;;  %v13777_v41 = vpop.permute.xlu0 %3899  ;;  %v16717_v24 = vshrl.u32 %v13688_v23, 16  ;;  %v16718_v7 = vshrl.u32 %v13299_v12, 16 }
 0x4bf   : > { %v6748_v22 = vrot.slane %v16714_v58, 2  ;;  %v3962_v16 = vsel %vm1005_vm5, %v16715_v10, %v13612_v0  ;;  %16716 = vst [vmem:[#allocation24_spill] sm:$0xff] %v13777_v41  ;;  %v6763_v5 = vshrl.u32 %v13347_v19, 16  ;;  %v16719_v53 = vshll.u32 %v13299_v12, 16 }
 0x4c0   : > { %v6564_v9 = vor.u32 %v6563_v47, %v16717_v24  ;;  %v6751_v60 = vrot.slane %v16718_v7, 1  ;;  %v6756_v29 = vrot.slane %v6754_v57, 1  ;;  %v16720_v15 = vshll.u32 %v13333_v32, 16  ;;  %6612 = vrot.lane.b32.xlu1 %v13681_v61, %s10683_s7 }
 0x4c1   : > { %v6752_v58 = vrot.slane %v16719_v53, 2  ;;  %v6578_v0 = vshll.u32 %v13755_v26, 16  ;;  %v13789_v10 = vrot.slane %v4225_v43, 1  ;;  %v4026_v41 = vsel %vm16509_vm6, %v3962_v16, %v13642_v36  ;;  %v16727_v53 = vld [vmem:[#allocation26_spill] sm:$0xff] }
 0x4c2   : > { %v6757_v50 = vrot.slane %v16720_v15, 2  ;;  %6614 = vrot.lane.b32.xlu0 %v6533_v48, %s10683_s7  ;;  %v6732_v47 = vsel %vm16507_vm3, %v6726_v46, %v6731_v51  ;;  %v13798_v12 = vsel %vm16507_vm3, %v6735_v8, %v6740_v14  ;;  %v13801_v32 = vsel %vm441_vm2, %v6564_v9, %v6568_v35  ;;  %v13805_v7 = vpop.permute.xlu1 %3939  ;;  %v13807_v36 = vpop.permute.xlu0 %3903 }
 0x4c3   : > { %v6744_v57 = vor.u32 %v6743_v39, %v6742_v21  ;;  %v6749_v15 = vor.u32 %v6748_v22, %v6747_v33  ;;  %v16721_v43 = vshll.u32 %v13744_v4, 16  ;;  %v6571_v61 = vshrl.u32 %v13744_v4, 16 }
 0x4c4   : > { %v6765_v48 = vrot.slane %v6763_v5, 1  ;;  %v16722_v46 = vshll.u32 %v13347_v19, 16  ;;  %v6772_v8 = vshrl.u32 %v13364_v40, 16  ;;  %v4105_v14 = vshll.u32 %v4026_v41, 16  ;;  %6616 = vrot.lane.b32.xlu1 %v13685_v44, %s10683_s7 }
 0x4c5   : > { %v6575_v24 = vrot.slane %v16721_v43, 1  ;;  %v6753_v35 = vor.u32 %v6752_v58, %v6751_v60  ;;  %v6758_v16 = vor.u32 %v6757_v50, %v6756_v29  ;;  %v6580_v22 = vrot.slane %v6578_v0, 1 }
 0x4c6   : > { %v6766_v51 = vrot.slane %v16722_v46, 2  ;;  %6618 = vrot.lane.b32.xlu0 %v6557_v6, %s10683_s7  ;;  %v6665_v21 = vrot.slane %v13688_v23, 1  ;;  %v6666_v39 = vrot.slane %v13709_v27, 1  ;;  %v16723_v19 = vshrl.u32 %v13319_v18, 16  ;;  %v13834_v43 = vpop.permute.xlu1 %3943  ;;  %v13836_v46 = vpop.permute.xlu0 %3907 }
 0x4c7   : > { %v16724_v9 = vshll.u32 %v13319_v18, 16  ;;  %v6750_v29 = vsel %vm16507_vm3, %v6744_v57, %v6749_v15  ;;  %v6576_v50 = vor.u32 %v6575_v24, %v6571_v61  ;;  %v16725_v60 = vshrl.u32 %v13326_v20, 16 }
 0x4c8   : > { %v6760_v33 = vrot.slane %v16723_v19, 1  ;;  %v16726_v6 = vshll.u32 %v13326_v20, 16  ;;  %v3970_v58 = vsel %vm1005_vm5, %v16727_v53, %v13676_v17  ;;  %v6767_v18 = vor.u32 %v6766_v51, %v6765_v48  ;;  %6852 = vrot.lane.b32.xlu1 %v13726_v3, %s10684_s8  ;;  %v16756_v3 = vld [vmem:[#allocation44_spill] sm:$0xff] }
 0x4c9   : > { %v6761_v41 = vrot.slane %v16724_v9, 2  ;;  %v6769_v44 = vrot.slane %v16725_v60, 1  ;;  %v6774_v19 = vrot.slane %v6772_v8, 1  ;;  %v16728_v57 = vshll.u32 %v13364_v40, 16 }
 0x4ca   : > { %v6770_v5 = vrot.slane %v16726_v6, 2  ;;  %v13842_v24 = vsel %vm16509_vm6, %v3970_v58, %v13711_v52  ;;  %v13845_v20 = vsel %vm16507_vm3, %v6753_v35, %v6758_v16  ;;  %v6669_v9 = vrot.slane %v13755_v26, 1  ;;  %6854 = vrot.lane.b32.xlu0 %v6732_v47, %s10684_s8  ;;  %v3804_v6 = vpop.permute.xlu1 %3803  ;;  %v3800_v47 = vpop.permute.xlu0 %3799 }
 0x4cb   : > { %v6775_v15 = vrot.slane %v16728_v57, 2  ;;  %v6922_v17 = vrot.slane %v13709_v27, 2  ;;  %v13849_v60 = vrot.slane %v4105_v14, 1  ;;  %v13855_v40 = vsel %vm441_vm2, %v6576_v50, %v6580_v22 }
 0x4cc   : > { %v13858_v52 = vsel %vm666_vm1, %v6665_v21, %v6666_v39  ;;  %v6762_v48 = vor.u32 %v6761_v41, %v6760_v33  ;;  %v6771_v51 = vor.u32 %v6770_v5, %v6769_v44  ;;  %v6668_v8 = vrot.slane %v13744_v4, 1  ;;  %v16730_v39 = vld [vmem:[#allocation17_spill] sm:$0xff]  ;;  %v16731_v41 = vld [vmem:[#allocation16_spill] sm:$0xff]  ;;  %6952 = vrot.lane.b32.xlu1 %v13740_v37, %s10681_s29 }
 0x4cd   : > { %v6921_v35 = vrot.slane %v13688_v23, 2  ;;  %v16729_v14 = vshrl.u32 %v13379_v55, 16  ;;  %v6776_v50 = vor.u32 %v6775_v15, %v6774_v19  ;;  %v6781_v21 = vshrl.u32 %v13409_v1, 16 }
 0x4ce   : > { %v13868_v22 = vsel %vm16507_vm3, %v6762_v48, %v6767_v18  ;;  %v3980_v33 = vsel %vm1005_vm5, %v16730_v39, %v3804_v6  ;;  %v3976_v44 = vsel %vm1005_vm5, %v16731_v41, %v3800_v47  ;;  %v13876_v5 = vsel %vm666_vm1, %v6668_v8, %v6669_v9  ;;  %6954 = vrot.lane.b32.xlu0 %v13761_v54, %s10681_s29  ;;  %v13905_v39 = vld [vmem:[#allocation2 + $0xb4] sm:$0xff]  }
 0x4cf   : > { %v13864_v16 = vrot.slane %v16729_v14, 1  ;;  %v13879_v53 = vsel %vm16508_vm0, %v6921_v35, %v6922_v17  ;;  %v4044_v58 = vsel %vm16509_vm6, %v3980_v33, %v13578_v2  ;;  %v4040_v18 = vsel %vm16509_vm6, %v3976_v44, %v13540_v42  ;;  %v3812_v14 = vpop.permute.xlu1 %3811  ;;  %v13898_v42 = vpop.permute.xlu0 %4270 }
 0x4d0   : > { %v16732_v19 = vshll.u32 %v13379_v55, 16  ;;  %v6790_v15 = vshrl.u32 %v13335_v62, 16  ;;  %v4151_v9 = vshll.u32 %v4044_v58, 16  ;;  %v4141_v17 = vshll.u32 %v4040_v18, 16  ;;  %6856 = vrot.lane.b32.xlu1 %v13798_v12, %s10684_s8 }
 0x4d1   : > { %v16733_v48 = vshll.u32 %v13409_v1, 16  ;;  %v16734_v2 = vshrl.u32 %v13305_v34, 16  ;;  %v4149_v37 = vshrl.u32 %v4044_v58, 16  ;;  %v13901_v54 = vsel %vm16507_vm3, %v6771_v51, %v6776_v50  ;;  %v16736_v1 = vld [vmem:[#allocation19_spill] sm:$0xff] }
 0x4d2   : > { %v6779_v57 = vrot.slane %v16732_v19, 2  ;;  %v6783_v55 = vrot.slane %v6781_v21, 1  ;;  %v16735_v6 = vshll.u32 %v13305_v34, 16  ;;  %v4153_v33 = vrot.slane %v4151_v9, 1  ;;  %6858 = vrot.lane.b32.xlu0 %v6750_v29, %s10684_s8 }
 0x4d3   : > { %v6784_v8 = vrot.slane %v16733_v48, 2  ;;  %v13896_v35 = vrot.slane %v16734_v2, 1  ;;  %v3988_v41 = vsel %vm1005_vm5, %v16736_v1, %v3812_v14  ;;  %v4139_v44 = vshrl.u32 %v4040_v18, 16  ;;  %v13917_v9 = vld [vmem:[#allocation2 + $0xbc] ss:$0 sps:$4 sm:$0x33]   ;;  %v13920_v14 = vpop.permute.xlu1 %4714 }
 0x4d4   : > { %v6788_v47 = vrot.slane %v16735_v6, 2  ;;  %v4143_v19 = vrot.slane %v4141_v17, 1  ;;  %v4052_v58 = vsel %vm16509_vm6, %v3988_v41, %v13644_v59  ;;  %v6780_v51 = vor.u32 %v6779_v57, %v13864_v16  ;;  %v3808_v59 = vpop.permute.xlu0 %3807  ;;  %v16738_v57 = vld [vmem:[#allocation18_spill] sm:$0xff]  ;;  %v16740_v1 = vld [vmem:[#allocation9_spill] sm:$0xff]  ;;  %6620 = vrot.lane.b32.xlu1 %v13801_v32, %s10683_s7 }
 0x4d5   : > { %v6792_v34 = vrot.slane %v6790_v15, 1  ;;  %v16737_v50 = vshll.u32 %v13335_v62, 16  ;;  %v4154_v48 = vor.u32 %v4153_v33, %v4149_v37  ;;  %v4171_v2 = vshll.u32 %v4052_v58, 16  ;;  %v16739_v15 = vld [vmem:[#allocation43_spill] sm:$0xff] }
 0x4d6   : > { %v4144_v18 = vor.u32 %v4143_v19, %v4139_v44  ;;  %v6925_v17 = vrot.slane %v13755_v26, 2  ;;  %v6785_v6 = vor.u32 %v6784_v8, %v6783_v55  ;;  %v6789_v12 = vor.u32 %v6788_v47, %v13896_v35  ;;  %v13937_v8 = vld [vmem:[%s16411_s5 + $0xc] sm:$0xff]   ;;  %v16741_v47 = vld [vmem:[#allocation45_spill] sm:$0xff]  ;;  %6622 = vrot.lane.b32.xlu0 %v13855_v40, %s10683_s7 }
 0x4d7   : > { %v6793_v21 = vrot.slane %v16737_v50, 2  ;;  %v6924_v29 = vrot.slane %v13744_v4, 2  ;;  %v16505_v16 = vshrl.u32 %v13905_v39, 16  ;;  %v3984_v62 = vsel %vm1005_vm5, %v16738_v57, %v3808_v59 }
 0x4d8   : > { %v13929_v37 = vsel %vm441_vm2, %v4144_v18, %v16739_v15  ;;  %v16504_v33 = vshll.u32 %v13905_v39, 16  ;;  %v4748_v41 = vsel %vm16508_vm0, %v16740_v1, 0  ;;  %v4173_v35 = vrot.slane %v4171_v2, 1  ;;  %v3816_v57 = vpop.permute.xlu0 %3815  ;;  %6860 = vrot.lane.b32.xlu1 %v13845_v20, %s10684_s8 }
 0x4d9   : > { %v4048_v55 = vsel %vm16509_vm6, %v3984_v62, %v13614_v63  ;;  %9929 = vmatprep.mubr.msk.bf16.mxu1 %vm1071_vm7, %v13929_v37  ;;  %v13947_v44 = vsel %vm441_vm2, %v4154_v48, %v16741_v47  ;;  %v16506_v19 = vshll.u32 %v13917_v9, 16  ;;  %v6794_v32 = vor.u32 %v6793_v21, %v6792_v34  ;;  %v3824_v48 = vpop.permute.xlu1 %3823  ;;  %v16744_v34 = vld [vmem:[#allocation23_spill] sm:$0xff]  ;;  %v16745_v47 = vld [vmem:[#allocation30_spill] sm:$0xff] }
 0x4da   : > { %v4161_v50 = vshll.u32 %v4048_v55, 16  ;;  %9930 = vmatmul.mubr.msk.bf16.vlgmr.msra.gmra.mrb[0].mxu1 %vm1071_vm7, %v13947_v44  ;;  %v13955_v2 = vsel %vm16508_vm0, %v6924_v29, %v6925_v17  ;;  %v16742_v63 = vshrl.u32 %v13381_v30, 16  ;;  %v4169_v59 = vshrl.u32 %v4052_v58, 16  ;;  %6862 = vrot.lane.b32.xlu0 %v13868_v22, %s10684_s8 }
 0x4db   : > { %v6786_v62 = vsel %vm16507_vm3, %v6780_v51, %v6785_v6  ;;  %v16743_v15 = vshll.u32 %v13381_v30, 16  ;;  %v6799_v40 = vshrl.u32 %v16688_v28, 16  ;;  %9950 = vmatpush3.bf16.msra.mxu1 %v4748_v41  ;;  %v4000_v21 = vsel %vm1005_vm5, %v16744_v34, %v3824_v48  ;;  %v16747_v34 = vld [vmem:[#allocation21_spill] sm:$0xff] }
 0x4dc   : > { %v13959_v18 = vrot.slane %v16742_v63, 1  ;;  %v4159_v17 = vshrl.u32 %v4048_v55, 16  ;;  %v4163_v29 = vrot.slane %v4161_v50, 1  ;;  %v3992_v63 = vsel %vm1005_vm5, %v16745_v47, %v3816_v57  ;;  %9983 = vmatprep.subr.bf16.mxu1 %v13937_v8  ;;  %6700 = vrot.lane.b32.xlu1 %v13858_v52, %s10682_s30 }
 0x4dd   : > { %v13964_v1 = vrot.slane %v16743_v15, 2  ;;  %v4174_v58 = vor.u32 %v4173_v35, %v4169_v59  ;;  %v4064_v51 = vsel %vm16509_vm6, %v4000_v21, %v13775_v11  ;;  %v4056_v30 = vsel %vm16509_vm6, %v3992_v63, %v13746_v45  ;;  %v13987_v35 = vpop.permute.xlu1 %4709  ;;  %v3820_v59 = vpop.permute.xlu0 %3819 }
 0x4de   : > { %v6587_v6 = vrot.slane %v16504_v33, 1  ;;  %v4201_v41 = vshll.u32 %v4064_v51, 16  ;;  %v4164_v55 = vor.u32 %v4163_v29, %v4159_v17  ;;  %v13983_v50 = vsel %vm16507_vm3, %v6789_v12, %v6794_v32  ;;  %6702 = vrot.lane.b32.xlu0 %v13876_v5, %s10682_s30 }
 0x4df   : > { %v6592_v11 = vrot.slane %v16506_v19, 1  ;;  %v4181_v20 = vshll.u32 %v4056_v30, 16  ;;  %v6798_v45 = vor.u32 %v13964_v1, %v13959_v18  ;;  %v16746_v48 = vshll.u32 %v16688_v28, 16  ;;  %v16749_v18 = vld [vmem:[#allocation48_spill] sm:$0xff]  ;;  %v14014_v1 = vld [vmem:[#allocation2 + $0xc0] sm:$0xff]  }
 0x4e0   : > { %v6808_v15 = vshrl.u32 %v16685_v56, 16  ;;  %v3996_v22 = vsel %vm1005_vm5, %v16747_v34, %v3820_v59  ;;  %v13998_v12 = vsel %vm441_vm2, %v4164_v55, %v13473_v38  ;;  %v6801_v32 = vrot.slane %v6799_v40, 1  ;;  %v14024_v55 = vld [vmem:[#allocation2 + $0xc8] ss:$0 sps:$4 sm:$0x33]   ;;  %6864 = vrot.lane.b32.xlu1 %v13901_v54, %s10684_s8 }
 0x4e1   : > { %v6802_v57 = vrot.slane %v16746_v48, 2  ;;  %v16748_v21 = vshrl.u32 %v13390_v13, 16  ;;  %v4179_v29 = vshrl.u32 %v4056_v30, 16  ;;  %v4183_v47 = vrot.slane %v4181_v20, 1  ;;  %9933 = vmatprep.mubr.msk.bf16.mxu1 %vm1071_vm7, %v13998_v12  ;;  %v3784_v20 = vpop.permute.xlu1 %3783  ;;  %v14026_v59 = vpop.permute.xlu0 %4265 }
 0x4e2   : > { %v4060_v28 = vsel %vm16509_vm6, %v3996_v22, %v13678_v31  ;;  %v14012_v38 = vsel %vm441_vm2, %v4174_v58, %v16749_v18  ;;  %v4203_v40 = vrot.slane %v4201_v41, 1  ;;  %v6588_v31 = vor.u32 %v6587_v6, %v16505_v16  ;;  %6866 = vrot.lane.b32.xlu0 %v6786_v62, %s10684_s8 }
 0x4e3   : > { %v14002_v17 = vrot.slane %v16748_v21, 1  ;;  %v4191_v63 = vshll.u32 %v4060_v28, 16  ;;  %9934 = vmatmul.mubr.msk.bf16.gmra.mrb[4].mxu1 %vm1071_vm7, %v14012_v38  ;;  %v16750_v52 = vshll.u32 %v13390_v13, 16  ;;  %v4184_v58 = vor.u32 %v4183_v47, %v4179_v29  ;;  %v16752_v13 = vld [vmem:[#allocation50_spill] sm:$0xff] }
 0x4e4   : > { %v6810_v41 = vrot.slane %v6808_v15, 1  ;;  %v16751_v48 = vshll.u32 %v16685_v56, 16  ;;  %v6671_v5 = vrot.slane %v13905_v39, 1  ;;  %v4199_v22 = vshrl.u32 %v4064_v51, 16  ;;  %6956 = vrot.lane.b32.xlu1 %v13879_v53, %s10681_s29 }
 0x4e5   : > { %v6806_v30 = vrot.slane %v16750_v52, 2  ;;  %v4189_v21 = vshrl.u32 %v4060_v28, 16  ;;  %v4193_v18 = vrot.slane %v4191_v63, 1  ;;  %v6672_v6 = vrot.slane %v13917_v9, 1  ;;  %v3788_v28 = vpop.permute.xlu1 %3787  ;;  %v3828_v63 = vpop.permute.xlu0 %3827 }
 0x4e6   : > { %v6811_v34 = vrot.slane %v16751_v48, 2  ;;  %v14036_v29 = vsel %vm441_vm2, %v4184_v58, %v16752_v13  ;;  %v6803_v47 = vor.u32 %v6802_v57, %v6801_v32  ;;  %v7102_v15 = vshrl.u32 %v14014_v1, 16  ;;  %6958 = vrot.lane.b32.xlu0 %v13955_v2, %s10681_s29 }
 0x4e7   : > { %v7104_v56 = vshll.u32 %v14014_v1, 16  ;;  %v4204_v52 = vor.u32 %v4203_v40, %v4199_v22  ;;  %v4194_v48 = vor.u32 %v4193_v18, %v4189_v21  ;;  %9937 = vmatprep.mubr.msk.bf16.mxu1 %vm1071_vm7, %v14036_v29  ;;  %v7109_v51 = vshll.u32 %v14024_v55, 16  ;;  %v16754_v22 = vld [vmem:[#allocation27_spill] sm:$0xff]  ;;  %v16755_v18 = vld [vmem:[#allocation28_spill] sm:$0xff] }
 0x4e8   : > { %v6817_v54 = vshrl.u32 %v13426_v25, 16  ;;  %v6593_v58 = vsel %vm441_vm2, %v6588_v31, %v6592_v11  ;;  %v6807_v57 = vor.u32 %v6806_v30, %v14002_v17  ;;  %v6812_v32 = vor.u32 %v6811_v34, %v6810_v41  ;;  %6868 = vrot.lane.b32.xlu1 %v13983_v50, %s10684_s8 }
 0x4e9   : > { %v16753_v13 = vshrl.u32 %v13438_v49, 16  ;;  %v3960_v21 = vsel %vm1005_vm5, %v16754_v22, %v3784_v20  ;;  %v4004_v62 = vsel %vm1005_vm5, %v16755_v18, %v3828_v63  ;;  %v14055_v33 = vsel %vm441_vm2, %v4194_v48, %v16756_v3  ;;  %v16760_v20 = vld [vmem:[#allocation20_spill] sm:$0xff]  ;;  %v3792_v34 = vpop.permute.xlu1 %3791  ;;  %v16762_v48 = vld [vmem:[#allocation29_spill] sm:$0xff] }
 0x4ea   : > { %v16757_v16 = vshll.u32 %v13438_v49, 16  ;;  %v4068_v11 = vsel %vm16509_vm6, %v4004_v62, %v13805_v7  ;;  %v6804_v17 = vsel %vm16507_vm3, %v6798_v45, %v6803_v47  ;;  %v6673_v31 = vsel %vm666_vm1, %v6671_v5, %v6672_v6  ;;  %v16758_v49 = vld [vmem:[#allocation47_spill] sm:$0xff]  ;;  %v3832_v5 = vpop.permute.xlu0 %3831 }
 0x4eb   : > { %v6814_v40 = vrot.slane %v16753_v13, 1  ;;  %v7106_v30 = vrot.slane %v7104_v56, 1  ;;  %9938 = vmatmul.mubr.msk.bf16.gmra.mrb[8].mxu1 %vm1071_vm7, %v14055_v33  ;;  %v14073_v3 = vsel %vm441_vm2, %v4204_v52, %v16758_v49  ;;  %v14077_v7 = vrot.slane %v7109_v51, 1  ;;  %6870 = vrot.lane.b32.xlu0 %v6804_v17, %s10684_s8  ;;  %v16765_v49 = vld [vmem:[#allocation32_spill] sm:$0xff]  ;;  %v16767_v17 = vld [vmem:[#allocation25_spill] sm:$0xff] }
 0x4ec   : > { %v6815_v19 = vrot.slane %v16757_v16, 2  ;;  %v6819_v53 = vrot.slane %v6817_v54, 1  ;;  %v16759_v16 = vshll.u32 %v13426_v25, 16  ;;  %v4024_v41 = vsel %vm16509_vm6, %v3960_v21, %v16760_v20  ;;  %9941 = vmatprep.mubr.msk.bf16.mxu1 %vm1071_vm7, %v14073_v3  ;;  %6624 = vrot.lane.b32.xlu1 %v6593_v58, %s10683_s7 }
 0x4ed   : > { %v4211_v2 = vshll.u32 %v4068_v11, 16  ;;  %v6813_v6 = vsel %vm16507_vm3, %v6807_v57, %v6812_v32  ;;  %v16761_v47 = vshrl.u32 %v13688_v23, 16  ;;  %v4008_v54 = vsel %vm1005_vm5, %v16762_v48, %v3832_v5  ;;  %v3796_v20 = vpop.permute.xlu1 %3795 }
 0x4ee   : > { %v6820_v45 = vrot.slane %v16759_v16, 2  ;;  %v6816_v25 = vor.u32 %v6815_v19, %v6814_v40  ;;  %v16763_v63 = vshll.u32 %v13688_v23, 16  ;;  %v6826_v22 = vshrl.u32 %v13709_v27, 16 }
 0x4ef   : > { %v14088_v52 = vrot.slane %v16761_v47, 1  ;;  %v4209_v21 = vshrl.u32 %v4068_v11, 16  ;;  %v4213_v18 = vrot.slane %v4211_v2, 1  ;;  %v4072_v57 = vsel %vm16509_vm6, %v4008_v54, %v13834_v43  ;;  %v3836_v43 = vpop.permute.xlu0 %3835  ;;  %6704 = vrot.lane.b32.xlu0 %v6673_v31, %s10682_s30 }
 0x4f0   : > { %v14094_v13 = vrot.slane %v16763_v63, 2  ;;  %v7107_v32 = vor.u32 %v7106_v30, %v7102_v15  ;;  %v4101_v62 = vshll.u32 %v4024_v41, 16  ;;  %v6821_v19 = vor.u32 %v6820_v45, %v6819_v53  ;;  %v16766_v30 = vld [vmem:[#allocation33_spill] sm:$0xff]  ;;  %6872 = vrot.lane.b32.xlu1 %v6813_v6, %s10684_s8 }
 0x4f1   : > { %v16764_v23 = vshll.u32 %v13709_v27, 16  ;;  %v6927_v11 = vrot.slane %v13905_v39, 2  ;;  %v3964_v16 = vsel %vm1005_vm5, %v16765_v49, %v3788_v28  ;;  %v4214_v50 = vor.u32 %v4213_v18, %v4209_v21  ;;  %v16768_v28 = vld [vmem:[#allocation12_spill] sm:$0xff]  ;;  %v16769_v21 = vld [vmem:[#allocation10_spill] sm:$0xff] }
 0x4f2   : > { %v4221_v2 = vshll.u32 %v4072_v57, 16  ;;  %v6928_v5 = vrot.slane %v13917_v9, 2  ;;  %v3968_v47 = vsel %vm1005_vm5, %v16766_v30, %v3792_v34  ;;  %v4012_v53 = vsel %vm1005_vm5, %v16767_v17, %v3836_v43  ;;  %v16770_v34 = vld [vmem:[#allocation24_spill] sm:$0xff] }
 0x4f3   : > { %v14106_v40 = vrot.slane %v16764_v23, 2  ;;  %v14116_v27 = vrot.slane %v6826_v22, 1  ;;  %v6835_v45 = vshrl.u32 %v13755_v26, 16  ;;  %v4219_v48 = vshrl.u32 %v4072_v57, 16  ;;  %v14138_v43 = vpop.permute.xlu0 %4272 }
 0x4f4   : > { %v4223_v54 = vrot.slane %v4221_v2, 1  ;;  %v4076_v63 = vsel %vm16509_vm6, %v4012_v53, %v16768_v28  ;;  %v14124_v18 = vsel %vm441_vm2, %v4214_v50, %v16769_v21  ;;  %v4103_v23 = vrot.slane %v4101_v62, 1  ;;  %v14136_v50 = vpop.permute.xlu1 %4263 }
 0x4f5   : > { %v4028_v49 = vsel %vm16509_vm6, %v3964_v16, %v16770_v34  ;;  %9942 = vmatmul.mubr.msk.bf16.gmra.mrb[12].mxu1 %vm1071_vm7, %v14124_v18  ;;  %v6822_v22 = vsel %vm16507_vm3, %v6816_v25, %v6821_v19  ;;  %v6832_v58 = vrot.slane %v6571_v61, 1  ;;  %v4032_v57 = vsel %vm16509_vm6, %v3968_v47, %v13807_v36 }
 0x4f6   : > { %v4224_v2 = vor.u32 %v4223_v54, %v4219_v48  ;;  %v4231_v62 = vshll.u32 %v4076_v63, 16  ;;  %v16771_v16 = vshll.u32 %v13744_v4, 16  ;;  %v4099_v30 = vshrl.u32 %v4024_v41, 16  ;;  %6874 = vrot.lane.b32.xlu0 %v6822_v22, %s10684_s8 }
 0x4f7   : > { %v6837_v17 = vrot.slane %v6835_v45, 1  ;;  %v6838_v25 = vrot.slane %v6578_v0, 2  ;;  %v6844_v19 = vshrl.u32 %v13917_v9, 16  ;;  %v4111_v61 = vshll.u32 %v4028_v49, 16  ;;  %v16772_v0 = vld [vmem:[#allocation34_spill] sm:$0xff] }
 0x4f8   : > { %v6833_v31 = vrot.slane %v16771_v16, 2  ;;  %v4229_v53 = vshrl.u32 %v4076_v63, 16  ;;  %v4233_v28 = vrot.slane %v4231_v62, 1  ;;  %v14148_v36 = vsel %vm441_vm2, %v4224_v2, %v13789_v10  ;;  %v14159_v45 = vpop.permute.xlu1 %4707  ;;  %v14161_v10 = vpop.permute.xlu0 %4716 }
 0x4f9   : > { %v4104_v47 = vor.u32 %v4103_v23, %v4099_v30  ;;  %v4121_v48 = vshll.u32 %v4032_v57, 16  ;;  %v7112_v4 = vsel %vm441_vm2, %v7107_v32, %v14077_v7  ;;  %9945 = vmatprep.mubr.msk.bf16.mxu1 %vm1071_vm7, %v14148_v36  ;;  %v6825_v26 = vor.u32 %v14094_v13, %v14088_v52  ;;  %v16773_v13 = vld [vmem:[#allocation49_spill] sm:$0xff] }
 0x4fa   : > { %v3972_v41 = vsel %vm1005_vm5, %v16772_v0, %v3796_v20  ;;  %v4234_v6 = vor.u32 %v4233_v28, %v4229_v53  ;;  %v7116_v54 = vrot.slane %v14024_v55, 1  ;;  %v7123_v7 = vshrl.u32 %v14024_v55, 16  ;;  %7113 = vrot.lane.b32.xlu1 %v7112_v4, %s10683_s7  ;;  %v16777_v4 = vld [vmem:[#allocation11_spill] sm:$0xff] }
 0x4fb   : > { %v6830_v32 = vor.u32 %v14106_v40, %v14116_v27  ;;  %v6929_v63 = vsel %vm16508_vm0, %v6927_v11, %v6928_v5  ;;  %v6834_v21 = vor.u32 %v6833_v31, %v6832_v58  ;;  %v6839_v23 = vor.u32 %v6838_v25, %v6837_v17  ;;  %v14188_v5 = vld [vmem:[#allocation2] sm:$0xff]  }
 0x4fc   : > { %v4113_v52 = vrot.slane %v4111_v61, 1  ;;  %v14171_v20 = vsel %vm441_vm2, %v4234_v6, %v16773_v13  ;;  %v6846_v34 = vrot.slane %v6844_v19, 1  ;;  %v16774_v22 = vshll.u32 %v13917_v9, 16  ;;  %6960 = vrot.lane.b32.xlu0 %v6929_v63, %s10681_s29  ;;  %v14190_v27 = vpop.permute.xlu1 %6676  ;;  %v14205_v61 = vld [vmem:[#allocation2 + $0x8] ss:$0 sps:$4 sm:$0x33]  }
 0x4fd   : > { %v4123_v62 = vrot.slane %v4121_v48, 1  ;;  %v14177_v16 = vsel %vm16509_vm6, %v3972_v41, %v13836_v46  ;;  %9946 = vmatmul.mubr.msk.bf16.gmra.mrb[16].mxu1 %vm1071_vm7, %v14171_v20  ;;  %v14184_v40 = vsel %vm441_vm2, %v4104_v47, %v13849_v60  ;;  %v7126_v11 = vrot.slane %v7109_v51, 2  ;;  %v14194_v46 = vpop.permute.xlu0 %6678  ;;  %v16779_v41 = vld [vmem:[#allocation46_spill] sm:$0xff] }
 0x4fe   : > { %v6847_v2 = vrot.slane %v16774_v22, 2  ;;  %v4109_v9 = vshrl.u32 %v4028_v49, 16  ;;  %9951 = vmatprep.mubr.msk.bf16.mxu1 %vm1071_vm7, %v14184_v40  ;;  %v7125_v58 = vrot.slane %v7123_v7, 1  ;;  %v16775_v31 = vshrl.u32 %v13905_v39, 16 }
 0x4ff   : > { %v16776_v60 = vshll.u32 %v13905_v39, 16  ;;  %v4119_v25 = vshrl.u32 %v4032_v57, 16  ;;  %v6831_v51 = vsel %vm16507_vm3, %v6825_v26, %v6830_v32  ;;  %v7120_v49 = vrot.slane %v7102_v15, 1  ;;  %v16778_v57 = vld [vmem:[#allocation14_spill] sm:$0xff] }
 0x500   : > { %v6841_v30 = vrot.slane %v16775_v31, 1  ;;  %v7121_v19 = vrot.slane %v7104_v56, 2  ;;  %v4114_v53 = vor.u32 %v4113_v52, %v4109_v9  ;;  %v4131_v28 = vshll.u32 %v14177_v16, 16  ;;  %6876 = vrot.lane.b32.xlu1 %v6831_v51, %s10684_s8  ;;  %v14220_v63 = vpop.permute.xlu1 %6932  ;;  %v16781_v31 = vld [vmem:[#allocation15_spill] sm:$0xff] }
 0x501   : > { %v6842_v17 = vrot.slane %v16776_v60, 2  ;;  %v6840_v47 = vsel %vm16507_vm3, %v6834_v21, %v6839_v23  ;;  %v6848_v48 = vor.u32 %v6847_v2, %v6846_v34  ;;  %v3974_v26 = vsel %vm1005_vm5, %v16778_v57, %v16777_v4  ;;  %v14222_v21 = vpop.permute.xlu0 %6934 }
 0x502   : > { %v4124_v0 = vor.u32 %v4123_v62, %v4119_v25  ;;  %v7115_v15 = vrot.slane %v14014_v1, 1  ;;  %6878 = vrot.lane.b32.xlu0 %v6840_v47, %s10684_s8  ;;  %v6405_v56 = vshll.u32 %v14188_v5, 16  ;;  %v4038_v6 = vsel %vm16509_vm6, %v3974_v26, %v16779_v41  ;;  %v10616_v62 = vld [vmem:[%s16411_s5 + $0x14] ss:$0 sps:$4 sm:$0x33]  }
 0x503   : > { %v16780_v7 = vshll.u32 %v13842_v24, 16  ;;  %v7127_v23 = vor.u32 %v7126_v11, %v7125_v58  ;;  %v6843_v52 = vor.u32 %v6842_v17, %v6841_v30  ;;  %v7122_v34 = vor.u32 %v7121_v19, %v7120_v49 }
 0x504   : > { %v7117_v13 = vsel %vm666_vm1, %v7115_v15, %v7116_v54  ;;  %v6410_v22 = vshll.u32 %v14205_v61, 16  ;;  %v6709_v2 = vshrl.u32 %v14205_v61, 16  ;;  %v4133_v9 = vrot.slane %v4131_v28, 1  ;;  %v14245_v51 = vpop.permute.xlu1 %6680 }
 0x505   : > { %v4127_v32 = vrot.slane %v16780_v7, 1  ;;  %7118 = vrot.lane.b32.xlu1 %v7117_v13, %s10682_s30  ;;  %v6849_v24 = vsel %vm16507_vm3, %v6843_v52, %v6848_v48  ;;  %v14234_v11 = vsel %vm441_vm2, %v4114_v53, %v16781_v31  ;;  %v7132_v54 = vrot.slane %v14024_v55, 2  ;;  %v14250_v55 = vpop.permute.xlu0 %6682  ;;  %v14259_v48 = vld [vmem:[%s16411_s5] sm:$0xff]  }
 0x506   : > { %6880 = vrot.lane.b32.xlu0 %v6849_v24, %s10684_s8  ;;  %9952 = vmatmul.mubr.msk.bf16.vlgmr.msra.gmra.mrb[20].mxu1 %vm1071_vm7, %v14234_v11  ;;  %v6403_v30 = vshrl.u32 %v14188_v5, 16  ;;  %v6407_v60 = vrot.slane %v6405_v56, 1  ;;  %v4135_v17 = vshll.u32 %v4038_v6, 16  ;;  %v4129_v25 = vshrl.u32 %v14177_v16, 16 }
 0x507   : > { %v14241_v58 = vsel %vm441_vm2, %v4124_v0, %v4127_v32  ;;  %v7128_v49 = vsel %vm16507_vm3, %v7122_v34, %v7127_v23  ;;  %v7131_v19 = vrot.slane %v14014_v1, 2  ;;  %9984 = vmatpush3.bf16.msra.mxu1 %v13937_v8  ;;  %v6412_v53 = vrot.slane %v6410_v22, 1 }
 0x508   : > { %9955 = vmatprep.mubr.msk.bf16.mxu1 %vm1071_vm7, %v14241_v58  ;;  %v6711_v28 = vrot.slane %v6709_v2, 1  ;;  %v6712_v47 = vrot.slane %v6410_v22, 2  ;;  %10494 = vmatprep.subr.msk.bf16.mxu1 %vm1237_vm4, %v10616_v62  ;;  %v7190_v16 = vsel %vm1237_vm4, %v10616_v62, 0  ;;  %v4134_v4 = vor.u32 %v4133_v9, %v4129_v25  ;;  %v14265_v6 = vpop.permute.xlu1 %6936 }
 0x509   : > { %7129 = vrot.lane.b32.xlu1 %v7128_v49, %s10684_s8  ;;  %v7133_v57 = vsel %vm16508_vm0, %v7131_v19, %v7132_v54  ;;  %v6627_v26 = vrot.slane %v14205_v61, 1  ;;  %v6408_v8 = vor.u32 %v6407_v60, %v6403_v30  ;;  %v6706_v0 = vrot.slane %v6403_v30, 1  ;;  %v14267_v7 = vpop.permute.xlu0 %6938  ;;  %v16782_v30 = vld [vmem:[#allocation4_spill] sm:$0xff]  ;;  %v16783_v60 = vld [vmem:[#allocation5_spill] sm:$0xff]  ;;  %v16785_v19 = vld [vmem:[#allocation6_spill] sm:$0xff] }
 0x50a   : > { %7134 = vrot.lane.b32.xlu0 %v7133_v57, %s10681_s29  ;;  %v6707_v15 = vrot.slane %v6405_v56, 2  ;;  %v4137_v41 = vrot.slane %v4135_v17, 1  ;;  %v6626_v32 = vrot.slane %v14188_v5, 1  ;;  %v6713_v52 = vor.u32 %v6712_v47, %v6711_v28 }
 0x50b   : > { %9986 = vmatpush3.bf16.msra.mxu1 %v7190_v16  ;;  %v6413_v23 = vsel %vm441_vm2, %v6408_v8, %v6412_v53  ;;  %v6883_v56 = vrot.slane %v14205_v61, 2  ;;  %v6882_v9 = vrot.slane %v14188_v5, 2  ;;  %v16784_v17 = vrot.slane %v16783_v60, 4 }
 0x50c   : > { %10019 = vmatprep.subr.bf16.mxu1 %v14259_v48  ;;  %v6628_v13 = vsel %vm666_vm1, %v6626_v32, %v6627_v26  ;;  %v14275_v34 = vsel %vm441_vm2, %v4134_v4, %v4137_v41  ;;  %v6708_v22 = vor.u32 %v6707_v15, %v6706_v0  ;;  %v14281_v2 = vpop.permute.xlu1 %6684  ;;  %v10655_v26 = vld [vmem:[#allocation2 + $0xcc] sm:$0xff]   ;;  %v10656_v32 = vld [vmem:[#allocation2 + $0xd4] ss:$0 sps:$4 sm:$0x33]  }
 0x50d   : > { %6594 = vrot.lane.b32.xlu1 %v6413_v23, %s10683_s7  ;;  %v14285_v62 = vpop.permute.xlu0 %6686  ;;  %v6884_v61 = vsel %vm16508_vm0, %v6882_v9, %v6883_v56  ;;  %v4275_v8 = vsel %vm1005_vm5, %v10655_v26, %v14136_v50  ;;  %v4277_v23 = vsel %vm1005_vm5, %v10656_v32, %v14026_v59  ;;  %v16786_v50 = vld [vmem:[#allocation35_spill] sm:$0xff] }
 0x50e   : > { %6674 = vrot.lane.b32.xlu0 %v6628_v13, %s10682_s30  ;;  %9956 = vmatmul.mubr.msk.bf16.gmra.mrb[24].mxu1 %vm1071_vm7, %v14275_v34  ;;  %v6714_v24 = vsel %vm16507_vm3, %v6708_v22, %v6713_v52  ;;  %v4279_v0 = vsel %vm16509_vm6, %v4275_v8, %v13898_v42  ;;  %v4719_v13 = vsel %vm1005_vm5, %v16786_v50, %v14159_v45  ;;  %v16787_v45 = vld [vmem:[#allocation39_spill] sm:$0xff]  ;;  %vm16790_vm3 = vcmask 162816  }
 0x50f   : > { %9959 = vmatprep.mubr.msk.bf16.mxu1 %vm1071_vm7, %v13929_v37  ;;  %v4284_v52 = vshll.u32 %v4279_v0, 16  ;;  %v4281_v56 = vsel %vm16509_vm6, %v4277_v23, %v14138_v43  ;;  %v4282_v60 = vshrl.u32 %v4279_v0, 16  ;;  %v4721_v43 = vsel %vm1005_vm5, %v16787_v45, %v13987_v35  ;;  %vm16791_vm0 = vmmov %vm16790_vm3 }
 0x510   : > { %v14292_v31 = vpop.permute.xlu1 %6940 }
 0x511   : > { %6850 = vrot.lane.b32.xlu1 %v6714_v24, %s10684_s8  ;;  %v14294_v54 = vpop.permute.xlu0 %6942  ;;  %v4286_v9 = vrot.slane %v4284_v52, 1  ;;  %v4723_v24 = vsel %vm16509_vm6, %v4719_v13, %v13920_v14  ;;  %v4725_v14 = vsel %vm16509_vm6, %v4721_v43, %v14161_v10  ;;  %v10657_v43 = vld [vmem:[#allocation2 + $0xc] sm:$0xff]  }
 0x512   : > { %6930 = vrot.lane.b32.xlu0 %v6884_v61, %s10681_s29  ;;  %v4288_v61 = vshll.u32 %v4281_v56, 16  ;;  %v4732_v52 = vshll.u32 %v4725_v14, 16  ;;  %v4726_v0 = vshrl.u32 %v4723_v24, 16 }
 0x514   : > { %v14303_v25 = vpop.permute.xlu1 %6688  ;;  %v4290_v26 = vrot.slane %v4288_v61, 1  ;;  %v4734_v10 = vrot.slane %v4732_v52, 1 }
 0x515   : > { %5475 = vrot.lane.b32.xlu1 %v16782_v30, %s10685_s11  ;;  %v14307_v49 = vpop.permute.xlu0 %6690 }
 0x516   : > { %5479 = vrot.lane.b32.xlu0 %v16784_v17, %s10685_s11  ;;  %9960 = vmatmul.mubr.msk.bf16.gmra.mrb[28].mxu1 %vm1071_vm7, %v13947_v44  ;;  %v4728_v17 = vshll.u32 %v4723_v24, 16 }
 0x517   : > { %9963 = vmatprep.mubr.msk.bf16.mxu1 %vm1071_vm7, %v13998_v12 }
 0x518   : > { %v14311_v53 = vpop.permute.xlu1 %6944  ;;  %v4730_v23 = vrot.slane %v4728_v17, 1 }
 0x519   : > { %5477 = vrot.lane.b32.xlu1 %v16785_v19, %s10685_s11  ;;  %v14313_v28 = vpop.permute.xlu0 %6946  ;;  %v4287_v19 = vor.u32 %v4286_v9, %v4282_v60 }
 0x51a   : > { %v4731_v56 = vor.u32 %v4730_v23, %v4726_v0 }
 0x51b   : > { %v14360_v50 = vsel %vm441_vm2, %v4287_v19, %v4290_v26  ;;  %v10658_v19 = vld [vmem:[#allocation2 + $0x18] sm:$0xff]  }
 0x51c   : > { %v14317_v47 = vpop.permute.xlu1 %6692  ;;  %v4735_v60 = vsel %vm441_vm2, %v4731_v56, %v4734_v10 }
 0x51d   : > { %v14321_v16 = vpop.permute.xlu0 %6694 }
 0x51e   : > { %9964 = vmatmul.mubr.msk.bf16.gmra.mrb[0].mxu1 %vm1071_vm7, %v14012_v38 }
 0x51f   : > { %9967 = vmatprep.mubr.msk.bf16.mxu1 %vm1071_vm7, %v14036_v29 }
 0x520   : > { %v14323_v4 = vpop.permute.xlu1 %6948 }
 0x521   : > { %v14325_v57 = vpop.permute.xlu0 %6950 }
 0x524   : > { %v14333_v15 = vpop.permute.xlu1 %6696 }
 0x525   : > { %v14337_v41 = vpop.permute.xlu0 %6698 }
 0x526   : > { %9968 = vmatmul.mubr.msk.bf16.gmra.mrb[4].mxu1 %vm1071_vm7, %v14055_v33 }
 0x527   : > { %9971 = vmatprep.mubr.msk.bf16.mxu1 %vm1071_vm7, %v14073_v3 }
 0x528   : > { %v6597_v42 = vpop.permute.xlu1 %6596 }
 0x529   : > { %v6599_v22 = vpop.permute.xlu0 %6598  ;;  %v6965_v17 = vsel %vm1005_vm5, %v10657_v43, %v6597_v42 }
 0x52a   : > { %v6967_v26 = vsel %vm1005_vm5, %v10658_v19, %v6599_v22  ;;  %v6997_v14 = vsel %vm16509_vm6, %v6965_v17, %v14190_v27  ;;  %v10618_v27 = vld [vmem:[%s16411_s5 + $0x8] ss:$0 sps:$4 sm:$0x33]   ;;  %v10660_v17 = vld [vmem:[#allocation2 + $0x30] sm:$0xff]  }
 0x52b   : > { %v6999_v52 = vsel %vm16509_vm6, %v6967_v26, %v14194_v46  ;;  %v7365_v19 = vsel %vm1237_vm4, %v10618_v27, 0  ;;  %v14413_v26 = vld [vmem:[%s16411_s5 + $0x18] sm:$0xff]  }
 0x52c   : > { %v6601_v30 = vpop.permute.xlu1 %6600 }
 0x52d   : > { %v6603_v59 = vpop.permute.xlu0 %6602 }
 0x52e   : > { %9972 = vmatmul.mubr.msk.bf16.gmra.mrb[8].mxu1 %vm1071_vm7, %v14124_v18 }
 0x52f   : > { %9975 = vmatprep.mubr.msk.bf16.mxu1 %vm1071_vm7, %v14148_v36 }
 0x530   : > { %v6605_v8 = vpop.permute.xlu1 %6604 }
 0x531   : > { %v6607_v32 = vpop.permute.xlu0 %6606 }
 0x534   : > { %v14362_v13 = vpop.permute.xlu1 %6608 }
 0x535   : > { %v14366_v35 = vpop.permute.xlu0 %6610 }
 0x536   : > { %9976 = vmatmul.mubr.msk.bf16.gmra.mrb[12].mxu1 %vm1071_vm7, %v14171_v20 }
 0x537   : > { %9979 = vmatprep.mubr.msk.bf16.mxu1 %vm1071_vm7, %v14360_v50 }
 0x538   : > { %v14368_v9 = vpop.permute.xlu1 %6612 }
 0x539   : > { %v14370_v61 = vpop.permute.xlu0 %6614 }
 0x53c   : > { %v14374_v45 = vpop.permute.xlu1 %6616 }
 0x53d   : > { %v14376_v24 = vpop.permute.xlu0 %6618 }
 0x53e   : > { %9980 = vmatmul.mubr.msk.bf16.gmra.mrb[16].mxu1 %vm1071_vm7, %v4735_v60 }
 0x540   : > { %v6853_v23 = vpop.permute.xlu1 %6852 }
 0x541   : > { %v6855_v0 = vpop.permute.xlu0 %6854  ;;  %v7029_v56 = vsel %vm1071_vm7, %v6997_v14, %v6853_v23 }
 0x542   : > { %v7031_v10 = vsel %vm1071_vm7, %v6999_v52, %v6855_v0  ;;  %v14388_v60 = vsel %vm16788_vm11, %v7029_v56, %v14220_v63  ;;  %v10659_v63 = vld [vmem:[#allocation2 + $0x24] sm:$0xff]   ;;  %vm16794_vm11 = vcmask 162816  }
 0x543   : > { %v14392_v42 = vsel %vm16789_vm9, %v7031_v10, %v14222_v21  ;;  %9987 = vmatprep.mubr.msk.bf16.mxu1 %vm16790_vm3, %v14388_v60  ;;  %v6969_v43 = vsel %vm1005_vm5, %v10659_v63, %v6601_v30  ;;  %v6971_v21 = vsel %vm1005_vm5, %v10660_v17, %v6603_v59 }
 0x544   : > { %v14399_v46 = vpop.permute.xlu1 %6952  ;;  %v7001_v14 = vsel %vm16509_vm6, %v6969_v43, %v14245_v51  ;;  %v7003_v30 = vsel %vm16509_vm6, %v6971_v21, %v14250_v55  ;;  %v10661_v55 = vld [vmem:[#allocation2 + $0x3c] sm:$0xff]  }
 0x545   : > { %v14403_v22 = vpop.permute.xlu0 %6954  ;;  %v6973_v10 = vsel %vm1005_vm5, %v10661_v55, %v6605_v8 }
 0x546   : > { %9988 = vmatmul.mubr.msk.bf16.vlgmr.msra.gmra.mrb[32].mxu1 %vm16791_vm0, %v14392_v42  ;;  %vm16792_vm0 = vmmov %vm16789_vm9 }
 0x547   : > { %10020 = vmatpush3.bf16.msra.mxu1 %v14259_v48  ;;  %vm16793_vm3 = vmmov %vm16792_vm0 }
 0x548   : > { %10495 = vmatprep.subr.msk.bf16.mxu1 %vm1237_vm4, %v10618_v27  ;;  %v6857_v23 = vpop.permute.xlu1 %6856  ;;  %vm16795_vm9 = vmmov %vm16794_vm11 }
 0x549   : > { %v6859_v52 = vpop.permute.xlu0 %6858  ;;  %v7033_v59 = vsel %vm1071_vm7, %v7001_v14, %v6857_v23  ;;  %v10663_v23 = vld [vmem:[#allocation2 + $0x54] sm:$0xff]  }
 0x54a   : > { %v7035_v48 = vsel %vm1071_vm7, %v7003_v30, %v6859_v52  ;;  %v14423_v0 = vsel %vm16792_vm0, %v7033_v59, %v14265_v6  ;;  %v10662_v6 = vld [vmem:[#allocation2 + $0x48] sm:$0xff]  }
 0x54b   : > { %10022 = vmatpush3.bf16.msra.mxu1 %v7365_v19  ;;  %v14427_v56 = vsel %vm16793_vm3, %v7035_v48, %v14267_v7  ;;  %9991 = vmatprep.mubr.msk.bf16.mxu1 %vm16794_vm11, %v14423_v0  ;;  %v6975_v63 = vsel %vm1005_vm5, %v10662_v6, %v6607_v32  ;;  %v7005_v7 = vsel %vm16509_vm6, %v6973_v10, %v14281_v2  ;;  %vm16796_vm3 = vmmov %vm16795_vm9 }
 0x54c   : > { %10055 = vmatprep.subr.bf16.mxu1 %v14413_v26  ;;  %v14432_v51 = vpop.permute.xlu1 %6620  ;;  %v7007_v21 = vsel %vm16509_vm6, %v6975_v63, %v14285_v62  ;;  %vm16797_vm11 = vmmov %vm16792_vm0  ;;  %v6977_v62 = vsel %vm1005_vm5, %v10663_v23, %v14362_v13  ;;  %v10665_v63 = vld [vmem:[#allocation2 + $0x6c] sm:$0xff]  }
 0x54d   : > { %v14437_v27 = vpop.permute.xlu0 %6622  ;;  %v7009_v59 = vsel %vm16509_vm6, %v6977_v62, %v14303_v25  ;;  %v10667_v62 = vld [vmem:[#allocation2 + $0x84] sm:$0xff]  }
 0x54e   : > { %9992 = vmatmul.mubr.msk.bf16.gmra.mrb[36].mxu1 %vm16795_vm9, %v14427_v56  ;;  %vm16798_vm9 = vmmov %vm16796_vm3 }
 0x550   : > { %v6861_v43 = vpop.permute.xlu1 %6860 }
 0x551   : > { %v7037_v17 = vsel %vm1071_vm7, %v7005_v7, %v6861_v43  ;;  %v6863_v19 = vpop.permute.xlu0 %6862 }
 0x552   : > { %v14447_v14 = vsel %vm16792_vm0, %v7037_v17, %v14292_v31  ;;  %v7039_v8 = vsel %vm1071_vm7, %v7007_v21, %v6863_v19  ;;  %v10664_v31 = vld [vmem:[#allocation2 + $0x60] sm:$0xff]  }
 0x553   : > { %9995 = vmatprep.mubr.msk.bf16.mxu1 %vm16796_vm3, %v14447_v14  ;;  %v14454_v32 = vsel %vm16797_vm11, %v7039_v8, %v14294_v54  ;;  %v6979_v52 = vsel %vm1005_vm5, %v10664_v31, %v14366_v35  ;;  %vm16799_vm11 = vmmov %vm16792_vm0 }
 0x554   : > { %v6701_v2 = vpop.permute.xlu1 %6700  ;;  %v7011_v55 = vsel %vm16509_vm6, %v6979_v52, %v14307_v49  ;;  %v6981_v49 = vsel %vm1005_vm5, %v10665_v63, %v14368_v9 }
 0x555   : > { %v6703_v30 = vpop.permute.xlu0 %6702  ;;  %v7013_v17 = vsel %vm16509_vm6, %v6981_v49, %v14317_v47 }
 0x556   : > { %9996 = vmatmul.mubr.msk.bf16.gmra.mrb[40].mxu1 %vm16798_vm9, %v14454_v32  ;;  %vm16800_vm9 = vmmov %vm16796_vm3 }
 0x558   : > { %v6865_v48 = vpop.permute.xlu1 %6864 }
 0x559   : > { %v7041_v54 = vsel %vm1071_vm7, %v7009_v59, %v6865_v48  ;;  %v6867_v10 = vpop.permute.xlu0 %6866 }
 0x55a   : > { %v14469_v6 = vsel %vm16792_vm0, %v7041_v54, %v14311_v53  ;;  %v7043_v13 = vsel %vm1071_vm7, %v7011_v55, %v6867_v10  ;;  %v10666_v53 = vld [vmem:[#allocation2 + $0x78] sm:$0xff]  }
 0x55b   : > { %9999 = vmatprep.mubr.msk.bf16.mxu1 %vm16796_vm3, %v14469_v6  ;;  %v14476_v35 = vsel %vm16799_vm11, %v7043_v13, %v14313_v28  ;;  %v6983_v43 = vsel %vm1005_vm5, %v10666_v53, %v14370_v61  ;;  %vm16801_vm11 = vmmov %vm16792_vm0 }
 0x55c   : > { %v6957_v25 = vpop.permute.xlu1 %6956  ;;  %v7015_v19 = vsel %vm16509_vm6, %v6983_v43, %v14321_v16  ;;  %v6985_v16 = vsel %vm1005_vm5, %v10667_v62, %v14374_v45 }
 0x55d   : > { %v6959_v7 = vpop.permute.xlu0 %6958  ;;  %v7017_v59 = vsel %vm16509_vm6, %v6985_v16, %v14333_v15 }
 0x55e   : > { %10000 = vmatmul.mubr.msk.bf16.gmra.mrb[44].mxu1 %vm16800_vm9, %v14476_v35  ;;  %vm16802_vm9 = vmmov %vm16796_vm3 }
 0x560   : > { %v6869_v21 = vpop.permute.xlu1 %6868 }
 0x561   : > { %v7045_v28 = vsel %vm1071_vm7, %v7013_v17, %v6869_v21  ;;  %v6871_v8 = vpop.permute.xlu0 %6870 }
 0x562   : > { %v14491_v23 = vsel %vm16792_vm0, %v7045_v28, %v14323_v4  ;;  %v7047_v9 = vsel %vm1071_vm7, %v7015_v19, %v6871_v8  ;;  %v10668_v4 = vld [vmem:[#allocation2 + $0x90] sm:$0xff]  }
 0x563   : > { %10003 = vmatprep.mubr.msk.bf16.mxu1 %vm16796_vm3, %v14491_v23  ;;  %v14498_v61 = vsel %vm16801_vm11, %v7047_v9, %v14325_v57  ;;  %v6987_v52 = vsel %vm1005_vm5, %v10668_v4, %v14376_v24  ;;  %vm16803_vm11 = vmmov %vm16792_vm0 }
 0x564   : > { %v6625_v47 = vpop.permute.xlu1 %6624  ;;  %v7019_v54 = vsel %vm16509_vm6, %v6987_v52, %v14337_v41  ;;  %v10669_v41 = vld [vmem:[#allocation2 + $0x9c] sm:$0xff]  }
 0x565   : > { %v6705_v31 = vpop.permute.xlu0 %6704  ;;  %v6989_v63 = vsel %vm1005_vm5, %v10669_v41, %v14432_v51  ;;  %v14581_v41 = vld [vmem:[%s16411_s5 + $0x24] sm:$0xff]  }
 0x566   : > { %10004 = vmatmul.mubr.msk.bf16.gmra.mrb[48].mxu1 %vm16802_vm9, %v14498_v61  ;;  %vm16804_vm9 = vmmov %vm16796_vm3  ;;  %v7021_v53 = vsel %vm16509_vm6, %v6989_v63, %v6701_v2 }
 0x568   : > { %v6873_v48 = vpop.permute.xlu1 %6872 }
 0x569   : > { %v7049_v57 = vsel %vm1071_vm7, %v7017_v59, %v6873_v48  ;;  %v6875_v55 = vpop.permute.xlu0 %6874 }
 0x56a   : > { %v14513_v10 = vsel %vm16792_vm0, %v7049_v57, %v14399_v46  ;;  %v7051_v45 = vsel %vm1071_vm7, %v7019_v54, %v6875_v55  ;;  %v10670_v46 = vld [vmem:[#allocation2 + $0xa8] sm:$0xff]  }
 0x56b   : > { %10007 = vmatprep.mubr.msk.bf16.mxu1 %vm16796_vm3, %v14513_v10  ;;  %v14520_v24 = vsel %vm16803_vm11, %v7051_v45, %v14403_v22  ;;  %v6991_v49 = vsel %vm1005_vm5, %v10670_v46, %v14437_v27  ;;  %vm16805_vm11 = vmmov %vm16792_vm0  ;;  %v6993_v27 = vsel %vm1005_vm5, %v13905_v39, %v6625_v47  ;;  %v10624_v45 = vld [vmem:[%s16411_s5 + $0x20] ss:$0 sps:$4 sm:$0x33]  }
 0x56c   : > { %v7114_v15 = vpop.permute.xlu1 %7113  ;;  %v7023_v17 = vsel %vm16509_vm6, %v6991_v49, %v6703_v30  ;;  %v7025_v30 = vsel %vm16509_vm6, %v6993_v27, %v6705_v31  ;;  %v5741_v49 = vld [vmem:[#allocation2 + $0xcc] sm:$0x1] }
 0x56d   : > { %v7137_v9 = vsel %vm1005_vm5, %v14014_v1, %v7114_v15 }
 0x56e   : > { %10008 = vmatmul.mubr.msk.bf16.gmra.mrb[52].mxu1 %vm16804_vm9, %v14520_v24  ;;  %v6961_v13 = vpop.permute.xlu0 %6960  ;;  %vm16806_vm9 = vmmov %vm16796_vm3 }
 0x572   : > { %v6877_v43 = vpop.permute.xlu1 %6876 }
 0x573   : > { %v7053_v22 = vsel %vm1071_vm7, %v7021_v53, %v6877_v43 }
 0x574   : > { %v6879_v21 = vpop.permute.xlu0 %6878  ;;  %v14532_v28 = vsel %vm16792_vm0, %v7053_v22, %v6957_v25  ;;  %v5881_v22 = vld [vmem:[#allocation2 + $0xd4] sm:$0x2] }
 0x575   : > { %v7055_v19 = vsel %vm1071_vm7, %v7023_v17, %v6879_v21  ;;  %10011 = vmatprep.mubr.msk.bf16.mxu1 %vm16796_vm3, %v14532_v28 }
 0x576   : > { %v14538_v51 = vsel %vm16805_vm11, %v7055_v19, %v6959_v7  ;;  %vm16807_vm11 = vmmov %vm16792_vm0 }
 0x577   : > { %v7119_v2 = vpop.permute.xlu1 %7118  ;;  %10012 = vmatmul.mubr.msk.bf16.gmra.mrb[56].mxu1 %vm16806_vm9, %v14538_v51  ;;  %vm16808_vm9 = vmmov %vm16796_vm3 }
 0x578   : > { %v6881_v8 = vpop.permute.xlu0 %6880  ;;  %v7139_v7 = vsel %vm16509_vm6, %v7137_v9, %v7119_v2 }
 0x579   : > { %v7057_v25 = vsel %vm1071_vm7, %v7025_v30, %v6881_v8 }
 0x57a   : > { %v14549_v62 = vsel %vm16792_vm0, %v7057_v25, %v6961_v13  ;;  %v7595_v13 = vsel %vm1237_vm4, %v10624_v45, 0 }
 0x57b   : > { %v7130_v16 = vpop.permute.xlu1 %7129  ;;  %10015 = vmatprep.mubr.msk.bf16.mxu1 %vm16796_vm3, %v14549_v62 }
 0x57c   : > { %v7141_v39 = vsel %vm1071_vm7, %v7139_v7, %v7130_v16  ;;  %v7135_v47 = vpop.permute.xlu0 %7134 }
 0x57d   : > { %v14556_v31 = vsel %vm16807_vm11, %v7141_v39, %v7135_v47  ;;  %vm16809_vm11 = vmmov %vm16796_vm3 }
 0x57f   : > { %v6595_v4 = vpop.permute.xlu1 %6594  ;;  %10016 = vmatmul.mubr.msk.bf16.gmra.mrb[60].mxu1 %vm16808_vm9, %v14556_v31  ;;  %vm16810_vm9 = vcmask 27649  }
 0x580   : > { %v6963_v1 = vsel %vm1005_vm5, %v14188_v5, %v6595_v4  ;;  %v6675_v52 = vpop.permute.xlu0 %6674  ;;  %v16822_v4 = vld [vmem:[#allocation40_spill] sm:$0xff] }
 0x581   : > { %v6995_v59 = vsel %vm16509_vm6, %v6963_v1, %v6675_v52  ;;  %vm16811_vm6 = vmmov %vm16796_vm3  ;;  %v16823_v1 = vld [vmem:[#allocation22_spill] sm:$0xff] }
 0x582   : > { %v14607_v52 = vcombine.low %v16823_v1, %v16822_v4 }
 0x583   : > { %v6851_v48 = vpop.permute.xlu1 %6850 }
 0x584   : > { %v7027_v57 = vsel %vm1071_vm7, %v6995_v59, %v6851_v48  ;;  %v6931_v54 = vpop.permute.xlu0 %6930  ;;  %v3566_v39 = vshrl.u32 %v14607_v52, 16  ;;  %v3842_v4 = vrot.slane %v14607_v52, 1 }
 0x585   : > { %v7059_v55 = vsel %vm16792_vm0, %v7027_v57, %v6931_v54  ;;  %vm16817_vm0 = vmmov %vm16796_vm3 }
 0x586   : > { %10023 = vmatprep.mubr.msk.bf16.mxu1 %vm16796_vm3, %v7059_v55 }
 0x587   : > { %v5476_v15 = vpop.permute.xlu1 %5475  ;;  %10024 = vmatmul.mubr.msk.bf16.vlgmr.msra.gmra.mrb[32].mxu1 %vm16809_vm11, %v14388_v60  ;;  %vm16828_vm11 = vmmov %vm16817_vm0 }
 0x588   : > { %5574 = vst.msk [vmem:[#allocation2 + $0xcc] sm:$0xe] %vm16810_vm9, %v5476_v15  ;;  %10027 = vmatprep.mubr.msk.bf16.mxu1 %vm16811_vm6, %v14392_v42  ;;  %v5480_v5 = vpop.permute.xlu0 %5479  ;;  %10056 = vmatpush3.bf16.msra.mxu1 %v14413_v26  ;;  %vm16812_vm6 = vmmov %vm16796_vm3  ;;  %vm16829_vm9 = vsmask.f32 6400 }
 0x589   : > { %5576 = vst.msk [vmem:[#allocation2 + $0xd4] sm:$0x1] %vm3008_vm13, %v5480_v5  ;;  %10496 = vmatprep.subr.msk.bf16.mxu1 %vm1237_vm4, %v10624_v45  ;;  %vm16813_vm13 = vmmov %vm16796_vm3 }
 0x58b   : > { %v5478_v60 = vpop.permute.xlu1 %5477 }
 0x58c   : > { %5575 = vst.msk [vmem:[#allocation2 + $0xd0] sm:$0xf] %vm3006_vm14, %v5478_v60  ;;  %10058 = vmatpush3.bf16.msra.mxu1 %v7595_v13  ;;  %vm16816_vm14 = vmmov %vm16796_vm3  ;;  %v16825_v60 = vld [vmem:[#allocation37_spill] sm:$0xff]  ;;  %vm16827_vm3 = vcmask 1045504  }
 0x58d   : > { %10091 = vmatprep.subr.bf16.mxu1 %v14581_v41 }
 0x58f   : > { %v5607_v63 = vld [vmem:[#allocation2 + $0xcc] sm:$0x2]  ;;  %10028 = vmatmul.mubr.msk.bf16.gmra.mrb[36].mxu1 %vm16812_vm6, %v14423_v0  ;;  %v5907_v27 = vld [vmem:[#allocation2 + $0xcc] sm:$0x4]  ;;  %vm16830_vm6 = vmmov %vm16817_vm0 }
 0x590   : > { %v9250_v26 = vrot.slane %v5607_v63, 9  ;;  %v5767_v46 = vld [vmem:[#allocation2 + $0xd4] sm:$0x1]  ;;  %10031 = vmatprep.mubr.msk.bf16.mxu1 %vm16813_vm13, %v14427_v56  ;;  %v9270_v30 = vrot.slane %v5907_v27, 10  ;;  %v14618_v63 = vcombine.low %v16825_v60, %v16825_v60  ;;  %vm16831_vm13 = vmmov %vm16827_vm3  ;;  %v16834_v60 = vld [vmem:[#allocation13_spill] sm:$0xff] }
 0x591   : > { %v5807_v53 = vrot.slane %v5767_v46, 7  ;;  %v10620_v48 = vld [vmem:[#allocation2 + $0xd4] ss:$0 sps:$4 sm:$0x33]  }
 0x592   : > { %v5742_v17 = vsel %vm12232_vm12, %v9250_v26, %v5741_v49  ;;  %vm16821_vm12 = vmmov %vm16817_vm0  ;;  %v7551_v45 = vrot.slane %v10620_v48, 1  ;;  %v7544_v15 = vshll.u32 %v10620_v48, 16  ;;  %v7558_v5 = vshrl.u32 %v10620_v48, 16 }
 0x593   : > { %5743 = vst [vmem:[#allocation2 + $0xcc] sm:$0x1] %v5742_v17  ;;  %v5882_v19 = vsel %vm12213_vm8, %v5807_v53, %v5881_v22  ;;  %v6069_v2 = vld [vmem:[#allocation2 + $0xd0] sm:$0x8]  ;;  %vm16820_vm8 = vmmov %vm16817_vm0  ;;  %v3568_v26 = vshll.u32 %v14607_v52, 16  ;;  %v7567_v53 = vrot.slane %v10620_v48, 2 }
 0x594   : > { %5883 = vst [vmem:[#allocation2 + $0xd4] sm:$0x2] %v5882_v19  ;;  %v9290_v25 = vrot.slane %v6069_v2, 10  ;;  %v7546_v49 = vrot.slane %v7544_v15, 1  ;;  %v7560_v43 = vrot.slane %v7558_v5, 1  ;;  %v7561_v19 = vrot.slane %v7544_v15, 2 }
 0x597   : > { %10032 = vmatmul.mubr.msk.bf16.gmra.mrb[40].mxu1 %vm16816_vm14, %v14447_v14  ;;  %vm16832_vm14 = vmmov %vm16827_vm3 }
 0x598   : > { %10035 = vmatprep.mubr.msk.bf16.mxu1 %vm16817_vm0, %v14454_v32 }
 0x59a   : > { %v6043_v8 = vld [vmem:[#allocation2 + $0xcc] sm:$0x1] }
 0x59b   : > { %v6044_v7 = vsel %vm12667_vm15, %v9270_v30, %v6043_v8  ;;  %v6205_v16 = vld [vmem:[#allocation2 + $0xd4] sm:$0x2]  ;;  %vm16826_vm15 = vmmov %vm16817_vm0  ;;  %v7562_v30 = vor.u32 %v7561_v19, %v7560_v43  ;;  %v3570_v8 = vrot.slane %v3568_v26, 1  ;;  %v10671_v43 = vld [vmem:[%s16410_s4] sm:$0x3f]   ;;  %v3577_v19 = vshrl.u32 %v14618_v63, 16 }
 0x59c   : > { %6045 = vst [vmem:[#allocation2 + $0xcc] sm:$0x1] %v6044_v7  ;;  %v6206_v47 = vsel %vm13070_vm10, %v9290_v25, %v6205_v16  ;;  %vm16824_vm10 = vmmov %vm16817_vm0  ;;  %v3573_v25 = vshll.u32 %v14618_v63, 16  ;;  %v3843_v7 = vrot.slane %v14618_v63, 1 }
 0x59d   : > { %6207 = vst [vmem:[#allocation2 + $0xd4] sm:$0x2] %v6206_v47  ;;  %v14633_v47 = vld [vmem:[#allocation2 + $0xd8] sm:$0xff]   ;;  %v3571_v48 = vor.u32 %v3570_v8, %v3566_v39  ;;  %vm16835_vm0 = vmmov %vm16827_vm3 }
 0x59e   : > { %v7801_v15 = vshll.u32 %v14633_v47, 16 }
 0x59f   : > { %10036 = vmatmul.mubr.msk.bf16.gmra.mrb[44].mxu1 %vm16820_vm8, %v14469_v6  ;;  %vm16837_vm8 = vmmov %vm16830_vm6 }
 0x5a0   : > { %10039 = vmatprep.mubr.msk.bf16.mxu1 %vm16821_vm12, %v14476_v35  ;;  %vm16838_vm12 = vmmov %vm16830_vm6 }
 0x5a3   : > { %v14609_v59 = vld [vmem:[#allocation2 + $0xcc] sm:$0xff]  }
 0x5a4   : > { %v7537_v57 = vshrl.u32 %v14609_v59, 16  ;;  %v7539_v54 = vshll.u32 %v14609_v59, 16  ;;  %v7550_v55 = vrot.slane %v14609_v59, 1  ;;  %v7566_v27 = vrot.slane %v14609_v59, 2 }
 0x5a6   : > { %v7541_v13 = vrot.slane %v7539_v54, 1  ;;  %v7552_v46 = vsel %vm666_vm1, %v7550_v55, %v7551_v45  ;;  %v7555_v22 = vrot.slane %v7537_v57, 1  ;;  %v7556_v21 = vrot.slane %v7539_v54, 2  ;;  %v10623_v54 = vld [vmem:[#allocation2 + $0xe0] ss:$0 sps:$4 sm:$0x33]  }
 0x5a7   : > { %10040 = vmatmul.mubr.msk.bf16.gmra.mrb[48].mxu1 %vm16824_vm10, %v14491_v23  ;;  %7553 = vrot.lane.b32.xlu1 %v7552_v46, %s10682_s30  ;;  %v7568_v9 = vsel %vm16827_vm3, %v7566_v27, %v7567_v53  ;;  %v10630_v55 = vld [vmem:[%s16410_s4 + $0x8] sm:$0x3f]   ;;  %v3844_v45 = vsel %vm666_vm1, %v3842_v4, %v3843_v7  ;;  %v7820_v53 = vshrl.u32 %v10623_v54, 16  ;;  %v7812_v27 = vrot.slane %v14633_v47, 1  ;;  %vm16839_vm10 = vmmov %vm16835_vm0 }
 0x5a8   : > { %10043 = vmatprep.mubr.msk.bf16.mxu1 %vm16826_vm15, %v14498_v61  ;;  %v7542_v17 = vor.u32 %v7541_v13, %v7537_v57  ;;  %v7557_v16 = vor.u32 %v7556_v21, %v7555_v22  ;;  %v3575_v57 = vrot.slane %v3573_v25, 1  ;;  %10490 = vmatprep.subr.msk.bf16.mxu0 %vm16831_vm13, %v10630_v55  ;;  %v4350_v5 = vsel %vm16832_vm14, %v10630_v55, 0  ;;  %v16833_v13 = vld [vmem:[#allocation38_spill] sm:$0xff]  ;;  %vm16840_vm15 = vmmov %vm16830_vm6 }
 0x5a9   : > { %9882 = vmatpush3.bf16.msra.mxu0 %v4350_v5  ;;  %v14652_v26 = vcombine.low %v16834_v60, %v16833_v13  ;;  %v7799_v22 = vshrl.u32 %v14633_v47, 16  ;;  %v7803_v21 = vrot.slane %v7801_v15, 1  ;;  %v7822_v25 = vrot.slane %v7820_v53, 1  ;;  %vm16841_vm3 = vmmov %vm16829_vm9 }
 0x5aa   : > { %v7547_v2 = vsel %vm441_vm2, %v7542_v17, %v7546_v49  ;;  %v7563_v1 = vsel %vm16829_vm9, %v7557_v16, %v7562_v30  ;;  %v3576_v46 = vsel %vm441_vm2, %v3571_v48, %v3575_v57  ;;  %v7806_v49 = vshll.u32 %v10623_v54, 16  ;;  %10491 = vmatprep.subr.msk.bf16.mxu0 %vm16835_vm0, %v10671_v43  ;;  %vm16843_vm9 = vmmov %vm16830_vm6 }
 0x5ab   : > { %7548 = vrot.lane.b32.xlu0 %v7547_v2, %s10683_s7  ;;  %7569 = vrot.lane.b32.xlu1 %v7568_v9, %s10681_s29  ;;  %v7813_v17 = vrot.slane %v10623_v54, 1  ;;  %v16836_v2 = vld [vmem:[#allocation36_spill] sm:$0xff]  ;;  %v3554_v16 = vshll.u32 %v14652_v26, 16  ;;  %v7829_v39 = vrot.slane %v10623_v54, 2  ;;  %v7804_v4 = vor.u32 %v7803_v21, %v7799_v22  ;;  %vm16845_vm13 = vmmov %vm16830_vm6 }
 0x5ac   : > { %v14666_v30 = vcombine.low %v16836_v2, %v16836_v2  ;;  %v7808_v8 = vrot.slane %v7806_v49, 1  ;;  %v7823_v9 = vrot.slane %v7806_v49, 2  ;;  %v7818_v48 = vrot.slane %v7801_v15, 2  ;;  %v14684_v15 = vld [vmem:[#allocation2 + $0xe4] sm:$0xff]   ;;  %vm16846_vm14 = vmmov %vm16841_vm3 }
 0x5ad   : > { %v7828_v57 = vrot.slane %v14633_v47, 2  ;;  %v3556_v5 = vrot.slane %v3554_v16, 1  ;;  %v3552_v49 = vshrl.u32 %v14652_v26, 16  ;;  %v3839_v53 = vrot.slane %v14652_v26, 1 }
 0x5ae   : > { %v7809_v55 = vsel %vm441_vm2, %v7804_v4, %v7808_v8  ;;  %v3559_v13 = vshll.u32 %v14666_v30, 16  ;;  %v10626_v21 = vld [vmem:[#allocation2 + $0xec] ss:$0 sps:$4 sm:$0x33]   ;;  %v8061_v16 = vshrl.u32 %v14684_v15, 16 }
 0x5af   : > { %10044 = vmatmul.mubr.msk.bf16.gmra.mrb[52].mxu1 %vm16828_vm11, %v14513_v10  ;;  %7564 = vrot.lane.b32.xlu0 %v7563_v1, %s10684_s8  ;;  %v7817_v1 = vrot.slane %v7799_v22, 1  ;;  %v7830_v60 = vsel %vm16839_vm10, %v7828_v57, %v7829_v39  ;;  %vm16842_vm11 = vmmov %vm16830_vm6  ;;  %v8068_v8 = vshll.u32 %v10626_v21, 16  ;;  %v8074_v39 = vrot.slane %v14684_v15, 1  ;;  %v10628_v4 = vld [vmem:[%s16411_s5 + $0x2c] ss:$0 sps:$4 sm:$0x33]  }
 0x5b0   : > { %10047 = vmatprep.mubr.msk.bf16.mxu1 %vm16830_vm6, %v14520_v24  ;;  %3891 = vrot.lane.b32.xlu1 %v3844_v45, %s10682_s30  ;;  %v7824_v45 = vor.u32 %v7823_v9, %v7822_v25  ;;  %v3561_v22 = vrot.slane %v3559_v13, 1  ;;  %v8082_v25 = vshrl.u32 %v10626_v21, 16  ;;  %v8075_v9 = vrot.slane %v10626_v21, 1 }
 0x5b1   : > { %v7819_v54 = vor.u32 %v7818_v48, %v7817_v1  ;;  %v8070_v1 = vrot.slane %v8068_v8, 1  ;;  %v8085_v57 = vrot.slane %v8068_v8, 2  ;;  %v8079_v13 = vrot.slane %v8061_v16, 1 }
 0x5b2   : > { %v8084_v48 = vrot.slane %v8082_v25, 1 }
 0x5b3   : > { %3779 = vrot.lane.b32.xlu0 %v3576_v46, %s10683_s7  ;;  %v3840_v46 = vrot.slane %v14666_v30, 1  ;;  %v7825_v43 = vsel %vm16841_vm3, %v7819_v54, %v7824_v45  ;;  %v8091_v45 = vrot.slane %v10626_v21, 2  ;;  %v7857_v54 = vsel %vm1237_vm4, %v10628_v4, 0 }
 0x5b4   : > { %3893 = vrot.lane.b32.xlu1 %v3843_v7, %s10682_s30  ;;  %v7814_v7 = vsel %vm666_vm1, %v7812_v27, %v7813_v17  ;;  %v3557_v17 = vor.u32 %v3556_v5, %v3552_v49  ;;  %v8063_v27 = vshll.u32 %v14684_v15, 16  ;;  %v14719_v49 = vld [vmem:[%s16411_s5 + $0x30] sm:$0xff]  }
 0x5b6   : > { %v3562_v2 = vsel %vm441_vm2, %v3557_v17, %v3561_v22 }
 0x5b7   : > { %10048 = vmatmul.mubr.msk.bf16.gmra.mrb[56].mxu1 %vm16837_vm8, %v14532_v28  ;;  %3781 = vrot.lane.b32.xlu0 %v3577_v19, %s10683_s7  ;;  %v3841_v19 = vsel %vm666_vm1, %v3839_v53, %v3840_v46 }
 0x5b8   : > { %10051 = vmatprep.mubr.msk.bf16.mxu1 %vm16838_vm12, %v14538_v51  ;;  %7815 = vrot.lane.b32.xlu1 %v7814_v7, %s10682_s30  ;;  %v3563_v7 = vshrl.u32 %v14666_v30, 16 }
 0x5bb   : > { %7810 = vrot.lane.b32.xlu0 %v7809_v55, %s10683_s7  ;;  %v8076_v55 = vsel %vm666_vm1, %v8074_v39, %v8075_v9  ;;  %vm16844_vm1 = vmmov %vm16835_vm0 }
 0x5bc   : > { %7831 = vrot.lane.b32.xlu1 %v7830_v60, %s10681_s29  ;;  %v8080_v60 = vrot.slane %v8063_v27, 2  ;;  %vm16847_vm0 = vmmov %vm16830_vm6 }
 0x5bd   : > { %vm16848_vm8 = vmmov %vm16847_vm0 }
 0x5be   : > { %vm16849_vm12 = vmmov %vm16847_vm0 }
 0x5bf   : > { %10052 = vmatmul.mubr.msk.bf16.gmra.mrb[60].mxu1 %vm16840_vm15, %v14549_v62  ;;  %7826 = vrot.lane.b32.xlu0 %v7825_v43, %s10684_s8  ;;  %v8086_v43 = vor.u32 %v8085_v57, %v8084_v48  ;;  %vm16854_vm10 = vmmov %vm16847_vm0 }
 0x5c0   : > { %10059 = vmatprep.mubr.msk.bf16.mxu1 %vm16842_vm11, %v14392_v42  ;;  %3887 = vrot.lane.b32.xlu1 %v3841_v19, %s10682_s30  ;;  %v8065_v42 = vrot.slane %v8063_v27, 1  ;;  %vm16855_vm15 = vmmov %vm16847_vm0 }
 0x5c1   : > { %vm16860_vm3 = vmmov %vm16847_vm0 }
 0x5c2   : > { %v8066_v5 = vor.u32 %v8065_v42, %v8061_v16  ;;  %vm16861_vm11 = vmmov %vm16847_vm0 }
 0x5c3   : > { %3775 = vrot.lane.b32.xlu0 %v3562_v2, %s10683_s7 }
 0x5c4   : > { %3889 = vrot.lane.b32.xlu1 %v3840_v46, %s10682_s30  ;;  %v8090_v46 = vrot.slane %v14684_v15, 2  ;;  %v8071_v53 = vsel %vm441_vm2, %v8066_v5, %v8070_v1 }
 0x5c6   : > { %v8092_v17 = vsel %vm16844_vm1, %v8090_v46, %v8091_v45  ;;  %vm16868_vm1 = vmmov %vm16847_vm0 }
 0x5c7   : > { %10060 = vmatmul.mubr.msk.bf16.vlgmr.msra.gmra.mrb[32].mxu1 %vm16843_vm9, %v14423_v0  ;;  %3777 = vrot.lane.b32.xlu0 %v3563_v7, %s10683_s7  ;;  %vm16866_vm9 = vmmov %vm16847_vm0 }
 0x5c8   : > { %10063 = vmatprep.mubr.msk.bf16.mxu1 %vm16830_vm6, %v14427_v56  ;;  %8077 = vrot.lane.b32.xlu1 %v8076_v55, %s10682_s30  ;;  %vm16867_vm6 = vmmov %vm16847_vm0 }
 0x5c9   : > { %10092 = vmatpush3.bf16.msra.mxu1 %v14581_v41  ;;  %v8081_v41 = vor.u32 %v8080_v60, %v8079_v13 }
 0x5ca   : > { %10497 = vmatprep.subr.msk.bf16.mxu1 %vm1237_vm4, %v10628_v4 }
 0x5cb   : > { %8072 = vrot.lane.b32.xlu0 %v8071_v53, %s10683_s7  ;;  %v8087_v22 = vsel %vm16846_vm14, %v8081_v41, %v8086_v43  ;;  %vm16875_vm14 = vcmask 64512  }
 0x5cc   : > { %8093 = vrot.lane.b32.xlu1 %v8092_v17, %s10681_s29 }
 0x5cd   : > { %10094 = vmatpush3.bf16.msra.mxu1 %v7857_v54 }
 0x5ce   : > { %10127 = vmatprep.subr.bf16.mxu1 %v14719_v49 }
 0x5cf   : > { %10064 = vmatmul.mubr.msk.bf16.gmra.mrb[36].mxu1 %vm16845_vm13, %v14447_v14  ;;  %8088 = vrot.lane.b32.xlu0 %v8087_v22, %s10684_s8  ;;  %vm16869_vm13 = vmmov %vm16847_vm0 }
 0x5d0   : > { %10067 = vmatprep.mubr.msk.bf16.mxu1 %vm16847_vm0, %v14454_v32  ;;  %vm16876_vm0 = vcmask 130048  }
 0x5d7   : > { %10068 = vmatmul.mubr.msk.bf16.gmra.mrb[40].mxu1 %vm16848_vm8, %v14469_v6  ;;  %vm16877_vm8 = vmmov %vm16868_vm1 }
 0x5d8   : > { %10071 = vmatprep.mubr.msk.bf16.mxu1 %vm16849_vm12, %v14476_v35  ;;  %vm16878_vm12 = vmmov %vm16868_vm1 }
 0x5d9   : > { %v14736_v21 = vpop.f32.mrb[20].mxu1 }
 0x5da   : > { %16850 = vst [vmem:[#allocation26_spill] sm:$0xff] %v14736_v21  ;;  %v14738_v19 = vpop.f32.mrb[21].mxu1 }
 0x5db   : > { %16851 = vst [vmem:[#allocation17_spill] sm:$0xff] %v14738_v19  ;;  %v14740_v27 = vpop.f32.mrb[22].mxu1 }
 0x5dc   : > { %16852 = vst [vmem:[#allocation16_spill] sm:$0xff] %v14740_v27  ;;  %v14742_v2 = vpop.f32.mrb[23].mxu1 }
 0x5dd   : > { %16853 = vst [vmem:[#allocation19_spill] sm:$0xff] %v14742_v2 }
 0x5df   : > { %10072 = vmatmul.mubr.msk.bf16.gmra.mrb[44].mxu1 %vm16854_vm10, %v14491_v23  ;;  %vm16879_vm10 = vmmov %vm16875_vm14 }
 0x5e0   : > { %10075 = vmatprep.mubr.msk.bf16.mxu1 %vm16855_vm15, %v14498_v61  ;;  %vm16880_vm15 = vmmov %vm16879_vm10 }
 0x5e1   : > { %v14748_v8 = vpop.f32.mrb[24].mxu1 }
 0x5e2   : > { %16856 = vst [vmem:[#allocation18_spill] sm:$0xff] %v14748_v8  ;;  %v14750_v25 = vpop.f32.mrb[25].mxu1 }
 0x5e3   : > { %16857 = vst [vmem:[#allocation43_spill] sm:$0xff] %v14750_v25  ;;  %v14752_v9 = vpop.f32.mrb[26].mxu1 }
 0x5e4   : > { %16858 = vst [vmem:[#allocation9_spill] sm:$0xff] %v14752_v9  ;;  %v14754_v16 = vpop.f32.mrb[27].mxu1 }
 0x5e5   : > { %16859 = vst [vmem:[#allocation45_spill] sm:$0xff] %v14754_v16 }
 0x5e7   : > { %10076 = vmatmul.mubr.msk.bf16.gmra.mrb[48].mxu1 %vm16860_vm3, %v14513_v10  ;;  %vm16881_vm3 = vmmov %vm16868_vm1 }
 0x5e8   : > { %10079 = vmatprep.mubr.msk.bf16.mxu1 %vm16861_vm11, %v14520_v24  ;;  %vm16882_vm11 = vmmov %vm16868_vm1 }
 0x5e9   : > { %v14760_v42 = vpop.f32.mrb[28].mxu1 }
 0x5ea   : > { %16862 = vst [vmem:[#allocation23_spill] sm:$0xff] %v14760_v42  ;;  %v14762_v7 = vpop.f32.mrb[29].mxu1 }
 0x5eb   : > { %16863 = vst [vmem:[#allocation30_spill] sm:$0xff] %v14762_v7  ;;  %v14764_v39 = vpop.f32.mrb[30].mxu1 }
 0x5ec   : > { %16864 = vst [vmem:[#allocation21_spill] sm:$0xff] %v14764_v39  ;;  %v14766_v4 = vpop.f32.mrb[31].mxu1 }
 0x5ed   : > { %16865 = vst [vmem:[#allocation48_spill] sm:$0xff] %v14766_v4 }
 0x5ef   : > { %10080 = vmatmul.mubr.msk.bf16.gmra.mrb[52].mxu1 %vm16866_vm9, %v14532_v28  ;;  %vm16884_vm9 = vmmov %vm16868_vm1 }
 0x5f0   : > { %10083 = vmatprep.mubr.msk.bf16.mxu1 %vm16867_vm6, %v14538_v51  ;;  %vm16885_vm6 = vmmov %vm16868_vm1 }
 0x5f1   : > { %v14772_v1 = vpop.f32.mrb[0].mxu1 }
 0x5f2   : > { %v14774_v48 = vpop.f32.mrb[1].mxu1 }
 0x5f3   : > { %v14776_v57 = vpop.f32.mrb[2].mxu1 }
 0x5f4   : > { %v14778_v55 = vpop.f32.mrb[3].mxu1 }
 0x5f7   : > { %10084 = vmatmul.mubr.msk.bf16.gmra.mrb[56].mxu1 %vm16868_vm1, %v14549_v62 }
 0x5f8   : > { %10087 = vmatprep.mubr.msk.bf16.mxu1 %vm16869_vm13, %v14556_v31  ;;  %vm16887_vm13 = vmmov %vm16868_vm1 }
 0x5f9   : > { %v14784_v45 = vpop.f32.mrb[4].mxu1 }
 0x5fa   : > { %v14786_v5 = vpop.f32.mrb[5].mxu1 }
 0x5fb   : > { %v14788_v13 = vpop.f32.mrb[6].mxu1 }
 0x5fc   : > { %v14790_v60 = vpop.f32.mrb[7].mxu1 }
 0x601   : > { %v14792_v46 = vpop.f32.mrb[8].mxu1 }
 0x602   : > { %v14794_v54 = vpop.f32.mrb[9].mxu1 }
 0x603   : > { %v14796_v53 = vpop.f32.mrb[10].mxu1 }
 0x604   : > { %v14798_v43 = vpop.f32.mrb[11].mxu1 }
 0x609   : > { %v14800_v17 = vpop.f32.mrb[12].mxu1 }
 0x60a   : > { %v14802_v41 = vpop.f32.mrb[13].mxu1 }
 0x60b   : > { %v14804_v22 = vpop.f32.mrb[14].mxu1 }
 0x60c   : > { %v14806_v4 = vpop.f32.mrb[15].mxu1 }
 0x60d   : > { %16870 = vst [vmem:[#allocation50_spill] sm:$0xff] %v14806_v4 }
 0x611   : > { %v14808_v39 = vpop.f32.mrb[16].mxu1 }
 0x612   : > { %16871 = vst [vmem:[#allocation27_spill] sm:$0xff] %v14808_v39  ;;  %v14810_v7 = vpop.f32.mrb[17].mxu1 }
 0x613   : > { %16872 = vst [vmem:[#allocation28_spill] sm:$0xff] %v14810_v7  ;;  %v14812_v42 = vpop.f32.mrb[18].mxu1 }
 0x614   : > { %16873 = vst [vmem:[#allocation44_spill] sm:$0xff] %v14812_v42  ;;  %v14814_v16 = vpop.f32.mrb[19].mxu1 }
 0x615   : > { %16874 = vst [vmem:[#allocation47_spill] sm:$0xff] %v14814_v16 }
 0x619   : > { %v7554_v9 = vpop.permute.xlu1 %7553 }
 0x61d   : > { %v7549_v25 = vpop.permute.xlu0 %7548  ;;  %v7570_v2 = vpop.permute.xlu1 %7569 }
 0x61e   : > { %v7572_v8 = vsel %vm1005_vm5, %v14609_v59, %v7549_v25 }
 0x61f   : > { %v7574_v27 = vsel %vm16875_vm14, %v7572_v8, %v7554_v9  ;;  %vm16888_vm14 = vmmov %vm16868_vm1 }
 0x621   : > { %v7565_v19 = vpop.permute.xlu0 %7564 }
 0x622   : > { %v7576_v21 = vsel %vm1071_vm7, %v7574_v27, %v7565_v19  ;;  %v3892_v39 = vpop.permute.xlu1 %3891  ;;  %v10631_v27 = vld [vmem:[%s16411_s5 + $0x38] ss:$0 sps:$4 sm:$0x33]  }
 0x623   : > { %v14821_v4 = vsel %vm16876_vm0, %v7576_v21, %v7570_v2  ;;  %vm16889_vm0 = vmmov %vm16868_vm1 }
 0x624   : > { %10088 = vmatmul.mubr.msk.bf16.gmra.mrb[60].mxu1 %vm16877_vm8, %v14821_v4  ;;  %vm16890_vm8 = vmmov %vm16889_vm0 }
 0x625   : > { %10095 = vmatprep.mubr.msk.bf16.mxu1 %vm16878_vm12, %v14423_v0  ;;  %v3780_v16 = vpop.permute.xlu0 %3779  ;;  %vm16891_vm12 = vmmov %vm16889_vm0 }
 0x626   : > { %v3956_v59 = vsel %vm1005_vm5, %v14607_v52, %v3780_v16  ;;  %v3894_v19 = vpop.permute.xlu1 %3893 }
 0x627   : > { %v4020_v25 = vsel %vm16879_vm10, %v3956_v59, %v3892_v39  ;;  %vm16892_vm10 = vmmov %vm16889_vm0 }
 0x628   : > { %v4091_v8 = vshll.u32 %v4020_v25, 16  ;;  %v4089_v0 = vshrl.u32 %v4020_v25, 16 }
 0x629   : > { %v3782_v9 = vpop.permute.xlu0 %3781 }
 0x62a   : > { %v4093_v42 = vrot.slane %v4091_v8, 1  ;;  %v3958_v21 = vsel %vm1005_vm5, %v14618_v63, %v3782_v9  ;;  %v8119_v63 = vsel %vm1237_vm4, %v10631_v27, 0 }
 0x62b   : > { %v4022_v2 = vsel %vm16880_vm15, %v3958_v21, %v3894_v19  ;;  %vm16893_vm15 = vmmov %vm16889_vm0 }
 0x62c   : > { %v4095_v7 = vshll.u32 %v4022_v2, 16  ;;  %10096 = vmatmul.mubr.msk.bf16.vlgmr.msra.gmra.mrb[32].mxu1 %vm16881_vm3, %v14427_v56  ;;  %v4094_v52 = vor.u32 %v4093_v42, %v4089_v0  ;;  %vm16894_vm3 = vcmask 64512  }
 0x62d   : > { %10128 = vmatpush3.bf16.msra.mxu1 %v14719_v49  ;;  %10099 = vmatprep.mubr.msk.bf16.mxu1 %vm16882_vm11, %v14447_v14  ;;  %v16883_v49 = vld [vmem:[#allocation41_spill] sm:$0xff]  ;;  %v7811_v42 = vpop.permute.xlu0 %7810  ;;  %vm16895_vm11 = vmmov %vm16889_vm0 }
 0x62e   : > { %v4097_v16 = vrot.slane %v4095_v7, 1  ;;  %10498 = vmatprep.subr.msk.bf16.mxu1 %vm1237_vm4, %v10631_v27  ;;  %vm16886_vm4 = vmmov %vm16868_vm1  ;;  %v7816_v7 = vpop.permute.xlu1 %7815 }
 0x630   : > { %v4098_v39 = vsel %vm441_vm2, %v4094_v52, %v4097_v16 }
 0x631   : > { %9883 = vmatprep.mubr.msk.bf16.mxu0 %vm1071_vm7, %v4098_v39  ;;  %10130 = vmatpush3.bf16.msra.mxu1 %v8119_v63 }
 0x632   : > { %9884 = vmatmul.mubr.msk.bf16.vlgmr.msra.gmra.mrb[32].mxu0 %vm1071_vm7, %v14184_v40 }
 0x633   : > { %9887 = vmatprep.mubr.msk.bf16.mxu0 %vm1071_vm7, %v14234_v11  ;;  %9916 = vmatpush3.bf16.msra.mxu0 %v16883_v49 }
 0x634   : > { %10100 = vmatmul.mubr.msk.bf16.gmra.mrb[36].mxu1 %vm16884_vm9, %v14454_v32  ;;  %vm16896_vm9 = vmmov %vm16894_vm3 }
 0x635   : > { %10103 = vmatprep.mubr.msk.bf16.mxu1 %vm16885_vm6, %v14469_v6  ;;  %vm16897_vm6 = vmmov %vm16894_vm3 }
 0x63a   : > { %9888 = vmatmul.mubr.msk.bf16.gmra.mrb[36].mxu0 %vm1071_vm7, %v14241_v58 }
 0x63b   : > { %9891 = vmatprep.mubr.msk.bf16.mxu0 %vm1071_vm7, %v14275_v34 }
 0x63c   : > { %10104 = vmatmul.mubr.msk.bf16.gmra.mrb[40].mxu1 %vm16886_vm4, %v14476_v35  ;;  %vm16898_vm4 = vcmask 130048  }
 0x63d   : > { %10107 = vmatprep.mubr.msk.bf16.mxu1 %vm16868_vm1, %v14491_v23  ;;  %vm16899_vm1 = vmmov %vm16889_vm0 }
 0x642   : > { %9892 = vmatmul.mubr.msk.bf16.gmra.mrb[40].mxu0 %vm1071_vm7, %v13929_v37  ;;  %v7827_v37 = vpop.permute.xlu0 %7826 }
 0x643   : > { %9895 = vmatprep.mubr.msk.bf16.mxu0 %vm1071_vm7, %v13947_v44  ;;  %v7832_v44 = vpop.permute.xlu1 %7831 }
 0x644   : > { %10108 = vmatmul.mubr.msk.bf16.gmra.mrb[44].mxu1 %vm16887_vm13, %v14498_v61  ;;  %vm16900_vm13 = vmmov %vm16889_vm0 }
 0x645   : > { %10111 = vmatprep.mubr.msk.bf16.mxu1 %vm16888_vm14, %v14513_v10  ;;  %vm16901_vm14 = vmmov %vm16889_vm0 }
 0x646   : > { %v3776_v59 = vpop.permute.xlu0 %3775 }
 0x647   : > { %v3952_v25 = vsel %vm1005_vm5, %v14652_v26, %v3776_v59  ;;  %v16918_v59 = vld [vmem:[#allocation3_spill] sm:$0xff] }
 0x64a   : > { %9896 = vmatmul.mubr.msk.bf16.gmra.mrb[44].mxu0 %vm1071_vm7, %v13998_v12  ;;  %v3888_v12 = vpop.permute.xlu1 %3887 }
 0x64b   : > { %9899 = vmatprep.mubr.msk.bf16.mxu0 %vm1071_vm7, %v14012_v38  ;;  %v3778_v38 = vpop.permute.xlu0 %3777  ;;  %v4016_v8 = vsel %vm16894_vm3, %v3952_v25, %v3888_v12  ;;  %vm16907_vm3 = vmmov %vm16889_vm0  ;;  %v8316_v12 = vsub.s32 3, %v16918_v59  ;;  %v16919_v25 = vld [vmem:[#allocation27_spill] sm:$0xff] }
 0x64c   : > { %10112 = vmatmul.mubr.msk.bf16.gmra.mrb[48].mxu1 %vm16889_vm0, %v14520_v24  ;;  %v4081_v19 = vshll.u32 %v4016_v8, 16  ;;  %v4079_v27 = vshrl.u32 %v4016_v8, 16 }
 0x64d   : > { %10115 = vmatprep.mubr.msk.bf16.mxu1 %vm16890_vm8, %v14532_v28  ;;  %vm16902_vm8 = vmmov %vm16889_vm0 }
 0x64e   : > { %v3890_v26 = vpop.permute.xlu1 %3889  ;;  %v4083_v21 = vrot.slane %v4081_v19, 1 }
 0x650   : > { %v4084_v0 = vor.u32 %v4083_v21, %v4079_v27 }
 0x652   : > { %9900 = vmatmul.mubr.msk.bf16.gmra.mrb[48].mxu0 %vm1071_vm7, %v14036_v29  ;;  %v3954_v29 = vsel %vm1005_vm5, %v14666_v30, %v3778_v38 }
 0x653   : > { %9903 = vmatprep.mubr.msk.bf16.mxu0 %vm1071_vm7, %v14055_v33  ;;  %v7834_v33 = vsel %vm1005_vm5, %v14633_v47, %v7811_v42  ;;  %v4018_v9 = vsel %vm16897_vm6, %v3954_v29, %v3890_v26  ;;  %vm16910_vm6 = vmmov %vm16889_vm0  ;;  %v16920_v29 = vld [vmem:[#allocation28_spill] sm:$0xff] }
 0x654   : > { %10116 = vmatmul.mubr.msk.bf16.gmra.mrb[52].mxu1 %vm16891_vm12, %v14538_v51  ;;  %v4085_v47 = vshll.u32 %v4018_v9, 16  ;;  %vm16903_vm12 = vmmov %vm16889_vm0 }
 0x655   : > { %10119 = vmatprep.mubr.msk.bf16.mxu1 %vm16892_vm10, %v14549_v62  ;;  %vm16905_vm10 = vmmov %vm16889_vm0 }
 0x656   : > { %v4087_v2 = vrot.slane %v4085_v47, 1  ;;  %v16922_v47 = vld [vmem:[#allocation47_spill] sm:$0xff] }
 0x658   : > { %v4088_v52 = vsel %vm441_vm2, %v4084_v0, %v4087_v2  ;;  %vm16904_vm2 = vmmov %vm16889_vm0 }
 0x65a   : > { %9904 = vmatmul.mubr.msk.bf16.gmra.mrb[52].mxu0 %vm1071_vm7, %v14073_v3  ;;  %v7836_v3 = vsel %vm16896_vm9, %v7834_v33, %v7816_v7  ;;  %vm16909_vm9 = vmmov %vm16889_vm0 }
 0x65b   : > { %9907 = vmatprep.mubr.msk.bf16.mxu0 %vm1071_vm7, %v14124_v18  ;;  %v7838_v18 = vsel %vm1071_vm7, %v7836_v3, %v7827_v37  ;;  %v16921_v3 = vld [vmem:[#allocation44_spill] sm:$0xff] }
 0x65c   : > { %10120 = vmatmul.mubr.msk.bf16.gmra.mrb[56].mxu1 %vm16893_vm15, %v14556_v31  ;;  %v7840_v30 = vsel %vm16898_vm4, %v7838_v18, %v7832_v44  ;;  %vm16906_vm15 = vmmov %vm16889_vm0  ;;  %v16917_v44 = vld [vmem:[#allocation50_spill] sm:$0xff] }
 0x65d   : > { %10123 = vmatprep.mubr.msk.bf16.mxu1 %vm16895_vm11, %v14821_v4  ;;  %vm16908_vm11 = vmmov %vm16889_vm0 }
 0x65e   : > { %vm16911_vm4 = vmmov %vm16889_vm0 }
 0x662   : > { %9908 = vmatmul.mubr.msk.bf16.gmra.mrb[56].mxu0 %vm1071_vm7, %v14148_v36  ;;  %v8073_v36 = vpop.permute.xlu0 %8072 }
 0x663   : > { %9911 = vmatprep.mubr.msk.bf16.mxu0 %vm1071_vm7, %v14171_v20  ;;  %v8078_v20 = vpop.permute.xlu1 %8077 }
 0x664   : > { %10124 = vmatmul.mubr.msk.bf16.gmra.mrb[60].mxu1 %vm16899_vm1, %v7840_v30  ;;  %vm16912_vm1 = vmmov %vm16889_vm0 }
 0x665   : > { %10131 = vmatprep.mubr.msk.bf16.mxu1 %vm16900_vm13, %v14427_v56  ;;  %vm16913_vm13 = vmmov %vm16889_vm0 }
 0x66a   : > { %9912 = vmatmul.mubr.msk.bf16.gmra.mrb[60].mxu0 %vm1071_vm7, %v14360_v50  ;;  %v8094_v50 = vpop.permute.xlu1 %8093 }
 0x66b   : > { %9917 = vmatprep.mubr.msk.bf16.mxu0 %vm1071_vm7, %v4088_v52 }
 0x66c   : > { %10132 = vmatmul.mubr.msk.bf16.vlgmr.msra.gmra.mrb[32].mxu1 %vm16901_vm14, %v14447_v14  ;;  %vm16914_vm14 = vcmask 64512  }
 0x66d   : > { %10135 = vmatprep.mubr.msk.bf16.mxu1 %vm16889_vm0, %v14454_v32  ;;  %vm16915_vm0 = vcmask 130048  }
 0x672   : > { %9918 = vmatmul.mubr.msk.bf16.vlgmr.msra.gmra.mrb[32].mxu0 %vm1071_vm7, %v4098_v39 }
 0x673   : > { %9921 = vmatprep.mubr.msk.bf16.mxu0 %vm1071_vm7, %v14184_v40  ;;  %v8096_v40 = vsel %vm1005_vm5, %v14684_v15, %v8073_v36 }
 0x674   : > { %10136 = vmatmul.mubr.msk.bf16.gmra.mrb[36].mxu1 %vm16902_vm8, %v14469_v6  ;;  %vm16916_vm8 = vmmov %vm16912_vm1 }
 0x675   : > { %10139 = vmatprep.mubr.msk.bf16.mxu1 %vm16903_vm12, %v14476_v35 }
 0x67a   : > { %9922 = vmatmul.mubr.msk.bf16.gmra.mrb[36].mxu0 %vm1071_vm7, %v14234_v11  ;;  %v8089_v11 = vpop.permute.xlu0 %8088 }
 0x67b   : > { %9925 = vmatprep.mubr.msk.bf16.mxu0 %vm1071_vm7, %v14241_v58  ;;  %v8098_v58 = vsel %vm16914_vm14, %v8096_v40, %v8078_v20 }
 0x67c   : > { %10140 = vmatmul.mubr.msk.bf16.gmra.mrb[40].mxu1 %vm16904_vm2, %v14491_v23 }
 0x67d   : > { %10143 = vmatprep.mubr.msk.bf16.mxu1 %vm16905_vm10, %v14498_v61 }
 0x682   : > { %9926 = vmatmul.mubr.msk.bf16.gmra.mrb[40].mxu0 %vm1071_vm7, %v14275_v34  ;;  %v8100_v34 = vsel %vm1071_vm7, %v8098_v58, %v8089_v11 }
 0x683   : > { %v8102_v56 = vsel %vm16915_vm0, %v8100_v34, %v8094_v50  ;;  %v16923_v34 = vld [vmem:[#allocation26_spill] sm:$0xff] }
 0x684   : > { %10144 = vmatmul.mubr.msk.bf16.gmra.mrb[44].mxu1 %vm16906_vm15, %v14513_v10 }
 0x685   : > { %10147 = vmatprep.mubr.msk.bf16.mxu1 %vm16907_vm3, %v14520_v24 }
 0x68c   : > { %10148 = vmatmul.mubr.msk.bf16.gmra.mrb[48].mxu1 %vm16908_vm11, %v14532_v28 }
 0x68d   : > { %10151 = vmatprep.mubr.msk.bf16.mxu1 %vm16909_vm9, %v14538_v51 }
 0x694   : > { %10152 = vmatmul.mubr.msk.bf16.gmra.mrb[52].mxu1 %vm16910_vm6, %v14549_v62 }
 0x695   : > { %10155 = vmatprep.mubr.msk.bf16.mxu1 %vm16911_vm4, %v14556_v31 }
 0x69c   : > { %10156 = vmatmul.mubr.msk.bf16.gmra.mrb[56].mxu1 %vm16912_vm1, %v14821_v4 }
 0x69d   : > { %10159 = vmatprep.mubr.msk.bf16.mxu1 %vm16913_vm13, %v7840_v30 }
 0x6a4   : > { %10160 = vmatmul.mubr.msk.bf16.gmra.mrb[60].mxu1 %vm16916_vm8, %v8102_v56 }
 0x71d   : > { %v9897_v14 = vpop.f32.mrb[44].mxu0 }
 0x71e   : > { %v14959_v32 = vadd.f32 %v14772_v1, %v9897_v14  ;;  %v4434_v6 = vpop.f32.mrb[45].mxu0  ;;  %v16924_v14 = vsub.s32 0, %v16918_v59 }
 0x71f   : > { %v14962_v35 = vadd.f32 %v14774_v48, %v4434_v6  ;;  %v9898_v23 = vpop.f32.mrb[46].mxu0 }
 0x720   : > { %v14965_v61 = vadd.f32 %v14776_v57, %v9898_v23  ;;  %v4437_v10 = vpop.f32.mrb[47].mxu0 }
 0x721   : > { %v14968_v24 = vadd.f32 %v14778_v55, %v4437_v10  ;;  %v16925_v10 = vld [vmem:[#allocation17_spill] sm:$0xff] }
 0x725   : > { %v9901_v28 = vpop.f32.mrb[48].mxu0 }
 0x726   : > { %v14971_v51 = vadd.f32 %v14784_v45, %v9901_v28  ;;  %v4450_v62 = vpop.f32.mrb[49].mxu0 }
 0x727   : > { %v14974_v31 = vadd.f32 %v14786_v5, %v4450_v62  ;;  %v9902_v15 = vpop.f32.mrb[50].mxu0 }
 0x728   : > { %v14977_v4 = vadd.f32 %v14788_v13, %v9902_v15  ;;  %v4453_v1 = vpop.f32.mrb[51].mxu0 }
 0x729   : > { %v14980_v48 = vadd.f32 %v14790_v60, %v4453_v1 }
 0x72d   : > { %v9905_v57 = vpop.f32.mrb[52].mxu0 }
 0x72e   : > { %v14983_v55 = vadd.f32 %v14792_v46, %v9905_v57  ;;  %v4466_v16 = vpop.f32.mrb[53].mxu0  ;;  %v16926_v57 = vld [vmem:[#allocation16_spill] sm:$0xff] }
 0x72f   : > { %v14986_v45 = vadd.f32 %v14794_v54, %v4466_v16  ;;  %v9906_v63 = vpop.f32.mrb[54].mxu0 }
 0x730   : > { %v14989_v5 = vadd.f32 %v14796_v53, %v9906_v63  ;;  %v4469_v39 = vpop.f32.mrb[55].mxu0 }
 0x731   : > { %v14992_v13 = vadd.f32 %v14798_v43, %v4469_v39  ;;  %v2775_v43 = vld [vmem:[%s16408_s2] sm:$0x3f] }
 0x732   : > { %v15010_v38 = vrot.slane %v2775_v43, %v8316_v12  ;;  %v15043_v6 = vrot.slane %v2775_v43, %v16924_v14  ;;  %v16929_v14 = vld [vmem:[#allocation43_spill] sm:$0xff] }
 0x735   : > { %v9909_v49 = vpop.f32.mrb[56].mxu0 }
 0x736   : > { %v14995_v60 = vadd.f32 %v14800_v17, %v9909_v49  ;;  %v4482_v42 = vpop.f32.mrb[57].mxu0 }
 0x737   : > { %v14998_v46 = vadd.f32 %v14802_v41, %v4482_v42  ;;  %v9910_v7 = vpop.f32.mrb[58].mxu0 }
 0x738   : > { %v15001_v54 = vadd.f32 %v14804_v22, %v9910_v7  ;;  %v4485_v37 = vpop.f32.mrb[59].mxu0  ;;  %v16927_v7 = vld [vmem:[#allocation19_spill] sm:$0xff] }
 0x739   : > { %v15004_v53 = vadd.f32 %v16917_v44, %v4485_v37 }
 0x73d   : > { %v9913_v17 = vpop.f32.mrb[60].mxu0 }
 0x73e   : > { %v15013_v41 = vadd.f32 %v16919_v25, %v9913_v17  ;;  %v4498_v33 = vpop.f32.mrb[61].mxu0 }
 0x73f   : > { %v15016_v22 = vadd.f32 %v16920_v29, %v4498_v33  ;;  %v9914_v8 = vpop.f32.mrb[62].mxu0  ;;  %v10133_v26 = vpop.f32.mrb[32].mxu1 }
 0x740   : > { %v15019_v9 = vadd.f32 %v16921_v3, %v9914_v8  ;;  %v4501_v18 = vpop.f32.mrb[63].mxu0  ;;  %v8155_v19 = vpop.f32.mrb[33].mxu1  ;;  %v15028_v0 = vadd.f32 %v10133_v26, %v15010_v38 }
 0x741   : > { %v15022_v30 = vadd.f32 %v16922_v47, %v4501_v18  ;;  %v15025_v21 = vadd.f32 %v15010_v38, %v8155_v19  ;;  %v10134_v27 = vpop.f32.mrb[34].mxu1 }
 0x742   : > { %v8158_v2 = vpop.f32.mrb[35].mxu1  ;;  %v15036_v20 = vadd.f32 %v10134_v27, %v15010_v38  ;;  %v8353_v23 = vsel %vm1005_vm5, %v15028_v0, 0.0 }
 0x743   : > { %v15031_v52 = vadd.f32 %v15010_v38, %v8158_v2  ;;  %v8350_v36 = vsel %vm1005_vm5, %v15025_v21, 0.0 }
 0x744   : > { %v8355_v49 = vsel %vm1005_vm5, %v15036_v20, 0.0 }
 0x745   : > { %v8351_v40 = vsel %vm1005_vm5, %v15031_v52, 0.0  ;;  %v9919_v11 = vpop.f32.mrb[32].mxu0 }
 0x746   : > { %v8352_v58 = vadd.f32 %v8351_v40, %v8350_v36  ;;  %v10165_v50 = vadd.f32 %v16923_v34, %v9919_v11  ;;  %v4558_v56 = vpop.f32.mrb[33].mxu0  ;;  %v16928_v11 = vld [vmem:[#allocation18_spill] sm:$0xff] }
 0x747   : > { %v10166_v28 = vadd.f32 %v16925_v10, %v4558_v56  ;;  %v9920_v62 = vpop.f32.mrb[34].mxu0  ;;  %v10137_v15 = vpop.f32.mrb[36].mxu1 }
 0x748   : > { %v8354_v1 = vadd.f32 %v8353_v23, %v8352_v58  ;;  %v10167_v16 = vadd.f32 %v16926_v57, %v9920_v62  ;;  %v4561_v63 = vpop.f32.mrb[35].mxu0  ;;  %v8171_v39 = vpop.f32.mrb[37].mxu1  ;;  %v15059_v25 = vadd.f32 %v10165_v50, %v15043_v6  ;;  %v15070_v26 = vadd.f32 %v10137_v15, %v15010_v38  ;;  %v16930_v57 = vld [vmem:[#allocation9_spill] sm:$0xff] }
 0x749   : > { %v15052_v42 = vadd.f32 %v10166_v28, %v15043_v6  ;;  %v10168_v37 = vadd.f32 %v16927_v7, %v4561_v63  ;;  %v15056_v44 = vadd.f32 %v15010_v38, %v8171_v39  ;;  %v10138_v12 = vpop.f32.mrb[38].mxu1 }
 0x74a   : > { %v8356_v43 = vadd.f32 %v8355_v49, %v8354_v1  ;;  %v8174_v17 = vpop.f32.mrb[39].mxu1  ;;  %v15067_v8 = vadd.f32 %v10167_v16, %v15043_v6  ;;  %v15080_v36 = vadd.f32 %v10138_v12, %v15010_v38  ;;  %v4982_v50 = vsel %vm1005_vm5, %v15059_v25, 0.0 }
 0x74b   : > { %v15062_v33 = vadd.f32 %v10168_v37, %v15043_v6  ;;  %v8357_v29 = vsel %vm1005_vm5, %v15056_v44, 0.0  ;;  %v15073_v18 = vadd.f32 %v15010_v38, %v8174_v17  ;;  %v4979_v19 = vsel %vm1005_vm5, %v15052_v42, 0.0  ;;  %v16931_v37 = vld [vmem:[#allocation45_spill] sm:$0xff] }
 0x74c   : > { %v8358_v3 = vadd.f32 %v8357_v29, %v8356_v43  ;;  %v4984_v62 = vsel %vm1005_vm5, %v15067_v8, 0.0  ;;  %v8361_v15 = vsel %vm1005_vm5, %v15070_v26, 0.0  ;;  %v8363_v29 = vsel %vm1005_vm5, %v15080_v36, 0.0 }
 0x74d   : > { %v4980_v47 = vsel %vm1005_vm5, %v15062_v33, 0.0  ;;  %v9923_v27 = vpop.f32.mrb[36].mxu0  ;;  %v8359_v40 = vsel %vm1005_vm5, %v15073_v18, 0.0 }
 0x74e   : > { %v4981_v2 = vadd.f32 %v4980_v47, %v4979_v19  ;;  %v10169_v58 = vadd.f32 %v16928_v11, %v9923_v27  ;;  %v4574_v34 = vpop.f32.mrb[37].mxu0  ;;  %v8360_v56 = vadd.f32 %v8359_v40, %v8358_v3 }
 0x74f   : > { %v10170_v23 = vadd.f32 %v16929_v14, %v4574_v34  ;;  %v9924_v10 = vpop.f32.mrb[38].mxu0  ;;  %v10141_v28 = vpop.f32.mrb[40].mxu1 }
 0x750   : > { %v4983_v1 = vadd.f32 %v4982_v50, %v4981_v2  ;;  %v10171_v16 = vadd.f32 %v16930_v57, %v9924_v10  ;;  %v4577_v63 = vpop.f32.mrb[39].mxu0  ;;  %v8187_v39 = vpop.f32.mrb[41].mxu1  ;;  %v8362_v49 = vadd.f32 %v8361_v15, %v8360_v56  ;;  %v15103_v3 = vadd.f32 %v10169_v58, %v15043_v6 }
 0x751   : > { %v15094_v7 = vadd.f32 %v10170_v23, %v15043_v6  ;;  %v10172_v12 = vadd.f32 %v16931_v37, %v4577_v63  ;;  %v15098_v43 = vadd.f32 %v15010_v38, %v8187_v39  ;;  %v10142_v17 = vpop.f32.mrb[42].mxu1  ;;  %v16933_v39 = vld [vmem:[#allocation30_spill] sm:$0xff] }
 0x752   : > { %v4985_v19 = vadd.f32 %v4984_v62, %v4983_v1  ;;  %v8190_v47 = vpop.f32.mrb[43].mxu1  ;;  %v8364_v40 = vadd.f32 %v8363_v29, %v8362_v49  ;;  %v15116_v56 = vadd.f32 %v10171_v16, %v15043_v6  ;;  %v16932_v62 = vld [vmem:[#allocation23_spill] sm:$0xff]  ;;  %v4990_v57 = vsel %vm1005_vm5, %v15103_v3, 0.0  ;;  %v16934_v29 = vld [vmem:[#allocation21_spill] sm:$0xff] }
 0x753   : > { %v4986_v27 = vsel %vm1005_vm5, %v15094_v7, 0.0  ;;  %v15108_v2 = vadd.f32 %v10172_v12, %v15043_v6  ;;  %v8365_v11 = vsel %vm1005_vm5, %v15098_v43, 0.0  ;;  %v15113_v50 = vadd.f32 %v15010_v38, %v8190_v47 }
 0x754   : > { %v4987_v34 = vadd.f32 %v4986_v27, %v4985_v19  ;;  %v8366_v10 = vadd.f32 %v8365_v11, %v8364_v40  ;;  %v4992_v27 = vsel %vm1005_vm5, %v15116_v56, 0.0  ;;  %v15130_v40 = vadd.f32 %v10141_v28, %v15010_v38 }
 0x755   : > { %v4988_v58 = vsel %vm1005_vm5, %v15108_v2, 0.0  ;;  %v9927_v14 = vpop.f32.mrb[40].mxu0  ;;  %v8367_v63 = vsel %vm1005_vm5, %v15113_v50, 0.0 }
 0x756   : > { %v4989_v23 = vadd.f32 %v4988_v58, %v4987_v34  ;;  %v10173_v15 = vadd.f32 %v16932_v62, %v9927_v14  ;;  %v4590_v1 = vpop.f32.mrb[41].mxu0  ;;  %v16935_v34 = vld [vmem:[#allocation48_spill] sm:$0xff]  ;;  %v8368_v14 = vadd.f32 %v8367_v63, %v8366_v10  ;;  %v8369_v28 = vsel %vm1005_vm5, %v15130_v40, 0.0 }
 0x757   : > { %v10174_v49 = vadd.f32 %v16933_v39, %v4590_v1  ;;  %v9928_v37 = vpop.f32.mrb[42].mxu0  ;;  %v10145_v16 = vpop.f32.mrb[44].mxu1 }
 0x758   : > { %v4991_v12 = vadd.f32 %v4990_v57, %v4989_v23  ;;  %v10175_v19 = vadd.f32 %v16934_v29, %v9928_v37  ;;  %v4593_v47 = vpop.f32.mrb[43].mxu0  ;;  %v15137_v1 = vadd.f32 %v10173_v15, %v15043_v6  ;;  %v8370_v15 = vadd.f32 %v8369_v28, %v8368_v14 }
 0x759   : > { %v15133_v11 = vadd.f32 %v10174_v49, %v15043_v6  ;;  %v10176_v58 = vadd.f32 %v16935_v34, %v4593_v47  ;;  %v15147_v49 = vadd.f32 %v10142_v17, %v15010_v38  ;;  %v15162_v17 = vadd.f32 %v14968_v24, %v15043_v6 }
 0x75a   : > { %v4993_v62 = vadd.f32 %v4992_v27, %v4991_v12  ;;  %v15150_v37 = vadd.f32 %v10175_v19, %v15043_v6  ;;  %v15156_v12 = vadd.f32 %v14962_v35, %v15043_v6  ;;  %v4998_v29 = vsel %vm1005_vm5, %v15137_v1, 0.0  ;;  %v8203_v27 = vpop.f32.mrb[45].mxu1 }
 0x75b   : > { %v4994_v23 = vsel %vm1005_vm5, %v15133_v11, 0.0  ;;  %v15142_v57 = vadd.f32 %v10176_v58, %v15043_v6  ;;  %v8371_v19 = vsel %vm1005_vm5, %v15147_v49, 0.0  ;;  %v15169_v58 = vadd.f32 %v15010_v38, %v8203_v27  ;;  %v10146_v35 = vpop.f32.mrb[46].mxu1 }
 0x75c   : > { %v4995_v39 = vadd.f32 %v4994_v23, %v4993_v62  ;;  %v5000_v34 = vsel %vm1005_vm5, %v15150_v37, 0.0  ;;  %v15173_v14 = vadd.f32 %v14959_v32, %v15043_v6  ;;  %v8372_v23 = vadd.f32 %v8371_v19, %v8370_v15 }
 0x75d   : > { %v4996_v10 = vsel %vm1005_vm5, %v15142_v57, 0.0  ;;  %16936 = vst [vmem:[#allocation20_spill] sm:$0xff] %v15169_v58  ;;  %v5002_v24 = vsel %vm1005_vm5, %v15156_v12, 0.0  ;;  %v15178_v28 = vadd.f32 %v10145_v16, %v15010_v38  ;;  %v15187_v32 = vadd.f32 %v14965_v61, %v15043_v6 }
 0x75e   : > { %v4997_v63 = vadd.f32 %v4996_v10, %v4995_v39  ;;  %v8206_v39 = vpop.f32.mrb[47].mxu1  ;;  %v8373_v10 = vsel %vm1005_vm5, %v15169_v58, 0.0  ;;  %v5004_v15 = vsel %vm1005_vm5, %v15162_v17, 0.0 }
 0x75f   : > { %16937 = vst [vmem:[#allocation29_spill] sm:$0xff] %v15178_v28  ;;  %v8374_v27 = vadd.f32 %v8373_v10, %v8372_v23  ;;  %v8377_v61 = vsel %vm1005_vm5, %v15178_v28, 0.0  ;;  %v10149_v23 = vpop.f32.mrb[48].mxu1  ;;  %v5008_v59 = vsel %vm1005_vm5, %v15187_v32, 0.0 }
 0x760   : > { %v4999_v47 = vadd.f32 %v4998_v29, %v4997_v63  ;;  %v15183_v63 = vadd.f32 %v15010_v38, %v8206_v39  ;;  %v5006_v39 = vsel %vm1005_vm5, %v15173_v14, 0.0 }
 0x762   : > { %v5001_v62 = vadd.f32 %v5000_v34, %v4999_v47  ;;  %16938 = vst [vmem:[#allocation32_spill] sm:$0xff] %v15183_v63  ;;  %v15192_v47 = vadd.f32 %v10146_v35, %v15010_v38  ;;  %v8375_v16 = vsel %vm1005_vm5, %v15183_v63, 0.0  ;;  %v8219_v35 = vpop.f32.mrb[49].mxu1 }
 0x763   : > { %v8376_v34 = vadd.f32 %v8375_v16, %v8374_v27  ;;  %v15217_v16 = vadd.f32 %v14971_v51, %v15043_v6  ;;  %v15231_v51 = vadd.f32 %v14977_v4, %v15043_v6 }
 0x764   : > { %v5003_v29 = vadd.f32 %v5002_v24, %v5001_v62  ;;  %16939 = vst [vmem:[#allocation33_spill] sm:$0xff] %v15192_v47  ;;  %v15200_v62 = vadd.f32 %v14974_v31, %v15043_v6  ;;  %v8379_v27 = vsel %vm1005_vm5, %v15192_v47, 0.0  ;;  %v15213_v31 = vadd.f32 %v15010_v38, %v8219_v35 }
 0x765   : > { %v8378_v10 = vadd.f32 %v8377_v61, %v8376_v34 }
 0x766   : > { %v5005_v19 = vadd.f32 %v5004_v15, %v5003_v29  ;;  %v15208_v29 = vadd.f32 %v14980_v48, %v15043_v6  ;;  %16940 = vst [vmem:[#allocation25_spill] sm:$0xff] %v15213_v31  ;;  %v10150_v15 = vpop.f32.mrb[50].mxu1  ;;  %v5010_v61 = vsel %vm1005_vm5, %v15200_v62, 0.0  ;;  %v15222_v48 = vadd.f32 %v10149_v23, %v15010_v38 }
 0x767   : > { %v8380_v34 = vadd.f32 %v8379_v27, %v8378_v10  ;;  %v8381_v47 = vsel %vm1005_vm5, %v15213_v31, 0.0  ;;  %v5016_v31 = vsel %vm1005_vm5, %v15231_v51, 0.0 }
 0x768   : > { %v5007_v24 = vadd.f32 %v5006_v39, %v5005_v19  ;;  %v8222_v39 = vpop.f32.mrb[51].mxu1  ;;  %16941 = vst [vmem:[#allocation12_spill] sm:$0xff] %v15222_v48  ;;  %v8385_v4 = vsel %vm1005_vm5, %v15222_v48, 0.0 }
 0x769   : > { %v15227_v35 = vadd.f32 %v15010_v38, %v8222_v39  ;;  %v8382_v63 = vadd.f32 %v8381_v47, %v8380_v34  ;;  %v5014_v39 = vsel %vm1005_vm5, %v15217_v16, 0.0  ;;  %v15244_v47 = vadd.f32 %v14986_v45, %v15043_v6 }
 0x76a   : > { %v5009_v19 = vadd.f32 %v5008_v59, %v5007_v24  ;;  %v5012_v59 = vsel %vm1005_vm5, %v15208_v29, 0.0  ;;  %v15236_v24 = vadd.f32 %v10150_v15, %v15010_v38 }
 0x76b   : > { %16942 = vst [vmem:[#allocation10_spill] sm:$0xff] %v15227_v35  ;;  %v8383_v23 = vsel %vm1005_vm5, %v15227_v35, 0.0 }
 0x76c   : > { %v5011_v28 = vadd.f32 %v5010_v61, %v5009_v19  ;;  %16943 = vst [vmem:[#allocation24_spill] sm:$0xff] %v15236_v24  ;;  %v8384_v27 = vadd.f32 %v8383_v23, %v8382_v63  ;;  %v10153_v19 = vpop.f32.mrb[52].mxu1  ;;  %v8387_v63 = vsel %vm1005_vm5, %v15236_v24, 0.0  ;;  %v15261_v23 = vadd.f32 %v14983_v55, %v15043_v6 }
 0x76d   : > { %v8235_v15 = vpop.f32.mrb[53].mxu1  ;;  %v15275_v55 = vadd.f32 %v14989_v5, %v15043_v6 }
 0x76e   : > { %v5013_v10 = vadd.f32 %v5012_v59, %v5011_v28  ;;  %v8386_v61 = vadd.f32 %v8385_v4, %v8384_v27  ;;  %v15252_v28 = vadd.f32 %v14992_v13, %v15043_v6  ;;  %v15257_v45 = vadd.f32 %v15010_v38, %v8235_v15  ;;  %v10154_v59 = vpop.f32.mrb[54].mxu1 }
 0x76f   : > { %v5018_v4 = vsel %vm1005_vm5, %v15244_v47, 0.0  ;;  %v15266_v13 = vadd.f32 %v10153_v19, %v15010_v38 }
 0x770   : > { %v5015_v34 = vadd.f32 %v5014_v39, %v5013_v10  ;;  %16944 = vst [vmem:[#allocation34_spill] sm:$0xff] %v15257_v45  ;;  %v8388_v27 = vadd.f32 %v8387_v63, %v8386_v61  ;;  %v8238_v39 = vpop.f32.mrb[55].mxu1  ;;  %v8389_v24 = vsel %vm1005_vm5, %v15257_v45, 0.0  ;;  %v5024_v45 = vsel %vm1005_vm5, %v15275_v55, 0.0 }
 0x771   : > { %16945 = vst [vmem:[#allocation49_spill] sm:$0xff] %v15266_v13  ;;  %v15271_v15 = vadd.f32 %v15010_v38, %v8238_v39  ;;  %v5022_v39 = vsel %vm1005_vm5, %v15261_v23, 0.0  ;;  %v8393_v5 = vsel %vm1005_vm5, %v15266_v13, 0.0 }
 0x772   : > { %v5017_v10 = vadd.f32 %v5016_v31, %v5015_v34  ;;  %v8390_v35 = vadd.f32 %v8389_v24, %v8388_v27  ;;  %v5020_v31 = vsel %vm1005_vm5, %v15252_v28, 0.0  ;;  %v15280_v34 = vadd.f32 %v10154_v59, %v15010_v38 }
 0x773   : > { %16946 = vst [vmem:[#allocation11_spill] sm:$0xff] %v15271_v15  ;;  %v8391_v19 = vsel %vm1005_vm5, %v15271_v15, 0.0  ;;  %v15288_v24 = vadd.f32 %v14998_v46, %v15043_v6 }
 0x774   : > { %v5019_v48 = vadd.f32 %v5018_v4, %v5017_v10  ;;  %16947 = vst [vmem:[#allocation14_spill] sm:$0xff] %v15280_v34  ;;  %v8392_v63 = vadd.f32 %v8391_v19, %v8390_v35  ;;  %v10157_v10 = vpop.f32.mrb[56].mxu1  ;;  %v8395_v35 = vsel %vm1005_vm5, %v15280_v34, 0.0  ;;  %v15305_v19 = vadd.f32 %v14995_v60, %v15043_v6 }
 0x775   : > { %v8251_v59 = vpop.f32.mrb[57].mxu1  ;;  %v15319_v60 = vadd.f32 %v15001_v54, %v15043_v6 }
 0x776   : > { %v5021_v61 = vadd.f32 %v5020_v31, %v5019_v48  ;;  %v8394_v4 = vadd.f32 %v8393_v5, %v8392_v63  ;;  %v15296_v48 = vadd.f32 %v15004_v53, %v15043_v6  ;;  %v15301_v46 = vadd.f32 %v15010_v38, %v8251_v59  ;;  %v10158_v31 = vpop.f32.mrb[58].mxu1  ;;  %16949 = vst [vmem:[#allocation15_spill] sm:$0xff] %v15305_v19 }
 0x777   : > { %v5026_v5 = vsel %vm1005_vm5, %v15288_v24, 0.0  ;;  %v15310_v53 = vadd.f32 %v10157_v10, %v15010_v38  ;;  %16950 = vst [vmem:[#allocation4_spill] sm:$0xff] %v15319_v60  ;;  %v5032_v58 = vsel %vm1005_vm5, %v15319_v60, 0.0 }
 0x778   : > { %v5023_v27 = vadd.f32 %v5022_v39, %v5021_v61  ;;  %16948 = vst [vmem:[#allocation46_spill] sm:$0xff] %v15296_v48  ;;  %v8396_v63 = vadd.f32 %v8395_v35, %v8394_v4  ;;  %v8254_v39 = vpop.f32.mrb[59].mxu1  ;;  %v8397_v34 = vsel %vm1005_vm5, %v15301_v46, 0.0 }
 0x779   : > { %v15315_v59 = vadd.f32 %v15010_v38, %v8254_v39  ;;  %v5030_v39 = vsel %vm1005_vm5, %v15305_v19, 0.0  ;;  %v8401_v54 = vsel %vm1005_vm5, %v15310_v53, 0.0 }
 0x77a   : > { %v5025_v61 = vadd.f32 %v5024_v45, %v5023_v27  ;;  %v8398_v15 = vadd.f32 %v8397_v34, %v8396_v63  ;;  %v5028_v45 = vsel %vm1005_vm5, %v15296_v48, 0.0  ;;  %v15324_v27 = vadd.f32 %v10158_v31, %v15010_v38 }
 0x77b   : > { %v8399_v10 = vsel %vm1005_vm5, %v15315_v59, 0.0  ;;  %v15332_v34 = vadd.f32 %v15016_v22, %v15043_v6 }
 0x77c   : > { %v5027_v13 = vadd.f32 %v5026_v5, %v5025_v61  ;;  %v8400_v35 = vadd.f32 %v8399_v10, %v8398_v15  ;;  %v10161_v61 = vpop.f32.mrb[60].mxu1  ;;  %v8403_v15 = vsel %vm1005_vm5, %v15324_v27, 0.0  ;;  %v15349_v10 = vadd.f32 %v15013_v41, %v15043_v6 }
 0x77d   : > { %v8267_v31 = vpop.f32.mrb[61].mxu1  ;;  %v15363_v41 = vadd.f32 %v15019_v9, %v15043_v6 }
 0x77e   : > { %v5029_v4 = vadd.f32 %v5028_v45, %v5027_v13  ;;  %v8402_v5 = vadd.f32 %v8401_v54, %v8400_v35  ;;  %v15340_v13 = vadd.f32 %v15022_v30, %v15043_v6  ;;  %v15345_v22 = vadd.f32 %v15010_v38, %v8267_v31  ;;  %v10162_v45 = vpop.f32.mrb[62].mxu1  ;;  %16952 = vst [vmem:[#allocation6_spill] sm:$0xff] %v15349_v10 }
 0x77f   : > { %v5034_v54 = vsel %vm1005_vm5, %v15332_v34, 0.0  ;;  %v15354_v30 = vadd.f32 %v10161_v61, %v15010_v38  ;;  %v5040_v6 = vsel %vm1005_vm5, %v15363_v41, 0.0 }
 0x780   : > { %v5031_v63 = vadd.f32 %v5030_v39, %v5029_v4  ;;  %16951 = vst [vmem:[#allocation5_spill] sm:$0xff] %v15340_v13  ;;  %v8404_v35 = vadd.f32 %v8403_v15, %v8402_v5  ;;  %v8270_v39 = vpop.f32.mrb[63].mxu1  ;;  %v8405_v60 = vsel %vm1005_vm5, %v15345_v22, 0.0 }
 0x781   : > { %v15359_v31 = vadd.f32 %v15010_v38, %v8270_v39  ;;  %v5038_v39 = vsel %vm1005_vm5, %v15349_v10, 0.0 }
 0x782   : > { %v5033_v4 = vadd.f32 %v5032_v58, %v5031_v63  ;;  %v8406_v48 = vadd.f32 %v8405_v60, %v8404_v35  ;;  %v5036_v58 = vsel %vm1005_vm5, %v15340_v13, 0.0  ;;  %v15368_v63 = vadd.f32 %v10162_v45, %v15010_v38 }
 0x783   : > { %v8407_v61 = vsel %vm1005_vm5, %v15359_v31, 0.0  ;;  %v8409_v60 = vsel %vm1005_vm5, %v15354_v30, 0.0 }
 0x784   : > { %v5035_v19 = vadd.f32 %v5034_v54, %v5033_v4  ;;  %v8408_v15 = vadd.f32 %v8407_v61, %v8406_v48  ;;  %v8411_v38 = vsel %vm1005_vm5, %v15368_v63, 0.0 }
 0x786   : > { %v5037_v5 = vadd.f32 %v5036_v58, %v5035_v19  ;;  %v8410_v9 = vadd.f32 %v8409_v60, %v8408_v15 }
 0x788   : > { %v5039_v4 = vadd.f32 %v5038_v39, %v5037_v5  ;;  %v8412_v35 = vadd.f32 %v8411_v38, %v8410_v9 }
 0x78a   : > { %v5041_v45 = vadd.f32 %v5040_v6, %v5039_v4  ;;  %v8413_v39 = vrot.slane %v8412_v35, 4 }
 0x78c   : > { %v5042_v54 = vrot.slane %v5041_v45, 4  ;;  %v8414_v60 = vadd.f32 %v8413_v39, %v8412_v35 }
 0x78e   : > { %v5043_v13 = vadd.f32 %v5042_v54, %v5041_v45 }
 0x790   : > { %v5044_v19 = vrot.slane %v5043_v13, 2 }
 0x792   : > { %v5045_v48 = vadd.f32 %v5044_v19, %v5043_v13 }
 0x794   : > { %v5046_v58 = vrot.slane %v5045_v48, 1 }
 0x796   : > { %v5047_v61 = vadd.f32 %v5046_v58, %v5045_v48 }
 0x798   : > { %v15380_v10 = vmul.f32 0.00390625, %v5047_v61 }
 0x79a   : > { %v15384_v5 = vsub.f32 %v15142_v57, %v15380_v10  ;;  %v15388_v15 = vsub.f32 %v15150_v37, %v15380_v10  ;;  %v15392_v4 = vsub.f32 %v15052_v42, %v15380_v10  ;;  %v15396_v13 = vsub.f32 %v15062_v33, %v15380_v10 }
 0x79b   : > { %v15400_v9 = vsub.f32 %v15059_v25, %v15380_v10  ;;  %v8415_v57 = vrot.slane %v8414_v60, 2  ;;  %v15404_v6 = vsub.f32 %v15067_v8, %v15380_v10  ;;  %v15412_v38 = vsub.f32 %v15094_v7, %v15380_v10 }
 0x79c   : > { %v5081_v37 = vmul.f32 %v15392_v4, %v15392_v4  ;;  %v5082_v42 = vmul.f32 %v15396_v13, %v15396_v13  ;;  %v15418_v45 = vsub.f32 %v15108_v2, %v15380_v10  ;;  %v15426_v7 = vsub.f32 %v15103_v3, %v15380_v10 }
 0x79d   : > { %v5083_v33 = vmul.f32 %v15400_v9, %v15400_v9  ;;  %v8416_v25 = vadd.f32 %v8415_v57, %v8414_v60  ;;  %v5084_v8 = vmul.f32 %v15404_v6, %v15404_v6  ;;  %v5085_v48 = vmul.f32 %v15412_v38, %v15412_v38 }
 0x79e   : > { %v5113_v35 = vsel %vm1005_vm5, %v5081_v37, 0.0  ;;  %v5114_v54 = vsel %vm1005_vm5, %v5082_v42, 0.0  ;;  %v15433_v2 = vsub.f32 %v15116_v56, %v15380_v10  ;;  %v5086_v39 = vmul.f32 %v15418_v45, %v15418_v45 }
 0x79f   : > { %v5115_v19 = vadd.f32 %v5114_v54, %v5113_v35  ;;  %v5116_v58 = vsel %vm1005_vm5, %v5083_v33, 0.0  ;;  %v5118_v60 = vsel %vm1005_vm5, %v5084_v8, 0.0  ;;  %v8417_v57 = vrot.slane %v8416_v25, 1 }
 0x7a0   : > { %v15440_v3 = vsub.f32 %v15133_v11, %v15380_v10  ;;  %v5087_v42 = vmul.f32 %v15426_v7, %v15426_v7  ;;  %v5120_v33 = vsel %vm1005_vm5, %v5085_v48, 0.0  ;;  %v5088_v56 = vmul.f32 %v15433_v2, %v15433_v2 }
 0x7a1   : > { %v5117_v61 = vadd.f32 %v5116_v58, %v5115_v19  ;;  %v5122_v54 = vsel %vm1005_vm5, %v5086_v39, 0.0  ;;  %v8418_v19 = vadd.f32 %v8417_v57, %v8416_v25  ;;  %v15450_v8 = vsub.f32 %v15137_v1, %v15380_v10 }
 0x7a2   : > { %v5089_v11 = vmul.f32 %v15440_v3, %v15440_v3  ;;  %v5090_v48 = vmul.f32 %v15384_v5, %v15384_v5  ;;  %v15462_v25 = vsub.f32 %v15156_v12, %v15380_v10 }
 0x7a3   : > { %v5119_v37 = vadd.f32 %v5118_v60, %v5117_v61  ;;  %v5124_v61 = vsel %vm1005_vm5, %v5087_v42, 0.0  ;;  %v5091_v1 = vmul.f32 %v15450_v8, %v15450_v8  ;;  %v15469_v42 = vsub.f32 %v15162_v17, %v15380_v10 }
 0x7a4   : > { %v5128_v57 = vsel %vm1005_vm5, %v5089_v11, 0.0 }
 0x7a5   : > { %v5121_v35 = vadd.f32 %v5120_v33, %v5119_v37  ;;  %v5126_v37 = vsel %vm1005_vm5, %v5088_v56, 0.0  ;;  %v15458_v33 = vmul.f32 0.00390625, %v8418_v19 }
 0x7a7   : > { %v5123_v58 = vadd.f32 %v5122_v54, %v5121_v35  ;;  %v5092_v35 = vmul.f32 %v15388_v15, %v15388_v15  ;;  %v5130_v54 = vsel %vm1005_vm5, %v5090_v48, 0.0  ;;  %v15476_v19 = vsub.f32 %v15301_v46, %v15458_v33 }
 0x7a8   : > { %v15480_v12 = vsub.f32 %v15315_v59, %v15458_v33  ;;  %v15488_v17 = vsub.f32 %v15324_v27, %v15458_v33  ;;  %v15496_v46 = vsub.f32 %v15359_v31, %v15458_v33  ;;  %v15500_v59 = vsub.f32 %v15354_v30, %v15458_v33 }
 0x7a9   : > { %v5125_v60 = vadd.f32 %v5124_v61, %v5123_v58  ;;  %16953 = vst [vmem:[#allocation35_spill] sm:$0xff] %v15476_v19  ;;  %v15484_v58 = vsub.f32 %v15310_v53, %v15458_v33  ;;  %v15492_v61 = vsub.f32 %v15345_v22, %v15458_v33  ;;  %v15504_v53 = vsub.f32 %v15173_v14, %v15380_v10 }
 0x7aa   : > { %16954 = vst [vmem:[#allocation39_spill] sm:$0xff] %v15480_v12  ;;  %16956 = vst [vmem:[#allocation7_spill] sm:$0xff] %v15488_v17  ;;  %v5093_v27 = vmul.f32 %v15462_v25, %v15462_v25  ;;  %v5132_v48 = vsel %vm1005_vm5, %v5091_v1, 0.0  ;;  %v15511_v22 = vsub.f32 %v15368_v63, %v15458_v33  ;;  %v15515_v31 = vsub.f32 %v15025_v21, %v15458_v33 }
 0x7ab   : > { %v5127_v39 = vadd.f32 %v5126_v37, %v5125_v60  ;;  %16955 = vst [vmem:[#allocation8_spill] sm:$0xff] %v15484_v58  ;;  %v15519_v30 = vsub.f32 %v15031_v52, %v15458_v33  ;;  %v15523_v14 = vsub.f32 %v15187_v32, %v15380_v10  ;;  %v5094_v37 = vmul.f32 %v15469_v42, %v15469_v42 }
 0x7ac   : > { %v15530_v1 = vsub.f32 %v15028_v0, %v15458_v33  ;;  %v15534_v21 = vsub.f32 %v15200_v62, %v15380_v10  ;;  %v5095_v52 = vmul.f32 %v15504_v53, %v15504_v53  ;;  %v5136_v32 = vsel %vm1005_vm5, %v5093_v27, 0.0 }
 0x7ad   : > { %v5129_v56 = vadd.f32 %v5128_v57, %v5127_v39  ;;  %v5134_v39 = vsel %vm1005_vm5, %v5092_v35, 0.0  ;;  %v8452_v35 = vmul.f32 %v15515_v31, %v15515_v31  ;;  %v8453_v0 = vmul.f32 %v15519_v30, %v15519_v30 }
 0x7ae   : > { %16957 = vst [vmem:[#allocation31_spill] sm:$0xff] %v15530_v1  ;;  %v15549_v62 = vsub.f32 %v15208_v29, %v15380_v10  ;;  %v5097_v29 = vmul.f32 %v15534_v21, %v15534_v21 }
 0x7af   : > { %v5131_v11 = vadd.f32 %v5130_v54, %v5129_v56  ;;  %v15541_v56 = vsub.f32 %v15036_v20, %v15458_v33  ;;  %v5096_v54 = vmul.f32 %v15523_v14, %v15523_v14  ;;  %v15556_v20 = vsub.f32 %v15056_v44, %v15458_v33 }
 0x7b1   : > { %v5133_v60 = vadd.f32 %v5132_v48, %v5131_v11  ;;  %v5138_v11 = vsel %vm1005_vm5, %v5094_v37, 0.0  ;;  %v8454_v48 = vmul.f32 %v15530_v1, %v15530_v1  ;;  %v15569_v37 = vsub.f32 %v15073_v18, %v15458_v33 }
 0x7b2   : > { %v8455_v44 = vmul.f32 %v15541_v56, %v15541_v56 }
 0x7b3   : > { %v5135_v63 = vadd.f32 %v5134_v39, %v5133_v60  ;;  %v15562_v60 = vsub.f32 %v15217_v16, %v15380_v10  ;;  %v5140_v39 = vsel %vm1005_vm5, %v5095_v52, 0.0  ;;  %v15577_v16 = vsub.f32 %v15231_v51, %v15380_v10 }
 0x7b4   : > { %v5142_v52 = vsel %vm1005_vm5, %v5096_v54, 0.0  ;;  %v15591_v51 = vsub.f32 %v15244_v47, %v15380_v10  ;;  %v5144_v54 = vsel %vm1005_vm5, %v5097_v29, 0.0  ;;  %v15605_v47 = vsub.f32 %v15252_v28, %v15380_v10 }
 0x7b5   : > { %v5137_v57 = vadd.f32 %v5136_v32, %v5135_v63  ;;  %v8484_v32 = vsel %vm1005_vm5, %v8452_v35, 0.0  ;;  %v8456_v35 = vmul.f32 %v15556_v20, %v15556_v20  ;;  %v15619_v28 = vsub.f32 %v15261_v23, %v15380_v10 }
 0x7b6   : > { %v15633_v23 = vsub.f32 %v15275_v55, %v15380_v10  ;;  %v15647_v55 = vsub.f32 %v15288_v24, %v15380_v10 }
 0x7b7   : > { %v5139_v27 = vadd.f32 %v5138_v11, %v5137_v57  ;;  %v8485_v57 = vsel %vm1005_vm5, %v8453_v0, 0.0  ;;  %v5098_v11 = vmul.f32 %v15549_v62, %v15549_v62  ;;  %v8487_v0 = vsel %vm1005_vm5, %v8454_v48, 0.0  ;;  %16958 = vst [vmem:[#allocation42_spill] sm:$0xff] %v15619_v28 }
 0x7b8   : > { %v8486_v1 = vadd.f32 %v8485_v57, %v8484_v32  ;;  %v8457_v57 = vmul.f32 %v15569_v37, %v15569_v37  ;;  %v8489_v48 = vsel %vm1005_vm5, %v8455_v44, 0.0  ;;  %v8491_v44 = vsel %vm1005_vm5, %v8456_v35, 0.0  ;;  %16960 = vst [vmem:[#allocation22_spill] sm:$0xff] %v15633_v23  ;;  %16962 = vst [vmem:[#allocation38_spill] sm:$0xff] %v15647_v55 }
 0x7b9   : > { %v5141_v63 = vadd.f32 %v5140_v39, %v5139_v27  ;;  %v15584_v27 = vsub.f32 %v15070_v26, %v15458_v33  ;;  %v5099_v39 = vmul.f32 %v15562_v60, %v15562_v60  ;;  %v15598_v26 = vsub.f32 %v15080_v36, %v15458_v33 }
 0x7ba   : > { %v8488_v32 = vadd.f32 %v8487_v0, %v8486_v1  ;;  %v5146_v29 = vsel %vm1005_vm5, %v5098_v11, 0.0  ;;  %v15612_v36 = vsub.f32 %v15098_v43, %v15458_v33  ;;  %v15626_v43 = vsub.f32 %v15113_v50, %v15458_v33 }
 0x7bb   : > { %v5143_v18 = vadd.f32 %v5142_v52, %v5141_v63  ;;  %v5100_v52 = vmul.f32 %v15577_v16, %v15577_v16  ;;  %v8458_v0 = vmul.f32 %v15584_v27, %v15584_v27  ;;  %v5148_v11 = vsel %vm1005_vm5, %v5099_v39, 0.0 }
 0x7bc   : > { %v8490_v1 = vadd.f32 %v8489_v48, %v8488_v32  ;;  %16959 = vst [vmem:[#allocation40_spill] sm:$0xff] %v15626_v43  ;;  %v8459_v48 = vmul.f32 %v15598_v26, %v15598_v26  ;;  %v8493_v35 = vsel %vm1005_vm5, %v8457_v57, 0.0  ;;  %v15640_v50 = vsub.f32 %v15130_v40, %v15458_v33 }
 0x7bd   : > { %v5145_v63 = vadd.f32 %v5144_v54, %v5143_v18  ;;  %v5101_v54 = vmul.f32 %v15591_v51, %v15591_v51  ;;  %v5150_v39 = vsel %vm1005_vm5, %v5100_v52, 0.0  ;;  %v8495_v57 = vsel %vm1005_vm5, %v8458_v0, 0.0 }
 0x7be   : > { %v8492_v32 = vadd.f32 %v8491_v44, %v8490_v1  ;;  %16961 = vst [vmem:[#allocation37_spill] sm:$0xff] %v15640_v50  ;;  %v8460_v44 = vmul.f32 %v15612_v36, %v15612_v36  ;;  %v15654_v40 = vsub.f32 %v15147_v49, %v15458_v33  ;;  %v8497_v0 = vsel %vm1005_vm5, %v8459_v48, 0.0 }
 0x7bf   : > { %v5147_v18 = vadd.f32 %v5146_v29, %v5145_v63  ;;  %v5102_v29 = vmul.f32 %v15605_v47, %v15605_v47  ;;  %v5152_v52 = vsel %vm1005_vm5, %v5101_v54, 0.0 }
 0x7c0   : > { %v8494_v1 = vadd.f32 %v8493_v35, %v8492_v32  ;;  %v8461_v35 = vmul.f32 %v15626_v43, %v15626_v43  ;;  %v8499_v48 = vsel %vm1005_vm5, %v8460_v44, 0.0  ;;  %v16967_v43 = vld [vmem:[#allocation15_spill] sm:$0xff] }
 0x7c1   : > { %v5149_v63 = vadd.f32 %v5148_v11, %v5147_v18  ;;  %v5103_v11 = vmul.f32 %v15619_v28, %v15619_v28  ;;  %v5104_v28 = vmul.f32 %v15633_v23, %v15633_v23  ;;  %v5154_v54 = vsel %vm1005_vm5, %v5102_v29, 0.0 }
 0x7c2   : > { %v8496_v32 = vadd.f32 %v8495_v57, %v8494_v1  ;;  %v16965_v57 = vld [vmem:[#allocation20_spill] sm:$0xff]  ;;  %v5105_v23 = vmul.f32 %v15647_v55, %v15647_v55  ;;  %v8501_v44 = vsel %vm1005_vm5, %v8461_v35, 0.0 }
 0x7c3   : > { %v5151_v18 = vadd.f32 %v5150_v39, %v5149_v63  ;;  %v16963_v39 = vld [vmem:[#allocation46_spill] sm:$0xff]  ;;  %v15668_v49 = vsub.f32 %v16965_v57, %v15458_v33  ;;  %v5156_v29 = vsel %vm1005_vm5, %v5103_v11, 0.0  ;;  %v8463_v57 = vmul.f32 %v15654_v40, %v15654_v40 }
 0x7c4   : > { %v15661_v24 = vsub.f32 %v16963_v39, %v15380_v10  ;;  %v8498_v1 = vadd.f32 %v8497_v0, %v8496_v32  ;;  %v15675_v39 = vsub.f32 %v16967_v43, %v15380_v10  ;;  %v16969_v0 = vld [vmem:[#allocation32_spill] sm:$0xff]  ;;  %v5158_v11 = vsel %vm1005_vm5, %v5104_v28, 0.0 }
 0x7c5   : > { %v5153_v63 = vadd.f32 %v5152_v52, %v5151_v18  ;;  %16966 = vst [vmem:[#allocation36_spill] sm:$0xff] %v15668_v49  ;;  %v8462_v52 = vmul.f32 %v15640_v50, %v15640_v50  ;;  %v16971_v50 = vld [vmem:[#allocation4_spill] sm:$0xff]  ;;  %v5160_v28 = vsel %vm1005_vm5, %v5105_v23, 0.0 }
 0x7c6   : > { %16964 = vst [vmem:[#allocation13_spill] sm:$0xff] %v15661_v24  ;;  %16968 = vst [vmem:[#allocation41_spill] sm:$0xff] %v15675_v39  ;;  %v8500_v32 = vadd.f32 %v8499_v48, %v8498_v1  ;;  %v15689_v43 = vsub.f32 %v16971_v50, %v15380_v10  ;;  %v5106_v55 = vmul.f32 %v15661_v24, %v15661_v24  ;;  %v16973_v48 = vld [vmem:[#allocation29_spill] sm:$0xff] }
 0x7c7   : > { %v5155_v18 = vadd.f32 %v5154_v54, %v5153_v63  ;;  %v15682_v54 = vsub.f32 %v16969_v0, %v15458_v33  ;;  %v8464_v0 = vmul.f32 %v15668_v49, %v15668_v49  ;;  %v8503_v35 = vsel %vm1005_vm5, %v8462_v52, 0.0  ;;  %v16977_v49 = vld [vmem:[#allocation5_spill] sm:$0xff] }
 0x7c8   : > { %16972 = vst [vmem:[#allocation27_spill] sm:$0xff] %v15689_v43  ;;  %v8502_v1 = vadd.f32 %v8501_v44, %v8500_v32  ;;  %v15703_v50 = vsub.f32 %v15332_v34, %v15380_v10  ;;  %v5107_v24 = vmul.f32 %v15675_v39, %v15675_v39  ;;  %v16975_v44 = vld [vmem:[#allocation33_spill] sm:$0xff]  ;;  %v8505_v52 = vsel %vm1005_vm5, %v8463_v57, 0.0 }
 0x7c9   : > { %v5157_v63 = vadd.f32 %v5156_v29, %v5155_v18  ;;  %16970 = vst [vmem:[#allocation50_spill] sm:$0xff] %v15682_v54  ;;  %v15696_v29 = vsub.f32 %v16973_v48, %v15458_v33  ;;  %v8465_v48 = vmul.f32 %v15682_v54, %v15682_v54  ;;  %v15717_v34 = vsub.f32 %v16977_v49, %v15380_v10  ;;  %v16980_v54 = vld [vmem:[#allocation6_spill] sm:$0xff] }
 0x7ca   : > { %16974 = vst [vmem:[#allocation28_spill] sm:$0xff] %v15703_v50  ;;  %v8504_v32 = vadd.f32 %v8503_v35, %v8502_v1  ;;  %v5108_v39 = vmul.f32 %v15689_v43, %v15689_v43  ;;  %v5162_v23 = vsel %vm1005_vm5, %v5106_v55, 0.0  ;;  %v16979_v35 = vld [vmem:[#allocation25_spill] sm:$0xff]  ;;  %v8507_v57 = vsel %vm1005_vm5, %v8464_v0, 0.0 }
 0x7cb   : > { %v5159_v18 = vadd.f32 %v5158_v11, %v5157_v63  ;;  %v15710_v11 = vsub.f32 %v16975_v44, %v15458_v33  ;;  %16978 = vst [vmem:[#allocation47_spill] sm:$0xff] %v15717_v34  ;;  %v8466_v44 = vmul.f32 %v15696_v29, %v15696_v29  ;;  %v15731_v49 = vsub.f32 %v16980_v54, %v15380_v10 }
 0x7cc   : > { %v8506_v1 = vadd.f32 %v8505_v52, %v8504_v32  ;;  %v5109_v43 = vmul.f32 %v15703_v50, %v15703_v50  ;;  %v5164_v55 = vsel %vm1005_vm5, %v5107_v24, 0.0  ;;  %v16982_v52 = vld [vmem:[#allocation10_spill] sm:$0xff]  ;;  %v8509_v0 = vsel %vm1005_vm5, %v8465_v48, 0.0 }
 0x7cd   : > { %v5161_v63 = vadd.f32 %v5160_v28, %v5159_v18  ;;  %16976 = vst [vmem:[#allocation44_spill] sm:$0xff] %v15710_v11  ;;  %v15724_v28 = vsub.f32 %v16979_v35, %v15458_v33  ;;  %16981 = vst [vmem:[#allocation26_spill] sm:$0xff] %v15731_v49  ;;  %v8467_v35 = vmul.f32 %v15710_v11, %v15710_v11  ;;  %v5166_v24 = vsel %vm1005_vm5, %v5108_v39, 0.0  ;;  %v16986_v39 = vld [vmem:[#allocation24_spill] sm:$0xff] }
 0x7ce   : > { %v8508_v32 = vadd.f32 %v8507_v57, %v8506_v1  ;;  %v15745_v54 = vsub.f32 %v15363_v41, %v15380_v10  ;;  %v5110_v50 = vmul.f32 %v15717_v34, %v15717_v34  ;;  %v16985_v57 = vld [vmem:[#allocation12_spill] sm:$0xff]  ;;  %v8511_v48 = vsel %vm1005_vm5, %v8466_v44, 0.0 }
 0x7cf   : > { %v5163_v18 = vadd.f32 %v5162_v23, %v5161_v63  ;;  %v15738_v23 = vsub.f32 %v16982_v52, %v15458_v33  ;;  %v8468_v52 = vmul.f32 %v15724_v28, %v15724_v28  ;;  %v5111_v10 = vmul.f32 %v15731_v49, %v15731_v49 }
 0x7d0   : > { %16984 = vst [vmem:[#allocation16_spill] sm:$0xff] %v15745_v54  ;;  %v8510_v1 = vadd.f32 %v8509_v0, %v8508_v32  ;;  %v5168_v41 = vsel %vm1005_vm5, %v5109_v43, 0.0  ;;  %v15762_v32 = vsub.f32 %v16986_v39, %v15458_v33  ;;  %v8513_v0 = vsel %vm1005_vm5, %v8467_v35, 0.0  ;;  %v16987_v43 = vld [vmem:[#allocation34_spill] sm:$0xff] }
 0x7d1   : > { %v5165_v63 = vadd.f32 %v5164_v55, %v5163_v18  ;;  %16983 = vst [vmem:[#allocation17_spill] sm:$0xff] %v15738_v23  ;;  %v15752_v55 = vsub.f32 %v16985_v57, %v15458_v33  ;;  %v5170_v44 = vsel %vm1005_vm5, %v5110_v50, 0.0 }
 0x7d2   : > { %v8512_v11 = vadd.f32 %v8511_v48, %v8510_v1  ;;  %v15772_v1 = vsub.f32 %v16987_v43, %v15458_v33  ;;  %v8515_v48 = vsel %vm1005_vm5, %v8468_v52, 0.0  ;;  %v8471_v50 = vmul.f32 %v15762_v32, %v15762_v32  ;;  %v16990_v43 = vld [vmem:[#allocation49_spill] sm:$0xff] }
 0x7d3   : > { %v5167_v18 = vadd.f32 %v5166_v24, %v5165_v63  ;;  %v8469_v63 = vmul.f32 %v15738_v23, %v15738_v23  ;;  %v5112_v24 = vmul.f32 %v15745_v54, %v15745_v54  ;;  %v16988_v23 = vld [vmem:[#allocation11_spill] sm:$0xff]  ;;  %v15788_v52 = vsub.f32 %v16990_v43, %v15458_v33 }
 0x7d4   : > { %v8514_v57 = vadd.f32 %v8513_v0, %v8512_v11  ;;  %v15780_v54 = vsub.f32 %v16988_v23, %v15458_v33 }
 0x7d5   : > { %v5169_v34 = vadd.f32 %v5168_v41, %v5167_v18  ;;  %v8470_v18 = vmul.f32 %v15752_v55, %v15752_v55  ;;  %v5172_v41 = vsel %vm1005_vm5, %v5111_v10, 0.0  ;;  %v8517_v11 = vsel %vm1005_vm5, %v8469_v63, 0.0  ;;  %16991 = vst [vmem:[#allocation18_spill] sm:$0xff] %v15788_v52 }
 0x7d6   : > { %v8516_v39 = vadd.f32 %v8515_v48, %v8514_v57  ;;  %16989 = vst [vmem:[#allocation19_spill] sm:$0xff] %v15780_v54  ;;  %v16992_v48 = vld [vmem:[#allocation14_spill] sm:$0xff]  ;;  %v8473_v63 = vmul.f32 %v15780_v54, %v15780_v54  ;;  %v8476_v54 = vmul.f32 %v15476_v19, %v15476_v19 }
 0x7d7   : > { %v5171_v49 = vadd.f32 %v5170_v44, %v5169_v34  ;;  %v5174_v34 = vsel %vm1005_vm5, %v5112_v24, 0.0  ;;  %v8519_v10 = vsel %vm1005_vm5, %v8470_v18, 0.0  ;;  %v8521_v24 = vsel %vm1005_vm5, %v8471_v50, 0.0 }
 0x7d8   : > { %v8518_v0 = vadd.f32 %v8517_v11, %v8516_v39  ;;  %v8474_v11 = vmul.f32 %v15788_v52, %v15788_v52 }
 0x7d9   : > { %v5173_v35 = vadd.f32 %v5172_v41, %v5171_v49  ;;  %v8472_v49 = vmul.f32 %v15772_v1, %v15772_v1  ;;  %v15795_v41 = vsub.f32 %v16992_v48, %v15458_v33  ;;  %v8525_v33 = vsel %vm1005_vm5, %v8473_v63, 0.0 }
 0x7da   : > { %v8520_v23 = vadd.f32 %v8519_v10, %v8518_v0  ;;  %v8527_v50 = vsel %vm1005_vm5, %v8474_v11, 0.0  ;;  %v8531_v63 = vsel %vm1005_vm5, %v8476_v54, 0.0 }
 0x7db   : > { %v5175_v44 = vadd.f32 %v5174_v34, %v5173_v35  ;;  %16993 = vst [vmem:[#allocation43_spill] sm:$0xff] %v15795_v41  ;;  %v8523_v34 = vsel %vm1005_vm5, %v8472_v49, 0.0  ;;  %v8475_v0 = vmul.f32 %v15795_v41, %v15795_v41 }
 0x7dc   : > { %v8522_v39 = vadd.f32 %v8521_v24, %v8520_v23 }
 0x7dd   : > { %v5176_v57 = vrot.slane %v5175_v44, 4  ;;  %v8529_v49 = vsel %vm1005_vm5, %v8475_v0, 0.0 }
 0x7de   : > { %v8524_v43 = vadd.f32 %v8523_v34, %v8522_v39  ;;  %v8478_v34 = vmul.f32 %v15484_v58, %v15484_v58 }
 0x7df   : > { %v5177_v35 = vadd.f32 %v5176_v57, %v5175_v44  ;;  %v8477_v57 = vmul.f32 %v15480_v12, %v15480_v12 }
 0x7e0   : > { %v8526_v10 = vadd.f32 %v8525_v33, %v8524_v43  ;;  %v8535_v0 = vsel %vm1005_vm5, %v8478_v34, 0.0 }
 0x7e1   : > { %v5178_v18 = vrot.slane %v5177_v35, 2  ;;  %v8533_v11 = vsel %vm1005_vm5, %v8477_v57, 0.0 }
 0x7e2   : > { %v8528_v44 = vadd.f32 %v8527_v50, %v8526_v10  ;;  %v8480_v50 = vmul.f32 %v15492_v61, %v15492_v61 }
 0x7e3   : > { %v5179_v48 = vadd.f32 %v5178_v18, %v5177_v35  ;;  %v8479_v18 = vmul.f32 %v15488_v17, %v15488_v17 }
 0x7e4   : > { %v8530_v24 = vadd.f32 %v8529_v49, %v8528_v44  ;;  %v8481_v44 = vmul.f32 %v15496_v46, %v15496_v46  ;;  %v8482_v49 = vmul.f32 %v15500_v59, %v15500_v59  ;;  %v8539_v57 = vsel %vm1005_vm5, %v8480_v50, 0.0 }
 0x7e5   : > { %v5180_v23 = vrot.slane %v5179_v48, 1  ;;  %v8537_v54 = vsel %vm1005_vm5, %v8479_v18, 0.0  ;;  %v15835_v18 = vld [vmem:[%s16408_s2] sm:$0x3f] }
 0x7e6   : > { %v8532_v35 = vadd.f32 %v8531_v63, %v8530_v24  ;;  %v8541_v63 = vsel %vm1005_vm5, %v8481_v44, 0.0 }
 0x7e7   : > { %v5181_v39 = vadd.f32 %v5180_v23, %v5179_v48 }
 0x7e8   : > { %v8534_v33 = vadd.f32 %v8533_v11, %v8532_v35  ;;  %v8543_v35 = vsel %vm1005_vm5, %v8482_v49, 0.0 }
 0x7e9   : > { %v5182_v43 = vmul.f32 0.00390625, %v5181_v39  ;;  %v8483_v39 = vmul.f32 %v15511_v22, %v15511_v22 }
 0x7ea   : > { %v8536_v48 = vadd.f32 %v8535_v0, %v8534_v33  ;;  %v16994_v33 = vld [vmem:[#allocation3_spill] sm:$0xff] }
 0x7eb   : > { %v5183_v10 = vadd.f32 1e-05, %v5182_v43  ;;  %v8545_v11 = vsel %vm1005_vm5, %v8483_v39, 0.0  ;;  %v16996_v44 = vsub.s32 2, %v16994_v33 }
 0x7ec   : > { %v8538_v23 = vadd.f32 %v8537_v54, %v8536_v48 }
 0x7ed   : > { %10643 = vrsqrt.f32 %v5183_v10  ;;  %v16995_v10 = vsub.s32 1, %v16994_v33  ;;  %v15847_v54 = vrot.slane %v15835_v18, %v16996_v44 }
 0x7ee   : > { %v8540_v24 = vadd.f32 %v8539_v57, %v8538_v23 }
 0x7ef   : > { %v15840_v50 = vrot.slane %v15835_v18, %v16995_v10 }
 0x7f0   : > { %v8542_v34 = vadd.f32 %v8541_v63, %v8540_v24 }
 0x7f2   : > { %v8544_v43 = vadd.f32 %v8543_v35, %v8542_v34 }
 0x7f4   : > { %v8546_v0 = vadd.f32 %v8545_v11, %v8544_v43 }
 0x7f6   : > { %v8547_v49 = vrot.slane %v8546_v0, 4 }
 0x7f7   : > { %v15842_v48 = vpop.eup %10643 }
 0x7f8   : > { %v5194_v23 = vmul.f32 %v15842_v48, %v15384_v5  ;;  %v5186_v57 = vmul.f32 %v15842_v48, %v15396_v13  ;;  %v5185_v24 = vmul.f32 %v15842_v48, %v15392_v4  ;;  %v5188_v39 = vmul.f32 %v15842_v48, %v15404_v6 }
 0x7f9   : > { %v5187_v63 = vmul.f32 %v15842_v48, %v15400_v9  ;;  %v5190_v34 = vmul.f32 %v15842_v48, %v15418_v45  ;;  %v5189_v5 = vmul.f32 %v15842_v48, %v15412_v38  ;;  %v8548_v43 = vadd.f32 %v8547_v49, %v8546_v0 }
 0x7fa   : > { %v5230_v35 = vmul.f32 %v15840_v50, %v5194_v23  ;;  %v5222_v13 = vmul.f32 %v15840_v50, %v5186_v57  ;;  %v5221_v11 = vmul.f32 %v15840_v50, %v5185_v24  ;;  %v5224_v4 = vmul.f32 %v15840_v50, %v5188_v39 }
 0x7fb   : > { %v5223_v6 = vmul.f32 %v15840_v50, %v5187_v63  ;;  %v5226_v10 = vmul.f32 %v15840_v50, %v5190_v34  ;;  %v5225_v9 = vmul.f32 %v15840_v50, %v5189_v5  ;;  %v8549_v44 = vrot.slane %v8548_v43, 2 }
 0x7fc   : > { %v5266_v45 = vadd.f32 %v15847_v54, %v5230_v35  ;;  %v5258_v38 = vadd.f32 %v15847_v54, %v5222_v13  ;;  %v5257_v0 = vadd.f32 %v15847_v54, %v5221_v11  ;;  %v5260_v23 = vadd.f32 %v15847_v54, %v5224_v4 }
 0x7fd   : > { %v5259_v49 = vadd.f32 %v15847_v54, %v5223_v6  ;;  %v5262_v57 = vadd.f32 %v15847_v54, %v5226_v10  ;;  %v5261_v24 = vadd.f32 %v15847_v54, %v5225_v9  ;;  %v8550_v63 = vadd.f32 %v8549_v44, %v8548_v43 }
 0x7fe   : > { %v5298_v39 = vmul.f32 0.2, %v5266_v45  ;;  %v5290_v34 = vmul.f32 0.2, %v5258_v38  ;;  %v5289_v5 = vmul.f32 0.2, %v5257_v0  ;;  %v5192_v4 = vmul.f32 %v15842_v48, %v15433_v2 }
 0x7ff   : > { %v5292_v35 = vmul.f32 0.2, %v5260_v23  ;;  %v5291_v13 = vmul.f32 0.2, %v5259_v49  ;;  %v5294_v11 = vmul.f32 0.2, %v5262_v57  ;;  %v5191_v2 = vmul.f32 %v15842_v48, %v15426_v7 }
 0x800   : > { %v8551_v6 = vrot.slane %v8550_v63, 1  ;;  %v5322_v43 = vmax.f32 %v5258_v38, %v5290_v34  ;;  %v5321_v10 = vmax.f32 %v5257_v0, %v5289_v5  ;;  %v5293_v9 = vmul.f32 0.2, %v5261_v24 }
 0x801   : > { %v5324_v44 = vmax.f32 %v5260_v23, %v5292_v35  ;;  %v5323_v17 = vmax.f32 %v5259_v49, %v5291_v13  ;;  %v5326_v58 = vmax.f32 %v5262_v57, %v5294_v11  ;;  %v5228_v12 = vmul.f32 %v15840_v50, %v5192_v4 }
 0x802   : > { %v8552_v19 = vadd.f32 %v8551_v6, %v8550_v63  ;;  %5354 = vst.msk [vmem:[%s15881_s27 + $0x8] sm:$0xff] %vm1005_vm5, %v5322_v43  ;;  %5353 = vst.msk [vmem:[%s15881_s27] sm:$0xff] %vm1005_vm5, %v5321_v10  ;;  %v5325_v41 = vmax.f32 %v5261_v24, %v5293_v9  ;;  %v5330_v52 = vmax.f32 %v5266_v45, %v5298_v39 }
 0x803   : > { %5356 = vst.msk [vmem:[%s15881_s27 + $0x18] sm:$0xff] %vm1005_vm5, %v5324_v44  ;;  %5355 = vst.msk [vmem:[%s15881_s27 + $0x10] sm:$0xff] %vm1005_vm5, %v5323_v17  ;;  %v5264_v38 = vadd.f32 %v15847_v54, %v5228_v12  ;;  %v5193_v0 = vmul.f32 %v15842_v48, %v15440_v3  ;;  %v5196_v23 = vmul.f32 %v15842_v48, %v15388_v15 }
 0x804   : > { %5358 = vst.msk [vmem:[%s15881_s27 + $0x28] sm:$0xff] %vm1005_vm5, %v5326_v58  ;;  %v5195_v49 = vmul.f32 %v15842_v48, %v15450_v8  ;;  %v8553_v57 = vmul.f32 0.00390625, %v8552_v19  ;;  %5357 = vst.msk [vmem:[%s15881_s27 + $0x20] sm:$0xff] %vm1005_vm5, %v5325_v41  ;;  %v5227_v7 = vmul.f32 %v15840_v50, %v5191_v2  ;;  %v5198_v58 = vmul.f32 %v15842_v48, %v15469_v42 }
 0x805   : > { %5362 = vst.msk [vmem:[%s15881_s27 + $0x48] sm:$0xff] %vm1005_vm5, %v5330_v52  ;;  %v5197_v12 = vmul.f32 %v15842_v48, %v15462_v25  ;;  %v5296_v3 = vmul.f32 0.2, %v5264_v38  ;;  %v5229_v15 = vmul.f32 %v15840_v50, %v5193_v0  ;;  %v5232_v17 = vmul.f32 %v15840_v50, %v5196_v23 }
 0x806   : > { %v5231_v8 = vmul.f32 %v15840_v50, %v5195_v49  ;;  %v8554_v19 = vadd.f32 1e-05, %v8553_v57  ;;  %v5263_v41 = vadd.f32 %v15847_v54, %v5227_v7  ;;  %v5234_v45 = vmul.f32 %v15840_v50, %v5198_v58 }
 0x807   : > { %v5233_v52 = vmul.f32 %v15840_v50, %v5197_v12  ;;  %v5328_v24 = vmax.f32 %v5264_v38, %v5296_v3  ;;  %v5265_v42 = vadd.f32 %v15847_v54, %v5229_v15  ;;  %v5268_v25 = vadd.f32 %v15847_v54, %v5232_v17 }
 0x808   : > { %v5267_v39 = vadd.f32 %v15847_v54, %v5231_v8  ;;  %10645 = vrsqrt.f32 %v8554_v19  ;;  %v5295_v63 = vmul.f32 0.2, %v5263_v41  ;;  %v5270_v34 = vadd.f32 %v15847_v54, %v5234_v45 }
 0x809   : > { %v5269_v5 = vadd.f32 %v15847_v54, %v5233_v52  ;;  %5360 = vst.msk [vmem:[%s15881_s27 + $0x38] sm:$0xff] %vm1005_vm5, %v5328_v24  ;;  %v5297_v35 = vmul.f32 0.2, %v5265_v42  ;;  %v5300_v13 = vmul.f32 0.2, %v5268_v25  ;;  %v5200_v4 = vmul.f32 %v15842_v48, %v15523_v14 }
 0x80a   : > { %v5299_v11 = vmul.f32 0.2, %v5267_v39  ;;  %v5327_v6 = vmax.f32 %v5263_v41, %v5295_v63  ;;  %v5302_v43 = vmul.f32 0.2, %v5270_v34  ;;  %v5199_v9 = vmul.f32 %v15842_v48, %v15504_v53 }
 0x80b   : > { %v5301_v10 = vmul.f32 0.2, %v5269_v5  ;;  %v5329_v44 = vmax.f32 %v5265_v42, %v5297_v35  ;;  %v5332_v2 = vmax.f32 %v5268_v25, %v5300_v13  ;;  %v5236_v0 = vmul.f32 %v15840_v50, %v5200_v4 }
 0x80c   : > { %v5331_v38 = vmax.f32 %v5267_v39, %v5299_v11  ;;  %5359 = vst.msk [vmem:[%s15881_s27 + $0x30] sm:$0xff] %vm1005_vm5, %v5327_v6  ;;  %v5334_v23 = vmax.f32 %v5270_v34, %v5302_v43  ;;  %v5235_v14 = vmul.f32 %v15840_v50, %v5199_v9  ;;  %v8590_v57 = vsub.s32 4, %v16994_v33 }
 0x80d   : > { %v5333_v49 = vmax.f32 %v5269_v5, %v5301_v10  ;;  %5361 = vst.msk [vmem:[%s15881_s27 + $0x40] sm:$0xff] %vm1005_vm5, %v5329_v44  ;;  %5364 = vst.msk [vmem:[%s15881_s27 + $0x58] sm:$0xff] %vm1005_vm5, %v5332_v2  ;;  %v5272_v53 = vadd.f32 %v15847_v54, %v5236_v0  ;;  %v8626_v58 = vsub.s32 5, %v16994_v33  ;;  %v5202_v41 = vmul.f32 %v15842_v48, %v15549_v62  ;;  %v16997_v44 = vld [vmem:[#allocation31_spill] sm:$0xff] }
 0x80e   : > { %5363 = vst.msk [vmem:[%s15881_s27 + $0x50] sm:$0xff] %vm1005_vm5, %v5331_v38  ;;  %5366 = vst.msk [vmem:[%s15881_s27 + $0x68] sm:$0xff] %vm1005_vm5, %v5334_v23  ;;  %v5271_v7 = vadd.f32 %v15847_v54, %v5235_v14  ;;  %v15950_v15 = vrot.slane %v15835_v18, %v8590_v57  ;;  %v5201_v42 = vmul.f32 %v15842_v48, %v15534_v21 }
 0x80f   : > { %5365 = vst.msk [vmem:[%s15881_s27 + $0x60] sm:$0xff] %vm1005_vm5, %v5333_v49  ;;  %v5304_v12 = vmul.f32 0.2, %v5272_v53  ;;  %v15957_v45 = vrot.slane %v15835_v18, %v8626_v58  ;;  %v5238_v24 = vmul.f32 %v15840_v50, %v5202_v41  ;;  %v5204_v62 = vmul.f32 %v15842_v48, %v15577_v16 }
 0x810   : > { %v5303_v3 = vmul.f32 0.2, %v5271_v7  ;;  %v5203_v18 = vmul.f32 %v15842_v48, %v15562_v60  ;;  %v5206_v39 = vmul.f32 %v15842_v48, %v15605_v47  ;;  %v5205_v63 = vmul.f32 %v15842_v48, %v15591_v51 }
 0x811   : > { %v5336_v17 = vmax.f32 %v5272_v53, %v5304_v12  ;;  %v15983_v21 = vadd.f32 %v15847_v54, %v5238_v24  ;;  %v5237_v16 = vmul.f32 %v15840_v50, %v5201_v42  ;;  %v5240_v34 = vmul.f32 %v15840_v50, %v5204_v62  ;;  %v16998_v53 = vld [vmem:[#allocation40_spill] sm:$0xff] }
 0x812   : > { %v15952_v8 = vpop.eup %10645  ;;  %v5335_v19 = vmax.f32 %v5271_v7, %v5303_v3  ;;  %v5239_v60 = vmul.f32 %v15840_v50, %v5203_v18  ;;  %v5242_v35 = vmul.f32 %v15840_v50, %v5206_v39  ;;  %v5241_v51 = vmul.f32 %v15840_v50, %v5205_v63  ;;  %v17002_v42 = vld [vmem:[#allocation44_spill] sm:$0xff]  ;;  %v17003_v63 = vld [vmem:[#allocation17_spill] sm:$0xff] }
 0x813   : > { %v8585_v52 = vmul.f32 %v15952_v8, %v15496_v46  ;;  %5368 = vst.msk [vmem:[%s15881_s27 + $0x78] sm:$0xff] %vm1005_vm5, %v5336_v17  ;;  %v8557_v46 = vmul.f32 %v15952_v8, %v15519_v30  ;;  %v8556_v30 = vmul.f32 %v15952_v8, %v15515_v31  ;;  %v15995_v13 = vmul.f32 0.2, %v15983_v21 }
 0x814   : > { %5367 = vst.msk [vmem:[%s15881_s27 + $0x70] sm:$0xff] %vm1005_vm5, %v5335_v19  ;;  %v15998_v11 = vadd.f32 %v15847_v54, %v5237_v16  ;;  %v16001_v4 = vadd.f32 %v15847_v54, %v5240_v34  ;;  %v16004_v6 = vadd.f32 %v15847_v54, %v5239_v60  ;;  %v8584_v31 = vmul.f32 %v15952_v8, %v15492_v61  ;;  %v17000_v19 = vld [vmem:[#allocation36_spill] sm:$0xff] }
 0x815   : > { %v8621_v33 = vmul.f32 %v15950_v15, %v8585_v52  ;;  %v8593_v5 = vmul.f32 %v15950_v15, %v8557_v46  ;;  %v8586_v43 = vmul.f32 %v15952_v8, %v15500_v59  ;;  %v8587_v10 = vmul.f32 %v15952_v8, %v15511_v22  ;;  %v17001_v52 = vld [vmem:[#allocation50_spill] sm:$0xff] }
 0x816   : > { %v8558_v2 = vmul.f32 %v15952_v8, %v16997_v44  ;;  %v8559_v38 = vmul.f32 %v15952_v8, %v15541_v56  ;;  %v8592_v0 = vmul.f32 %v15950_v15, %v8556_v30  ;;  %v16018_v23 = vadd.f32 %v15847_v54, %v5242_v35 }
 0x817   : > { %v15974_v25 = vadd.f32 %v15957_v45, %v8621_v33  ;;  %v8629_v47 = vadd.f32 %v15957_v45, %v8593_v5  ;;  %v8560_v61 = vmul.f32 %v15952_v8, %v15556_v20  ;;  %v8561_v59 = vmul.f32 %v15952_v8, %v15569_v37  ;;  %v16999_v20 = vld [vmem:[#allocation37_spill] sm:$0xff]  ;;  %v17004_v5 = vld [vmem:[#allocation19_spill] sm:$0xff] }
 0x818   : > { %v16025_v22 = vadd.f32 %v15847_v54, %v5241_v51  ;;  %v8562_v14 = vmul.f32 %v15952_v8, %v15584_v27  ;;  %v8563_v56 = vmul.f32 %v15952_v8, %v15598_v26  ;;  %v8564_v57 = vmul.f32 %v15952_v8, %v15612_v36  ;;  %v17005_v51 = vld [vmem:[#allocation18_spill] sm:$0xff] }
 0x819   : > { %v8661_v9 = vmul.f32 0.2, %v8629_v47  ;;  %v8565_v7 = vmul.f32 %v15952_v8, %v16998_v53  ;;  %v8566_v58 = vmul.f32 %v15952_v8, %v16999_v20  ;;  %v8620_v37 = vmul.f32 %v15950_v15, %v8584_v31 }
 0x81a   : > { %v8622_v12 = vmul.f32 %v15950_v15, %v8586_v43  ;;  %v8623_v27 = vmul.f32 %v15950_v15, %v8587_v10  ;;  %v8567_v26 = vmul.f32 %v15952_v8, %v15654_v40  ;;  %v8594_v3 = vmul.f32 %v15950_v15, %v8558_v2  ;;  %v17006_v43 = vld [vmem:[#allocation43_spill] sm:$0xff] }
 0x81b   : > { %v8693_v49 = vmax.f32 %v8629_v47, %v8661_v9  ;;  %v8595_v36 = vmul.f32 %v15950_v15, %v8559_v38  ;;  %v8628_v17 = vadd.f32 %v15957_v45, %v8592_v0  ;;  %v8568_v41 = vmul.f32 %v15952_v8, %v17000_v19 }
 0x81c   : > { %v8569_v33 = vmul.f32 %v15952_v8, %v17001_v52  ;;  %v8570_v24 = vmul.f32 %v15952_v8, %v15696_v29  ;;  %v8571_v62 = vmul.f32 %v15952_v8, %v17002_v42  ;;  %v8572_v40 = vmul.f32 %v15952_v8, %v15724_v28 }
 0x81d   : > { %8758 = vrot.lane.b32.xlu1 %v8693_v49, %s10683_s7  ;;  %v8596_v18 = vmul.f32 %v15950_v15, %v8560_v61  ;;  %v8597_v46 = vmul.f32 %v15950_v15, %v8561_v59  ;;  %v8660_v39 = vmul.f32 0.2, %v8628_v17  ;;  %v8573_v16 = vmul.f32 %v15952_v8, %v17003_v63 }
 0x81e   : > { %v8574_v34 = vmul.f32 %v15952_v8, %v15752_v55  ;;  %v8575_v29 = vmul.f32 %v15952_v8, %v15762_v32  ;;  %v8576_v60 = vmul.f32 %v15952_v8, %v15772_v1  ;;  %v8577_v28 = vmul.f32 %v15952_v8, %v17004_v5  ;;  %v17007_v1 = vld [vmem:[#allocation35_spill] sm:$0xff] }
 0x81f   : > { %v8692_v30 = vmax.f32 %v8628_v17, %v8660_v39  ;;  %v8630_v35 = vadd.f32 %v15957_v45, %v8594_v3  ;;  %v8631_v47 = vadd.f32 %v15957_v45, %v8595_v36  ;;  %v8578_v31 = vmul.f32 %v15952_v8, %v17005_v51 }
 0x820   : > { %v16074_v55 = vmul.f32 %v15952_v8, %v17006_v43  ;;  %v8598_v32 = vmul.f32 %v15950_v15, %v8562_v14  ;;  %v8599_v10 = vmul.f32 %v15950_v15, %v8563_v56  ;;  %v16080_v9 = vmul.f32 %v15952_v8, %v17007_v1 }
 0x821   : > { %v8600_v44 = vmul.f32 %v15950_v15, %v8564_v57  ;;  %8756 = vrot.lane.b32.xlu0 %v8692_v30, %s10683_s7  ;;  %v8632_v2 = vadd.f32 %v15957_v45, %v8596_v18  ;;  %v8633_v38 = vadd.f32 %v15957_v45, %v8597_v46  ;;  %v8601_v0 = vmul.f32 %v15950_v15, %v8565_v7 }
 0x822   : > { %v16088_v61 = vadd.f32 %v15957_v45, %v8620_v37  ;;  %v16091_v59 = vadd.f32 %v15957_v45, %v8622_v12  ;;  %v16094_v49 = vadd.f32 %v15957_v45, %v8623_v27  ;;  %v8602_v14 = vmul.f32 %v15950_v15, %v8566_v58  ;;  %v17008_v58 = vld [vmem:[#allocation39_spill] sm:$0xff] }
 0x823   : > { %v8663_v56 = vmul.f32 0.2, %v8631_v47  ;;  %v8662_v57 = vmul.f32 0.2, %v8630_v35  ;;  %v5338_v53 = vmax.f32 %v15983_v21, %v15995_v13  ;;  %v8603_v20 = vmul.f32 %v15950_v15, %v8567_v26 }
 0x824   : > { %v8605_v7 = vmul.f32 %v15950_v15, %v8569_v33  ;;  %v8634_v37 = vadd.f32 %v15957_v45, %v8598_v32  ;;  %v8635_v3 = vadd.f32 %v15957_v45, %v8599_v10  ;;  %v8665_v17 = vmul.f32 0.2, %v8633_v38 }
 0x825   : > { %v8695_v12 = vmax.f32 %v8631_v47, %v8663_v56  ;;  %v8694_v36 = vmax.f32 %v8630_v35, %v8662_v57  ;;  %v8664_v27 = vmul.f32 0.2, %v8632_v2  ;;  %5370 = vst.msk [vmem:[%s15881_s27 + $0x88] sm:$0xff] %vm1005_vm5, %v5338_v53  ;;  %v16107_v19 = vmul.f32 %v15952_v8, %v17008_v58 }
 0x826   : > { %v8604_v21 = vmul.f32 %v15950_v15, %v8568_v41  ;;  %v8606_v13 = vmul.f32 %v15950_v15, %v8570_v24  ;;  %v8607_v26 = vmul.f32 %v15950_v15, %v8571_v62  ;;  %v8608_v52 = vmul.f32 %v15950_v15, %v8572_v40 }
 0x827   : > { %v8609_v33 = vmul.f32 %v15950_v15, %v8573_v16  ;;  %v8636_v42 = vadd.f32 %v15957_v45, %v8600_v44  ;;  %8762 = vrot.lane.b32.xlu1 %v8695_v12, %s10683_s7  ;;  %8760 = vrot.lane.b32.xlu0 %v8694_v36, %s10683_s7  ;;  %v8637_v18 = vadd.f32 %v15957_v45, %v8601_v0  ;;  %v8667_v39 = vmul.f32 0.2, %v8635_v3 }
 0x828   : > { %v16119_v46 = vadd.f32 %v15957_v45, %v8602_v14  ;;  %v16122_v41 = vadd.f32 %v15957_v45, %v8603_v20  ;;  %v16125_v24 = vadd.f32 %v15957_v45, %v8605_v7  ;;  %v8697_v62 = vmax.f32 %v8633_v38, %v8665_v17 }
 0x829   : > { %v8696_v40 = vmax.f32 %v8632_v2, %v8664_v27  ;;  %v8666_v63 = vmul.f32 0.2, %v8634_v37  ;;  %v8610_v16 = vmul.f32 %v15950_v15, %v8574_v34  ;;  %v16129_v5 = vadd.f32 %v15957_v45, %v8604_v21 }
 0x82a   : > { %v16132_v30 = vadd.f32 %v15957_v45, %v8606_v13  ;;  %v16135_v35 = vadd.f32 %v15957_v45, %v8607_v26  ;;  %v8611_v47 = vmul.f32 %v15950_v15, %v8575_v29  ;;  %v16139_v51 = vmul.f32 %v15950_v15, %v8576_v60 }
 0x82b   : > { %v16142_v43 = vmul.f32 %v15950_v15, %v8577_v28  ;;  %8766 = vrot.lane.b32.xlu1 %v8697_v62, %s10683_s7  ;;  %8764 = vrot.lane.b32.xlu0 %v8696_v40, %s10683_s7  ;;  %v16147_v34 = vadd.f32 %v15957_v45, %v8609_v33  ;;  %v8669_v32 = vmul.f32 0.2, %v8637_v18  ;;  %v8668_v10 = vmul.f32 0.2, %v8636_v42  ;;  %v17011_v40 = vld [vmem:[#allocation13_spill] sm:$0xff] }
 0x82c   : > { %v8671_v1 = vmul.f32 0.2, %v16122_v41  ;;  %v8699_v44 = vmax.f32 %v8635_v3, %v8667_v39  ;;  %v8698_v2 = vmax.f32 %v8634_v37, %v8666_v63  ;;  %v8670_v29 = vmul.f32 0.2, %v16119_v46  ;;  %v17009_v37 = vld [vmem:[#allocation22_spill] sm:$0xff] }
 0x82d   : > { %v16152_v60 = vmul.f32 0.2, %v16125_v24  ;;  %v16155_v28 = vmul.f32 %v15950_v15, %v8578_v31  ;;  %v8672_v38 = vmul.f32 0.2, %v16129_v5  ;;  %v16159_v0 = vmul.f32 0.2, %v16135_v35 }
 0x82e   : > { %v16162_v14 = vmul.f32 0.2, %v16132_v30  ;;  %v16165_v56 = vadd.f32 %v15957_v45, %v8608_v52  ;;  %v16168_v57 = vadd.f32 %v15957_v45, %v8610_v16  ;;  %v16171_v53 = vadd.f32 %v15957_v45, %v8611_v47 }
 0x82f   : > { %8770 = vrot.lane.b32.xlu1 %v8699_v44, %s10683_s7  ;;  %8768 = vrot.lane.b32.xlu0 %v8698_v2, %s10683_s7  ;;  %v8701_v31 = vmax.f32 %v8637_v18, %v8669_v32  ;;  %v8700_v20 = vmax.f32 %v8636_v42, %v8668_v10  ;;  %v8703_v7 = vmax.f32 %v16122_v41, %v8671_v1  ;;  %v16182_v17 = vmul.f32 0.2, %v16147_v34  ;;  %v17013_v1 = vld [vmem:[#allocation27_spill] sm:$0xff] }
 0x830   : > { %v5208_v3 = vmul.f32 %v15842_v48, %v17009_v37  ;;  %v8702_v12 = vmax.f32 %v16119_v46, %v8670_v29  ;;  %v8705_v36 = vmax.f32 %v16125_v24, %v16152_v60  ;;  %v5305_v27 = vmul.f32 0.2, %v15998_v11  ;;  %v17010_v24 = vld [vmem:[#allocation42_spill] sm:$0xff]  ;;  %v17015_v29 = vld [vmem:[#allocation47_spill] sm:$0xff] }
 0x831   : > { %v8704_v58 = vmax.f32 %v16129_v5, %v8672_v38  ;;  %v8707_v21 = vmax.f32 %v16135_v35, %v16159_v0  ;;  %v8706_v13 = vmax.f32 %v16132_v30, %v16162_v14  ;;  %v5308_v26 = vmul.f32 0.2, %v16001_v4 }
 0x832   : > { %v5337_v52 = vmax.f32 %v15998_v11, %v5305_v27  ;;  %v5307_v33 = vmul.f32 0.2, %v16004_v6  ;;  %v5310_v42 = vmul.f32 0.2, %v16018_v23  ;;  %v5309_v18 = vmul.f32 0.2, %v16025_v22 }
 0x833   : > { %8774 = vrot.lane.b32.xlu1 %v8701_v31, %s10683_s7  ;;  %8772 = vrot.lane.b32.xlu0 %v8700_v20, %s10683_s7  ;;  %v5340_v46 = vmax.f32 %v16001_v4, %v5308_v26  ;;  %v5244_v41 = vmul.f32 %v15840_v50, %v5208_v3  ;;  %v5207_v62 = vmul.f32 %v15842_v48, %v17010_v24  ;;  %v17012_v4 = vld [vmem:[#allocation38_spill] sm:$0xff]  ;;  %v17016_v27 = vld [vmem:[#allocation28_spill] sm:$0xff]  ;;  %v8679_v14 = vmul.f32 0.2, %v16171_v53 }
 0x834   : > { %v5210_v39 = vmul.f32 %v15842_v48, %v17011_v40  ;;  %5369 = vst.msk [vmem:[%s15881_s27 + $0x80] sm:$0xff] %vm1005_vm5, %v5337_v52  ;;  %v5339_v11 = vmax.f32 %v16004_v6, %v5307_v33  ;;  %v5342_v63 = vmax.f32 %v16018_v23, %v5310_v42  ;;  %v5341_v16 = vmax.f32 %v16025_v22, %v5309_v18  ;;  %v17014_v22 = vld [vmem:[#allocation41_spill] sm:$0xff] }
 0x835   : > { %v5209_v5 = vmul.f32 %v15842_v48, %v17012_v4  ;;  %5372 = vst.msk [vmem:[%s15881_s27 + $0x98] sm:$0xff] %vm1005_vm5, %v5340_v46  ;;  %v5280_v47 = vadd.f32 %v15847_v54, %v5244_v41  ;;  %v5243_v32 = vmul.f32 %v15840_v50, %v5207_v62  ;;  %v5212_v44 = vmul.f32 %v15842_v48, %v17013_v1  ;;  %v17018_v1 = vld [vmem:[#allocation26_spill] sm:$0xff] }
 0x836   : > { %v5246_v10 = vmul.f32 %v15840_v50, %v5210_v39  ;;  %v16220_v6 = vmul.f32 0.2, %v16165_v56  ;;  %5371 = vst.msk [vmem:[%s15881_s27 + $0x90] sm:$0xff] %vm1005_vm5, %v5339_v11  ;;  %5374 = vst.msk [vmem:[%s15881_s27 + $0xa8] sm:$0xff] %vm1005_vm5, %v5342_v63  ;;  %v5211_v2 = vmul.f32 %v15842_v48, %v17014_v22  ;;  %v5214_v60 = vmul.f32 %v15842_v48, %v17015_v29  ;;  %v17017_v63 = vld [vmem:[#allocation16_spill] sm:$0xff] }
 0x837   : > { %8778 = vrot.lane.b32.xlu1 %v8703_v7, %s10683_s7  ;;  %8776 = vrot.lane.b32.xlu0 %v8702_v12, %s10683_s7  ;;  %5373 = vst.msk [vmem:[%s15881_s27 + $0xa0] sm:$0xff] %vm1005_vm5, %v5341_v16  ;;  %v5245_v23 = vmul.f32 %v15840_v50, %v5209_v5  ;;  %v5312_v38 = vmul.f32 0.2, %v5280_v47  ;;  %v5279_v31 = vadd.f32 %v15847_v54, %v5243_v32 }
 0x838   : > { %v5282_v20 = vadd.f32 %v15847_v54, %v5246_v10  ;;  %v5248_v7 = vmul.f32 %v15840_v50, %v5212_v44  ;;  %v5247_v3 = vmul.f32 %v15840_v50, %v5211_v2  ;;  %v5250_v12 = vmul.f32 %v15840_v50, %v5214_v60 }
 0x839   : > { %v5281_v37 = vadd.f32 %v15847_v54, %v5245_v23  ;;  %v5213_v26 = vmul.f32 %v15842_v48, %v17016_v27  ;;  %v5344_v52 = vmax.f32 %v5280_v47, %v5312_v38  ;;  %v5311_v33 = vmul.f32 0.2, %v5279_v31 }
 0x83a   : > { %v5314_v42 = vmul.f32 0.2, %v5282_v20  ;;  %v5284_v18 = vadd.f32 %v15847_v54, %v5248_v7  ;;  %v5283_v41 = vadd.f32 %v15847_v54, %v5247_v3  ;;  %v5286_v24 = vadd.f32 %v15847_v54, %v5250_v12 }
 0x83b   : > { %8782 = vrot.lane.b32.xlu1 %v8705_v36, %s10683_s7  ;;  %8780 = vrot.lane.b32.xlu0 %v8704_v58, %s10683_s7  ;;  %v5313_v46 = vmul.f32 0.2, %v5281_v37  ;;  %v5249_v62 = vmul.f32 %v15840_v50, %v5213_v26  ;;  %5376 = vst.msk [vmem:[%s15881_s27 + $0xb8] sm:$0xff] %vm1005_vm5, %v5344_v52  ;;  %v5343_v40 = vmax.f32 %v5279_v31, %v5311_v33 }
 0x83c   : > { %v5346_v39 = vmax.f32 %v5282_v20, %v5314_v42  ;;  %v5316_v11 = vmul.f32 0.2, %v5284_v18  ;;  %v5216_v36 = vmul.f32 %v15842_v48, %v17017_v63  ;;  %v5315_v4 = vmul.f32 0.2, %v5283_v41 }
 0x83d   : > { %v5345_v16 = vmax.f32 %v5281_v37, %v5313_v46  ;;  %v5318_v58 = vmul.f32 0.2, %v5286_v24  ;;  %v5285_v5 = vadd.f32 %v15847_v54, %v5249_v62  ;;  %v8615_v47 = vmul.f32 %v15950_v15, %v16074_v55  ;;  %5375 = vst.msk [vmem:[%s15881_s27 + $0xb0] sm:$0xff] %vm1005_vm5, %v5343_v40 }
 0x83e   : > { %5378 = vst.msk [vmem:[%s15881_s27 + $0xc8] sm:$0xff] %vm1005_vm5, %v5346_v39  ;;  %v5348_v32 = vmax.f32 %v5284_v18, %v5316_v11  ;;  %v5252_v10 = vmul.f32 %v15840_v50, %v5216_v36  ;;  %v5215_v44 = vmul.f32 %v15842_v48, %v17018_v1  ;;  %v8648_v23 = vadd.f32 %v15957_v45, %v16139_v51 }
 0x83f   : > { %8786 = vrot.lane.b32.xlu1 %v8707_v21, %s10683_s7  ;;  %8784 = vrot.lane.b32.xlu0 %v8706_v13, %s10683_s7  ;;  %5377 = vst.msk [vmem:[%s15881_s27 + $0xc0] sm:$0xff] %vm1005_vm5, %v5345_v16  ;;  %v5347_v55 = vmax.f32 %v5283_v41, %v5315_v4  ;;  %v5350_v22 = vmax.f32 %v5286_v24, %v5318_v58  ;;  %v5317_v48 = vmul.f32 0.2, %v5285_v5  ;;  %v8678_v21 = vmul.f32 0.2, %v16168_v57 }
 0x840   : > { %v8649_v2 = vadd.f32 %v15957_v45, %v16142_v43  ;;  %v8709_v51 = vmax.f32 %v16147_v34, %v16182_v17  ;;  %5380 = vst.msk [vmem:[%s15881_s27 + $0xd8] sm:$0xff] %vm1005_vm5, %v5348_v32  ;;  %v5288_v35 = vadd.f32 %v15847_v54, %v5252_v10  ;;  %v5251_v0 = vmul.f32 %v15840_v50, %v5215_v44  ;;  %v17019_v34 = vld [vmem:[#allocation8_spill] sm:$0xff]  ;;  %v17020_v50 = vld [vmem:[#allocation7_spill] sm:$0xff] }
 0x841   : > { %v8708_v30 = vmax.f32 %v16165_v56, %v16220_v6  ;;  %5379 = vst.msk [vmem:[%s15881_s27 + $0xd0] sm:$0xff] %vm1005_vm5, %v5347_v55  ;;  %5382 = vst.msk [vmem:[%s15881_s27 + $0xe8] sm:$0xff] %vm1005_vm5, %v5350_v22  ;;  %v5349_v43 = vmax.f32 %v5285_v5, %v5317_v48  ;;  %v8582_v17 = vmul.f32 %v15952_v8, %v17019_v34  ;;  %v8688_v36 = vmul.f32 0.2, %v16088_v61 }
 0x842   : > { %v5320_v13 = vmul.f32 0.2, %v5288_v35  ;;  %v5287_v29 = vadd.f32 %v15847_v54, %v5251_v0  ;;  %v8583_v60 = vmul.f32 %v15952_v8, %v17020_v50  ;;  %v8616_v56 = vmul.f32 %v15950_v15, %v16080_v9 }
 0x843   : > { %v8617_v6 = vmul.f32 %v15950_v15, %v16107_v19  ;;  %8790 = vrot.lane.b32.xlu1 %v8709_v51, %s10683_s7  ;;  %8788 = vrot.lane.b32.xlu0 %v8708_v30, %s10683_s7  ;;  %5381 = vst.msk [vmem:[%s15881_s27 + $0xe0] sm:$0xff] %vm1005_vm5, %v5349_v43  ;;  %v8650_v38 = vadd.f32 %v15957_v45, %v16155_v28  ;;  %v8681_v7 = vmul.f32 0.2, %v8649_v2  ;;  %v8680_v19 = vmul.f32 0.2, %v8648_v23 }
 0x844   : > { %v8651_v54 = vadd.f32 %v15957_v45, %v8615_v47  ;;  %v5352_v31 = vmax.f32 %v5288_v35, %v5320_v13  ;;  %v5319_v8 = vmul.f32 0.2, %v5287_v29  ;;  %v8711_v20 = vmax.f32 %v16171_v53, %v8679_v14 }
 0x845   : > { %v8710_v9 = vmax.f32 %v16168_v57, %v8678_v21  ;;  %v8618_v28 = vmul.f32 %v15950_v15, %v8582_v17  ;;  %v8619_v3 = vmul.f32 %v15950_v15, %v8583_v60  ;;  %v8652_v12 = vadd.f32 %v15957_v45, %v8616_v56 }
 0x846   : > { %5384 = vst.msk [vmem:[%s15881_s27 + $0xf8] sm:$0xff] %vm1005_vm5, %v5352_v31  ;;  %v5351_v37 = vmax.f32 %v5287_v29, %v5319_v8  ;;  %v8653_v27 = vadd.f32 %v15957_v45, %v8617_v6  ;;  %v8713_v57 = vmax.f32 %v8649_v2, %v8681_v7  ;;  %v8712_v53 = vmax.f32 %v8648_v23, %v8680_v19 }
 0x847   : > { %8794 = vrot.lane.b32.xlu1 %v8711_v20, %s10683_s7  ;;  %8792 = vrot.lane.b32.xlu0 %v8710_v9, %s10683_s7  ;;  %v8683_v26 = vmul.f32 0.2, %v8651_v54  ;;  %v8682_v52 = vmul.f32 0.2, %v8650_v38  ;;  %v8654_v33 = vadd.f32 %v15957_v45, %v8618_v28  ;;  %v8655_v42 = vadd.f32 %v15957_v45, %v8619_v3 }
 0x848   : > { %5383 = vst.msk [vmem:[%s15881_s27 + $0xf0] sm:$0xff] %vm1005_vm5, %v5351_v37  ;;  %v8685_v46 = vmul.f32 0.2, %v8653_v27  ;;  %v8684_v41 = vmul.f32 0.2, %v8652_v12  ;;  %v8720_v4 = vmax.f32 %v16088_v61, %v8688_v36  ;;  %vm8852_vm5 = vcmask 64544  }
 0x849   : > { %v8715_v18 = vmax.f32 %v8651_v54, %v8683_v26  ;;  %v8714_v15 = vmax.f32 %v8650_v38, %v8682_v52  ;;  %v8687_v40 = vmul.f32 0.2, %v8655_v42  ;;  %v8686_v39 = vmul.f32 0.2, %v8654_v33 }
 0x84a   : > { %v8717_v24 = vmax.f32 %v8653_v27, %v8685_v46  ;;  %v8716_v62 = vmax.f32 %v8652_v12, %v8684_v41  ;;  %v8689_v45 = vmul.f32 0.2, %v15974_v25  ;;  %v8691_v58 = vmul.f32 0.2, %v16094_v49 }
 0x84b   : > { %8798 = vrot.lane.b32.xlu1 %v8713_v57, %s10683_s7  ;;  %8796 = vrot.lane.b32.xlu0 %v8712_v53, %s10683_s7  ;;  %v8719_v11 = vmax.f32 %v8655_v42, %v8687_v40  ;;  %v8718_v63 = vmax.f32 %v8654_v33, %v8686_v39  ;;  %v8690_v5 = vmul.f32 0.2, %v16091_v59 }
 0x84c   : > { %v8721_v16 = vmax.f32 %v15974_v25, %v8689_v45  ;;  %v8723_v47 = vmax.f32 %v16094_v49, %v8691_v58 }
 0x84d   : > { %v8722_v32 = vmax.f32 %v16091_v59, %v8690_v5 }
 0x84f   : > { %8802 = vrot.lane.b32.xlu1 %v8715_v18, %s10683_s7  ;;  %8800 = vrot.lane.b32.xlu0 %v8714_v15, %s10683_s7 }
 0x853   : > { %8806 = vrot.lane.b32.xlu1 %v8717_v24, %s10683_s7  ;;  %8804 = vrot.lane.b32.xlu0 %v8716_v62, %s10683_s7 }
 0x857   : > { %8810 = vrot.lane.b32.xlu1 %v8719_v11, %s10683_s7  ;;  %8808 = vrot.lane.b32.xlu0 %v8718_v63, %s10683_s7 }
 0x85b   : > { %8814 = vrot.lane.b32.xlu1 %v8721_v16, %s10683_s7  ;;  %8812 = vrot.lane.b32.xlu0 %v8720_v4, %s10683_s7 }
 0x85f   : > { %8818 = vrot.lane.b32.xlu1 %v8723_v47, %s10683_s7  ;;  %8816 = vrot.lane.b32.xlu0 %v8722_v32, %s10683_s7 }
 0x88f   : > { %v8759_v25 = vpop.permute.xlu1 %8758 }
 0x890   : > { %8854 = vst.msk [vmem:[%s15881_s27 + $0x8] sm:$0xff] %vm8852_vm5, %v8759_v25 }
 0x893   : > { %v8757_v61 = vpop.permute.xlu0 %8756 }
 0x894   : > { %8853 = vst.msk [vmem:[%s15881_s27] sm:$0xff] %vm8852_vm5, %v8757_v61 }
 0x899   : > { %v8763_v10 = vpop.permute.xlu1 %8762  ;;  %v8761_v49 = vpop.permute.xlu0 %8760 }
 0x89a   : > { %8856 = vst.msk [vmem:[%s15881_s27 + $0x18] sm:$0xff] %vm8852_vm5, %v8763_v10  ;;  %8855 = vst.msk [vmem:[%s15881_s27 + $0x10] sm:$0xff] %vm8852_vm5, %v8761_v49 }
 0x89d   : > { %v8767_v59 = vpop.permute.xlu1 %8766  ;;  %v8765_v1 = vpop.permute.xlu0 %8764 }
 0x89e   : > { %8858 = vst.msk [vmem:[%s15881_s27 + $0x28] sm:$0xff] %vm8852_vm5, %v8767_v59  ;;  %8857 = vst.msk [vmem:[%s15881_s27 + $0x20] sm:$0xff] %vm8852_vm5, %v8765_v1 }
 0x8a1   : > { %v8771_v44 = vpop.permute.xlu1 %8770  ;;  %v8769_v23 = vpop.permute.xlu0 %8768 }
 0x8a2   : > { %8860 = vst.msk [vmem:[%s15881_s27 + $0x38] sm:$0xff] %vm8852_vm5, %v8771_v44  ;;  %8859 = vst.msk [vmem:[%s15881_s27 + $0x30] sm:$0xff] %vm8852_vm5, %v8769_v23 }
 0x8a5   : > { %v8775_v55 = vpop.permute.xlu1 %8774  ;;  %v8773_v22 = vpop.permute.xlu0 %8772 }
 0x8a6   : > { %8862 = vst.msk [vmem:[%s15881_s27 + $0x48] sm:$0xff] %vm8852_vm5, %v8775_v55  ;;  %8861 = vst.msk [vmem:[%s15881_s27 + $0x40] sm:$0xff] %vm8852_vm5, %v8773_v22 }
 0x8a9   : > { %v8779_v48 = vpop.permute.xlu1 %8778  ;;  %v8777_v2 = vpop.permute.xlu0 %8776 }
 0x8aa   : > { %8864 = vst.msk [vmem:[%s15881_s27 + $0x58] sm:$0xff] %vm8852_vm5, %v8779_v48  ;;  %8863 = vst.msk [vmem:[%s15881_s27 + $0x50] sm:$0xff] %vm8852_vm5, %v8777_v2 }
 0x8ad   : > { %v8783_v51 = vpop.permute.xlu1 %8782  ;;  %v8781_v35 = vpop.permute.xlu0 %8780 }
 0x8ae   : > { %8866 = vst.msk [vmem:[%s15881_s27 + $0x68] sm:$0xff] %vm8852_vm5, %v8783_v51  ;;  %8865 = vst.msk [vmem:[%s15881_s27 + $0x60] sm:$0xff] %vm8852_vm5, %v8781_v35 }
 0x8b1   : > { %v8787_v0 = vpop.permute.xlu1 %8786  ;;  %v8785_v30 = vpop.permute.xlu0 %8784 }
 0x8b2   : > { %8868 = vst.msk [vmem:[%s15881_s27 + $0x78] sm:$0xff] %vm8852_vm5, %v8787_v0  ;;  %8867 = vst.msk [vmem:[%s15881_s27 + $0x70] sm:$0xff] %vm8852_vm5, %v8785_v30 }
 0x8b5   : > { %v8791_v14 = vpop.permute.xlu1 %8790  ;;  %v8789_v21 = vpop.permute.xlu0 %8788 }
 0x8b6   : > { %8870 = vst.msk [vmem:[%s15881_s27 + $0x88] sm:$0xff] %vm8852_vm5, %v8791_v14  ;;  %8869 = vst.msk [vmem:[%s15881_s27 + $0x80] sm:$0xff] %vm8852_vm5, %v8789_v21 }
 0x8b9   : > { %v8795_v43 = vpop.permute.xlu1 %8794  ;;  %v8793_v34 = vpop.permute.xlu0 %8792 }
 0x8ba   : > { %8872 = vst.msk [vmem:[%s15881_s27 + $0x98] sm:$0xff] %vm8852_vm5, %v8795_v43  ;;  %8871 = vst.msk [vmem:[%s15881_s27 + $0x90] sm:$0xff] %vm8852_vm5, %v8793_v34 }
 0x8bd   : > { %v8799_v17 = vpop.permute.xlu1 %8798  ;;  %v8797_v13 = vpop.permute.xlu0 %8796 }
 0x8be   : > { %8874 = vst.msk [vmem:[%s15881_s27 + $0xa8] sm:$0xff] %vm8852_vm5, %v8799_v17  ;;  %8873 = vst.msk [vmem:[%s15881_s27 + $0xa0] sm:$0xff] %vm8852_vm5, %v8797_v13 }
 0x8c1   : > { %v8803_v29 = vpop.permute.xlu1 %8802  ;;  %v8801_v50 = vpop.permute.xlu0 %8800 }
 0x8c2   : > { %8876 = vst.msk [vmem:[%s15881_s27 + $0xb8] sm:$0xff] %vm8852_vm5, %v8803_v29  ;;  %8875 = vst.msk [vmem:[%s15881_s27 + $0xb0] sm:$0xff] %vm8852_vm5, %v8801_v50 }
 0x8c5   : > { %v8807_v60 = vpop.permute.xlu1 %8806  ;;  %v8805_v56 = vpop.permute.xlu0 %8804 }
 0x8c6   : > { %8878 = vst.msk [vmem:[%s15881_s27 + $0xc8] sm:$0xff] %vm8852_vm5, %v8807_v60  ;;  %8877 = vst.msk [vmem:[%s15881_s27 + $0xc0] sm:$0xff] %vm8852_vm5, %v8805_v56 }
 0x8c9   : > { %v8811_v6 = vpop.permute.xlu1 %8810  ;;  %v8809_v38 = vpop.permute.xlu0 %8808 }
 0x8ca   : > { %8880 = vst.msk [vmem:[%s15881_s27 + $0xd8] sm:$0xff] %vm8852_vm5, %v8811_v6  ;;  %8879 = vst.msk [vmem:[%s15881_s27 + $0xd0] sm:$0xff] %vm8852_vm5, %v8809_v38 }
 0x8cd   : > { %v8815_v54 = vpop.permute.xlu1 %8814  ;;  %v8813_v31 = vpop.permute.xlu0 %8812 }
 0x8ce   : > { %8882 = vst.msk [vmem:[%s15881_s27 + $0xe8] sm:$0xff] %vm8852_vm5, %v8815_v54  ;;  %8881 = vst.msk [vmem:[%s15881_s27 + $0xe0] sm:$0xff] %vm8852_vm5, %v8813_v31 }
 0x8d1   : > { %v8819_v8 = vpop.permute.xlu1 %8818  ;;  %v8817_v20 = vpop.permute.xlu0 %8816 }
 0x8d2   : > { %8884 = vst.msk [vmem:[%s15881_s27 + $0xf8] sm:$0xff] %vm8852_vm5, %v8819_v8  ;;  %8883 = vst.msk [vmem:[%s15881_s27 + $0xf0] sm:$0xff] %vm8852_vm5, %v8817_v20 }
 0x8d3 PF: > { %s16_s21 = sadd.s32 1, %s10679_s21  }
 0x8d4   : > { %p13_p4 = scmp.ge.s32.totalorder %s16_s21, 4  }
 0x8d6   :  { %15 = sbr.rel (!%p13_p4) target bundleno = 1 (0x1), region = 88 }

</bundles_post_ra>
